<compile_context>
chip_gen: v7x
topology: tpu7x:2x2x1
jax: 0.10.0
libtpu: 0.0.40
codegen_flags: <defaults>
</compile_context>

<pallas_src>
import functools

import jax
import jax.numpy as jnp
from jax import lax
from jax.experimental import pallas as pl
from jax.experimental.pallas import tpu as pltpu

EPS = 1e-5                       # BatchNorm3d default eps
_VMEM_LIMIT = 32 * 1024 * 1024   # safe on v5e/v6e (128 MiB phys) and v7x (64 MiB)


# ---------------------------------------------------------------------------
# Fused conv3x3x3 (replicate-padded) + bias + ReLU + per-block BN statistics.
#
# The padded channels-last volume is viewed as (N, D+2, (H+3)*(W+2), C).  For
# tap (kd, kh, kw), the contribution to output row r = h*(W+2) + w comes from
# flattened padded row r + kh*(W+2) + kw of depth slice d+kd, so every tap is
# ONE contiguous 2-D row slice (no reshape / concat inside the kernel).  Rows
# with w in {W, W+1} are junk and are masked out of the statistics; H is
# padded by (1, 2) so the junk rows never read out of bounds.
# ---------------------------------------------------------------------------
def _conv_relu_stats_kernel(x0_ref, x1_ref, x2_ref, w_ref, b_ref,
                            act_ref, sum_ref, m2_ref, *, H, W, C):
    Wp = W + 2
    rows = H * Wp
    slabs = (x0_ref, x1_ref, x2_ref)
    acc = jnp.zeros((rows, C), jnp.float32)
    for kd in range(3):
        for kh in range(3):
            for kw in range(3):
                start = kh * Wp + kw
                lhs = slabs[kd][0, 0, start:start + rows, :]        # (rows, C) bf16
                acc = acc + jnp.dot(lhs, w_ref[kd * 9 + kh * 3 + kw],
                                    preferred_element_type=jnp.float32)
    act = jnp.maximum(acc + b_ref[...], 0.0)                        # (rows, C) f32
    act_ref[...] = act[None, None].astype(act_ref.dtype)

    # Per-block Welford statistics over the H*W valid rows (junk rows masked).
    r_idx = lax.broadcasted_iota(jnp.int32, (rows, 1), 0)
    valid = (r_idx % Wp) < W
    cnt = float(H * W)
    bsum = jnp.sum(jnp.where(valid, act, 0.0), axis=0, keepdims=True)     # (1, C)
    bmean = bsum / cnt
    diff = act - bmean
    bm2 = jnp.sum(jnp.where(valid, diff * diff, 0.0), axis=0, keepdims=True)
    sum_ref[...] = bsum[None, None]
    m2_ref[...] = bm2[None, None]


def conv_relu_stats(xp_flat, w27, bias, *, N, D, H, W, C, act_dtype):
    Wp = W + 2
    HWf = (H + 3) * Wp
    rows = H * Wp
    kernel = functools.partial(_conv_relu_stats_kernel, H=H, W=W, C=C)
    flops = N * D * 27 * 2 * rows * C * C
    bytes_accessed = (3 * xp_flat.size * xp_flat.dtype.itemsize
                      + N * D * (w27.size * w27.dtype.itemsize + bias.size * 4)
                      + N * D * rows * C * jnp.dtype(act_dtype).itemsize
                      + 2 * N * D * C * 4)
    return pl.pallas_call(
        kernel,
        out_shape=(jax.ShapeDtypeStruct((N, D, rows, C), act_dtype),
                   jax.ShapeDtypeStruct((N, D, 1, C), jnp.float32),
                   jax.ShapeDtypeStruct((N, D, 1, C), jnp.float32)),
        grid_spec=pltpu.PrefetchScalarGridSpec(
            num_scalar_prefetch=0,
            grid=(N, D),
            in_specs=[
                pl.BlockSpec((1, 1, HWf, C), lambda n, d: (n, d, 0, 0)),
                pl.BlockSpec((1, 1, HWf, C), lambda n, d: (n, d + 1, 0, 0)),
                pl.BlockSpec((1, 1, HWf, C), lambda n, d: (n, d + 2, 0, 0)),
                pl.BlockSpec((27, C, C), lambda n, d: (0, 0, 0)),
                pl.BlockSpec((1, C), lambda n, d: (0, 0)),
            ],
            out_specs=(
                pl.BlockSpec((1, 1, rows, C), lambda n, d: (n, d, 0, 0)),
                pl.BlockSpec((1, 1, 1, C), lambda n, d: (n, d, 0, 0)),
                pl.BlockSpec((1, 1, 1, C), lambda n, d: (n, d, 0, 0)),
            )),
        compiler_params=pltpu.CompilerParams(
            dimension_semantics=("parallel", "parallel"),
            vmem_limit_bytes=_VMEM_LIMIT),
        cost_estimate=pl.CostEstimate(flops=flops, transcendentals=0,
                                      bytes_accessed=bytes_accessed),
    )(xp_flat, xp_flat, xp_flat, w27, bias)


# ---------------------------------------------------------------------------
# Final pass: y = scale * a + shift + residual (lane-dense when 128 % C == 0).
# ---------------------------------------------------------------------------
def _bn_residual_kernel(a_ref, r_ref, scale_ref, shift_ref, out_ref):
    out_ref[...] = a_ref[...] * scale_ref[...] + shift_ref[...] + r_ref[...]


def _pick_row_tile(R, width):
    budget = 8 * 1024 * 1024
    for t in (2048, 1024, 512, 256, 128, 64, 32, 16, 8):
        if R % t == 0 and 6 * t * width * 4 <= budget:
            return t
    # TODO(synk): masked ragged row tiles for large R with no small divisor.
    return R


def bn_residual(act2d, res2d, scale, shift):
    R, width = act2d.shape
    tile_r = _pick_row_tile(R, width)
    nb = R // tile_r
    row_spec = pl.BlockSpec((tile_r, width), lambda i: (i, 0))
    vec_spec = pl.BlockSpec((1, width), lambda i: (0, 0))
    return pl.pallas_call(
        _bn_residual_kernel,
        out_shape=jax.ShapeDtypeStruct((R, width), jnp.float32),
        grid_spec=pltpu.PrefetchScalarGridSpec(
            num_scalar_prefetch=0, grid=(nb,),
            in_specs=[row_spec, row_spec, vec_spec, vec_spec],
            out_specs=row_spec),
        compiler_params=pltpu.CompilerParams(
            dimension_semantics=("parallel",),
            vmem_limit_bytes=_VMEM_LIMIT),
        cost_estimate=pl.CostEstimate(flops=3 * R * width, transcendentals=0,
                                      bytes_accessed=3 * R * width * 4),
    )(act2d, res2d, scale, shift)


# ---------------------------------------------------------------------------
# Plain-JAX glue.
# ---------------------------------------------------------------------------
def _pad_and_flatten(x_cl):
    # x_cl: (N, D, H, W, C).  pad=1 replicate ("symmetric" for pad=1) on
    # D/H/W; H gets one extra trailing mirrored row so the junk-row slices in
    # the conv kernel never read out of bounds.
    N, D, H, W, C = x_cl.shape
    xp = jnp.pad(x_cl, ((0, 0), (1, 1), (1, 2), (1, 1), (0, 0)),
                 mode="symmetric")
    return xp.reshape(N, D + 2, (H + 3) * (W + 2), C)


def _valid(act, N, D, H, W, C):
    # Drop the junk columns w in {W, W+1} of the (N, D, H*(W+2), C) output.
    return act.reshape(N, D, H, W + 2, C)[:, :, :, :W, :]


def _bn_affine(bsum, bm2, gamma, beta, cnt, total):
    # Chan/Welford combine of per-block (count = cnt) partials -> scale, shift.
    C = bsum.shape[-1]
    bsum = bsum.reshape(-1, C)
    bm2 = bm2.reshape(-1, C)
    gmean = jnp.sum(bsum, axis=0) / total
    bmean = bsum / cnt
    m2 = jnp.sum(bm2, axis=0) + cnt * jnp.sum((bmean - gmean) ** 2, axis=0)
    var = m2 / total                              # biased, training-mode BN
    scale = gamma * lax.rsqrt(var + EPS)
    shift = beta - gmean * scale
    return scale, shift


# ---------------------------------------------------------------------------
# Parameter init (deterministic, synthetic — no checkpoint).
# ---------------------------------------------------------------------------
def init_params(key, C):
    params = []
    for _ in range(3):
        key, k1, k2 = jax.random.split(key, 3)
        w = jax.random.normal(k1, (3, 3, 3, C, C), jnp.float32) / jnp.sqrt(27.0 * C)
        b = jax.random.normal(k2, (C,), jnp.float32) * 0.05
        params.append(dict(w=w, b=b,
                           gamma=jnp.ones((C,), jnp.float32),   # BN defaults
                           beta=jnp.zeros((C,), jnp.float32)))
    return params


# ---------------------------------------------------------------------------
# ResidualLayer forward.
# ---------------------------------------------------------------------------
def residual_layer(x, params):
    # x: (N, C, D, H, W)  (PyTorch NCDHW).
    N, C, D, H, W = x.shape
    P = N * D * H * W
    x_cl = jnp.transpose(x, (0, 2, 3, 4, 1)).astype(jnp.float32)   # N D H W C

    inp = x_cl.astype(jnp.bfloat16)
    scale = shift = None
    act = None
    for i, prm in enumerate(params):
        if i == 0:
            w_eff, b_eff = prm["w"], prm["b"]
        else:
            # Fold the previous layer's BN affine into this conv (exact:
            # per-channel affine commutes with replicate padding).
            w_eff = prm["w"] * scale.reshape(1, 1, 1, C, 1)
            b_eff = prm["b"] + jnp.einsum("dhwio,i->o", prm["w"], shift)
            inp = _valid(act, N, D, H, W, C)          # previous bf16 activation
        xp = _pad_and_flatten(inp)
        act_dtype = jnp.float32 if i == 2 else jnp.bfloat16
        act, bsum, bm2 = conv_relu_stats(
            xp,
            w_eff.reshape(27, C, C).astype(jnp.bfloat16),
            b_eff.reshape(1, C).astype(jnp.float32),
            N=N, D=D, H=H, W=W, C=C, act_dtype=act_dtype)
        scale, shift = _bn_affine(bsum, bm2, prm["gamma"], prm["beta"],
                                  cnt=H * W, total=P)

    # Final fused pass: y = scale*a + shift + residual, lane-dense layout.
    a_flat = _valid(act, N, D, H, W, C).reshape(P, C)
    r_flat = x_cl.reshape(P, C)
    if (P * C) % 128 == 0 and 128 % C == 0:
        rep = 128 // C
        a2d = a_flat.reshape(-1, 128)
        r2d = r_flat.reshape(-1, 128)
        sc = jnp.tile(scale.reshape(1, C), (1, rep))
        sh = jnp.tile(shift.reshape(1, C), (1, rep))
    else:
        # TODO(synk): lane-dense re-tiling when C does not divide 128.
        a2d, r2d = a_flat, r_flat
        sc, sh = scale.reshape(1, C), shift.reshape(1, C)
    y = bn_residual(a2d, r2d, sc, sh).reshape(N, D, H, W, C)
    return jnp.transpose(y, (0, 4, 1, 2, 3))          # back to NCDHW


# Pure-JAX reference: straightforward (un-folded) conv -> ReLU -> BN chain,
# matching the kernel's precision choices (bf16 conv inputs/weights, f32
# accumulation and BN math) but NOT the BN-folding / Welford rearrangements.
def residual_layer_ref(x, params):
    N, C, D, H, W = x.shape
    x_cl = jnp.transpose(x, (0, 2, 3, 4, 1)).astype(jnp.float32)
    out = x_cl
    for prm in params:
        inp = out.astype(jnp.bfloat16)
        xp = jnp.pad(inp, ((0, 0), (1, 1), (1, 1), (1, 1), (0, 0)),
                     mode="symmetric")
        w16 = prm["w"].astype(jnp.bfloat16)
        conv = jnp.zeros((N, D, H, W, C), jnp.float32)
        for kd in range(3):
            for kh in range(3):
                for kw in range(3):
                    patch = xp[:, kd:kd + D, kh:kh + H, kw:kw + W, :]
                    conv = conv + jnp.einsum(
                        "ndhwi,io->ndhwo", patch, w16[kd, kh, kw],
                        preferred_element_type=jnp.float32)
        act = jnp.maximum(conv + prm["b"], 0.0)
        mean = jnp.mean(act, axis=(0, 1, 2, 3))
        var = jnp.mean((act - mean) ** 2, axis=(0, 1, 2, 3))
        out = (act - mean) * lax.rsqrt(var + EPS) * prm["gamma"] + prm["beta"]
    out = out + x_cl
    return jnp.transpose(out, (0, 4, 1, 2, 3))


if __name__ == "__main__":
    key = jax.random.PRNGKey(0)
    k_x, k_p = jax.random.split(key)

    N, C, D, H, W = 2, 4, 8, 8, 8                     # small NCDHW input
    x = jax.random.normal(k_x, (N, C, D, H, W), jnp.float32)
    params = init_params(k_p, C)

    fwd = jax.jit(residual_layer)
    out = jax.block_until_ready(fwd(x, params))

    ref = residual_layer_ref(x, params)
    assert out.shape == (N, C, D, H, W)
    err = float(jnp.max(jnp.abs(out - ref)))
    assert jnp.allclose(out, ref, atol=5e-2, rtol=5e-2), f"mismatch vs ref: {err}"

    print("KERNEL_OK")
</pallas_src>

<mosaic_0001>
module attributes {stable_mosaic.version = 11 : i64} {
  func.func @_conv_relu_stats_kernel(%arg0: i32, %arg1: i32, %arg2: memref<1x1x110x4xbf16, #tpu.memory_space<vmem>>, %arg3: memref<1x1x110x4xbf16, #tpu.memory_space<vmem>>, %arg4: memref<1x1x110x4xbf16, #tpu.memory_space<vmem>>, %arg5: memref<27x4x4xbf16, #tpu.memory_space<vmem>>, %arg6: memref<1x4xf32, #tpu.memory_space<vmem>>, %arg7: memref<1x1x80x4xbf16, #tpu.memory_space<vmem>>, %arg8: memref<1x1x1x4xf32, #tpu.memory_space<vmem>>, %arg9: memref<1x1x1x4xf32, #tpu.memory_space<vmem>>) attributes {dimension_semantics = [#tpu.dimension_semantics<parallel>, #tpu.dimension_semantics<parallel>], iteration_bounds = array<i64: 2, 8>, scalar_prefetch = 0 : i64, scratch_operands = 0 : i64, tpu.core_type = #tpu.core_type<tc>, window_params = [{transform_indices = @transform_0, window_bounds = array<i64: 1, 1, 110, 4>}, {transform_indices = @transform_1, window_bounds = array<i64: 1, 1, 110, 4>}, {transform_indices = @transform_2, window_bounds = array<i64: 1, 1, 110, 4>}, {pipeline_mode = #tpu.pipeline_mode<synchronous>, transform_indices = @transform_3, window_bounds = array<i64: 27, 4, 4>}, {pipeline_mode = #tpu.pipeline_mode<synchronous>, transform_indices = @transform_4, window_bounds = array<i64: 1, 4>}, {transform_indices = @transform_5, window_bounds = array<i64: 1, 1, 80, 4>}, {transform_indices = @transform_6, window_bounds = array<i64: 1, 1, 1, 4>}, {transform_indices = @transform_7, window_bounds = array<i64: 1, 1, 1, 4>}]} {
    %cst = arith.constant 0.000000e+00 : f32
    %0 = vector.broadcast %cst : f32 to vector<80x4xf32>
    %c0 = arith.constant 0 : index
    %c0_0 = arith.constant 0 : index
    %c0_1 = arith.constant 0 : index
    %c0_2 = arith.constant 0 : index
    %1 = vector.load %arg2[%c0, %c0_0, %c0_1, %c0_2] : memref<1x1x110x4xbf16, #tpu.memory_space<vmem>>, vector<1x1x80x4xbf16>
    %2 = vector.shape_cast %1 : vector<1x1x80x4xbf16> to vector<80x4xbf16>
    %c0_3 = arith.constant 0 : index
    %c0_4 = arith.constant 0 : index
    %c0_5 = arith.constant 0 : index
    %3 = vector.load %arg5[%c0_3, %c0_4, %c0_5] : memref<27x4x4xbf16, #tpu.memory_space<vmem>>, vector<1x4x4xbf16>
    %4 = vector.shape_cast %3 : vector<1x4x4xbf16> to vector<4x4xbf16>
    %cst_6 = arith.constant dense<0.000000e+00> : vector<80x4xf32>
    %5 = tpu.matmul %2, %4, %cst_6 {dimension_numbers = #tpu.dot_dimension_numbers<[1], [0], [0], [1], [0, 0, 1, 1], [], []>} : vector<80x4xbf16>, vector<4x4xbf16>, vector<80x4xf32> -> vector<80x4xf32>
    %6 = arith.addf %0, %5 : vector<80x4xf32>
    %c0_7 = arith.constant 0 : index
    %c0_8 = arith.constant 0 : index
    %c1 = arith.constant 1 : index
    %c0_9 = arith.constant 0 : index
    %7 = vector.load %arg2[%c0_7, %c0_8, %c1, %c0_9] : memref<1x1x110x4xbf16, #tpu.memory_space<vmem>>, vector<1x1x80x4xbf16>
    %8 = vector.shape_cast %7 : vector<1x1x80x4xbf16> to vector<80x4xbf16>
    %c1_10 = arith.constant 1 : index
    %c0_11 = arith.constant 0 : index
    %c0_12 = arith.constant 0 : index
    %9 = vector.load %arg5[%c1_10, %c0_11, %c0_12] : memref<27x4x4xbf16, #tpu.memory_space<vmem>>, vector<1x4x4xbf16>
    %10 = vector.shape_cast %9 : vector<1x4x4xbf16> to vector<4x4xbf16>
    %cst_13 = arith.constant dense<0.000000e+00> : vector<80x4xf32>
    %11 = tpu.matmul %8, %10, %cst_13 {dimension_numbers = #tpu.dot_dimension_numbers<[1], [0], [0], [1], [0, 0, 1, 1], [], []>} : vector<80x4xbf16>, vector<4x4xbf16>, vector<80x4xf32> -> vector<80x4xf32>
    %12 = arith.addf %6, %11 : vector<80x4xf32>
    %c0_14 = arith.constant 0 : index
    %c0_15 = arith.constant 0 : index
    %c2 = arith.constant 2 : index
    %c0_16 = arith.constant 0 : index
    %13 = vector.load %arg2[%c0_14, %c0_15, %c2, %c0_16] : memref<1x1x110x4xbf16, #tpu.memory_space<vmem>>, vector<1x1x80x4xbf16>
    %14 = vector.shape_cast %13 : vector<1x1x80x4xbf16> to vector<80x4xbf16>
    %c2_17 = arith.constant 2 : index
    %c0_18 = arith.constant 0 : index
    %c0_19 = arith.constant 0 : index
    %15 = vector.load %arg5[%c2_17, %c0_18, %c0_19] : memref<27x4x4xbf16, #tpu.memory_space<vmem>>, vector<1x4x4xbf16>
    %16 = vector.shape_cast %15 : vector<1x4x4xbf16> to vector<4x4xbf16>
    %cst_20 = arith.constant dense<0.000000e+00> : vector<80x4xf32>
    %17 = tpu.matmul %14, %16, %cst_20 {dimension_numbers = #tpu.dot_dimension_numbers<[1], [0], [0], [1], [0, 0, 1, 1], [], []>} : vector<80x4xbf16>, vector<4x4xbf16>, vector<80x4xf32> -> vector<80x4xf32>
    %18 = arith.addf %12, %17 : vector<80x4xf32>
    %c0_21 = arith.constant 0 : index
    %c0_22 = arith.constant 0 : index
    %c10 = arith.constant 10 : index
    %c0_23 = arith.constant 0 : index
    %19 = vector.load %arg2[%c0_21, %c0_22, %c10, %c0_23] : memref<1x1x110x4xbf16, #tpu.memory_space<vmem>>, vector<1x1x80x4xbf16>
    %20 = vector.shape_cast %19 : vector<1x1x80x4xbf16> to vector<80x4xbf16>
    %c3 = arith.constant 3 : index
    %c0_24 = arith.constant 0 : index
    %c0_25 = arith.constant 0 : index
    %21 = vector.load %arg5[%c3, %c0_24, %c0_25] : memref<27x4x4xbf16, #tpu.memory_space<vmem>>, vector<1x4x4xbf16>
    %22 = vector.shape_cast %21 : vector<1x4x4xbf16> to vector<4x4xbf16>
    %cst_26 = arith.constant dense<0.000000e+00> : vector<80x4xf32>
    %23 = tpu.matmul %20, %22, %cst_26 {dimension_numbers = #tpu.dot_dimension_numbers<[1], [0], [0], [1], [0, 0, 1, 1], [], []>} : vector<80x4xbf16>, vector<4x4xbf16>, vector<80x4xf32> -> vector<80x4xf32>
    %24 = arith.addf %18, %23 : vector<80x4xf32>
    %c0_27 = arith.constant 0 : index
    %c0_28 = arith.constant 0 : index
    %c11 = arith.constant 11 : index
    %c0_29 = arith.constant 0 : index
    %25 = vector.load %arg2[%c0_27, %c0_28, %c11, %c0_29] : memref<1x1x110x4xbf16, #tpu.memory_space<vmem>>, vector<1x1x80x4xbf16>
    %26 = vector.shape_cast %25 : vector<1x1x80x4xbf16> to vector<80x4xbf16>
    %c4 = arith.constant 4 : index
    %c0_30 = arith.constant 0 : index
    %c0_31 = arith.constant 0 : index
    %27 = vector.load %arg5[%c4, %c0_30, %c0_31] : memref<27x4x4xbf16, #tpu.memory_space<vmem>>, vector<1x4x4xbf16>
    %28 = vector.shape_cast %27 : vector<1x4x4xbf16> to vector<4x4xbf16>
    %cst_32 = arith.constant dense<0.000000e+00> : vector<80x4xf32>
    %29 = tpu.matmul %26, %28, %cst_32 {dimension_numbers = #tpu.dot_dimension_numbers<[1], [0], [0], [1], [0, 0, 1, 1], [], []>} : vector<80x4xbf16>, vector<4x4xbf16>, vector<80x4xf32> -> vector<80x4xf32>
    %30 = arith.addf %24, %29 : vector<80x4xf32>
    %c0_33 = arith.constant 0 : index
    %c0_34 = arith.constant 0 : index
    %c12 = arith.constant 12 : index
    %c0_35 = arith.constant 0 : index
    %31 = vector.load %arg2[%c0_33, %c0_34, %c12, %c0_35] : memref<1x1x110x4xbf16, #tpu.memory_space<vmem>>, vector<1x1x80x4xbf16>
    %32 = vector.shape_cast %31 : vector<1x1x80x4xbf16> to vector<80x4xbf16>
    %c5 = arith.constant 5 : index
    %c0_36 = arith.constant 0 : index
    %c0_37 = arith.constant 0 : index
    %33 = vector.load %arg5[%c5, %c0_36, %c0_37] : memref<27x4x4xbf16, #tpu.memory_space<vmem>>, vector<1x4x4xbf16>
    %34 = vector.shape_cast %33 : vector<1x4x4xbf16> to vector<4x4xbf16>
    %cst_38 = arith.constant dense<0.000000e+00> : vector<80x4xf32>
    %35 = tpu.matmul %32, %34, %cst_38 {dimension_numbers = #tpu.dot_dimension_numbers<[1], [0], [0], [1], [0, 0, 1, 1], [], []>} : vector<80x4xbf16>, vector<4x4xbf16>, vector<80x4xf32> -> vector<80x4xf32>
    %36 = arith.addf %30, %35 : vector<80x4xf32>
    %c0_39 = arith.constant 0 : index
    %c0_40 = arith.constant 0 : index
    %c20 = arith.constant 20 : index
    %c0_41 = arith.constant 0 : index
    %37 = vector.load %arg2[%c0_39, %c0_40, %c20, %c0_41] : memref<1x1x110x4xbf16, #tpu.memory_space<vmem>>, vector<1x1x80x4xbf16>
    %38 = vector.shape_cast %37 : vector<1x1x80x4xbf16> to vector<80x4xbf16>
    %c6 = arith.constant 6 : index
    %c0_42 = arith.constant 0 : index
    %c0_43 = arith.constant 0 : index
    %39 = vector.load %arg5[%c6, %c0_42, %c0_43] : memref<27x4x4xbf16, #tpu.memory_space<vmem>>, vector<1x4x4xbf16>
    %40 = vector.shape_cast %39 : vector<1x4x4xbf16> to vector<4x4xbf16>
    %cst_44 = arith.constant dense<0.000000e+00> : vector<80x4xf32>
    %41 = tpu.matmul %38, %40, %cst_44 {dimension_numbers = #tpu.dot_dimension_numbers<[1], [0], [0], [1], [0, 0, 1, 1], [], []>} : vector<80x4xbf16>, vector<4x4xbf16>, vector<80x4xf32> -> vector<80x4xf32>
    %42 = arith.addf %36, %41 : vector<80x4xf32>
    %c0_45 = arith.constant 0 : index
    %c0_46 = arith.constant 0 : index
    %c21 = arith.constant 21 : index
    %c0_47 = arith.constant 0 : index
    %43 = vector.load %arg2[%c0_45, %c0_46, %c21, %c0_47] : memref<1x1x110x4xbf16, #tpu.memory_space<vmem>>, vector<1x1x80x4xbf16>
    %44 = vector.shape_cast %43 : vector<1x1x80x4xbf16> to vector<80x4xbf16>
    %c7 = arith.constant 7 : index
    %c0_48 = arith.constant 0 : index
    %c0_49 = arith.constant 0 : index
    %45 = vector.load %arg5[%c7, %c0_48, %c0_49] : memref<27x4x4xbf16, #tpu.memory_space<vmem>>, vector<1x4x4xbf16>
    %46 = vector.shape_cast %45 : vector<1x4x4xbf16> to vector<4x4xbf16>
    %cst_50 = arith.constant dense<0.000000e+00> : vector<80x4xf32>
    %47 = tpu.matmul %44, %46, %cst_50 {dimension_numbers = #tpu.dot_dimension_numbers<[1], [0], [0], [1], [0, 0, 1, 1], [], []>} : vector<80x4xbf16>, vector<4x4xbf16>, vector<80x4xf32> -> vector<80x4xf32>
    %48 = arith.addf %42, %47 : vector<80x4xf32>
    %c0_51 = arith.constant 0 : index
    %c0_52 = arith.constant 0 : index
    %c22 = arith.constant 22 : index
    %c0_53 = arith.constant 0 : index
    %49 = vector.load %arg2[%c0_51, %c0_52, %c22, %c0_53] : memref<1x1x110x4xbf16, #tpu.memory_space<vmem>>, vector<1x1x80x4xbf16>
    %50 = vector.shape_cast %49 : vector<1x1x80x4xbf16> to vector<80x4xbf16>
    %c8 = arith.constant 8 : index
    %c0_54 = arith.constant 0 : index
    %c0_55 = arith.constant 0 : index
    %51 = vector.load %arg5[%c8, %c0_54, %c0_55] : memref<27x4x4xbf16, #tpu.memory_space<vmem>>, vector<1x4x4xbf16>
    %52 = vector.shape_cast %51 : vector<1x4x4xbf16> to vector<4x4xbf16>
    %cst_56 = arith.constant dense<0.000000e+00> : vector<80x4xf32>
    %53 = tpu.matmul %50, %52, %cst_56 {dimension_numbers = #tpu.dot_dimension_numbers<[1], [0], [0], [1], [0, 0, 1, 1], [], []>} : vector<80x4xbf16>, vector<4x4xbf16>, vector<80x4xf32> -> vector<80x4xf32>
    %54 = arith.addf %48, %53 : vector<80x4xf32>
    %c0_57 = arith.constant 0 : index
    %c0_58 = arith.constant 0 : index
    %c0_59 = arith.constant 0 : index
    %c0_60 = arith.constant 0 : index
    %55 = vector.load %arg3[%c0_57, %c0_58, %c0_59, %c0_60] : memref<1x1x110x4xbf16, #tpu.memory_space<vmem>>, vector<1x1x80x4xbf16>
    %56 = vector.shape_cast %55 : vector<1x1x80x4xbf16> to vector<80x4xbf16>
    %c9 = arith.constant 9 : index
    %c0_61 = arith.constant 0 : index
    %c0_62 = arith.constant 0 : index
    %57 = vector.load %arg5[%c9, %c0_61, %c0_62] : memref<27x4x4xbf16, #tpu.memory_space<vmem>>, vector<1x4x4xbf16>
    %58 = vector.shape_cast %57 : vector<1x4x4xbf16> to vector<4x4xbf16>
    %cst_63 = arith.constant dense<0.000000e+00> : vector<80x4xf32>
    %59 = tpu.matmul %56, %58, %cst_63 {dimension_numbers = #tpu.dot_dimension_numbers<[1], [0], [0], [1], [0, 0, 1, 1], [], []>} : vector<80x4xbf16>, vector<4x4xbf16>, vector<80x4xf32> -> vector<80x4xf32>
    %60 = arith.addf %54, %59 : vector<80x4xf32>
    %c0_64 = arith.constant 0 : index
    %c0_65 = arith.constant 0 : index
    %c1_66 = arith.constant 1 : index
    %c0_67 = arith.constant 0 : index
    %61 = vector.load %arg3[%c0_64, %c0_65, %c1_66, %c0_67] : memref<1x1x110x4xbf16, #tpu.memory_space<vmem>>, vector<1x1x80x4xbf16>
    %62 = vector.shape_cast %61 : vector<1x1x80x4xbf16> to vector<80x4xbf16>
    %c10_68 = arith.constant 10 : index
    %c0_69 = arith.constant 0 : index
    %c0_70 = arith.constant 0 : index
    %63 = vector.load %arg5[%c10_68, %c0_69, %c0_70] : memref<27x4x4xbf16, #tpu.memory_space<vmem>>, vector<1x4x4xbf16>
    %64 = vector.shape_cast %63 : vector<1x4x4xbf16> to vector<4x4xbf16>
    %cst_71 = arith.constant dense<0.000000e+00> : vector<80x4xf32>
    %65 = tpu.matmul %62, %64, %cst_71 {dimension_numbers = #tpu.dot_dimension_numbers<[1], [0], [0], [1], [0, 0, 1, 1], [], []>} : vector<80x4xbf16>, vector<4x4xbf16>, vector<80x4xf32> -> vector<80x4xf32>
    %66 = arith.addf %60, %65 : vector<80x4xf32>
    %c0_72 = arith.constant 0 : index
    %c0_73 = arith.constant 0 : index
    %c2_74 = arith.constant 2 : index
    %c0_75 = arith.constant 0 : index
    %67 = vector.load %arg3[%c0_72, %c0_73, %c2_74, %c0_75] : memref<1x1x110x4xbf16, #tpu.memory_space<vmem>>, vector<1x1x80x4xbf16>
    %68 = vector.shape_cast %67 : vector<1x1x80x4xbf16> to vector<80x4xbf16>
    %c11_76 = arith.constant 11 : index
    %c0_77 = arith.constant 0 : index
    %c0_78 = arith.constant 0 : index
    %69 = vector.load %arg5[%c11_76, %c0_77, %c0_78] : memref<27x4x4xbf16, #tpu.memory_space<vmem>>, vector<1x4x4xbf16>
    %70 = vector.shape_cast %69 : vector<1x4x4xbf16> to vector<4x4xbf16>
    %cst_79 = arith.constant dense<0.000000e+00> : vector<80x4xf32>
    %71 = tpu.matmul %68, %70, %cst_79 {dimension_numbers = #tpu.dot_dimension_numbers<[1], [0], [0], [1], [0, 0, 1, 1], [], []>} : vector<80x4xbf16>, vector<4x4xbf16>, vector<80x4xf32> -> vector<80x4xf32>
    %72 = arith.addf %66, %71 : vector<80x4xf32>
    %c0_80 = arith.constant 0 : index
    %c0_81 = arith.constant 0 : index
    %c10_82 = arith.constant 10 : index
    %c0_83 = arith.constant 0 : index
    %73 = vector.load %arg3[%c0_80, %c0_81, %c10_82, %c0_83] : memref<1x1x110x4xbf16, #tpu.memory_space<vmem>>, vector<1x1x80x4xbf16>
    %74 = vector.shape_cast %73 : vector<1x1x80x4xbf16> to vector<80x4xbf16>
    %c12_84 = arith.constant 12 : index
    %c0_85 = arith.constant 0 : index
    %c0_86 = arith.constant 0 : index
    %75 = vector.load %arg5[%c12_84, %c0_85, %c0_86] : memref<27x4x4xbf16, #tpu.memory_space<vmem>>, vector<1x4x4xbf16>
    %76 = vector.shape_cast %75 : vector<1x4x4xbf16> to vector<4x4xbf16>
    %cst_87 = arith.constant dense<0.000000e+00> : vector<80x4xf32>
    %77 = tpu.matmul %74, %76, %cst_87 {dimension_numbers = #tpu.dot_dimension_numbers<[1], [0], [0], [1], [0, 0, 1, 1], [], []>} : vector<80x4xbf16>, vector<4x4xbf16>, vector<80x4xf32> -> vector<80x4xf32>
    %78 = arith.addf %72, %77 : vector<80x4xf32>
    %c0_88 = arith.constant 0 : index
    %c0_89 = arith.constant 0 : index
    %c11_90 = arith.constant 11 : index
    %c0_91 = arith.constant 0 : index
    %79 = vector.load %arg3[%c0_88, %c0_89, %c11_90, %c0_91] : memref<1x1x110x4xbf16, #tpu.memory_space<vmem>>, vector<1x1x80x4xbf16>
    %80 = vector.shape_cast %79 : vector<1x1x80x4xbf16> to vector<80x4xbf16>
    %c13 = arith.constant 13 : index
    %c0_92 = arith.constant 0 : index
    %c0_93 = arith.constant 0 : index
    %81 = vector.load %arg5[%c13, %c0_92, %c0_93] : memref<27x4x4xbf16, #tpu.memory_space<vmem>>, vector<1x4x4xbf16>
    %82 = vector.shape_cast %81 : vector<1x4x4xbf16> to vector<4x4xbf16>
    %cst_94 = arith.constant dense<0.000000e+00> : vector<80x4xf32>
    %83 = tpu.matmul %80, %82, %cst_94 {dimension_numbers = #tpu.dot_dimension_numbers<[1], [0], [0], [1], [0, 0, 1, 1], [], []>} : vector<80x4xbf16>, vector<4x4xbf16>, vector<80x4xf32> -> vector<80x4xf32>
    %84 = arith.addf %78, %83 : vector<80x4xf32>
    %c0_95 = arith.constant 0 : index
    %c0_96 = arith.constant 0 : index
    %c12_97 = arith.constant 12 : index
    %c0_98 = arith.constant 0 : index
    %85 = vector.load %arg3[%c0_95, %c0_96, %c12_97, %c0_98] : memref<1x1x110x4xbf16, #tpu.memory_space<vmem>>, vector<1x1x80x4xbf16>
    %86 = vector.shape_cast %85 : vector<1x1x80x4xbf16> to vector<80x4xbf16>
    %c14 = arith.constant 14 : index
    %c0_99 = arith.constant 0 : index
    %c0_100 = arith.constant 0 : index
    %87 = vector.load %arg5[%c14, %c0_99, %c0_100] : memref<27x4x4xbf16, #tpu.memory_space<vmem>>, vector<1x4x4xbf16>
    %88 = vector.shape_cast %87 : vector<1x4x4xbf16> to vector<4x4xbf16>
    %cst_101 = arith.constant dense<0.000000e+00> : vector<80x4xf32>
    %89 = tpu.matmul %86, %88, %cst_101 {dimension_numbers = #tpu.dot_dimension_numbers<[1], [0], [0], [1], [0, 0, 1, 1], [], []>} : vector<80x4xbf16>, vector<4x4xbf16>, vector<80x4xf32> -> vector<80x4xf32>
    %90 = arith.addf %84, %89 : vector<80x4xf32>
    %c0_102 = arith.constant 0 : index
    %c0_103 = arith.constant 0 : index
    %c20_104 = arith.constant 20 : index
    %c0_105 = arith.constant 0 : index
    %91 = vector.load %arg3[%c0_102, %c0_103, %c20_104, %c0_105] : memref<1x1x110x4xbf16, #tpu.memory_space<vmem>>, vector<1x1x80x4xbf16>
    %92 = vector.shape_cast %91 : vector<1x1x80x4xbf16> to vector<80x4xbf16>
    %c15 = arith.constant 15 : index
    %c0_106 = arith.constant 0 : index
    %c0_107 = arith.constant 0 : index
    %93 = vector.load %arg5[%c15, %c0_106, %c0_107] : memref<27x4x4xbf16, #tpu.memory_space<vmem>>, vector<1x4x4xbf16>
    %94 = vector.shape_cast %93 : vector<1x4x4xbf16> to vector<4x4xbf16>
    %cst_108 = arith.constant dense<0.000000e+00> : vector<80x4xf32>
    %95 = tpu.matmul %92, %94, %cst_108 {dimension_numbers = #tpu.dot_dimension_numbers<[1], [0], [0], [1], [0, 0, 1, 1], [], []>} : vector<80x4xbf16>, vector<4x4xbf16>, vector<80x4xf32> -> vector<80x4xf32>
    %96 = arith.addf %90, %95 : vector<80x4xf32>
    %c0_109 = arith.constant 0 : index
    %c0_110 = arith.constant 0 : index
    %c21_111 = arith.constant 21 : index
    %c0_112 = arith.constant 0 : index
    %97 = vector.load %arg3[%c0_109, %c0_110, %c21_111, %c0_112] : memref<1x1x110x4xbf16, #tpu.memory_space<vmem>>, vector<1x1x80x4xbf16>
    %98 = vector.shape_cast %97 : vector<1x1x80x4xbf16> to vector<80x4xbf16>
    %c16 = arith.constant 16 : index
    %c0_113 = arith.constant 0 : index
    %c0_114 = arith.constant 0 : index
    %99 = vector.load %arg5[%c16, %c0_113, %c0_114] : memref<27x4x4xbf16, #tpu.memory_space<vmem>>, vector<1x4x4xbf16>
    %100 = vector.shape_cast %99 : vector<1x4x4xbf16> to vector<4x4xbf16>
    %cst_115 = arith.constant dense<0.000000e+00> : vector<80x4xf32>
    %101 = tpu.matmul %98, %100, %cst_115 {dimension_numbers = #tpu.dot_dimension_numbers<[1], [0], [0], [1], [0, 0, 1, 1], [], []>} : vector<80x4xbf16>, vector<4x4xbf16>, vector<80x4xf32> -> vector<80x4xf32>
    %102 = arith.addf %96, %101 : vector<80x4xf32>
    %c0_116 = arith.constant 0 : index
    %c0_117 = arith.constant 0 : index
    %c22_118 = arith.constant 22 : index
    %c0_119 = arith.constant 0 : index
    %103 = vector.load %arg3[%c0_116, %c0_117, %c22_118, %c0_119] : memref<1x1x110x4xbf16, #tpu.memory_space<vmem>>, vector<1x1x80x4xbf16>
    %104 = vector.shape_cast %103 : vector<1x1x80x4xbf16> to vector<80x4xbf16>
    %c17 = arith.constant 17 : index
    %c0_120 = arith.constant 0 : index
    %c0_121 = arith.constant 0 : index
    %105 = vector.load %arg5[%c17, %c0_120, %c0_121] : memref<27x4x4xbf16, #tpu.memory_space<vmem>>, vector<1x4x4xbf16>
    %106 = vector.shape_cast %105 : vector<1x4x4xbf16> to vector<4x4xbf16>
    %cst_122 = arith.constant dense<0.000000e+00> : vector<80x4xf32>
    %107 = tpu.matmul %104, %106, %cst_122 {dimension_numbers = #tpu.dot_dimension_numbers<[1], [0], [0], [1], [0, 0, 1, 1], [], []>} : vector<80x4xbf16>, vector<4x4xbf16>, vector<80x4xf32> -> vector<80x4xf32>
    %108 = arith.addf %102, %107 : vector<80x4xf32>
    %c0_123 = arith.constant 0 : index
    %c0_124 = arith.constant 0 : index
    %c0_125 = arith.constant 0 : index
    %c0_126 = arith.constant 0 : index
    %109 = vector.load %arg4[%c0_123, %c0_124, %c0_125, %c0_126] : memref<1x1x110x4xbf16, #tpu.memory_space<vmem>>, vector<1x1x80x4xbf16>
    %110 = vector.shape_cast %109 : vector<1x1x80x4xbf16> to vector<80x4xbf16>
    %c18 = arith.constant 18 : index
    %c0_127 = arith.constant 0 : index
    %c0_128 = arith.constant 0 : index
    %111 = vector.load %arg5[%c18, %c0_127, %c0_128] : memref<27x4x4xbf16, #tpu.memory_space<vmem>>, vector<1x4x4xbf16>
    %112 = vector.shape_cast %111 : vector<1x4x4xbf16> to vector<4x4xbf16>
    %cst_129 = arith.constant dense<0.000000e+00> : vector<80x4xf32>
    %113 = tpu.matmul %110, %112, %cst_129 {dimension_numbers = #tpu.dot_dimension_numbers<[1], [0], [0], [1], [0, 0, 1, 1], [], []>} : vector<80x4xbf16>, vector<4x4xbf16>, vector<80x4xf32> -> vector<80x4xf32>
    %114 = arith.addf %108, %113 : vector<80x4xf32>
    %c0_130 = arith.constant 0 : index
    %c0_131 = arith.constant 0 : index
    %c1_132 = arith.constant 1 : index
    %c0_133 = arith.constant 0 : index
    %115 = vector.load %arg4[%c0_130, %c0_131, %c1_132, %c0_133] : memref<1x1x110x4xbf16, #tpu.memory_space<vmem>>, vector<1x1x80x4xbf16>
    %116 = vector.shape_cast %115 : vector<1x1x80x4xbf16> to vector<80x4xbf16>
    %c19 = arith.constant 19 : index
    %c0_134 = arith.constant 0 : index
    %c0_135 = arith.constant 0 : index
    %117 = vector.load %arg5[%c19, %c0_134, %c0_135] : memref<27x4x4xbf16, #tpu.memory_space<vmem>>, vector<1x4x4xbf16>
    %118 = vector.shape_cast %117 : vector<1x4x4xbf16> to vector<4x4xbf16>
    %cst_136 = arith.constant dense<0.000000e+00> : vector<80x4xf32>
    %119 = tpu.matmul %116, %118, %cst_136 {dimension_numbers = #tpu.dot_dimension_numbers<[1], [0], [0], [1], [0, 0, 1, 1], [], []>} : vector<80x4xbf16>, vector<4x4xbf16>, vector<80x4xf32> -> vector<80x4xf32>
    %120 = arith.addf %114, %119 : vector<80x4xf32>
    %c0_137 = arith.constant 0 : index
    %c0_138 = arith.constant 0 : index
    %c2_139 = arith.constant 2 : index
    %c0_140 = arith.constant 0 : index
    %121 = vector.load %arg4[%c0_137, %c0_138, %c2_139, %c0_140] : memref<1x1x110x4xbf16, #tpu.memory_space<vmem>>, vector<1x1x80x4xbf16>
    %122 = vector.shape_cast %121 : vector<1x1x80x4xbf16> to vector<80x4xbf16>
    %c20_141 = arith.constant 20 : index
    %c0_142 = arith.constant 0 : index
    %c0_143 = arith.constant 0 : index
    %123 = vector.load %arg5[%c20_141, %c0_142, %c0_143] : memref<27x4x4xbf16, #tpu.memory_space<vmem>>, vector<1x4x4xbf16>
    %124 = vector.shape_cast %123 : vector<1x4x4xbf16> to vector<4x4xbf16>
    %cst_144 = arith.constant dense<0.000000e+00> : vector<80x4xf32>
    %125 = tpu.matmul %122, %124, %cst_144 {dimension_numbers = #tpu.dot_dimension_numbers<[1], [0], [0], [1], [0, 0, 1, 1], [], []>} : vector<80x4xbf16>, vector<4x4xbf16>, vector<80x4xf32> -> vector<80x4xf32>
    %126 = arith.addf %120, %125 : vector<80x4xf32>
    %c0_145 = arith.constant 0 : index
    %c0_146 = arith.constant 0 : index
    %c10_147 = arith.constant 10 : index
    %c0_148 = arith.constant 0 : index
    %127 = vector.load %arg4[%c0_145, %c0_146, %c10_147, %c0_148] : memref<1x1x110x4xbf16, #tpu.memory_space<vmem>>, vector<1x1x80x4xbf16>
    %128 = vector.shape_cast %127 : vector<1x1x80x4xbf16> to vector<80x4xbf16>
    %c21_149 = arith.constant 21 : index
    %c0_150 = arith.constant 0 : index
    %c0_151 = arith.constant 0 : index
    %129 = vector.load %arg5[%c21_149, %c0_150, %c0_151] : memref<27x4x4xbf16, #tpu.memory_space<vmem>>, vector<1x4x4xbf16>
    %130 = vector.shape_cast %129 : vector<1x4x4xbf16> to vector<4x4xbf16>
    %cst_152 = arith.constant dense<0.000000e+00> : vector<80x4xf32>
    %131 = tpu.matmul %128, %130, %cst_152 {dimension_numbers = #tpu.dot_dimension_numbers<[1], [0], [0], [1], [0, 0, 1, 1], [], []>} : vector<80x4xbf16>, vector<4x4xbf16>, vector<80x4xf32> -> vector<80x4xf32>
    %132 = arith.addf %126, %131 : vector<80x4xf32>
    %c0_153 = arith.constant 0 : index
    %c0_154 = arith.constant 0 : index
    %c11_155 = arith.constant 11 : index
    %c0_156 = arith.constant 0 : index
    %133 = vector.load %arg4[%c0_153, %c0_154, %c11_155, %c0_156] : memref<1x1x110x4xbf16, #tpu.memory_space<vmem>>, vector<1x1x80x4xbf16>
    %134 = vector.shape_cast %133 : vector<1x1x80x4xbf16> to vector<80x4xbf16>
    %c22_157 = arith.constant 22 : index
    %c0_158 = arith.constant 0 : index
    %c0_159 = arith.constant 0 : index
    %135 = vector.load %arg5[%c22_157, %c0_158, %c0_159] : memref<27x4x4xbf16, #tpu.memory_space<vmem>>, vector<1x4x4xbf16>
    %136 = vector.shape_cast %135 : vector<1x4x4xbf16> to vector<4x4xbf16>
    %cst_160 = arith.constant dense<0.000000e+00> : vector<80x4xf32>
    %137 = tpu.matmul %134, %136, %cst_160 {dimension_numbers = #tpu.dot_dimension_numbers<[1], [0], [0], [1], [0, 0, 1, 1], [], []>} : vector<80x4xbf16>, vector<4x4xbf16>, vector<80x4xf32> -> vector<80x4xf32>
    %138 = arith.addf %132, %137 : vector<80x4xf32>
    %c0_161 = arith.constant 0 : index
    %c0_162 = arith.constant 0 : index
    %c12_163 = arith.constant 12 : index
    %c0_164 = arith.constant 0 : index
    %139 = vector.load %arg4[%c0_161, %c0_162, %c12_163, %c0_164] : memref<1x1x110x4xbf16, #tpu.memory_space<vmem>>, vector<1x1x80x4xbf16>
    %140 = vector.shape_cast %139 : vector<1x1x80x4xbf16> to vector<80x4xbf16>
    %c23 = arith.constant 23 : index
    %c0_165 = arith.constant 0 : index
    %c0_166 = arith.constant 0 : index
    %141 = vector.load %arg5[%c23, %c0_165, %c0_166] : memref<27x4x4xbf16, #tpu.memory_space<vmem>>, vector<1x4x4xbf16>
    %142 = vector.shape_cast %141 : vector<1x4x4xbf16> to vector<4x4xbf16>
    %cst_167 = arith.constant dense<0.000000e+00> : vector<80x4xf32>
    %143 = tpu.matmul %140, %142, %cst_167 {dimension_numbers = #tpu.dot_dimension_numbers<[1], [0], [0], [1], [0, 0, 1, 1], [], []>} : vector<80x4xbf16>, vector<4x4xbf16>, vector<80x4xf32> -> vector<80x4xf32>
    %144 = arith.addf %138, %143 : vector<80x4xf32>
    %c0_168 = arith.constant 0 : index
    %c0_169 = arith.constant 0 : index
    %c20_170 = arith.constant 20 : index
    %c0_171 = arith.constant 0 : index
    %145 = vector.load %arg4[%c0_168, %c0_169, %c20_170, %c0_171] : memref<1x1x110x4xbf16, #tpu.memory_space<vmem>>, vector<1x1x80x4xbf16>
    %146 = vector.shape_cast %145 : vector<1x1x80x4xbf16> to vector<80x4xbf16>
    %c24 = arith.constant 24 : index
    %c0_172 = arith.constant 0 : index
    %c0_173 = arith.constant 0 : index
    %147 = vector.load %arg5[%c24, %c0_172, %c0_173] : memref<27x4x4xbf16, #tpu.memory_space<vmem>>, vector<1x4x4xbf16>
    %148 = vector.shape_cast %147 : vector<1x4x4xbf16> to vector<4x4xbf16>
    %cst_174 = arith.constant dense<0.000000e+00> : vector<80x4xf32>
    %149 = tpu.matmul %146, %148, %cst_174 {dimension_numbers = #tpu.dot_dimension_numbers<[1], [0], [0], [1], [0, 0, 1, 1], [], []>} : vector<80x4xbf16>, vector<4x4xbf16>, vector<80x4xf32> -> vector<80x4xf32>
    %150 = arith.addf %144, %149 : vector<80x4xf32>
    %c0_175 = arith.constant 0 : index
    %c0_176 = arith.constant 0 : index
    %c21_177 = arith.constant 21 : index
    %c0_178 = arith.constant 0 : index
    %151 = vector.load %arg4[%c0_175, %c0_176, %c21_177, %c0_178] : memref<1x1x110x4xbf16, #tpu.memory_space<vmem>>, vector<1x1x80x4xbf16>
    %152 = vector.shape_cast %151 : vector<1x1x80x4xbf16> to vector<80x4xbf16>
    %c25 = arith.constant 25 : index
    %c0_179 = arith.constant 0 : index
    %c0_180 = arith.constant 0 : index
    %153 = vector.load %arg5[%c25, %c0_179, %c0_180] : memref<27x4x4xbf16, #tpu.memory_space<vmem>>, vector<1x4x4xbf16>
    %154 = vector.shape_cast %153 : vector<1x4x4xbf16> to vector<4x4xbf16>
    %cst_181 = arith.constant dense<0.000000e+00> : vector<80x4xf32>
    %155 = tpu.matmul %152, %154, %cst_181 {dimension_numbers = #tpu.dot_dimension_numbers<[1], [0], [0], [1], [0, 0, 1, 1], [], []>} : vector<80x4xbf16>, vector<4x4xbf16>, vector<80x4xf32> -> vector<80x4xf32>
    %156 = arith.addf %150, %155 : vector<80x4xf32>
    %c0_182 = arith.constant 0 : index
    %c0_183 = arith.constant 0 : index
    %c22_184 = arith.constant 22 : index
    %c0_185 = arith.constant 0 : index
    %157 = vector.load %arg4[%c0_182, %c0_183, %c22_184, %c0_185] : memref<1x1x110x4xbf16, #tpu.memory_space<vmem>>, vector<1x1x80x4xbf16>
    %158 = vector.shape_cast %157 : vector<1x1x80x4xbf16> to vector<80x4xbf16>
    %c26 = arith.constant 26 : index
    %c0_186 = arith.constant 0 : index
    %c0_187 = arith.constant 0 : index
    %159 = vector.load %arg5[%c26, %c0_186, %c0_187] : memref<27x4x4xbf16, #tpu.memory_space<vmem>>, vector<1x4x4xbf16>
    %160 = vector.shape_cast %159 : vector<1x4x4xbf16> to vector<4x4xbf16>
    %cst_188 = arith.constant dense<0.000000e+00> : vector<80x4xf32>
    %161 = tpu.matmul %158, %160, %cst_188 {dimension_numbers = #tpu.dot_dimension_numbers<[1], [0], [0], [1], [0, 0, 1, 1], [], []>} : vector<80x4xbf16>, vector<4x4xbf16>, vector<80x4xf32> -> vector<80x4xf32>
    %162 = arith.addf %156, %161 : vector<80x4xf32>
    %c0_189 = arith.constant 0 : index
    %c0_190 = arith.constant 0 : index
    %163 = vector.load %arg6[%c0_189, %c0_190] : memref<1x4xf32, #tpu.memory_space<vmem>>, vector<1x4xf32>
    %164 = vector.broadcast %163 : vector<1x4xf32> to vector<80x4xf32>
    %165 = arith.addf %162, %164 : vector<80x4xf32>
    %cst_191 = arith.constant 0.000000e+00 : f32
    %166 = vector.broadcast %cst_191 : f32 to vector<80x4xf32>
    %167 = arith.maximumf %165, %166 : vector<80x4xf32>
    %168 = vector.shape_cast %167 : vector<80x4xf32> to vector<1x1x80x4xf32>
    %169 = arith.truncf %168 : vector<1x1x80x4xf32> to vector<1x1x80x4xbf16>
    %c0_192 = arith.constant 0 : index
    %c0_193 = arith.constant 0 : index
    %c0_194 = arith.constant 0 : index
    %c0_195 = arith.constant 0 : index
    %170 = vector.load %arg7[%c0_192, %c0_193, %c0_194, %c0_195] : memref<1x1x80x4xbf16, #tpu.memory_space<vmem>>, vector<1x1x80x4xbf16>
    tpu.vector_store %arg7[%c0_192, %c0_193, %c0_194, %c0_195], %169 {strides = array<i32>} : memref<1x1x80x4xbf16, #tpu.memory_space<vmem>>, vector<1x1x80x4xbf16>,
    %171 = tpu.iota {dimensions = array<i32: 0>} : vector<80x1xi32>
    %c10_i32 = arith.constant 10 : i32
    %c0_i32 = arith.constant 0 : i32
    %172 = arith.cmpi eq, %c10_i32, %c0_i32 : i32
    %c1_i32 = arith.constant 1 : i32
    %173 = arith.select %172, %c1_i32, %c10_i32 : i32
    %174 = vector.broadcast %173 : i32 to vector<80x1xi32>
    %175 = arith.remsi %171, %174 : vector<80x1xi32>
    %c0_i32_196 = arith.constant 0 : i32
    %176 = vector.broadcast %c0_i32_196 : i32 to vector<80x1xi32>
    %177 = arith.cmpi ne, %175, %176 : vector<80x1xi32>
    %c0_i32_197 = arith.constant 0 : i32
    %178 = vector.broadcast %c0_i32_197 : i32 to vector<80x1xi32>
    %179 = arith.cmpi slt, %175, %178 : vector<80x1xi32>
    %c0_i32_198 = arith.constant 0 : i32
    %180 = arith.cmpi slt, %173, %c0_i32_198 : i32
    %181 = vector.broadcast %180 : i1 to vector<80x1xi1>
    %182 = vector.broadcast %181 : vector<80x1xi1> to vector<80x1xi1>
    %183 = arith.xori %179, %182 : vector<80x1xi1>
    %184 = arith.andi %183, %177 : vector<80x1xi1>
    %185 = vector.broadcast %173 : i32 to vector<80x1xi32>
    %186 = arith.addi %175, %185 : vector<80x1xi32>
    %187 = arith.select %184, %186, %175 : vector<80x1xi1>, vector<80x1xi32>
    %c8_i32 = arith.constant 8 : i32
    %188 = vector.broadcast %c8_i32 : i32 to vector<80x1xi32>
    %189 = arith.cmpi slt, %187, %188 : vector<80x1xi32>
    %cst_199 = arith.constant 0.000000e+00 : f32
    %190 = vector.shape_cast %189 : vector<80x1xi1> to vector<80x1xi1>
    %191 = vector.broadcast %190 : vector<80x1xi1> to vector<80x4xi1>
    %192 = vector.broadcast %cst_199 : f32 to vector<80x4xf32>
    %193 = arith.select %191, %167, %192 : vector<80x4xi1>, vector<80x4xf32>
    %cst_200 = arith.constant dense<0.000000e+00> : vector<4xf32>
    %194 = vector.multi_reduction <add>, %193, %cst_200 [0] : vector<80x4xf32> to vector<4xf32>
    %195 = vector.shape_cast %194 : vector<4xf32> to vector<1x4xf32>
    %cst_201 = arith.constant 6.400000e+01 : f32
    %196 = vector.broadcast %cst_201 : f32 to vector<1x4xf32>
    %197 = arith.divf %195, %196 : vector<1x4xf32>
    %198 = vector.broadcast %197 : vector<1x4xf32> to vector<80x4xf32>
    %199 = arith.subf %167, %198 : vector<80x4xf32>
    %200 = arith.mulf %199, %199 : vector<80x4xf32>
    %cst_202 = arith.constant 0.000000e+00 : f32
    %201 = vector.shape_cast %189 : vector<80x1xi1> to vector<80x1xi1>
    %202 = vector.broadcast %201 : vector<80x1xi1> to vector<80x4xi1>
    %203 = vector.broadcast %cst_202 : f32 to vector<80x4xf32>
    %204 = arith.select %202, %200, %203 : vector<80x4xi1>, vector<80x4xf32>
    %cst_203 = arith.constant dense<0.000000e+00> : vector<4xf32>
    %205 = vector.multi_reduction <add>, %204, %cst_203 [0] : vector<80x4xf32> to vector<4xf32>
    %206 = vector.shape_cast %205 : vector<4xf32> to vector<1x4xf32>
    %207 = vector.shape_cast %195 : vector<1x4xf32> to vector<1x1x1x4xf32>
    %c0_204 = arith.constant 0 : index
    %c0_205 = arith.constant 0 : index
    %c0_206 = arith.constant 0 : index
    %c0_207 = arith.constant 0 : index
    %208 = vector.load %arg8[%c0_204, %c0_205, %c0_206, %c0_207] : memref<1x1x1x4xf32, #tpu.memory_space<vmem>>, vector<1x1x1x4xf32>
    tpu.vector_store %arg8[%c0_204, %c0_205, %c0_206, %c0_207], %207 {strides = array<i32>} : memref<1x1x1x4xf32, #tpu.memory_space<vmem>>, vector<1x1x1x4xf32>,
    %209 = vector.shape_cast %206 : vector<1x4xf32> to vector<1x1x1x4xf32>
    %c0_208 = arith.constant 0 : index
    %c0_209 = arith.constant 0 : index
    %c0_210 = arith.constant 0 : index
    %c0_211 = arith.constant 0 : index
    %210 = vector.load %arg9[%c0_208, %c0_209, %c0_210, %c0_211] : memref<1x1x1x4xf32, #tpu.memory_space<vmem>>, vector<1x1x1x4xf32>
    tpu.vector_store %arg9[%c0_208, %c0_209, %c0_210, %c0_211], %209 {strides = array<i32>} : memref<1x1x1x4xf32, #tpu.memory_space<vmem>>, vector<1x1x1x4xf32>,
    return
  }
  func.func @transform_0(%arg0: i32, %arg1: i32) -> (i32, i32, i32, i32) {
    %c0_i32 = arith.constant 0 : i32
    %c0_i32_0 = arith.constant 0 : i32
    %c0_i32_1 = arith.constant 0 : i32
    return %arg0, %arg1, %c0_i32, %c0_i32_0 : i32, i32, i32, i32
  }
  func.func @transform_1(%arg0: i32, %arg1: i32) -> (i32, i32, i32, i32) {
    %c1_i32 = arith.constant 1 : i32
    %0 = arith.addi %arg1, %c1_i32 : i32
    %c0_i32 = arith.constant 0 : i32
    %c0_i32_0 = arith.constant 0 : i32
    %c0_i32_1 = arith.constant 0 : i32
    return %arg0, %0, %c0_i32, %c0_i32_0 : i32, i32, i32, i32
  }
  func.func @transform_2(%arg0: i32, %arg1: i32) -> (i32, i32, i32, i32) {
    %c2_i32 = arith.constant 2 : i32
    %0 = arith.addi %arg1, %c2_i32 : i32
    %c0_i32 = arith.constant 0 : i32
    %c0_i32_0 = arith.constant 0 : i32
    %c0_i32_1 = arith.constant 0 : i32
    return %arg0, %0, %c0_i32, %c0_i32_0 : i32, i32, i32, i32
  }
  func.func @transform_3(%arg0: i32, %arg1: i32) -> (i32, i32, i32) {
    %c0_i32 = arith.constant 0 : i32
    %c0_i32_0 = arith.constant 0 : i32
    %c0_i32_1 = arith.constant 0 : i32
    %c0_i32_2 = arith.constant 0 : i32
    return %c0_i32, %c0_i32_0, %c0_i32_1 : i32, i32, i32
  }
  func.func @transform_4(%arg0: i32, %arg1: i32) -> (i32, i32) {
    %c0_i32 = arith.constant 0 : i32
    %c0_i32_0 = arith.constant 0 : i32
    %c0_i32_1 = arith.constant 0 : i32
    return %c0_i32, %c0_i32_0 : i32, i32
  }
  func.func @transform_5(%arg0: i32, %arg1: i32) -> (i32, i32, i32, i32) {
    %c0_i32 = arith.constant 0 : i32
    %c0_i32_0 = arith.constant 0 : i32
    %c0_i32_1 = arith.constant 0 : i32
    return %arg0, %arg1, %c0_i32, %c0_i32_0 : i32, i32, i32, i32
  }
  func.func @transform_6(%arg0: i32, %arg1: i32) -> (i32, i32, i32, i32) {
    %c0_i32 = arith.constant 0 : i32
    %c0_i32_0 = arith.constant 0 : i32
    %c0_i32_1 = arith.constant 0 : i32
    return %arg0, %arg1, %c0_i32, %c0_i32_0 : i32, i32, i32, i32
  }
  func.func @transform_7(%arg0: i32, %arg1: i32) -> (i32, i32, i32, i32) {
    %c0_i32 = arith.constant 0 : i32
    %c0_i32_0 = arith.constant 0 : i32
    %c0_i32_1 = arith.constant 0 : i32
    return %arg0, %arg1, %c0_i32, %c0_i32_0 : i32, i32, i32, i32
  }
}

module attributes {stable_mosaic.version = 11 : i64} {
  func.func @_conv_relu_stats_kernel(%arg0: i32, %arg1: i32, %arg2: memref<1x1x110x4xbf16, #tpu.memory_space<vmem>>, %arg3: memref<1x1x110x4xbf16, #tpu.memory_space<vmem>>, %arg4: memref<1x1x110x4xbf16, #tpu.memory_space<vmem>>, %arg5: memref<27x4x4xbf16, #tpu.memory_space<vmem>>, %arg6: memref<1x4xf32, #tpu.memory_space<vmem>>, %arg7: memref<1x1x80x4xf32, #tpu.memory_space<vmem>>, %arg8: memref<1x1x1x4xf32, #tpu.memory_space<vmem>>, %arg9: memref<1x1x1x4xf32, #tpu.memory_space<vmem>>) attributes {dimension_semantics = [#tpu.dimension_semantics<parallel>, #tpu.dimension_semantics<parallel>], iteration_bounds = array<i64: 2, 8>, scalar_prefetch = 0 : i64, scratch_operands = 0 : i64, tpu.core_type = #tpu.core_type<tc>, window_params = [{transform_indices = @transform_0, window_bounds = array<i64: 1, 1, 110, 4>}, {transform_indices = @transform_1, window_bounds = array<i64: 1, 1, 110, 4>}, {transform_indices = @transform_2, window_bounds = array<i64: 1, 1, 110, 4>}, {pipeline_mode = #tpu.pipeline_mode<synchronous>, transform_indices = @transform_3, window_bounds = array<i64: 27, 4, 4>}, {pipeline_mode = #tpu.pipeline_mode<synchronous>, transform_indices = @transform_4, window_bounds = array<i64: 1, 4>}, {transform_indices = @transform_5, window_bounds = array<i64: 1, 1, 80, 4>}, {transform_indices = @transform_6, window_bounds = array<i64: 1, 1, 1, 4>}, {transform_indices = @transform_7, window_bounds = array<i64: 1, 1, 1, 4>}]} {
    %cst = arith.constant 0.000000e+00 : f32
    %0 = vector.broadcast %cst : f32 to vector<80x4xf32>
    %c0 = arith.constant 0 : index
    %c0_0 = arith.constant 0 : index
    %c0_1 = arith.constant 0 : index
    %c0_2 = arith.constant 0 : index
    %1 = vector.load %arg2[%c0, %c0_0, %c0_1, %c0_2] : memref<1x1x110x4xbf16, #tpu.memory_space<vmem>>, vector<1x1x80x4xbf16>
    %2 = vector.shape_cast %1 : vector<1x1x80x4xbf16> to vector<80x4xbf16>
    %c0_3 = arith.constant 0 : index
    %c0_4 = arith.constant 0 : index
    %c0_5 = arith.constant 0 : index
    %3 = vector.load %arg5[%c0_3, %c0_4, %c0_5] : memref<27x4x4xbf16, #tpu.memory_space<vmem>>, vector<1x4x4xbf16>
    %4 = vector.shape_cast %3 : vector<1x4x4xbf16> to vector<4x4xbf16>
    %cst_6 = arith.constant dense<0.000000e+00> : vector<80x4xf32>
    %5 = tpu.matmul %2, %4, %cst_6 {dimension_numbers = #tpu.dot_dimension_numbers<[1], [0], [0], [1], [0, 0, 1, 1], [], []>} : vector<80x4xbf16>, vector<4x4xbf16>, vector<80x4xf32> -> vector<80x4xf32>
    %6 = arith.addf %0, %5 : vector<80x4xf32>
    %c0_7 = arith.constant 0 : index
    %c0_8 = arith.constant 0 : index
    %c1 = arith.constant 1 : index
    %c0_9 = arith.constant 0 : index
    %7 = vector.load %arg2[%c0_7, %c0_8, %c1, %c0_9] : memref<1x1x110x4xbf16, #tpu.memory_space<vmem>>, vector<1x1x80x4xbf16>
    %8 = vector.shape_cast %7 : vector<1x1x80x4xbf16> to vector<80x4xbf16>
    %c1_10 = arith.constant 1 : index
    %c0_11 = arith.constant 0 : index
    %c0_12 = arith.constant 0 : index
    %9 = vector.load %arg5[%c1_10, %c0_11, %c0_12] : memref<27x4x4xbf16, #tpu.memory_space<vmem>>, vector<1x4x4xbf16>
    %10 = vector.shape_cast %9 : vector<1x4x4xbf16> to vector<4x4xbf16>
    %cst_13 = arith.constant dense<0.000000e+00> : vector<80x4xf32>
    %11 = tpu.matmul %8, %10, %cst_13 {dimension_numbers = #tpu.dot_dimension_numbers<[1], [0], [0], [1], [0, 0, 1, 1], [], []>} : vector<80x4xbf16>, vector<4x4xbf16>, vector<80x4xf32> -> vector<80x4xf32>
    %12 = arith.addf %6, %11 : vector<80x4xf32>
    %c0_14 = arith.constant 0 : index
    %c0_15 = arith.constant 0 : index
    %c2 = arith.constant 2 : index
    %c0_16 = arith.constant 0 : index
    %13 = vector.load %arg2[%c0_14, %c0_15, %c2, %c0_16] : memref<1x1x110x4xbf16, #tpu.memory_space<vmem>>, vector<1x1x80x4xbf16>
    %14 = vector.shape_cast %13 : vector<1x1x80x4xbf16> to vector<80x4xbf16>
    %c2_17 = arith.constant 2 : index
    %c0_18 = arith.constant 0 : index
    %c0_19 = arith.constant 0 : index
    %15 = vector.load %arg5[%c2_17, %c0_18, %c0_19] : memref<27x4x4xbf16, #tpu.memory_space<vmem>>, vector<1x4x4xbf16>
    %16 = vector.shape_cast %15 : vector<1x4x4xbf16> to vector<4x4xbf16>
    %cst_20 = arith.constant dense<0.000000e+00> : vector<80x4xf32>
    %17 = tpu.matmul %14, %16, %cst_20 {dimension_numbers = #tpu.dot_dimension_numbers<[1], [0], [0], [1], [0, 0, 1, 1], [], []>} : vector<80x4xbf16>, vector<4x4xbf16>, vector<80x4xf32> -> vector<80x4xf32>
    %18 = arith.addf %12, %17 : vector<80x4xf32>
    %c0_21 = arith.constant 0 : index
    %c0_22 = arith.constant 0 : index
    %c10 = arith.constant 10 : index
    %c0_23 = arith.constant 0 : index
    %19 = vector.load %arg2[%c0_21, %c0_22, %c10, %c0_23] : memref<1x1x110x4xbf16, #tpu.memory_space<vmem>>, vector<1x1x80x4xbf16>
    %20 = vector.shape_cast %19 : vector<1x1x80x4xbf16> to vector<80x4xbf16>
    %c3 = arith.constant 3 : index
    %c0_24 = arith.constant 0 : index
    %c0_25 = arith.constant 0 : index
    %21 = vector.load %arg5[%c3, %c0_24, %c0_25] : memref<27x4x4xbf16, #tpu.memory_space<vmem>>, vector<1x4x4xbf16>
    %22 = vector.shape_cast %21 : vector<1x4x4xbf16> to vector<4x4xbf16>
    %cst_26 = arith.constant dense<0.000000e+00> : vector<80x4xf32>
    %23 = tpu.matmul %20, %22, %cst_26 {dimension_numbers = #tpu.dot_dimension_numbers<[1], [0], [0], [1], [0, 0, 1, 1], [], []>} : vector<80x4xbf16>, vector<4x4xbf16>, vector<80x4xf32> -> vector<80x4xf32>
    %24 = arith.addf %18, %23 : vector<80x4xf32>
    %c0_27 = arith.constant 0 : index
    %c0_28 = arith.constant 0 : index
    %c11 = arith.constant 11 : index
    %c0_29 = arith.constant 0 : index
    %25 = vector.load %arg2[%c0_27, %c0_28, %c11, %c0_29] : memref<1x1x110x4xbf16, #tpu.memory_space<vmem>>, vector<1x1x80x4xbf16>
    %26 = vector.shape_cast %25 : vector<1x1x80x4xbf16> to vector<80x4xbf16>
    %c4 = arith.constant 4 : index
    %c0_30 = arith.constant 0 : index
    %c0_31 = arith.constant 0 : index
    %27 = vector.load %arg5[%c4, %c0_30, %c0_31] : memref<27x4x4xbf16, #tpu.memory_space<vmem>>, vector<1x4x4xbf16>
    %28 = vector.shape_cast %27 : vector<1x4x4xbf16> to vector<4x4xbf16>
    %cst_32 = arith.constant dense<0.000000e+00> : vector<80x4xf32>
    %29 = tpu.matmul %26, %28, %cst_32 {dimension_numbers = #tpu.dot_dimension_numbers<[1], [0], [0], [1], [0, 0, 1, 1], [], []>} : vector<80x4xbf16>, vector<4x4xbf16>, vector<80x4xf32> -> vector<80x4xf32>
    %30 = arith.addf %24, %29 : vector<80x4xf32>
    %c0_33 = arith.constant 0 : index
    %c0_34 = arith.constant 0 : index
    %c12 = arith.constant 12 : index
    %c0_35 = arith.constant 0 : index
    %31 = vector.load %arg2[%c0_33, %c0_34, %c12, %c0_35] : memref<1x1x110x4xbf16, #tpu.memory_space<vmem>>, vector<1x1x80x4xbf16>
    %32 = vector.shape_cast %31 : vector<1x1x80x4xbf16> to vector<80x4xbf16>
    %c5 = arith.constant 5 : index
    %c0_36 = arith.constant 0 : index
    %c0_37 = arith.constant 0 : index
    %33 = vector.load %arg5[%c5, %c0_36, %c0_37] : memref<27x4x4xbf16, #tpu.memory_space<vmem>>, vector<1x4x4xbf16>
    %34 = vector.shape_cast %33 : vector<1x4x4xbf16> to vector<4x4xbf16>
    %cst_38 = arith.constant dense<0.000000e+00> : vector<80x4xf32>
    %35 = tpu.matmul %32, %34, %cst_38 {dimension_numbers = #tpu.dot_dimension_numbers<[1], [0], [0], [1], [0, 0, 1, 1], [], []>} : vector<80x4xbf16>, vector<4x4xbf16>, vector<80x4xf32> -> vector<80x4xf32>
    %36 = arith.addf %30, %35 : vector<80x4xf32>
    %c0_39 = arith.constant 0 : index
    %c0_40 = arith.constant 0 : index
    %c20 = arith.constant 20 : index
    %c0_41 = arith.constant 0 : index
    %37 = vector.load %arg2[%c0_39, %c0_40, %c20, %c0_41] : memref<1x1x110x4xbf16, #tpu.memory_space<vmem>>, vector<1x1x80x4xbf16>
    %38 = vector.shape_cast %37 : vector<1x1x80x4xbf16> to vector<80x4xbf16>
    %c6 = arith.constant 6 : index
    %c0_42 = arith.constant 0 : index
    %c0_43 = arith.constant 0 : index
    %39 = vector.load %arg5[%c6, %c0_42, %c0_43] : memref<27x4x4xbf16, #tpu.memory_space<vmem>>, vector<1x4x4xbf16>
    %40 = vector.shape_cast %39 : vector<1x4x4xbf16> to vector<4x4xbf16>
    %cst_44 = arith.constant dense<0.000000e+00> : vector<80x4xf32>
    %41 = tpu.matmul %38, %40, %cst_44 {dimension_numbers = #tpu.dot_dimension_numbers<[1], [0], [0], [1], [0, 0, 1, 1], [], []>} : vector<80x4xbf16>, vector<4x4xbf16>, vector<80x4xf32> -> vector<80x4xf32>
    %42 = arith.addf %36, %41 : vector<80x4xf32>
    %c0_45 = arith.constant 0 : index
    %c0_46 = arith.constant 0 : index
    %c21 = arith.constant 21 : index
    %c0_47 = arith.constant 0 : index
    %43 = vector.load %arg2[%c0_45, %c0_46, %c21, %c0_47] : memref<1x1x110x4xbf16, #tpu.memory_space<vmem>>, vector<1x1x80x4xbf16>
    %44 = vector.shape_cast %43 : vector<1x1x80x4xbf16> to vector<80x4xbf16>
    %c7 = arith.constant 7 : index
    %c0_48 = arith.constant 0 : index
    %c0_49 = arith.constant 0 : index
    %45 = vector.load %arg5[%c7, %c0_48, %c0_49] : memref<27x4x4xbf16, #tpu.memory_space<vmem>>, vector<1x4x4xbf16>
    %46 = vector.shape_cast %45 : vector<1x4x4xbf16> to vector<4x4xbf16>
    %cst_50 = arith.constant dense<0.000000e+00> : vector<80x4xf32>
    %47 = tpu.matmul %44, %46, %cst_50 {dimension_numbers = #tpu.dot_dimension_numbers<[1], [0], [0], [1], [0, 0, 1, 1], [], []>} : vector<80x4xbf16>, vector<4x4xbf16>, vector<80x4xf32> -> vector<80x4xf32>
    %48 = arith.addf %42, %47 : vector<80x4xf32>
    %c0_51 = arith.constant 0 : index
    %c0_52 = arith.constant 0 : index
    %c22 = arith.constant 22 : index
    %c0_53 = arith.constant 0 : index
    %49 = vector.load %arg2[%c0_51, %c0_52, %c22, %c0_53] : memref<1x1x110x4xbf16, #tpu.memory_space<vmem>>, vector<1x1x80x4xbf16>
    %50 = vector.shape_cast %49 : vector<1x1x80x4xbf16> to vector<80x4xbf16>
    %c8 = arith.constant 8 : index
    %c0_54 = arith.constant 0 : index
    %c0_55 = arith.constant 0 : index
    %51 = vector.load %arg5[%c8, %c0_54, %c0_55] : memref<27x4x4xbf16, #tpu.memory_space<vmem>>, vector<1x4x4xbf16>
    %52 = vector.shape_cast %51 : vector<1x4x4xbf16> to vector<4x4xbf16>
    %cst_56 = arith.constant dense<0.000000e+00> : vector<80x4xf32>
    %53 = tpu.matmul %50, %52, %cst_56 {dimension_numbers = #tpu.dot_dimension_numbers<[1], [0], [0], [1], [0, 0, 1, 1], [], []>} : vector<80x4xbf16>, vector<4x4xbf16>, vector<80x4xf32> -> vector<80x4xf32>
    %54 = arith.addf %48, %53 : vector<80x4xf32>
    %c0_57 = arith.constant 0 : index
    %c0_58 = arith.constant 0 : index
    %c0_59 = arith.constant 0 : index
    %c0_60 = arith.constant 0 : index
    %55 = vector.load %arg3[%c0_57, %c0_58, %c0_59, %c0_60] : memref<1x1x110x4xbf16, #tpu.memory_space<vmem>>, vector<1x1x80x4xbf16>
    %56 = vector.shape_cast %55 : vector<1x1x80x4xbf16> to vector<80x4xbf16>
    %c9 = arith.constant 9 : index
    %c0_61 = arith.constant 0 : index
    %c0_62 = arith.constant 0 : index
    %57 = vector.load %arg5[%c9, %c0_61, %c0_62] : memref<27x4x4xbf16, #tpu.memory_space<vmem>>, vector<1x4x4xbf16>
    %58 = vector.shape_cast %57 : vector<1x4x4xbf16> to vector<4x4xbf16>
    %cst_63 = arith.constant dense<0.000000e+00> : vector<80x4xf32>
    %59 = tpu.matmul %56, %58, %cst_63 {dimension_numbers = #tpu.dot_dimension_numbers<[1], [0], [0], [1], [0, 0, 1, 1], [], []>} : vector<80x4xbf16>, vector<4x4xbf16>, vector<80x4xf32> -> vector<80x4xf32>
    %60 = arith.addf %54, %59 : vector<80x4xf32>
    %c0_64 = arith.constant 0 : index
    %c0_65 = arith.constant 0 : index
    %c1_66 = arith.constant 1 : index
    %c0_67 = arith.constant 0 : index
    %61 = vector.load %arg3[%c0_64, %c0_65, %c1_66, %c0_67] : memref<1x1x110x4xbf16, #tpu.memory_space<vmem>>, vector<1x1x80x4xbf16>
    %62 = vector.shape_cast %61 : vector<1x1x80x4xbf16> to vector<80x4xbf16>
    %c10_68 = arith.constant 10 : index
    %c0_69 = arith.constant 0 : index
    %c0_70 = arith.constant 0 : index
    %63 = vector.load %arg5[%c10_68, %c0_69, %c0_70] : memref<27x4x4xbf16, #tpu.memory_space<vmem>>, vector<1x4x4xbf16>
    %64 = vector.shape_cast %63 : vector<1x4x4xbf16> to vector<4x4xbf16>
    %cst_71 = arith.constant dense<0.000000e+00> : vector<80x4xf32>
    %65 = tpu.matmul %62, %64, %cst_71 {dimension_numbers = #tpu.dot_dimension_numbers<[1], [0], [0], [1], [0, 0, 1, 1], [], []>} : vector<80x4xbf16>, vector<4x4xbf16>, vector<80x4xf32> -> vector<80x4xf32>
    %66 = arith.addf %60, %65 : vector<80x4xf32>
    %c0_72 = arith.constant 0 : index
    %c0_73 = arith.constant 0 : index
    %c2_74 = arith.constant 2 : index
    %c0_75 = arith.constant 0 : index
    %67 = vector.load %arg3[%c0_72, %c0_73, %c2_74, %c0_75] : memref<1x1x110x4xbf16, #tpu.memory_space<vmem>>, vector<1x1x80x4xbf16>
    %68 = vector.shape_cast %67 : vector<1x1x80x4xbf16> to vector<80x4xbf16>
    %c11_76 = arith.constant 11 : index
    %c0_77 = arith.constant 0 : index
    %c0_78 = arith.constant 0 : index
    %69 = vector.load %arg5[%c11_76, %c0_77, %c0_78] : memref<27x4x4xbf16, #tpu.memory_space<vmem>>, vector<1x4x4xbf16>
    %70 = vector.shape_cast %69 : vector<1x4x4xbf16> to vector<4x4xbf16>
    %cst_79 = arith.constant dense<0.000000e+00> : vector<80x4xf32>
    %71 = tpu.matmul %68, %70, %cst_79 {dimension_numbers = #tpu.dot_dimension_numbers<[1], [0], [0], [1], [0, 0, 1, 1], [], []>} : vector<80x4xbf16>, vector<4x4xbf16>, vector<80x4xf32> -> vector<80x4xf32>
    %72 = arith.addf %66, %71 : vector<80x4xf32>
    %c0_80 = arith.constant 0 : index
    %c0_81 = arith.constant 0 : index
    %c10_82 = arith.constant 10 : index
    %c0_83 = arith.constant 0 : index
    %73 = vector.load %arg3[%c0_80, %c0_81, %c10_82, %c0_83] : memref<1x1x110x4xbf16, #tpu.memory_space<vmem>>, vector<1x1x80x4xbf16>
    %74 = vector.shape_cast %73 : vector<1x1x80x4xbf16> to vector<80x4xbf16>
    %c12_84 = arith.constant 12 : index
    %c0_85 = arith.constant 0 : index
    %c0_86 = arith.constant 0 : index
    %75 = vector.load %arg5[%c12_84, %c0_85, %c0_86] : memref<27x4x4xbf16, #tpu.memory_space<vmem>>, vector<1x4x4xbf16>
    %76 = vector.shape_cast %75 : vector<1x4x4xbf16> to vector<4x4xbf16>
    %cst_87 = arith.constant dense<0.000000e+00> : vector<80x4xf32>
    %77 = tpu.matmul %74, %76, %cst_87 {dimension_numbers = #tpu.dot_dimension_numbers<[1], [0], [0], [1], [0, 0, 1, 1], [], []>} : vector<80x4xbf16>, vector<4x4xbf16>, vector<80x4xf32> -> vector<80x4xf32>
    %78 = arith.addf %72, %77 : vector<80x4xf32>
    %c0_88 = arith.constant 0 : index
    %c0_89 = arith.constant 0 : index
    %c11_90 = arith.constant 11 : index
    %c0_91 = arith.constant 0 : index
    %79 = vector.load %arg3[%c0_88, %c0_89, %c11_90, %c0_91] : memref<1x1x110x4xbf16, #tpu.memory_space<vmem>>, vector<1x1x80x4xbf16>
    %80 = vector.shape_cast %79 : vector<1x1x80x4xbf16> to vector<80x4xbf16>
    %c13 = arith.constant 13 : index
    %c0_92 = arith.constant 0 : index
    %c0_93 = arith.constant 0 : index
    %81 = vector.load %arg5[%c13, %c0_92, %c0_93] : memref<27x4x4xbf16, #tpu.memory_space<vmem>>, vector<1x4x4xbf16>
    %82 = vector.shape_cast %81 : vector<1x4x4xbf16> to vector<4x4xbf16>
    %cst_94 = arith.constant dense<0.000000e+00> : vector<80x4xf32>
    %83 = tpu.matmul %80, %82, %cst_94 {dimension_numbers = #tpu.dot_dimension_numbers<[1], [0], [0], [1], [0, 0, 1, 1], [], []>} : vector<80x4xbf16>, vector<4x4xbf16>, vector<80x4xf32> -> vector<80x4xf32>
    %84 = arith.addf %78, %83 : vector<80x4xf32>
    %c0_95 = arith.constant 0 : index
    %c0_96 = arith.constant 0 : index
    %c12_97 = arith.constant 12 : index
    %c0_98 = arith.constant 0 : index
    %85 = vector.load %arg3[%c0_95, %c0_96, %c12_97, %c0_98] : memref<1x1x110x4xbf16, #tpu.memory_space<vmem>>, vector<1x1x80x4xbf16>
    %86 = vector.shape_cast %85 : vector<1x1x80x4xbf16> to vector<80x4xbf16>
    %c14 = arith.constant 14 : index
    %c0_99 = arith.constant 0 : index
    %c0_100 = arith.constant 0 : index
    %87 = vector.load %arg5[%c14, %c0_99, %c0_100] : memref<27x4x4xbf16, #tpu.memory_space<vmem>>, vector<1x4x4xbf16>
    %88 = vector.shape_cast %87 : vector<1x4x4xbf16> to vector<4x4xbf16>
    %cst_101 = arith.constant dense<0.000000e+00> : vector<80x4xf32>
    %89 = tpu.matmul %86, %88, %cst_101 {dimension_numbers = #tpu.dot_dimension_numbers<[1], [0], [0], [1], [0, 0, 1, 1], [], []>} : vector<80x4xbf16>, vector<4x4xbf16>, vector<80x4xf32> -> vector<80x4xf32>
    %90 = arith.addf %84, %89 : vector<80x4xf32>
    %c0_102 = arith.constant 0 : index
    %c0_103 = arith.constant 0 : index
    %c20_104 = arith.constant 20 : index
    %c0_105 = arith.constant 0 : index
    %91 = vector.load %arg3[%c0_102, %c0_103, %c20_104, %c0_105] : memref<1x1x110x4xbf16, #tpu.memory_space<vmem>>, vector<1x1x80x4xbf16>
    %92 = vector.shape_cast %91 : vector<1x1x80x4xbf16> to vector<80x4xbf16>
    %c15 = arith.constant 15 : index
    %c0_106 = arith.constant 0 : index
    %c0_107 = arith.constant 0 : index
    %93 = vector.load %arg5[%c15, %c0_106, %c0_107] : memref<27x4x4xbf16, #tpu.memory_space<vmem>>, vector<1x4x4xbf16>
    %94 = vector.shape_cast %93 : vector<1x4x4xbf16> to vector<4x4xbf16>
    %cst_108 = arith.constant dense<0.000000e+00> : vector<80x4xf32>
    %95 = tpu.matmul %92, %94, %cst_108 {dimension_numbers = #tpu.dot_dimension_numbers<[1], [0], [0], [1], [0, 0, 1, 1], [], []>} : vector<80x4xbf16>, vector<4x4xbf16>, vector<80x4xf32> -> vector<80x4xf32>
    %96 = arith.addf %90, %95 : vector<80x4xf32>
    %c0_109 = arith.constant 0 : index
    %c0_110 = arith.constant 0 : index
    %c21_111 = arith.constant 21 : index
    %c0_112 = arith.constant 0 : index
    %97 = vector.load %arg3[%c0_109, %c0_110, %c21_111, %c0_112] : memref<1x1x110x4xbf16, #tpu.memory_space<vmem>>, vector<1x1x80x4xbf16>
    %98 = vector.shape_cast %97 : vector<1x1x80x4xbf16> to vector<80x4xbf16>
    %c16 = arith.constant 16 : index
    %c0_113 = arith.constant 0 : index
    %c0_114 = arith.constant 0 : index
    %99 = vector.load %arg5[%c16, %c0_113, %c0_114] : memref<27x4x4xbf16, #tpu.memory_space<vmem>>, vector<1x4x4xbf16>
    %100 = vector.shape_cast %99 : vector<1x4x4xbf16> to vector<4x4xbf16>
    %cst_115 = arith.constant dense<0.000000e+00> : vector<80x4xf32>
    %101 = tpu.matmul %98, %100, %cst_115 {dimension_numbers = #tpu.dot_dimension_numbers<[1], [0], [0], [1], [0, 0, 1, 1], [], []>} : vector<80x4xbf16>, vector<4x4xbf16>, vector<80x4xf32> -> vector<80x4xf32>
    %102 = arith.addf %96, %101 : vector<80x4xf32>
    %c0_116 = arith.constant 0 : index
    %c0_117 = arith.constant 0 : index
    %c22_118 = arith.constant 22 : index
    %c0_119 = arith.constant 0 : index
    %103 = vector.load %arg3[%c0_116, %c0_117, %c22_118, %c0_119] : memref<1x1x110x4xbf16, #tpu.memory_space<vmem>>, vector<1x1x80x4xbf16>
    %104 = vector.shape_cast %103 : vector<1x1x80x4xbf16> to vector<80x4xbf16>
    %c17 = arith.constant 17 : index
    %c0_120 = arith.constant 0 : index
    %c0_121 = arith.constant 0 : index
    %105 = vector.load %arg5[%c17, %c0_120, %c0_121] : memref<27x4x4xbf16, #tpu.memory_space<vmem>>, vector<1x4x4xbf16>
    %106 = vector.shape_cast %105 : vector<1x4x4xbf16> to vector<4x4xbf16>
    %cst_122 = arith.constant dense<0.000000e+00> : vector<80x4xf32>
    %107 = tpu.matmul %104, %106, %cst_122 {dimension_numbers = #tpu.dot_dimension_numbers<[1], [0], [0], [1], [0, 0, 1, 1], [], []>} : vector<80x4xbf16>, vector<4x4xbf16>, vector<80x4xf32> -> vector<80x4xf32>
    %108 = arith.addf %102, %107 : vector<80x4xf32>
    %c0_123 = arith.constant 0 : index
    %c0_124 = arith.constant 0 : index
    %c0_125 = arith.constant 0 : index
    %c0_126 = arith.constant 0 : index
    %109 = vector.load %arg4[%c0_123, %c0_124, %c0_125, %c0_126] : memref<1x1x110x4xbf16, #tpu.memory_space<vmem>>, vector<1x1x80x4xbf16>
    %110 = vector.shape_cast %109 : vector<1x1x80x4xbf16> to vector<80x4xbf16>
    %c18 = arith.constant 18 : index
    %c0_127 = arith.constant 0 : index
    %c0_128 = arith.constant 0 : index
    %111 = vector.load %arg5[%c18, %c0_127, %c0_128] : memref<27x4x4xbf16, #tpu.memory_space<vmem>>, vector<1x4x4xbf16>
    %112 = vector.shape_cast %111 : vector<1x4x4xbf16> to vector<4x4xbf16>
    %cst_129 = arith.constant dense<0.000000e+00> : vector<80x4xf32>
    %113 = tpu.matmul %110, %112, %cst_129 {dimension_numbers = #tpu.dot_dimension_numbers<[1], [0], [0], [1], [0, 0, 1, 1], [], []>} : vector<80x4xbf16>, vector<4x4xbf16>, vector<80x4xf32> -> vector<80x4xf32>
    %114 = arith.addf %108, %113 : vector<80x4xf32>
    %c0_130 = arith.constant 0 : index
    %c0_131 = arith.constant 0 : index
    %c1_132 = arith.constant 1 : index
    %c0_133 = arith.constant 0 : index
    %115 = vector.load %arg4[%c0_130, %c0_131, %c1_132, %c0_133] : memref<1x1x110x4xbf16, #tpu.memory_space<vmem>>, vector<1x1x80x4xbf16>
    %116 = vector.shape_cast %115 : vector<1x1x80x4xbf16> to vector<80x4xbf16>
    %c19 = arith.constant 19 : index
    %c0_134 = arith.constant 0 : index
    %c0_135 = arith.constant 0 : index
    %117 = vector.load %arg5[%c19, %c0_134, %c0_135] : memref<27x4x4xbf16, #tpu.memory_space<vmem>>, vector<1x4x4xbf16>
    %118 = vector.shape_cast %117 : vector<1x4x4xbf16> to vector<4x4xbf16>
    %cst_136 = arith.constant dense<0.000000e+00> : vector<80x4xf32>
    %119 = tpu.matmul %116, %118, %cst_136 {dimension_numbers = #tpu.dot_dimension_numbers<[1], [0], [0], [1], [0, 0, 1, 1], [], []>} : vector<80x4xbf16>, vector<4x4xbf16>, vector<80x4xf32> -> vector<80x4xf32>
    %120 = arith.addf %114, %119 : vector<80x4xf32>
    %c0_137 = arith.constant 0 : index
    %c0_138 = arith.constant 0 : index
    %c2_139 = arith.constant 2 : index
    %c0_140 = arith.constant 0 : index
    %121 = vector.load %arg4[%c0_137, %c0_138, %c2_139, %c0_140] : memref<1x1x110x4xbf16, #tpu.memory_space<vmem>>, vector<1x1x80x4xbf16>
    %122 = vector.shape_cast %121 : vector<1x1x80x4xbf16> to vector<80x4xbf16>
    %c20_141 = arith.constant 20 : index
    %c0_142 = arith.constant 0 : index
    %c0_143 = arith.constant 0 : index
    %123 = vector.load %arg5[%c20_141, %c0_142, %c0_143] : memref<27x4x4xbf16, #tpu.memory_space<vmem>>, vector<1x4x4xbf16>
    %124 = vector.shape_cast %123 : vector<1x4x4xbf16> to vector<4x4xbf16>
    %cst_144 = arith.constant dense<0.000000e+00> : vector<80x4xf32>
    %125 = tpu.matmul %122, %124, %cst_144 {dimension_numbers = #tpu.dot_dimension_numbers<[1], [0], [0], [1], [0, 0, 1, 1], [], []>} : vector<80x4xbf16>, vector<4x4xbf16>, vector<80x4xf32> -> vector<80x4xf32>
    %126 = arith.addf %120, %125 : vector<80x4xf32>
    %c0_145 = arith.constant 0 : index
    %c0_146 = arith.constant 0 : index
    %c10_147 = arith.constant 10 : index
    %c0_148 = arith.constant 0 : index
    %127 = vector.load %arg4[%c0_145, %c0_146, %c10_147, %c0_148] : memref<1x1x110x4xbf16, #tpu.memory_space<vmem>>, vector<1x1x80x4xbf16>
    %128 = vector.shape_cast %127 : vector<1x1x80x4xbf16> to vector<80x4xbf16>
    %c21_149 = arith.constant 21 : index
    %c0_150 = arith.constant 0 : index
    %c0_151 = arith.constant 0 : index
    %129 = vector.load %arg5[%c21_149, %c0_150, %c0_151] : memref<27x4x4xbf16, #tpu.memory_space<vmem>>, vector<1x4x4xbf16>
    %130 = vector.shape_cast %129 : vector<1x4x4xbf16> to vector<4x4xbf16>
    %cst_152 = arith.constant dense<0.000000e+00> : vector<80x4xf32>
    %131 = tpu.matmul %128, %130, %cst_152 {dimension_numbers = #tpu.dot_dimension_numbers<[1], [0], [0], [1], [0, 0, 1, 1], [], []>} : vector<80x4xbf16>, vector<4x4xbf16>, vector<80x4xf32> -> vector<80x4xf32>
    %132 = arith.addf %126, %131 : vector<80x4xf32>
    %c0_153 = arith.constant 0 : index
    %c0_154 = arith.constant 0 : index
    %c11_155 = arith.constant 11 : index
    %c0_156 = arith.constant 0 : index
    %133 = vector.load %arg4[%c0_153, %c0_154, %c11_155, %c0_156] : memref<1x1x110x4xbf16, #tpu.memory_space<vmem>>, vector<1x1x80x4xbf16>
    %134 = vector.shape_cast %133 : vector<1x1x80x4xbf16> to vector<80x4xbf16>
    %c22_157 = arith.constant 22 : index
    %c0_158 = arith.constant 0 : index
    %c0_159 = arith.constant 0 : index
    %135 = vector.load %arg5[%c22_157, %c0_158, %c0_159] : memref<27x4x4xbf16, #tpu.memory_space<vmem>>, vector<1x4x4xbf16>
    %136 = vector.shape_cast %135 : vector<1x4x4xbf16> to vector<4x4xbf16>
    %cst_160 = arith.constant dense<0.000000e+00> : vector<80x4xf32>
    %137 = tpu.matmul %134, %136, %cst_160 {dimension_numbers = #tpu.dot_dimension_numbers<[1], [0], [0], [1], [0, 0, 1, 1], [], []>} : vector<80x4xbf16>, vector<4x4xbf16>, vector<80x4xf32> -> vector<80x4xf32>
    %138 = arith.addf %132, %137 : vector<80x4xf32>
    %c0_161 = arith.constant 0 : index
    %c0_162 = arith.constant 0 : index
    %c12_163 = arith.constant 12 : index
    %c0_164 = arith.constant 0 : index
    %139 = vector.load %arg4[%c0_161, %c0_162, %c12_163, %c0_164] : memref<1x1x110x4xbf16, #tpu.memory_space<vmem>>, vector<1x1x80x4xbf16>
    %140 = vector.shape_cast %139 : vector<1x1x80x4xbf16> to vector<80x4xbf16>
    %c23 = arith.constant 23 : index
    %c0_165 = arith.constant 0 : index
    %c0_166 = arith.constant 0 : index
    %141 = vector.load %arg5[%c23, %c0_165, %c0_166] : memref<27x4x4xbf16, #tpu.memory_space<vmem>>, vector<1x4x4xbf16>
    %142 = vector.shape_cast %141 : vector<1x4x4xbf16> to vector<4x4xbf16>
    %cst_167 = arith.constant dense<0.000000e+00> : vector<80x4xf32>
    %143 = tpu.matmul %140, %142, %cst_167 {dimension_numbers = #tpu.dot_dimension_numbers<[1], [0], [0], [1], [0, 0, 1, 1], [], []>} : vector<80x4xbf16>, vector<4x4xbf16>, vector<80x4xf32> -> vector<80x4xf32>
    %144 = arith.addf %138, %143 : vector<80x4xf32>
    %c0_168 = arith.constant 0 : index
    %c0_169 = arith.constant 0 : index
    %c20_170 = arith.constant 20 : index
    %c0_171 = arith.constant 0 : index
    %145 = vector.load %arg4[%c0_168, %c0_169, %c20_170, %c0_171] : memref<1x1x110x4xbf16, #tpu.memory_space<vmem>>, vector<1x1x80x4xbf16>
    %146 = vector.shape_cast %145 : vector<1x1x80x4xbf16> to vector<80x4xbf16>
    %c24 = arith.constant 24 : index
    %c0_172 = arith.constant 0 : index
    %c0_173 = arith.constant 0 : index
    %147 = vector.load %arg5[%c24, %c0_172, %c0_173] : memref<27x4x4xbf16, #tpu.memory_space<vmem>>, vector<1x4x4xbf16>
    %148 = vector.shape_cast %147 : vector<1x4x4xbf16> to vector<4x4xbf16>
    %cst_174 = arith.constant dense<0.000000e+00> : vector<80x4xf32>
    %149 = tpu.matmul %146, %148, %cst_174 {dimension_numbers = #tpu.dot_dimension_numbers<[1], [0], [0], [1], [0, 0, 1, 1], [], []>} : vector<80x4xbf16>, vector<4x4xbf16>, vector<80x4xf32> -> vector<80x4xf32>
    %150 = arith.addf %144, %149 : vector<80x4xf32>
    %c0_175 = arith.constant 0 : index
    %c0_176 = arith.constant 0 : index
    %c21_177 = arith.constant 21 : index
    %c0_178 = arith.constant 0 : index
    %151 = vector.load %arg4[%c0_175, %c0_176, %c21_177, %c0_178] : memref<1x1x110x4xbf16, #tpu.memory_space<vmem>>, vector<1x1x80x4xbf16>
    %152 = vector.shape_cast %151 : vector<1x1x80x4xbf16> to vector<80x4xbf16>
    %c25 = arith.constant 25 : index
    %c0_179 = arith.constant 0 : index
    %c0_180 = arith.constant 0 : index
    %153 = vector.load %arg5[%c25, %c0_179, %c0_180] : memref<27x4x4xbf16, #tpu.memory_space<vmem>>, vector<1x4x4xbf16>
    %154 = vector.shape_cast %153 : vector<1x4x4xbf16> to vector<4x4xbf16>
    %cst_181 = arith.constant dense<0.000000e+00> : vector<80x4xf32>
    %155 = tpu.matmul %152, %154, %cst_181 {dimension_numbers = #tpu.dot_dimension_numbers<[1], [0], [0], [1], [0, 0, 1, 1], [], []>} : vector<80x4xbf16>, vector<4x4xbf16>, vector<80x4xf32> -> vector<80x4xf32>
    %156 = arith.addf %150, %155 : vector<80x4xf32>
    %c0_182 = arith.constant 0 : index
    %c0_183 = arith.constant 0 : index
    %c22_184 = arith.constant 22 : index
    %c0_185 = arith.constant 0 : index
    %157 = vector.load %arg4[%c0_182, %c0_183, %c22_184, %c0_185] : memref<1x1x110x4xbf16, #tpu.memory_space<vmem>>, vector<1x1x80x4xbf16>
    %158 = vector.shape_cast %157 : vector<1x1x80x4xbf16> to vector<80x4xbf16>
    %c26 = arith.constant 26 : index
    %c0_186 = arith.constant 0 : index
    %c0_187 = arith.constant 0 : index
    %159 = vector.load %arg5[%c26, %c0_186, %c0_187] : memref<27x4x4xbf16, #tpu.memory_space<vmem>>, vector<1x4x4xbf16>
    %160 = vector.shape_cast %159 : vector<1x4x4xbf16> to vector<4x4xbf16>
    %cst_188 = arith.constant dense<0.000000e+00> : vector<80x4xf32>
    %161 = tpu.matmul %158, %160, %cst_188 {dimension_numbers = #tpu.dot_dimension_numbers<[1], [0], [0], [1], [0, 0, 1, 1], [], []>} : vector<80x4xbf16>, vector<4x4xbf16>, vector<80x4xf32> -> vector<80x4xf32>
    %162 = arith.addf %156, %161 : vector<80x4xf32>
    %c0_189 = arith.constant 0 : index
    %c0_190 = arith.constant 0 : index
    %163 = vector.load %arg6[%c0_189, %c0_190] : memref<1x4xf32, #tpu.memory_space<vmem>>, vector<1x4xf32>
    %164 = vector.broadcast %163 : vector<1x4xf32> to vector<80x4xf32>
    %165 = arith.addf %162, %164 : vector<80x4xf32>
    %cst_191 = arith.constant 0.000000e+00 : f32
    %166 = vector.broadcast %cst_191 : f32 to vector<80x4xf32>
    %167 = arith.maximumf %165, %166 : vector<80x4xf32>
    %168 = vector.shape_cast %167 : vector<80x4xf32> to vector<1x1x80x4xf32>
    %c0_192 = arith.constant 0 : index
    %c0_193 = arith.constant 0 : index
    %c0_194 = arith.constant 0 : index
    %c0_195 = arith.constant 0 : index
    %169 = vector.load %arg7[%c0_192, %c0_193, %c0_194, %c0_195] : memref<1x1x80x4xf32, #tpu.memory_space<vmem>>, vector<1x1x80x4xf32>
    tpu.vector_store %arg7[%c0_192, %c0_193, %c0_194, %c0_195], %168 {strides = array<i32>} : memref<1x1x80x4xf32, #tpu.memory_space<vmem>>, vector<1x1x80x4xf32>,
    %170 = tpu.iota {dimensions = array<i32: 0>} : vector<80x1xi32>
    %c10_i32 = arith.constant 10 : i32
    %c0_i32 = arith.constant 0 : i32
    %171 = arith.cmpi eq, %c10_i32, %c0_i32 : i32
    %c1_i32 = arith.constant 1 : i32
    %172 = arith.select %171, %c1_i32, %c10_i32 : i32
    %173 = vector.broadcast %172 : i32 to vector<80x1xi32>
    %174 = arith.remsi %170, %173 : vector<80x1xi32>
    %c0_i32_196 = arith.constant 0 : i32
    %175 = vector.broadcast %c0_i32_196 : i32 to vector<80x1xi32>
    %176 = arith.cmpi ne, %174, %175 : vector<80x1xi32>
    %c0_i32_197 = arith.constant 0 : i32
    %177 = vector.broadcast %c0_i32_197 : i32 to vector<80x1xi32>
    %178 = arith.cmpi slt, %174, %177 : vector<80x1xi32>
    %c0_i32_198 = arith.constant 0 : i32
    %179 = arith.cmpi slt, %172, %c0_i32_198 : i32
    %180 = vector.broadcast %179 : i1 to vector<80x1xi1>
    %181 = vector.broadcast %180 : vector<80x1xi1> to vector<80x1xi1>
    %182 = arith.xori %178, %181 : vector<80x1xi1>
    %183 = arith.andi %182, %176 : vector<80x1xi1>
    %184 = vector.broadcast %172 : i32 to vector<80x1xi32>
    %185 = arith.addi %174, %184 : vector<80x1xi32>
    %186 = arith.select %183, %185, %174 : vector<80x1xi1>, vector<80x1xi32>
    %c8_i32 = arith.constant 8 : i32
    %187 = vector.broadcast %c8_i32 : i32 to vector<80x1xi32>
    %188 = arith.cmpi slt, %186, %187 : vector<80x1xi32>
    %cst_199 = arith.constant 0.000000e+00 : f32
    %189 = vector.shape_cast %188 : vector<80x1xi1> to vector<80x1xi1>
    %190 = vector.broadcast %189 : vector<80x1xi1> to vector<80x4xi1>
    %191 = vector.broadcast %cst_199 : f32 to vector<80x4xf32>
    %192 = arith.select %190, %167, %191 : vector<80x4xi1>, vector<80x4xf32>
    %cst_200 = arith.constant dense<0.000000e+00> : vector<4xf32>
    %193 = vector.multi_reduction <add>, %192, %cst_200 [0] : vector<80x4xf32> to vector<4xf32>
    %194 = vector.shape_cast %193 : vector<4xf32> to vector<1x4xf32>
    %cst_201 = arith.constant 6.400000e+01 : f32
    %195 = vector.broadcast %cst_201 : f32 to vector<1x4xf32>
    %196 = arith.divf %194, %195 : vector<1x4xf32>
    %197 = vector.broadcast %196 : vector<1x4xf32> to vector<80x4xf32>
    %198 = arith.subf %167, %197 : vector<80x4xf32>
    %199 = arith.mulf %198, %198 : vector<80x4xf32>
    %cst_202 = arith.constant 0.000000e+00 : f32
    %200 = vector.shape_cast %188 : vector<80x1xi1> to vector<80x1xi1>
    %201 = vector.broadcast %200 : vector<80x1xi1> to vector<80x4xi1>
    %202 = vector.broadcast %cst_202 : f32 to vector<80x4xf32>
    %203 = arith.select %201, %199, %202 : vector<80x4xi1>, vector<80x4xf32>
    %cst_203 = arith.constant dense<0.000000e+00> : vector<4xf32>
    %204 = vector.multi_reduction <add>, %203, %cst_203 [0] : vector<80x4xf32> to vector<4xf32>
    %205 = vector.shape_cast %204 : vector<4xf32> to vector<1x4xf32>
    %206 = vector.shape_cast %194 : vector<1x4xf32> to vector<1x1x1x4xf32>
    %c0_204 = arith.constant 0 : index
    %c0_205 = arith.constant 0 : index
    %c0_206 = arith.constant 0 : index
    %c0_207 = arith.constant 0 : index
    %207 = vector.load %arg8[%c0_204, %c0_205, %c0_206, %c0_207] : memref<1x1x1x4xf32, #tpu.memory_space<vmem>>, vector<1x1x1x4xf32>
    tpu.vector_store %arg8[%c0_204, %c0_205, %c0_206, %c0_207], %206 {strides = array<i32>} : memref<1x1x1x4xf32, #tpu.memory_space<vmem>>, vector<1x1x1x4xf32>,
    %208 = vector.shape_cast %205 : vector<1x4xf32> to vector<1x1x1x4xf32>
    %c0_208 = arith.constant 0 : index
    %c0_209 = arith.constant 0 : index
    %c0_210 = arith.constant 0 : index
    %c0_211 = arith.constant 0 : index
    %209 = vector.load %arg9[%c0_208, %c0_209, %c0_210, %c0_211] : memref<1x1x1x4xf32, #tpu.memory_space<vmem>>, vector<1x1x1x4xf32>
    tpu.vector_store %arg9[%c0_208, %c0_209, %c0_210, %c0_211], %208 {strides = array<i32>} : memref<1x1x1x4xf32, #tpu.memory_space<vmem>>, vector<1x1x1x4xf32>,
    return
  }
  func.func @transform_0(%arg0: i32, %arg1: i32) -> (i32, i32, i32, i32) {
    %c0_i32 = arith.constant 0 : i32
    %c0_i32_0 = arith.constant 0 : i32
    %c0_i32_1 = arith.constant 0 : i32
    return %arg0, %arg1, %c0_i32, %c0_i32_0 : i32, i32, i32, i32
  }
  func.func @transform_1(%arg0: i32, %arg1: i32) -> (i32, i32, i32, i32) {
    %c1_i32 = arith.constant 1 : i32
    %0 = arith.addi %arg1, %c1_i32 : i32
    %c0_i32 = arith.constant 0 : i32
    %c0_i32_0 = arith.constant 0 : i32
    %c0_i32_1 = arith.constant 0 : i32
    return %arg0, %0, %c0_i32, %c0_i32_0 : i32, i32, i32, i32
  }
  func.func @transform_2(%arg0: i32, %arg1: i32) -> (i32, i32, i32, i32) {
    %c2_i32 = arith.constant 2 : i32
    %0 = arith.addi %arg1, %c2_i32 : i32
    %c0_i32 = arith.constant 0 : i32
    %c0_i32_0 = arith.constant 0 : i32
    %c0_i32_1 = arith.constant 0 : i32
    return %arg0, %0, %c0_i32, %c0_i32_0 : i32, i32, i32, i32
  }
  func.func @transform_3(%arg0: i32, %arg1: i32) -> (i32, i32, i32) {
    %c0_i32 = arith.constant 0 : i32
    %c0_i32_0 = arith.constant 0 : i32
    %c0_i32_1 = arith.constant 0 : i32
    %c0_i32_2 = arith.constant 0 : i32
    return %c0_i32, %c0_i32_0, %c0_i32_1 : i32, i32, i32
  }
  func.func @transform_4(%arg0: i32, %arg1: i32) -> (i32, i32) {
    %c0_i32 = arith.constant 0 : i32
    %c0_i32_0 = arith.constant 0 : i32
    %c0_i32_1 = arith.constant 0 : i32
    return %c0_i32, %c0_i32_0 : i32, i32
  }
  func.func @transform_5(%arg0: i32, %arg1: i32) -> (i32, i32, i32, i32) {
    %c0_i32 = arith.constant 0 : i32
    %c0_i32_0 = arith.constant 0 : i32
    %c0_i32_1 = arith.constant 0 : i32
    return %arg0, %arg1, %c0_i32, %c0_i32_0 : i32, i32, i32, i32
  }
  func.func @transform_6(%arg0: i32, %arg1: i32) -> (i32, i32, i32, i32) {
    %c0_i32 = arith.constant 0 : i32
    %c0_i32_0 = arith.constant 0 : i32
    %c0_i32_1 = arith.constant 0 : i32
    return %arg0, %arg1, %c0_i32, %c0_i32_0 : i32, i32, i32, i32
  }
  func.func @transform_7(%arg0: i32, %arg1: i32) -> (i32, i32, i32, i32) {
    %c0_i32 = arith.constant 0 : i32
    %c0_i32_0 = arith.constant 0 : i32
    %c0_i32_1 = arith.constant 0 : i32
    return %arg0, %arg1, %c0_i32, %c0_i32_0 : i32, i32, i32, i32
  }
}

module attributes {stable_mosaic.version = 11 : i64} {
  func.func @_bn_residual_kernel(%arg0: i32, %arg1: memref<32x128xf32, #tpu.memory_space<vmem>>, %arg2: memref<32x128xf32, #tpu.memory_space<vmem>>, %arg3: memref<1x128xf32, #tpu.memory_space<vmem>>, %arg4: memref<1x128xf32, #tpu.memory_space<vmem>>, %arg5: memref<32x128xf32, #tpu.memory_space<vmem>>) attributes {dimension_semantics = [#tpu.dimension_semantics<parallel>], iteration_bounds = array<i64: 1>, scalar_prefetch = 0 : i64, scratch_operands = 0 : i64, tpu.core_type = #tpu.core_type<tc>, window_params = [{transform_indices = @transform_0, window_bounds = array<i64: 32, 128>}, {transform_indices = @transform_1, window_bounds = array<i64: 32, 128>}, {pipeline_mode = #tpu.pipeline_mode<synchronous>, transform_indices = @transform_2, window_bounds = array<i64: 1, 128>}, {pipeline_mode = #tpu.pipeline_mode<synchronous>, transform_indices = @transform_3, window_bounds = array<i64: 1, 128>}, {transform_indices = @transform_4, window_bounds = array<i64: 32, 128>}]} {
    %c0 = arith.constant 0 : index
    %c0_0 = arith.constant 0 : index
    %0 = vector.load %arg1[%c0, %c0_0] : memref<32x128xf32, #tpu.memory_space<vmem>>, vector<32x128xf32>
    %c0_1 = arith.constant 0 : index
    %c0_2 = arith.constant 0 : index
    %1 = vector.load %arg3[%c0_1, %c0_2] : memref<1x128xf32, #tpu.memory_space<vmem>>, vector<1x128xf32>
    %2 = vector.broadcast %1 : vector<1x128xf32> to vector<32x128xf32>
    %3 = arith.mulf %0, %2 : vector<32x128xf32>
    %c0_3 = arith.constant 0 : index
    %c0_4 = arith.constant 0 : index
    %4 = vector.load %arg4[%c0_3, %c0_4] : memref<1x128xf32, #tpu.memory_space<vmem>>, vector<1x128xf32>
    %5 = vector.broadcast %4 : vector<1x128xf32> to vector<32x128xf32>
    %6 = arith.addf %3, %5 : vector<32x128xf32>
    %c0_5 = arith.constant 0 : index
    %c0_6 = arith.constant 0 : index
    %7 = vector.load %arg2[%c0_5, %c0_6] : memref<32x128xf32, #tpu.memory_space<vmem>>, vector<32x128xf32>
    %8 = arith.addf %6, %7 : vector<32x128xf32>
    %c0_7 = arith.constant 0 : index
    %c0_8 = arith.constant 0 : index
    %9 = vector.load %arg5[%c0_7, %c0_8] : memref<32x128xf32, #tpu.memory_space<vmem>>, vector<32x128xf32>
    tpu.vector_store %arg5[%c0_7, %c0_8], %8 {strides = array<i32>} : memref<32x128xf32, #tpu.memory_space<vmem>>, vector<32x128xf32>,
    return
  }
  func.func @transform_0(%arg0: i32) -> (i32, i32) {
    %c0_i32 = arith.constant 0 : i32
    %c0_i32_0 = arith.constant 0 : i32
    return %arg0, %c0_i32 : i32, i32
  }
  func.func @transform_1(%arg0: i32) -> (i32, i32) {
    %c0_i32 = arith.constant 0 : i32
    %c0_i32_0 = arith.constant 0 : i32
    return %arg0, %c0_i32 : i32, i32
  }
  func.func @transform_2(%arg0: i32) -> (i32, i32) {
    %c0_i32 = arith.constant 0 : i32
    %c0_i32_0 = arith.constant 0 : i32
    %c0_i32_1 = arith.constant 0 : i32
    return %c0_i32, %c0_i32_0 : i32, i32
  }
  func.func @transform_3(%arg0: i32) -> (i32, i32) {
    %c0_i32 = arith.constant 0 : i32
    %c0_i32_0 = arith.constant 0 : i32
    %c0_i32_1 = arith.constant 0 : i32
    return %c0_i32, %c0_i32_0 : i32, i32
  }
  func.func @transform_4(%arg0: i32) -> (i32, i32) {
    %c0_i32 = arith.constant 0 : i32
    %c0_i32_0 = arith.constant 0 : i32
    return %arg0, %c0_i32 : i32, i32
  }
}

</mosaic_0001>

<bundles_post_ra>
// kernel: residual_layer.4
= control target key start
LH: loop header
LB: loop body
LE: loop exit
PB: predicated region body
PF: predicated region fallthrough
CT: control target
= control target key end

     0   :  { %s6148_s24 = smov 0   ;;  %s6150_s25 = smov 0   ;;  %s7945_s0 = inlined_call_operand.vmem [shape: bf16[2,10,110,4], index: 0, kind: input, shape index: {}, may-alias: {0,1,2}]   ;;  %s7946_s1 = inlined_call_operand.vmem [shape: bf16[2,10,110,4], index: 1, kind: input, shape index: {}, may-alias: {0,1,2}]   ;;  %s7947_s2 = inlined_call_operand.vmem [shape: bf16[2,10,110,4], index: 2, kind: input, shape index: {}, may-alias: {0,1,2}]   ;;  %s7948_s3 = inlined_call_operand.vmem [shape: bf16[27,4,4], index: 3, kind: input, shape index: {}]   ;;  %s7949_s4 = inlined_call_operand.vmem [shape: f32[1,4], index: 4, kind: input, shape index: {}]   ;;  %s7950_s5 = inlined_call_operand.vmem [shape: bf16[2,8,80,4], index: 5, kind: output, shape index: {0}]   ;;  %s7951_s6 = inlined_call_operand.vmem [shape: f32[2,8,1,4], index: 6, kind: output, shape index: {1}]   ;;  %s7952_s7 = inlined_call_operand.vmem [shape: f32[2,8,1,4], index: 7, kind: output, shape index: {2}]  }
   0x1   :  { %s6152_s26 = smov 0   ;;  %s6154_s27 = smov 0  }
   0x2   :  { %s6156_s28 = smov 0  }
   0x3 LB: > { %s27_s29 = sadd.s32 1, %s6096_s26  ;;  %s30_s30 = sadd.s32 1, %s6100_s27  ;;  %s6104_s28 = sphi %s6156_s28, %s18_s28   ;;  %s6100_s27 = sphi %s6154_s27, %s7997_s27   ;;  %s6096_s26 = sphi %s6152_s26, %s7996_s26   ;;  %s6092_s25 = sphi %s6150_s25, %s7995_s25   ;;  %s6088_s24 = sphi %s6148_s24, %s7994_s24  }
   0x4   : > { %p28_p0 = scmp.ge.s32.totalorder %s27_s29, 8  ;;  %p4891_p1 = scmp.ge.s32.totalorder %s6104_s28, 1 }
   0x5   : > { %p306_p2 = scmp.lt.s32.totalorder %s6104_s28, 17 }
   0x6   : > { %s7999_s29 = smov (%p28_p0, %s27_s29), 0  ;;  %s8001_s30 = smov (!%p28_p0, %s30_s30), %s6100_s27 }
   0x7   : > { %p307_p3 = pnand %p4891_p1, %p306_p2  ;;  %p32_p4 = scmp.ge.s32.totalorder %s8001_s30, 2 }
   0x8   : > { %v4898_v0 = vld [vmem:[%s7948_s3 + $0x2] sm:$0x3] (!%p307_p3)  ;;  %vm538_vm0 = vcmask (!%p307_p3), 1041408   ;;  %p380_p5 = scmp.lt.s32.totalorder (!%p307_p3), %s6092_s25, 1  ;;  %v6106_v1 = vmov (!%p307_p3), 0.0   ;;  %p382_p6 = scmp.lt.s32.totalorder (!%p307_p3), %s6088_s24, 9 }
   0x9   : > { %s8003_s30 = smov (%p32_p4, %s8001_s30), 0  ;;  %310 = sbr.rel (%p307_p3) target bundleno = 845 (0x34d), region = 40 }
   0xa   : > { %5323 = vmatprep.subr.bf16.mxu0 (!%p307_p3), %v6106_v1  ;;  %5917 = vmatprep.subr.bf16.mxu1 (!%p307_p3), %v6106_v1  ;;  %v540_v2 = vsel (!%p307_p3), %vm538_vm0, %v4898_v0, 0  ;;  %vm6107_vm1 = vmmov (!%p307_p3), 0   ;;  %vm477_vm2 = vsmask.f32 (!%p307_p3), 7424  ;;  %s389_s18 = sadd.s32 (!%p307_p3), 1, %s6088_s24  ;;  %vm522_vm3 = vcmask (!%p307_p3), 31744  }
   0xb   : > { %5324 = vmatpush3.bf16.msra.mxu0 (!%p307_p3), %v540_v2  ;;  %5918 = vmatpush3.bf16.msra.mxu1 (!%p307_p3), %v540_v2  ;;  %v4915_v17 = vld [vmem:[%s7948_s3 + $0x4] sm:$0x3] (!%p307_p3)  ;;  %v445_v19 = vld [vmem:[%s7948_s3] sm:$0x3] (!%p307_p3)  ;;  %p6248_p7 = scmp.lt.s32.totalorder (!%p307_p3), %s389_s18, 9  ;;  %vm707_vm4 = vcmask (!%p307_p3), 1046528  }
   0xc   : > { %5325 = vmatprep.mubr.msk.bf16.mxu0 (!%p307_p3), %vm6107_vm1, %v6106_v1  ;;  %5337 = vmatprep.mubr.msk.bf16.mxu1 (!%p307_p3), %vm6107_vm1, %v6106_v1  ;;  %v735_v26 = vsel (!%p307_p3), %vm538_vm0, %v4915_v17, 0  ;;  %v626_v31 = vsel (!%p307_p3), %vm538_vm0, %v445_v19, 0  ;;  %v4922_v43 = vld [vmem:[%s7948_s3 + $0x6] sm:$0x3] (!%p307_p3)  ;;  %v4934_v48 = vld [vmem:[%s7948_s3 + $0x8] sm:$0x3] (!%p307_p3) }
   0xd   : > { %5367 = vmatprep.subr.bf16.mxu0 (!%p307_p3), %v6106_v1  ;;  %5345 = vmatprep.subr.bf16.mxu1 (!%p307_p3), %v6106_v1  ;;  %v888_v45 = vsel (!%p307_p3), %vm538_vm0, %v4922_v43, 0  ;;  %v1049_v50 = vsel (!%p307_p3), %vm538_vm0, %v4934_v48, 0  ;;  %vm979_vm5 = vsmask.f32 (!%p307_p3), 6400  ;;  %v4948_v19 = vld [vmem:[%s7948_s3 + $0xc] sm:$0x3] (!%p307_p3) }
   0xe   : > { %vm1140_vm6 = vcmask (!%p307_p3), 1045504   ;;  %vm1412_vm7 = vsmask.f32 (!%p307_p3), 5376  ;;  %vm1573_vm8 = vcmask (!%p307_p3), 1044480   ;;  %p413_p9 = scmp.lt.s32.totalorder (!%p307_p3), %s6088_s24, 7 }
  0x10   : > { %s8005_s25 = smov (!%p380_p5, %s6092_s25), 1  ;;  %s8007_s18 = smov (!%p6248_p7, %s389_s18), 9 }
  0x11   : > { %s383_s10 = scalar_select %p382_p6, %s6088_s24, 9 }
  0x12   : > { %s6196_s11 = smul.u32 140, %s8005_s25 }
  0x13   : > { %s5919_s12 = smul.u32 14, %s383_s10 }
  0x14   : > { %s5921_s8 = smul.u32 14, %s8007_s18 }
  0x15   : > { %s386_s13 = sadd.s32 %s6196_s11, %s5919_s12 }
  0x16   : > { %s4892_s14 = sshll.u32 %s386_s13, 2  ;;  %s396_s9 = sadd.s32 %s5921_s8, %s6196_s11 }
  0x17   : > { %s6203_s17 = scalar_lea.vmem %s7945_s0, %s4892_s14  ;;  %s4893_s13 = sshll.u32 %s396_s9, 2 }
  0x18   : > { %v435_v3 = vld [vmem:[%s6203_s17] sm:$0xf]  ;;  %v6207_v4 = vld [vmem:[%s6203_s17 + $0x4] sm:$0xf]  ;;  %v6213_v6 = vld [vmem:[%s6203_s17 + $0x8] sm:$0xff]   ;;  %s400_s14 = sadd.s32 2, %s6088_s24  ;;  %s6291_s18 = scalar_lea.vmem %s7946_s1, %s4893_s13 }
  0x19   : > { %v6210_v5 = vcombine.low %v435_v3, %v6207_v4  ;;  %v486_v9 = vshll.u32 %v6213_v6, 16  ;;  %v6219_v10 = vld [vmem:[%s6203_s17 + $0x18] sm:$0xff]   ;;  %v6222_v11 = vld [vmem:[%s6203_s17 + $0x20] sm:$0xff]   ;;  %v6226_v12 = vld [vmem:[%s6203_s17 + $0x10] sm:$0xff]   ;;  %v490_v22 = vshrl.u32 %v6213_v6, 16  ;;  %v709_v47 = vrot.slane %v6213_v6, 1 }
  0x1a   : > { %v502_v15 = vshll.u32 %v6219_v10, 16  ;;  %v506_v16 = vshrl.u32 %v6219_v10, 16  ;;  %v510_v18 = vshll.u32 %v6222_v11, 16  ;;  %v494_v23 = vshll.u32 %v6226_v12, 16  ;;  %v701_v41 = vld [vmem:[%s6203_s17] sm:$0xe] }
  0x1b   : > { %v479_v7 = vshrl.u32 %v6210_v5, 16  ;;  %v481_v8 = vshll.u32 %v6210_v5, 16  ;;  %v488_v14 = vrot.slane %v486_v9, 1  ;;  %v6240_v24 = vld [vmem:[%s6203_s17 + $0x28] ss:$0 sps:$4 sm:$0x11]   ;;  %v4916_v44 = vcombine.low %v701_v41, %v6207_v4 }
  0x1c   : > { %v504_v21 = vrot.slane %v502_v15, 1  ;;  %v512_v25 = vrot.slane %v510_v18, 1  ;;  %v514_v29 = vshrl.u32 %v6222_v11, 16  ;;  %v518_v30 = vshll.u32 %v6240_v24, 16  ;;  %p403_p8 = scmp.lt.s32.totalorder %s400_s14, 9  ;;  %v6335_v58 = vld [vmem:[%s6203_s17 + $0xc] sm:$0xff]  }
  0x1d   : > { %v483_v13 = vrot.slane %v481_v8, 1  ;;  %v492_v33 = vor.u32 %v490_v22, %v488_v14  ;;  %v496_v34 = vrot.slane %v494_v23, 1  ;;  %v498_v38 = vshrl.u32 %v6226_v12, 16  ;;  %v820_v54 = vld [vmem:[%s6203_s17 + $0x4] sm:$0xe]  ;;  %s8011_s24 = smov (!%p413_p9, %s6088_s24), 7 }
  0x1e   : > { %v508_v28 = vor.u32 %v506_v16, %v504_v21  ;;  %v516_v35 = vor.u32 %v514_v29, %v512_v25  ;;  %v520_v36 = vrot.slane %v518_v30, 1  ;;  %v708_v46 = vrot.slane %v4916_v44, 1  ;;  %s8009_s14 = smov (!%p403_p8, %s400_s14), 9  ;;  %v6325_v56 = vld [vmem:[%s6203_s17 + $0x8] sm:$0xf]  ;;  %s5923_s10 = smul.u32 10, %s8011_s24 }
  0x1f   : > { %v484_v20 = vor.u32 %v483_v13, %v479_v7  ;;  %v497_v37 = vsel %vm477_vm2, %v492_v33, %v496_v34  ;;  %v500_v40 = vor.u32 %v498_v38, %v496_v34  ;;  %v711_v51 = vrot.slane %v6226_v12, 1  ;;  %s5922_s21 = smul.u32 14, %s8009_s14  ;;  %v6397_v34 = vld [vmem:[%s6203_s17 + $0x24] sm:$0xff]   ;;  %v5999_v44 = vld [vmem:[%s6203_s17 + $0x2c] ss:$0 sps:$4 sm:$0x11]  }
  0x20   : > { %v513_v32 = vsel %vm477_vm2, %v508_v28, %v512_v25  ;;  %v521_v39 = vsel %vm477_vm2, %v516_v35, %v520_v36  ;;  %v710_v49 = vsel %vm707_vm4, %v708_v46, %v709_v47  ;;  %v713_v53 = vrot.slane %v6219_v10, 1  ;;  %v6382_v25 = vld [vmem:[%s6203_s17 + $0x1c] sm:$0xff]  }
  0x21   : > { %v489_v27 = vsel %vm477_vm2, %v484_v20, %v488_v14  ;;  %5338 = vmatmul.mubr.msk.bf16.vlgmr.msra.gmra.mrb[0].mxu1 %vm522_vm3, %v513_v32  ;;  %v505_v42 = vsel %vm477_vm2, %v500_v40, %v504_v21  ;;  %v712_v52 = vsel %vm707_vm4, %v709_v47, %v711_v51  ;;  %s407_s22 = sadd.s32 %s5922_s21, %s6196_s11  ;;  %v715_v57 = vrot.slane %v6222_v11, 1  ;;  %s4896_s21 = sshll.u32 %s8005_s25, 3 }
  0x22   : > { %5326 = vmatmul.mubr.msk.bf16.vlgmr.msra.gmra.mrb[0].mxu0 %vm522_vm3, %v489_v27  ;;  %5346 = vmatpush3.bf16.msra.mxu1 %v626_v31  ;;  %s4894_s23 = sshll.u32 %s407_s22, 2  ;;  %v714_v55 = vsel %vm707_vm4, %v711_v51, %v713_v53  ;;  %v4923_v59 = vcombine.low %v820_v54, %v6325_v56  ;;  %v989_v61 = vshrl.u32 %v6335_v58, 16  ;;  %v992_v0 = vshll.u32 %v6335_v58, 16  ;;  %s7882_s22 = sadd.s32 %s4896_s21, %s8011_s24 }
  0x23   : > { %5368 = vmatpush3.bf16.msra.mxu0 %v735_v26  ;;  %5329 = vmatprep.mubr.msk.bf16.mxu0 %vm6107_vm1, %v6106_v1  ;;  %s6330_s9 = scalar_lea.vmem %s7947_s2, %s4894_s23  ;;  %v716_v62 = vsel %vm707_vm4, %v713_v53, %v715_v57  ;;  %v717_v2 = vrot.slane %v6240_v24, 1  ;;  %v862_v4 = vrot.slane %v6335_v58, 1  ;;  %v1321_v23 = vsel %vm538_vm0, %v4948_v19, 0  ;;  %v6489_v19 = vld [vmem:[%s6203_s17 + $0x28] sm:$0xff]   ;;  %s433_s8 = scalar_lea.vmem %s7952_s7, %s7882_s22 }
  0x24   : > { %5411 = vmatprep.subr.bf16.mxu0 %v6106_v1  ;;  %5341 = vmatprep.mubr.msk.bf16.mxu1 %vm6107_vm1, %v6106_v1  ;;  %v981_v60 = vshrl.u32 %v4923_v59, 16  ;;  %v984_v63 = vshll.u32 %v4923_v59, 16  ;;  %v861_v3 = vrot.slane %v4923_v59, 1  ;;  %v991_v7 = vrot.slane %v989_v61, 1  ;;  %v6432_v59 = vld [vmem:[%s6203_s17 + $0xc] sm:$0xf] }
  0x25   : > { %5389 = vmatprep.subr.bf16.mxu1 %v6106_v1  ;;  %v994_v9 = vrot.slane %v992_v0, 2  ;;  %v1007_v27 = vshrl.u32 %v6382_v25, 16  ;;  %v1010_v28 = vshll.u32 %v6382_v25, 16  ;;  %v866_v29 = vrot.slane %v6382_v25, 1  ;;  %v6443_v0 = vld [vmem:[%s6203_s17 + $0x10] sm:$0xff]  }
  0x26   : > { %v986_v8 = vrot.slane %v984_v63, 2  ;;  %v1016_v36 = vshrl.u32 %v6397_v34, 16  ;;  %v868_v38 = vrot.slane %v6397_v34, 1  ;;  %v870_v48 = vrot.slane %v5999_v44, 1 }
  0x27   : > { %v995_v15 = vor.u32 %v994_v9, %v991_v7  ;;  %v1009_v31 = vrot.slane %v1007_v27, 1  ;;  %v1012_v32 = vrot.slane %v1010_v28, 2  ;;  %v1142_v61 = vrot.slane %v6335_v58, 2  ;;  %v6007_v28 = vld [vmem:[%s6203_s17 + $0x30] ss:$0 sps:$4 sm:$0x33]  }
  0x28   : > { %v1018_v40 = vrot.slane %v1016_v36, 1  ;;  %v869_v43 = vsel %vm707_vm4, %v866_v29, %v868_v38  ;;  %v871_v53 = vsel %vm707_vm4, %v868_v38, %v870_v48  ;;  %v1575_v48 = vrot.slane %v6443_v0, 3 }
  0x29   : > { %5342 = vmatmul.mubr.msk.bf16.gmra.mrb[4].mxu1 %vm522_vm3, %v521_v39  ;;  %v1013_v35 = vor.u32 %v1012_v32, %v1009_v31 }
  0x2a   : > { %5330 = vmatmul.mubr.msk.bf16.gmra.mrb[4].mxu0 %vm522_vm3, %v497_v37  ;;  %5347 = vmatprep.mubr.msk.bf16.mxu1 %vm6107_vm1, %v6106_v1  ;;  %v1019_v37 = vshll.u32 %v6397_v34, 16 }
  0x2b   : > { %5333 = vmatprep.mubr.msk.bf16.mxu0 %vm6107_vm1, %v6106_v1 }
  0x2c   : > { %v1021_v41 = vrot.slane %v1019_v37, 2 }
  0x31   : > { %5348 = vmatmul.mubr.msk.bf16.vlgmr.msra.gmra.mrb[8].mxu1 %vm522_vm3, %v6210_v5  ;;  %v4941_v5 = vld [vmem:[%s7948_s3 + $0xa] sm:$0x3] }
  0x32   : > { %5334 = vmatmul.mubr.msk.bf16.gmra.mrb[8].mxu0 %vm522_vm3, %v505_v42  ;;  %5390 = vmatpush3.bf16.msra.mxu1 %v888_v45  ;;  %v1168_v13 = vsel %vm538_vm0, %v4941_v5, 0  ;;  %v6410_v42 = vld [vmem:[%s6203_s17 + $0x2c] ss:$0 sps:$4 sm:$0x33]   ;;  %v1022_v45 = vor.u32 %v1021_v41, %v1018_v40  ;;  %v4974_v41 = vld [vmem:[%s7948_s3 + $0x12] sm:$0x3] }
  0x33   : > { %5369 = vmatprep.mubr.msk.bf16.mxu0 %vm6107_vm1, %v6106_v1  ;;  %5351 = vmatprep.mubr.msk.bf16.mxu1 %vm6107_vm1, %v6106_v1  ;;  %v1025_v46 = vshrl.u32 %v6410_v42, 16  ;;  %v1028_v47 = vshll.u32 %v6410_v42, 16 }
  0x34   : > { %5433 = vmatprep.subr.bf16.mxu1 %v6106_v1 }
  0x35   : > { %v1027_v51 = vrot.slane %v1025_v46, 1  ;;  %v1739_v46 = vsel %vm538_vm0, %v4974_v41, 0 }
  0x39   : > { %5352 = vmatmul.mubr.msk.bf16.gmra.mrb[12].mxu1 %vm522_vm3, %v6213_v6  ;;  %v983_v6 = vrot.slane %v981_v60, 1 }
  0x3a   : > { %5370 = vmatmul.mubr.msk.bf16.vlgmr.msra.gmra.mrb[12].mxu0 %vm522_vm3, %v710_v49  ;;  %5355 = vmatprep.mubr.msk.bf16.mxu1 %vm6107_vm1, %v6106_v1  ;;  %v1134_v49 = vld [vmem:[%s6203_s17 + $0x4] sm:$0xc] }
  0x3b   : > { %5412 = vmatpush3.bf16.msra.mxu0 %v1049_v50  ;;  %5373 = vmatprep.mubr.msk.bf16.mxu0 %vm6107_vm1, %v6106_v1  ;;  %v987_v14 = vor.u32 %v986_v8, %v983_v6  ;;  %v1023_v50 = vsel %vm979_vm5, %v1013_v35, %v1022_v45  ;;  %v4942_v54 = vcombine.low %v1134_v49, %v6325_v56  ;;  %v4967_v6 = vld [vmem:[%s7948_s3 + $0x10] sm:$0x3]  ;;  %v6461_v8 = vld [vmem:[%s6203_s17 + $0x18] sm:$0xff]  }
  0x3c   : > { %5455 = vmatprep.subr.bf16.mxu0 %v6106_v1  ;;  %v1601_v9 = vsel %vm538_vm0, %v4967_v6, 0  ;;  %v1431_v38 = vshrl.u32 %v6461_v8, 16 }
  0x3d   : > { %v996_v20 = vsel %vm979_vm5, %v987_v14, %v995_v15  ;;  %v1141_v60 = vrot.slane %v4942_v54, 2  ;;  %v6476_v14 = vld [vmem:[%s6203_s17 + $0x20] sm:$0xff]  }
  0x3e   : > { %v1433_v44 = vrot.slane %v1431_v38, 2 }
  0x41   : > { %5356 = vmatmul.mubr.msk.bf16.gmra.mrb[16].mxu1 %vm522_vm3, %v6226_v12  ;;  %v6361_v12 = vld [vmem:[%s6203_s17 + $0x14] sm:$0xff]  }
  0x42   : > { %5374 = vmatmul.mubr.msk.bf16.gmra.mrb[16].mxu0 %vm522_vm3, %v712_v52  ;;  %5359 = vmatprep.mubr.msk.bf16.mxu1 %vm6107_vm1, %v6106_v1  ;;  %v998_v16 = vshrl.u32 %v6361_v12, 16  ;;  %v1001_v17 = vshll.u32 %v6361_v12, 16  ;;  %v864_v18 = vrot.slane %v6361_v12, 1  ;;  %v1030_v52 = vrot.slane %v1028_v47, 2 }
  0x43   : > { %5377 = vmatprep.mubr.msk.bf16.mxu0 %vm6107_vm1, %v6106_v1  ;;  %v1144_v5 = vrot.slane %v6361_v12, 2  ;;  %v1297_v12 = vrot.slane %v6461_v8, 2 }
  0x44   : > { %v1000_v21 = vrot.slane %v998_v16, 1  ;;  %v1003_v22 = vrot.slane %v1001_v17, 2  ;;  %v865_v24 = vsel %vm707_vm4, %v862_v4, %v864_v18  ;;  %v867_v33 = vsel %vm707_vm4, %v864_v18, %v866_v29 }
  0x45   : > { %v1299_v16 = vrot.slane %v6476_v14, 2  ;;  %v1148_v17 = vrot.slane %v6397_v34, 2  ;;  %v1303_v34 = vrot.slane %v6007_v28, 2 }
  0x46   : > { %v1004_v26 = vor.u32 %v1003_v22, %v1000_v21  ;;  %v1301_v21 = vrot.slane %v6489_v19, 2  ;;  %v1150_v22 = vrot.slane %v6410_v42, 2 }
  0x47   : > { %v1300_v18 = vsel %vm1140_vm6, %v1297_v12, %v1299_v16 }
  0x48   : > { %v1005_v30 = vsel %vm979_vm5, %v995_v15, %v1004_v26  ;;  %v1014_v39 = vsel %vm979_vm5, %v1004_v26, %v1013_v35  ;;  %v1425_v26 = vshll.u32 %v6443_v0, 16  ;;  %v1302_v27 = vsel %vm1140_vm6, %v1299_v16, %v1301_v21  ;;  %v1567_v35 = vld [vmem:[%s6203_s17 + $0x8] sm:$0x8] }
  0x49   : > { %5360 = vmatmul.mubr.msk.bf16.gmra.mrb[20].mxu1 %vm522_vm3, %v6219_v10  ;;  %v718_v10 = vsel %vm707_vm4, %v715_v57, %v717_v2  ;;  %v1253_v57 = vld [vmem:[%s6203_s17 + $0x8] sm:$0xc]  ;;  %v1143_v2 = vsel %vm1140_vm6, %v1141_v60, %v1142_v61  ;;  %v1151_v29 = vsel %vm1140_vm6, %v1148_v17, %v1150_v22  ;;  %v1304_v40 = vsel %vm1140_vm6, %v1301_v21, %v1303_v34 }
  0x4a   : > { %5378 = vmatmul.mubr.msk.bf16.gmra.mrb[20].mxu0 %vm522_vm3, %v714_v55  ;;  %5363 = vmatprep.mubr.msk.bf16.mxu1 %vm6107_vm1, %v6106_v1  ;;  %v1031_v55 = vor.u32 %v1030_v52, %v1027_v51  ;;  %v4949_v63 = vcombine.low %v1253_v57, %v6432_v59  ;;  %v4968_v42 = vcombine.low %v1567_v35, %v6432_v59  ;;  %v1440_v51 = vshrl.u32 %v6476_v14, 16 }
  0x4b   : > { %5381 = vmatprep.mubr.msk.bf16.mxu0 %vm6107_vm1, %v6106_v1  ;;  %v1443_v52 = vshll.u32 %v6476_v14, 16  ;;  %v1577_v60 = vrot.slane %v6461_v8, 3 }
  0x4c   : > { %v1032_v56 = vsel %vm979_vm5, %v1022_v45, %v1031_v55  ;;  %v1294_v58 = vrot.slane %v4949_v63, 2  ;;  %v1574_v47 = vrot.slane %v4968_v42, 3  ;;  %v1442_v57 = vrot.slane %v1440_v51, 2  ;;  %v6016_v51 = vld [vmem:[%s6291_s18 + $0x18] sm:$0xff]  }
  0x4d   : > { %v1445_v59 = vrot.slane %v1443_v52, 3 }
  0x51   : > { %5364 = vmatmul.mubr.msk.bf16.gmra.mrb[24].mxu1 %vm522_vm3, %v6222_v11  ;;  %v863_v11 = vsel %vm707_vm4, %v861_v3, %v862_v4  ;;  %v1295_v4 = vrot.slane %v6443_v0, 2 }
  0x52   : > { %5382 = vmatmul.mubr.msk.bf16.gmra.mrb[24].mxu0 %vm522_vm3, %v716_v62  ;;  %5391 = vmatprep.mubr.msk.bf16.mxu1 %vm6107_vm1, %v6106_v1  ;;  %v4960_v62 = vld [vmem:[%s7948_s3 + $0xe] sm:$0x3] }
  0x53   : > { %5385 = vmatprep.mubr.msk.bf16.mxu0 %vm6107_vm1, %v6106_v1  ;;  %v1482_v3 = vsel %vm538_vm0, %v4960_v62, 0  ;;  %v1296_v7 = vsel %vm1140_vm6, %v1294_v58, %v1295_v4  ;;  %v1452_v62 = vshll.u32 %v6489_v19, 16  ;;  %v6009_v58 = vld [vmem:[%s6203_s17 + $0x30] ss:$0 sps:$4 sm:$0x77]   ;;  %s426_s17 = scalar_lea.vmem %s7951_s6, %s7882_s22 }
  0x54   : > { %v1458_v6 = vshrl.u32 %v6009_v58, 16 }
  0x59   : > { %5392 = vmatmul.mubr.msk.bf16.vlgmr.msra.gmra.mrb[28].mxu1 %vm522_vm3, %v863_v11  ;;  %v1146_v11 = vrot.slane %v6382_v25, 2  ;;  %v1422_v25 = vshrl.u32 %v6443_v0, 16 }
  0x5a   : > { %5386 = vmatmul.mubr.msk.bf16.gmra.mrb[28].mxu0 %vm522_vm3, %v718_v10  ;;  %5434 = vmatpush3.bf16.msra.mxu1 %v1168_v13  ;;  %v1145_v10 = vsel %vm1140_vm6, %v1142_v61, %v1144_v5  ;;  %v1298_v13 = vsel %vm1140_vm6, %v1295_v4, %v1297_v12  ;;  %v1446_v61 = vor.u32 %v1445_v59, %v1442_v57  ;;  %v1579_v4 = vrot.slane %v6476_v14, 3  ;;  %v6566_v14 = vld [vmem:[%s6291_s18 + $0x4] sm:$0xf] }
  0x5b   : > { %5413 = vmatprep.mubr.msk.bf16.mxu0 %vm6107_vm1, %v6106_v1  ;;  %5395 = vmatprep.mubr.msk.bf16.mxu1 %vm6107_vm1, %v6106_v1  ;;  %v1147_v15 = vsel %vm1140_vm6, %v1144_v5, %v1146_v11  ;;  %v1424_v32 = vrot.slane %v1422_v25, 2 }
  0x5c   : > { %5477 = vmatprep.subr.bf16.mxu1 %v6106_v1 }
  0x61   : > { %5396 = vmatmul.mubr.msk.bf16.gmra.mrb[32].mxu1 %vm522_vm3, %v865_v24  ;;  %v1417_v24 = vshll.u32 %v4949_v63, 16 }
  0x62   : > { %5414 = vmatmul.mubr.msk.bf16.vlgmr.msra.gmra.mrb[32].mxu0 %vm522_vm3, %v996_v20  ;;  %5399 = vmatprep.mubr.msk.bf16.mxu1 %vm6107_vm1, %v6106_v1  ;;  %v1149_v20 = vsel %vm1140_vm6, %v1146_v11, %v1148_v17  ;;  %v1581_v11 = vrot.slane %v6489_v19, 3 }
  0x63   : > { %5456 = vmatpush3.bf16.msra.mxu0 %v1321_v23  ;;  %5417 = vmatprep.mubr.msk.bf16.mxu0 %vm6107_vm1, %v6106_v1  ;;  %v1414_v23 = vshrl.u32 %v4949_v63, 16  ;;  %v1419_v31 = vrot.slane %v1417_v24, 3  ;;  %v1578_v63 = vsel %vm1573_vm8, %v1575_v48, %v1577_v60 }
  0x64   : > { %5499 = vmatprep.subr.bf16.mxu0 %v6106_v1  ;;  %v1582_v16 = vsel %vm1573_vm8, %v1579_v4, %v1581_v11 }
  0x69   : > { %5400 = vmatmul.mubr.msk.bf16.gmra.mrb[36].mxu1 %vm522_vm3, %v867_v33  ;;  %v1427_v33 = vrot.slane %v1425_v26, 3 }
  0x6a   : > { %5418 = vmatmul.mubr.msk.bf16.gmra.mrb[36].mxu0 %vm522_vm3, %v1005_v30  ;;  %5403 = vmatprep.mubr.msk.bf16.mxu1 %vm6107_vm1, %v6106_v1  ;;  %v1416_v30 = vrot.slane %v1414_v23, 2  ;;  %v4997_v23 = vld [vmem:[%s7948_s3 + $0x16] sm:$0x3] }
  0x6b   : > { %5421 = vmatprep.mubr.msk.bf16.mxu0 %vm6107_vm1, %v6106_v1  ;;  %v1428_v37 = vor.u32 %v1427_v33, %v1424_v32  ;;  %v2043_v28 = vsel %vm538_vm0, %v4997_v23, 0  ;;  %v5004_v32 = vld [vmem:[%s7948_s3 + $0x18] sm:$0x3] }
  0x6c   : > { %v1420_v36 = vor.u32 %v1419_v31, %v1416_v30  ;;  %v6593_v31 = vld [vmem:[%s6291_s18 + $0x10] sm:$0xff]  }
  0x6d   : > { %v1881_v35 = vshll.u32 %v6593_v31, 16  ;;  %v1885_v42 = vshrl.u32 %v6593_v31, 16 }
  0x71   : > { %5404 = vmatmul.mubr.msk.bf16.gmra.mrb[40].mxu1 %vm522_vm3, %v869_v43  ;;  %v1429_v43 = vsel %vm1412_vm7, %v1420_v36, %v1428_v37  ;;  %v6011_v36 = vld [vmem:[%s6291_s18 + $0x8] sm:$0xff]  }
  0x72   : > { %5422 = vmatmul.mubr.msk.bf16.gmra.mrb[40].mxu0 %vm522_vm3, %v1014_v39  ;;  %5407 = vmatprep.mubr.msk.bf16.mxu1 %vm6107_vm1, %v6106_v1  ;;  %v1434_v39 = vshll.u32 %v6461_v8, 16  ;;  %v1580_v8 = vsel %vm1573_vm8, %v1577_v60, %v1579_v4 }
  0x73   : > { %5425 = vmatprep.mubr.msk.bf16.mxu0 %vm6107_vm1, %v6106_v1 }
  0x74   : > { %v1436_v45 = vrot.slane %v1434_v39, 3  ;;  %v1883_v39 = vrot.slane %v1881_v35, 1 }
  0x76   : > { %v1437_v49 = vor.u32 %v1436_v45, %v1433_v44  ;;  %v6014_v44 = vld [vmem:[%s6291_s18 + $0x10] sm:$0xff]   ;;  %v1887_v45 = vor.u32 %v1885_v42, %v1883_v39  ;;  %v6710_v42 = vld [vmem:[%s6291_s18 + $0x1c] sm:$0xff]  }
  0x78   : > { %v1438_v55 = vsel %vm1412_vm7, %v1428_v37, %v1437_v49  ;;  %v1447_v0 = vsel %vm1412_vm7, %v1437_v49, %v1446_v61  ;;  %v2196_v37 = vsel %vm538_vm0, %v5004_v32, 0 }
  0x79   : > { %5408 = vmatmul.mubr.msk.bf16.gmra.mrb[44].mxu1 %vm522_vm3, %v871_v53  ;;  %v1576_v53 = vsel %vm1573_vm8, %v1574_v47, %v1575_v48  ;;  %v6625_v47 = vld [vmem:[%s6291_s18 + $0x20] sm:$0xff]  }
  0x7a   : > { %5426 = vmatmul.mubr.msk.bf16.gmra.mrb[44].mxu0 %vm522_vm3, %v1023_v50  ;;  %5435 = vmatprep.mubr.msk.bf16.mxu1 %vm6107_vm1, %v6106_v1  ;;  %v4985_v50 = vld [vmem:[%s7948_s3 + $0x14] sm:$0x3]  ;;  %v1901_v59 = vshrl.u32 %v6625_v47, 16 }
  0x7b   : > { %5429 = vmatprep.mubr.msk.bf16.mxu0 %vm6107_vm1, %v6106_v1  ;;  %v1925_v54 = vsel %vm538_vm0, %v4985_v50, 0  ;;  %v1897_v50 = vshll.u32 %v6625_v47, 16 }
  0x81   : > { %5436 = vmatmul.mubr.msk.bf16.vlgmr.msra.gmra.mrb[48].mxu1 %vm522_vm3, %v1143_v2 }
  0x82   : > { %5430 = vmatmul.mubr.msk.bf16.gmra.mrb[48].mxu0 %vm522_vm3, %v1032_v56  ;;  %5478 = vmatpush3.bf16.msra.mxu1 %v1482_v3  ;;  %v1449_v56 = vshrl.u32 %v6489_v19, 16  ;;  %v1454_v3 = vrot.slane %v1452_v62, 3  ;;  %v1583_v19 = vrot.slane %v6009_v58, 3 }
  0x83   : > { %5457 = vmatprep.mubr.msk.bf16.mxu0 %vm6107_vm1, %v6106_v1  ;;  %5439 = vmatprep.mubr.msk.bf16.mxu1 %vm6107_vm1, %v6106_v1 }
  0x84   : > { %5521 = vmatprep.subr.bf16.mxu1 %v6106_v1  ;;  %v1451_v2 = vrot.slane %v1449_v56, 2  ;;  %v1584_v22 = vsel %vm1573_vm8, %v1581_v11, %v1583_v19 }
  0x86   : > { %v1455_v5 = vor.u32 %v1454_v3, %v1451_v2  ;;  %v6655_v2 = vld [vmem:[%s6291_s18 + $0x8] sm:$0xf] }
  0x89   : > { %5440 = vmatmul.mubr.msk.bf16.gmra.mrb[52].mxu1 %vm522_vm3, %v1145_v10  ;;  %v1460_v10 = vrot.slane %v1458_v6, 2 }
  0x8a   : > { %5458 = vmatmul.mubr.msk.bf16.vlgmr.msra.gmra.mrb[52].mxu0 %vm522_vm3, %v1296_v7  ;;  %5443 = vmatprep.mubr.msk.bf16.mxu1 %vm6107_vm1, %v6106_v1  ;;  %v1461_v7 = vshll.u32 %v6009_v58, 16 }
  0x8b   : > { %5500 = vmatpush3.bf16.msra.mxu0 %v1601_v9  ;;  %5461 = vmatprep.mubr.msk.bf16.mxu0 %vm6107_vm1, %v6106_v1  ;;  %v1456_v9 = vsel %vm1412_vm7, %v1446_v61, %v1455_v5  ;;  %v6018_v61 = vld [vmem:[%s6291_s18 + $0x20] sm:$0xff]  }
  0x8c   : > { %5543 = vmatprep.subr.bf16.mxu0 %v6106_v1  ;;  %v1463_v12 = vrot.slane %v1461_v7, 3 }
  0x91   : > { %5444 = vmatmul.mubr.msk.bf16.gmra.mrb[56].mxu1 %vm522_vm3, %v1147_v15  ;;  %v1464_v15 = vor.u32 %v1463_v12, %v1460_v10  ;;  %v6670_v12 = vld [vmem:[%s6291_s18 + $0xc] sm:$0xff]  }
  0x92   : > { %5462 = vmatmul.mubr.msk.bf16.gmra.mrb[56].mxu0 %vm522_vm3, %v1298_v13  ;;  %5447 = vmatprep.mubr.msk.bf16.mxu1 %vm6107_vm1, %v6106_v1  ;;  %v1824_v13 = vld [vmem:[%s6291_s18] sm:$0xf]  ;;  %v2170_v19 = vrot.slane %v6670_v12, 1 }
  0x93   : > { %5465 = vmatprep.mubr.msk.bf16.mxu0 %vm6107_vm1, %v6106_v1  ;;  %v4986_v17 = vcombine.low %v1824_v13, %v6566_v14 }
  0x95   : > { %v1868_v21 = vshll.u32 %v4986_v17, 16  ;;  %v1866_v24 = vshrl.u32 %v4986_v17, 16 }
  0x97   : > { %v1870_v25 = vrot.slane %v1868_v21, 1  ;;  %v2019_v21 = vrot.slane %v6593_v31, 1 }
  0x99   : > { %5448 = vmatmul.mubr.msk.bf16.gmra.mrb[60].mxu1 %vm522_vm3, %v1149_v20  ;;  %v6577_v20 = vld [vmem:[%s6291_s18 + $0x8] sm:$0xff]  }
  0x9a   : > { %5466 = vmatmul.mubr.msk.bf16.gmra.mrb[60].mxu0 %vm522_vm3, %v1300_v18  ;;  %5451 = vmatprep.mubr.msk.bf16.mxu1 %vm6107_vm1, %v6106_v1  ;;  %v1465_v18 = vsel %vm1412_vm7, %v1455_v5, %v1464_v15  ;;  %v1873_v26 = vshll.u32 %v6577_v20, 16  ;;  %v1877_v34 = vshrl.u32 %v6577_v20, 16  ;;  %v2017_v4 = vrot.slane %v6577_v20, 1 }
  0x9b   : > { %5469 = vmatprep.mubr.msk.bf16.mxu0 %vm6107_vm1, %v6106_v1 }
  0x9c   : > { %v1875_v30 = vrot.slane %v1873_v26, 1  ;;  %v2020_v31 = vsel %vm707_vm4, %v2017_v4, %v2019_v21 }
  0x9e   : > { %v1879_v38 = vor.u32 %v1877_v34, %v1875_v30 }
  0xa0   : > { %v1884_v41 = vsel %vm477_vm2, %v1879_v38, %v1883_v39 }
  0xa1   : > { %5452 = vmatmul.mubr.msk.bf16.gmra.mrb[64].mxu1 %vm522_vm3, %v1151_v29  ;;  %v1871_v29 = vor.u32 %v1870_v25, %v1866_v24 }
  0xa2   : > { %5470 = vmatmul.mubr.msk.bf16.gmra.mrb[64].mxu0 %vm522_vm3, %v1302_v27  ;;  %5479 = vmatprep.mubr.msk.bf16.mxu1 %vm6107_vm1, %v6106_v1  ;;  %v6010_v27 = vld [vmem:[%s6291_s18] sm:$0xff]  }
  0xa3   : > { %5473 = vmatprep.mubr.msk.bf16.mxu0 %vm6107_vm1, %v6106_v1  ;;  %v1876_v33 = vsel %vm477_vm2, %v1871_v29, %v1875_v30 }
  0xa9   : > { %5480 = vmatmul.mubr.msk.bf16.vlgmr.msra.gmra.mrb[68].mxu1 %vm522_vm3, %v1429_v43 }
  0xaa   : > { %5474 = vmatmul.mubr.msk.bf16.gmra.mrb[68].mxu0 %vm522_vm3, %v1304_v40  ;;  %5522 = vmatpush3.bf16.msra.mxu1 %v1739_v46  ;;  %v6611_v40 = vld [vmem:[%s6291_s18 + $0x18] sm:$0xff]  }
  0xab   : > { %5501 = vmatprep.mubr.msk.bf16.mxu0 %vm6107_vm1, %v6106_v1  ;;  %5483 = vmatprep.mubr.msk.bf16.mxu1 %vm6107_vm1, %v6106_v1  ;;  %v1889_v43 = vshll.u32 %v6611_v40, 16  ;;  %v1893_v49 = vshrl.u32 %v6611_v40, 16 }
  0xac   : > { %5565 = vmatprep.subr.bf16.mxu1 %v6106_v1 }
  0xad   : > { %v1891_v46 = vrot.slane %v1889_v43, 1 }
  0xaf   : > { %v1892_v48 = vsel %vm477_vm2, %v1887_v45, %v1891_v46  ;;  %v1895_v52 = vor.u32 %v1893_v49, %v1891_v46 }
  0xb1   : > { %5484 = vmatmul.mubr.msk.bf16.gmra.mrb[72].mxu1 %vm522_vm3, %v1438_v55  ;;  %v2010_v55 = vld [vmem:[%s6291_s18] sm:$0xe] }
  0xb2   : > { %5502 = vmatmul.mubr.msk.bf16.vlgmr.msra.gmra.mrb[72].mxu0 %vm522_vm3, %v1576_v53  ;;  %5487 = vmatprep.mubr.msk.bf16.mxu1 %vm6107_vm1, %v6106_v1  ;;  %v1899_v53 = vrot.slane %v1897_v50, 1  ;;  %v4998_v56 = vcombine.low %v2010_v55, %v6566_v14 }
  0xb3   : > { %5544 = vmatpush3.bf16.msra.mxu0 %v1925_v54  ;;  %5505 = vmatprep.mubr.msk.bf16.mxu0 %vm6107_vm1, %v6106_v1  ;;  %v6638_v54 = vld [vmem:[%s6291_s18 + $0x28] ss:$0 sps:$4 sm:$0x11]  }
  0xb4   : > { %5587 = vmatprep.subr.bf16.mxu0 %v6106_v1  ;;  %v1900_v57 = vsel %vm477_vm2, %v1895_v52, %v1899_v53  ;;  %v1905_v60 = vshll.u32 %v6638_v54, 16  ;;  %v1903_v62 = vor.u32 %v1901_v59, %v1899_v53  ;;  %v2016_v58 = vrot.slane %v4998_v56, 1 }
  0xb5   : > { %v2023_v52 = vrot.slane %v6625_v47, 1 }
  0xb6   : > { %v2018_v15 = vsel %vm707_vm4, %v2016_v58, %v2017_v4 }
  0xb9   : > { %5488 = vmatmul.mubr.msk.bf16.gmra.mrb[76].mxu1 %vm522_vm3, %v1447_v0  ;;  %v2128_v0 = vld [vmem:[%s6291_s18 + $0x4] sm:$0xe] }
  0xba   : > { %5506 = vmatmul.mubr.msk.bf16.gmra.mrb[76].mxu0 %vm522_vm3, %v1578_v63  ;;  %5491 = vmatprep.mubr.msk.bf16.mxu1 %vm6107_vm1, %v6106_v1  ;;  %v1907_v63 = vrot.slane %v1905_v60, 1  ;;  %v6667_v10 = vcombine.low %v2128_v0, %v6655_v2 }
  0xbb   : > { %5509 = vmatprep.mubr.msk.bf16.mxu0 %vm6107_vm1, %v6106_v1 }
  0xc1   : > { %5492 = vmatmul.mubr.msk.bf16.gmra.mrb[80].mxu1 %vm522_vm3, %v1456_v9  ;;  %v5016_v9 = vld [vmem:[%s7948_s3 + $0x1a] sm:$0x3] }
  0xc2   : > { %5510 = vmatmul.mubr.msk.bf16.gmra.mrb[80].mxu0 %vm522_vm3, %v1580_v8  ;;  %5495 = vmatprep.mubr.msk.bf16.mxu1 %vm6107_vm1, %v6106_v1  ;;  %v1908_v8 = vsel %vm477_vm2, %v1903_v62, %v1907_v63  ;;  %v2356_v17 = vsel %vm538_vm0, %v5016_v9, 0  ;;  %v2288_v9 = vshrl.u32 %v6667_v10, 16 }
  0xc3   : > { %5513 = vmatprep.mubr.msk.bf16.mxu0 %vm6107_vm1, %v6106_v1 }
  0xc9   : > { %5496 = vmatmul.mubr.msk.bf16.gmra.mrb[84].mxu1 %vm522_vm3, %v1465_v18  ;;  %v2169_v18 = vrot.slane %v6667_v10, 1 }
  0xca   : > { %5514 = vmatmul.mubr.msk.bf16.gmra.mrb[84].mxu0 %vm522_vm3, %v1582_v16  ;;  %5523 = vmatprep.mubr.msk.bf16.mxu1 %vm6107_vm1, %v6106_v1 }
  0xcb   : > { %5517 = vmatprep.mubr.msk.bf16.mxu0 %vm6107_vm1, %v6106_v1  ;;  %v2171_v26 = vsel %vm707_vm4, %v2169_v18, %v2170_v19 }
  0xd1   : > { %5524 = vmatmul.mubr.msk.bf16.vlgmr.msra.gmra.mrb[88].mxu1 %vm522_vm3, %v6010_v27  ;;  %v6693_v27 = vld [vmem:[%s6291_s18 + $0x14] sm:$0xff]  }
  0xd2   : > { %5518 = vmatmul.mubr.msk.bf16.gmra.mrb[88].mxu0 %vm522_vm3, %v1584_v22  ;;  %5566 = vmatpush3.bf16.msra.mxu1 %v2043_v28  ;;  %v5023_v22 = vld [vmem:[%s7948_s3 + $0x1c] sm:$0x3]  ;;  %v2172_v34 = vrot.slane %v6693_v27, 1 }
  0xd3   : > { %5545 = vmatprep.mubr.msk.bf16.mxu0 %vm6107_vm1, %v6106_v1  ;;  %5527 = vmatprep.mubr.msk.bf16.mxu1 %vm6107_vm1, %v6106_v1  ;;  %v2474_v30 = vsel %vm538_vm0, %v5023_v22, 0 }
  0xd4   : > { %5609 = vmatprep.subr.bf16.mxu1 %v6106_v1 }
  0xd9   : > { %5528 = vmatmul.mubr.msk.bf16.gmra.mrb[92].mxu1 %vm522_vm3, %v6011_v36  ;;  %v2021_v36 = vrot.slane %v6611_v40, 1  ;;  %v2174_v40 = vrot.slane %v6710_v42, 1 }
  0xda   : > { %5546 = vmatmul.mubr.msk.bf16.vlgmr.msra.gmra.mrb[92].mxu0 %vm522_vm3, %v1876_v33  ;;  %5531 = vmatprep.mubr.msk.bf16.mxu1 %vm6107_vm1, %v6106_v1 }
  0xdb   : > { %5588 = vmatpush3.bf16.msra.mxu0 %v2196_v37  ;;  %5549 = vmatprep.mubr.msk.bf16.mxu0 %vm6107_vm1, %v6106_v1  ;;  %v2175_v60 = vsel %vm707_vm4, %v2172_v34, %v2174_v40  ;;  %v2024_v58 = vsel %vm707_vm4, %v2021_v36, %v2023_v52 }
  0xdc   : > { %5631 = vmatprep.subr.bf16.mxu0 %v6106_v1 }
  0xe1   : > { %5532 = vmatmul.mubr.msk.bf16.gmra.mrb[96].mxu1 %vm522_vm3, %v6014_v44 }
  0xe2   : > { %5550 = vmatmul.mubr.msk.bf16.gmra.mrb[96].mxu0 %vm522_vm3, %v1884_v41  ;;  %5535 = vmatprep.mubr.msk.bf16.mxu1 %vm6107_vm1, %v6106_v1  ;;  %v2173_v41 = vsel %vm707_vm4, %v2170_v19, %v2172_v34 }
  0xe3   : > { %5553 = vmatprep.mubr.msk.bf16.mxu0 %vm6107_vm1, %v6106_v1 }
  0xe9   : > { %5536 = vmatmul.mubr.msk.bf16.gmra.mrb[100].mxu1 %vm522_vm3, %v6016_v51 }
  0xea   : > { %5554 = vmatmul.mubr.msk.bf16.gmra.mrb[100].mxu0 %vm522_vm3, %v1892_v48  ;;  %5539 = vmatprep.mubr.msk.bf16.mxu1 %vm6107_vm1, %v6106_v1  ;;  %v2022_v48 = vsel %vm707_vm4, %v2019_v21, %v2021_v36  ;;  %v2441_v36 = vld [vmem:[%s6291_s18 + $0x4] sm:$0xc] }
  0xeb   : > { %5557 = vmatprep.mubr.msk.bf16.mxu0 %vm6107_vm1, %v6106_v1 }
  0xf1   : > { %5540 = vmatmul.mubr.msk.bf16.gmra.mrb[104].mxu1 %vm522_vm3, %v6018_v61  ;;  %v6725_v61 = vld [vmem:[%s6291_s18 + $0x24] sm:$0xff]  }
  0xf2   : > { %5558 = vmatmul.mubr.msk.bf16.gmra.mrb[104].mxu0 %vm522_vm3, %v1900_v57  ;;  %5567 = vmatprep.mubr.msk.bf16.mxu1 %vm6107_vm1, %v6106_v1 }
  0xf3   : > { %5561 = vmatprep.mubr.msk.bf16.mxu0 %vm6107_vm1, %v6106_v1 }
  0xf4   : > { %v6660_v7 = vpop.f32.mrb[0].mxu1 }
  0xf5   : > { %v576_v3 = vpop.f32.mrb[0].mxu0  ;;  %v5339_v13 = vpop.f32.mrb[1].mxu1 }
  0xf6   : > { %v5327_v5 = vpop.f32.mrb[1].mxu0  ;;  %v6672_v14 = vpop.f32.mrb[2].mxu1  ;;  %v2296_v13 = vshrl.u32 %v6670_v12, 16 }
  0xf7   : > { %v579_v6 = vpop.f32.mrb[2].mxu0  ;;  %v5340_v16 = vpop.f32.mrb[3].mxu1  ;;  %v2176_v5 = vrot.slane %v6725_v61, 1 }
  0xf8   : > { %v5328_v11 = vpop.f32.mrb[3].mxu0 }
  0xf9   : > { %5568 = vmatmul.mubr.msk.bf16.vlgmr.msra.gmra.mrb[108].mxu1 %vm522_vm3, %v2018_v15  ;;  %v2291_v11 = vshll.u32 %v6667_v10, 16  ;;  %v2299_v15 = vshll.u32 %v6670_v12, 16 }
  0xfa   : > { %5562 = vmatmul.mubr.msk.bf16.gmra.mrb[108].mxu0 %vm522_vm3, %v1908_v8  ;;  %5610 = vmatpush3.bf16.msra.mxu1 %v2356_v17 }
  0xfb   : > { %5589 = vmatprep.mubr.msk.bf16.mxu0 %vm6107_vm1, %v6106_v1  ;;  %5571 = vmatprep.mubr.msk.bf16.mxu1 %vm6107_vm1, %v6106_v1 }
  0xfc   : > { %5653 = vmatprep.subr.bf16.mxu1 %v6106_v1  ;;  %v6689_v25 = vpop.f32.mrb[4].mxu1 }
  0xfd   : > { %v584_v20 = vpop.f32.mrb[4].mxu0  ;;  %v5343_v29 = vpop.f32.mrb[5].mxu1 }
  0xfe   : > { %v5331_v23 = vpop.f32.mrb[5].mxu0  ;;  %v6696_v32 = vpop.f32.mrb[6].mxu1  ;;  %v2293_v29 = vrot.slane %v2291_v11, 2 }
  0xff   : > { %v587_v24 = vpop.f32.mrb[6].mxu0  ;;  %v5344_v33 = vpop.f32.mrb[7].mxu1 }
 0x100   : > { %v5332_v28 = vpop.f32.mrb[7].mxu0 }
 0x101   : > { %5572 = vmatmul.mubr.msk.bf16.gmra.mrb[112].mxu1 %vm522_vm3, %v2020_v31  ;;  %v2290_v28 = vrot.slane %v2288_v9, 1  ;;  %v2301_v31 = vrot.slane %v2299_v15, 2 }
 0x102   : > { %5590 = vmatmul.mubr.msk.bf16.vlgmr.msra.gmra.mrb[112].mxu0 %vm522_vm3, %v2171_v26  ;;  %5575 = vmatprep.mubr.msk.bf16.mxu1 %vm6107_vm1, %v6106_v1 }
 0x103   : > { %5632 = vmatpush3.bf16.msra.mxu0 %v2474_v30  ;;  %5593 = vmatprep.mubr.msk.bf16.mxu0 %vm6107_vm1, %v6106_v1  ;;  %v2298_v30 = vrot.slane %v2296_v13, 1 }
 0x104   : > { %5675 = vmatprep.subr.bf16.mxu0 %v6106_v1  ;;  %v662_v38 = vpop.f32.mrb[8].mxu1 }
 0x105   : > { %v592_v35 = vpop.f32.mrb[8].mxu0  ;;  %v663_v43 = vadd.f32 %v662_v38, %v576_v3  ;;  %v5349_v44 = vpop.f32.mrb[9].mxu1  ;;  %v2294_v38 = vor.u32 %v2293_v29, %v2290_v28 }
 0x106   : > { %v5335_v37 = vpop.f32.mrb[9].mxu0  ;;  %v665_v46 = vpop.f32.mrb[10].mxu1 }
 0x107   : > { %v595_v39 = vpop.f32.mrb[10].mxu0  ;;  %v666_v49 = vadd.f32 %v665_v46, %v579_v6  ;;  %v5350_v50 = vpop.f32.mrb[11].mxu1  ;;  %v2025_v6 = vrot.slane %v6638_v54, 1  ;;  %v6027_v54 = vld [vmem:[%s6291_s18 + $0x2c] ss:$0 sps:$4 sm:$0x11]  }
 0x108   : > { %v5336_v45 = vpop.f32.mrb[11].mxu0  ;;  %v5030_v50 = vld [vmem:[%s7948_s3 + $0x1e] sm:$0x3] }
 0x109   : > { %5576 = vmatmul.mubr.msk.bf16.gmra.mrb[116].mxu1 %vm522_vm3, %v2022_v48  ;;  %v2026_v10 = vsel %vm707_vm4, %v2023_v52, %v2025_v6  ;;  %v2317_v6 = vshll.u32 %v6710_v42, 16 }
 0x10a   : > { %5594 = vmatmul.mubr.msk.bf16.gmra.mrb[116].mxu0 %vm522_vm3, %v2173_v41  ;;  %5579 = vmatprep.mubr.msk.bf16.mxu1 %vm6107_vm1, %v6106_v1  ;;  %v2302_v41 = vor.u32 %v2301_v31, %v2298_v30  ;;  %v2326_v30 = vshll.u32 %v6725_v61, 16 }
 0x10b   : > { %5597 = vmatprep.mubr.msk.bf16.mxu0 %vm6107_vm1, %v6106_v1 }
 0x10c   : > { %v670_v57 = vpop.f32.mrb[12].mxu1 }
 0x10d   : > { %v771_v51 = vpop.f32.mrb[12].mxu0  ;;  %v671_v56 = vadd.f32 %v670_v57, %v584_v20  ;;  %v5353_v62 = vpop.f32.mrb[13].mxu1  ;;  %v2177_v20 = vsel %vm707_vm4, %v2174_v40, %v2176_v5  ;;  %v5024_v40 = vcombine.low %v2441_v36, %v6655_v2 }
 0x10e   : > { %v5371_v53 = vpop.f32.mrb[13].mxu0  ;;  %v6721_v55 = vadd.f32 %v771_v51, %v663_v43  ;;  %v673_v3 = vpop.f32.mrb[14].mxu1  ;;  %v2305_v43 = vshrl.u32 %v6693_v27, 16 }
 0x10f   : > { %v774_v59 = vpop.f32.mrb[14].mxu0  ;;  %v674_v4 = vadd.f32 %v673_v3, %v587_v24  ;;  %v5354_v47 = vpop.f32.mrb[15].mxu1  ;;  %v2447_v2 = vrot.slane %v5024_v40, 2 }
 0x110   : > { %v5372_v63 = vpop.f32.mrb[15].mxu0  ;;  %v6727_v0 = vadd.f32 %v774_v59, %v666_v49 }
 0x111   : > { %5580 = vmatmul.mubr.msk.bf16.gmra.mrb[120].mxu1 %vm522_vm3, %v2024_v58  ;;  %v2627_v58 = vsel %vm538_vm0, %v5030_v50, 0 }
 0x112   : > { %5598 = vmatmul.mubr.msk.bf16.gmra.mrb[120].mxu0 %vm522_vm3, %v2175_v60  ;;  %5583 = vmatprep.mubr.msk.bf16.mxu1 %vm6107_vm1, %v6106_v1  ;;  %v2303_v60 = vsel %vm979_vm5, %v2294_v38, %v2302_v41 }
 0x113   : > { %5601 = vmatprep.mubr.msk.bf16.mxu0 %vm6107_vm1, %v6106_v1 }
 0x114   : > { %v678_v18 = vpop.f32.mrb[16].mxu1 }
 0x115   : > { %v779_v8 = vpop.f32.mrb[16].mxu0  ;;  %v679_v21 = vadd.f32 %v678_v18, %v592_v35  ;;  %v5357_v22 = vpop.f32.mrb[17].mxu1  ;;  %v2178_v35 = vrot.slane %v6027_v54, 1 }
 0x116   : > { %v6742_v16 = vadd.f32 %v779_v8, %v671_v56  ;;  %v5375_v17 = vpop.f32.mrb[17].mxu0  ;;  %v681_v26 = vpop.f32.mrb[18].mxu1  ;;  %v2307_v56 = vrot.slane %v2305_v43, 1 }
 0x117   : > { %v782_v19 = vpop.f32.mrb[18].mxu0  ;;  %v682_v33 = vadd.f32 %v681_v26, %v595_v39  ;;  %v5358_v34 = vpop.f32.mrb[19].mxu1  ;;  %v2308_v39 = vshll.u32 %v6693_v27, 16  ;;  %v2179_v49 = vsel %vm707_vm4, %v2176_v5, %v2178_v35  ;;  %v2314_v5 = vshrl.u32 %v6710_v42, 16 }
 0x118   : > { %v6746_v23 = vadd.f32 %v782_v19, %v674_v4  ;;  %v5376_v24 = vpop.f32.mrb[19].mxu0 }
 0x119   : > { %5584 = vmatmul.mubr.msk.bf16.gmra.mrb[124].mxu1 %vm522_vm3, %v2026_v10  ;;  %v2310_v62 = vrot.slane %v2308_v39, 2  ;;  %v2316_v22 = vrot.slane %v2314_v5, 1  ;;  %v2319_v24 = vrot.slane %v2317_v6, 2 }
 0x11a   : > { %5602 = vmatmul.mubr.msk.bf16.gmra.mrb[124].mxu0 %vm522_vm3, %v2177_v20  ;;  %5611 = vmatprep.mubr.msk.bf16.mxu1 %vm6107_vm1, %v6106_v1 }
 0x11b   : > { %5605 = vmatprep.mubr.msk.bf16.mxu0 %vm6107_vm1, %v6106_v1  ;;  %v2311_v47 = vor.u32 %v2310_v62, %v2307_v56  ;;  %v2320_v29 = vor.u32 %v2319_v24, %v2316_v22 }
 0x11c   : > { %v686_v46 = vpop.f32.mrb[20].mxu1 }
 0x11d   : > { %v787_v37 = vpop.f32.mrb[20].mxu0  ;;  %v687_v51 = vadd.f32 %v686_v46, %v6660_v7  ;;  %v5361_v52 = vpop.f32.mrb[21].mxu1  ;;  %v2448_v7 = vrot.slane %v6670_v12, 2  ;;  %v2321_v39 = vsel %vm979_vm5, %v2311_v47, %v2320_v29  ;;  %v2328_v46 = vrot.slane %v2326_v30, 2 }
 0x11e   : > { %v6758_v44 = vadd.f32 %v787_v37, %v679_v21  ;;  %v5379_v45 = vpop.f32.mrb[21].mxu0  ;;  %v689_v59 = vpop.f32.mrb[22].mxu1  ;;  %v2312_v21 = vsel %vm979_vm5, %v2302_v41, %v2311_v47 }
 0x11f   : > { %v790_v48 = vpop.f32.mrb[22].mxu0  ;;  %v690_v63 = vadd.f32 %v689_v59, %v6672_v14  ;;  %v5362_v3 = vpop.f32.mrb[23].mxu1  ;;  %v5042_v14 = vld [vmem:[%s7948_s3 + $0x20] sm:$0x3]  ;;  %v2449_v13 = vsel %vm1140_vm6, %v2447_v2, %v2448_v7 }
 0x120   : > { %v6766_v53 = vadd.f32 %v790_v48, %v682_v33  ;;  %v5380_v57 = vpop.f32.mrb[23].mxu0  ;;  %v2787_v20 = vsel %vm538_vm0, %v5042_v14, 0  ;;  %v6811_v48 = vld [vmem:[%s6291_s18 + $0x2c] ss:$0 sps:$4 sm:$0x33]  }
 0x121   : > { %5612 = vmatmul.mubr.msk.bf16.vlgmr.msra.gmra.mrb[128].mxu1 %vm522_vm3, %v2303_v60  ;;  %v2332_v52 = vshrl.u32 %v6811_v48, 16  ;;  %v2335_v57 = vshll.u32 %v6811_v48, 16 }
 0x122   : > { %5606 = vmatmul.mubr.msk.bf16.gmra.mrb[128].mxu0 %vm522_vm3, %v2179_v49  ;;  %5654 = vmatpush3.bf16.msra.mxu1 %v2627_v58 }
 0x123   : > { %5633 = vmatprep.mubr.msk.bf16.mxu0 %vm6107_vm1, %v6106_v1  ;;  %5615 = vmatprep.mubr.msk.bf16.mxu1 %vm6107_vm1, %v6106_v1  ;;  %v2337_v47 = vrot.slane %v2335_v57, 2 }
 0x124   : > { %5697 = vmatprep.subr.bf16.mxu1 %v6106_v1  ;;  %v694_v12 = vpop.f32.mrb[24].mxu1 }
 0x125   : > { %v795_v4 = vpop.f32.mrb[24].mxu0  ;;  %v695_v15 = vadd.f32 %v694_v12, %v6689_v25  ;;  %v5365_v17 = vpop.f32.mrb[25].mxu1  ;;  %v2450_v25 = vrot.slane %v6693_v27, 2  ;;  %v2559_v12 = vld [vmem:[%s6291_s18 + $0x8] sm:$0xc] }
 0x126   : > { %v6783_v8 = vadd.f32 %v795_v4, %v687_v51  ;;  %v5383_v9 = vpop.f32.mrb[25].mxu0  ;;  %v697_v54 = vpop.f32.mrb[26].mxu1  ;;  %v2334_v4 = vrot.slane %v2332_v52, 1 }
 0x127   : > { %v798_v11 = vpop.f32.mrb[26].mxu0  ;;  %v698_v10 = vadd.f32 %v697_v54, %v6696_v32  ;;  %v5366_v26 = vpop.f32.mrb[27].mxu1  ;;  %v2323_v32 = vshrl.u32 %v6725_v61, 16  ;;  %v2451_v27 = vsel %vm1140_vm6, %v2448_v7, %v2450_v25 }
 0x128   : > { %v6788_v18 = vadd.f32 %v798_v11, %v690_v63  ;;  %v5384_v19 = vpop.f32.mrb[27].mxu0  ;;  %v2338_v9 = vor.u32 %v2337_v47, %v2334_v4  ;;  %v6840_v11 = vld [vmem:[%s6291_s18 + $0xc] sm:$0xf]  ;;  %v6851_v26 = vld [vmem:[%s6291_s18 + $0x10] sm:$0xff]  }
 0x129   : > { %5616 = vmatmul.mubr.msk.bf16.gmra.mrb[132].mxu1 %vm522_vm3, %v2312_v21  ;;  %v2325_v45 = vrot.slane %v2323_v32, 1  ;;  %v5031_v22 = vcombine.low %v2559_v12, %v6840_v11  ;;  %v2727_v30 = vshrl.u32 %v6851_v26, 16 }
 0x12a   : > { %5634 = vmatmul.mubr.msk.bf16.vlgmr.msra.gmra.mrb[132].mxu0 %vm522_vm3, %v2449_v13  ;;  %5619 = vmatprep.mubr.msk.bf16.mxu1 %vm6107_vm1, %v6106_v1 }
 0x12b   : > { %5676 = vmatpush3.bf16.msra.mxu0 %v2787_v20  ;;  %5637 = vmatprep.mubr.msk.bf16.mxu0 %vm6107_vm1, %v6106_v1  ;;  %v2329_v51 = vor.u32 %v2328_v46, %v2325_v45  ;;  %v2722_v32 = vshll.u32 %v5031_v22, 16  ;;  %v5049_v46 = vld [vmem:[%s7948_s3 + $0x22] sm:$0x3] }
 0x12c   : > { %5719 = vmatprep.subr.bf16.mxu0 %v6106_v1  ;;  %v924_v34 = vpop.f32.mrb[28].mxu1 }
 0x12d   : > { %v803_v28 = vpop.f32.mrb[28].mxu0  ;;  %v963_v36 = vadd.f32 %v924_v34, %v6721_v55  ;;  %v5393_v37 = vpop.f32.mrb[29].mxu1  ;;  %v2452_v55 = vrot.slane %v6710_v42, 2  ;;  %v2330_v7 = vsel %vm979_vm5, %v2320_v29, %v2329_v51  ;;  %v2719_v29 = vshrl.u32 %v5031_v22, 16 }
 0x12e   : > { %v6803_v31 = vadd.f32 %v803_v28, %v695_v15  ;;  %v5387_v33 = vpop.f32.mrb[29].mxu0  ;;  %v927_v43 = vpop.f32.mrb[30].mxu1 }
 0x12f   : > { %v806_v35 = vpop.f32.mrb[30].mxu0  ;;  %v964_v49 = vadd.f32 %v927_v43, %v6727_v0  ;;  %v5394_v50 = vpop.f32.mrb[31].mxu1  ;;  %v2453_v62 = vsel %vm1140_vm6, %v2450_v25, %v2452_v55  ;;  %v2730_v33 = vshll.u32 %v6851_v26, 16  ;;  %v2721_v37 = vrot.slane %v2719_v29, 2 }
 0x130   : > { %v6807_v38 = vadd.f32 %v806_v35, %v698_v10  ;;  %v5388_v41 = vpop.f32.mrb[31].mxu0  ;;  %v2339_v10 = vsel %vm979_vm5, %v2329_v51, %v2338_v9  ;;  %v2601_v35 = vrot.slane %v6851_v26, 2 }
 0x131   : > { %5620 = vmatmul.mubr.msk.bf16.gmra.mrb[136].mxu1 %vm522_vm3, %v2321_v39  ;;  %v2724_v41 = vrot.slane %v2722_v32, 3 }
 0x132   : > { %5638 = vmatmul.mubr.msk.bf16.gmra.mrb[136].mxu0 %vm522_vm3, %v2451_v27  ;;  %5623 = vmatprep.mubr.msk.bf16.mxu1 %vm6107_vm1, %v6106_v1 }
 0x133   : > { %5641 = vmatprep.mubr.msk.bf16.mxu0 %vm6107_vm1, %v6106_v1 }
 0x134   : > { %v932_v60 = vpop.f32.mrb[32].mxu1 }
 0x135   : > { %v1085_v40 = vpop.f32.mrb[32].mxu0  ;;  %v965_v42 = vadd.f32 %v932_v60, %v6742_v16  ;;  %v5397_v63 = vpop.f32.mrb[33].mxu1  ;;  %v2454_v16 = vrot.slane %v6725_v61, 2 }
 0x136   : > { %v6823_v0 = vadd.f32 %v1085_v40, %v963_v36  ;;  %v5415_v59 = vpop.f32.mrb[33].mxu0  ;;  %v935_v2 = vpop.f32.mrb[34].mxu1 }
 0x137   : > { %v1088_v56 = vpop.f32.mrb[34].mxu0  ;;  %v966_v14 = vadd.f32 %v935_v2, %v6746_v23  ;;  %v5398_v5 = vpop.f32.mrb[35].mxu1  ;;  %v2455_v19 = vsel %vm1140_vm6, %v2452_v55, %v2454_v16  ;;  %v6875_v59 = vld [vmem:[%s6291_s18 + $0x18] sm:$0xff]  }
 0x138   : > { %v6827_v3 = vadd.f32 %v1088_v56, %v964_v49  ;;  %v5416_v58 = vpop.f32.mrb[35].mxu0  ;;  %v2732_v49 = vrot.slane %v2730_v33, 3  ;;  %v2736_v63 = vshrl.u32 %v6875_v59, 16 }
 0x139   : > { %5624 = vmatmul.mubr.msk.bf16.gmra.mrb[140].mxu1 %vm522_vm3, %v2330_v7  ;;  %v2739_v58 = vshll.u32 %v6875_v59, 16  ;;  %v5056_v7 = vld [vmem:[%s7948_s3 + $0x24] sm:$0x3] }
 0x13a   : > { %5642 = vmatmul.mubr.msk.bf16.gmra.mrb[140].mxu0 %vm522_vm3, %v2453_v62  ;;  %5627 = vmatprep.mubr.msk.bf16.mxu1 %vm6107_vm1, %v6106_v1  ;;  %v2905_v62 = vsel %vm538_vm0, %v5049_v46, 0 }
 0x13b   : > { %5645 = vmatprep.mubr.msk.bf16.mxu0 %vm6107_vm1, %v6106_v1  ;;  %v2741_v9 = vrot.slane %v2739_v58, 3 }
 0x13c   : > { %v940_v15 = vpop.f32.mrb[36].mxu1 }
 0x13d   : > { %v1093_v6 = vpop.f32.mrb[36].mxu0  ;;  %v967_v61 = vadd.f32 %v940_v15, %v6758_v44  ;;  %v5401_v20 = vpop.f32.mrb[37].mxu1  ;;  %v2456_v44 = vrot.slane %v6811_v48, 2  ;;  %v2729_v48 = vrot.slane %v2727_v30, 2 }
 0x13e   : > { %v6842_v23 = vadd.f32 %v1093_v6, %v965_v42  ;;  %v5419_v13 = vpop.f32.mrb[37].mxu0  ;;  %v943_v24 = vpop.f32.mrb[38].mxu1  ;;  %v2738_v6 = vrot.slane %v2736_v63, 2 }
 0x13f   : > { %v1096_v17 = vpop.f32.mrb[38].mxu0  ;;  %v968_v25 = vadd.f32 %v943_v24, %v6766_v53  ;;  %v5402_v28 = vpop.f32.mrb[39].mxu1  ;;  %v2600_v53 = vrot.slane %v5031_v22, 2  ;;  %v2457_v45 = vsel %vm1140_vm6, %v2454_v16, %v2456_v44  ;;  %v2733_v42 = vor.u32 %v2732_v49, %v2729_v48 }
 0x140   : > { %v6846_v54 = vadd.f32 %v1096_v17, %v966_v14  ;;  %v5420_v21 = vpop.f32.mrb[39].mxu0 }
 0x141   : > { %5628 = vmatmul.mubr.msk.bf16.gmra.mrb[144].mxu1 %vm522_vm3, %v2339_v10  ;;  %v2602_v57 = vsel %vm1140_vm6, %v2600_v53, %v2601_v35  ;;  %v6901_v21 = vld [vmem:[%s6291_s18 + $0x20] sm:$0xff]  }
 0x142   : > { %5646 = vmatmul.mubr.msk.bf16.gmra.mrb[144].mxu0 %vm522_vm3, %v2455_v19  ;;  %5655 = vmatprep.mubr.msk.bf16.mxu1 %vm6107_vm1, %v6106_v1  ;;  %v3043_v19 = vsel %vm538_vm0, %v5056_v7, 0  ;;  %v2745_v10 = vshrl.u32 %v6901_v21, 16 }
 0x143   : > { %5649 = vmatprep.mubr.msk.bf16.mxu0 %vm6107_vm1, %v6106_v1 }
 0x144   : > { %v948_v43 = vpop.f32.mrb[40].mxu1 }
 0x145   : > { %v1101_v34 = vpop.f32.mrb[40].mxu0  ;;  %v969_v50 = vadd.f32 %v948_v43, %v6783_v8  ;;  %v5405_v55 = vpop.f32.mrb[41].mxu1  ;;  %v2725_v8 = vor.u32 %v2724_v41, %v2721_v37  ;;  %v6921_v43 = vld [vmem:[%s6291_s18 + $0x28] sm:$0xff]  }
 0x146   : > { %v6864_v27 = vadd.f32 %v1101_v34, %v967_v61  ;;  %v5423_v36 = vpop.f32.mrb[41].mxu0  ;;  %v951_v52 = vpop.f32.mrb[42].mxu1  ;;  %v2747_v34 = vrot.slane %v2745_v10, 2  ;;  %v2754_v49 = vshrl.u32 %v6921_v43, 16 }
 0x147   : > { %v1104_v39 = vpop.f32.mrb[42].mxu0  ;;  %v970_v60 = vadd.f32 %v951_v52, %v6788_v18  ;;  %v5406_v56 = vpop.f32.mrb[43].mxu1  ;;  %v2603_v18 = vrot.slane %v6875_v59, 2  ;;  %v2734_v16 = vsel %vm1412_vm7, %v2725_v8, %v2733_v42 }
 0x148   : > { %v6871_v40 = vadd.f32 %v1104_v39, %v968_v25  ;;  %v5424_v51 = vpop.f32.mrb[43].mxu0  ;;  %v2748_v25 = vshll.u32 %v6901_v21, 16 }
 0x149   : > { %5656 = vmatmul.mubr.msk.bf16.vlgmr.msra.gmra.mrb[148].mxu1 %vm522_vm3, %v2602_v57  ;;  %v2604_v20 = vsel %vm1140_vm6, %v2601_v35, %v2603_v18  ;;  %v2756_v57 = vrot.slane %v2754_v49, 2 }
 0x14a   : > { %5650 = vmatmul.mubr.msk.bf16.gmra.mrb[148].mxu0 %vm522_vm3, %v2457_v45  ;;  %5698 = vmatpush3.bf16.msra.mxu1 %v2905_v62  ;;  %v2750_v53 = vrot.slane %v2748_v25, 3 }
 0x14b   : > { %5677 = vmatprep.mubr.msk.bf16.mxu0 %vm6107_vm1, %v6106_v1  ;;  %5659 = vmatprep.mubr.msk.bf16.mxu1 %vm6107_vm1, %v6106_v1 }
 0x14c   : > { %5741 = vmatprep.subr.bf16.mxu1 %v6106_v1  ;;  %v956_v14 = vpop.f32.mrb[44].mxu1 }
 0x14d   : > { %v1109_v2 = vpop.f32.mrb[44].mxu0  ;;  %v971_v12 = vadd.f32 %v956_v14, %v6803_v31  ;;  %v5409_v13 = vpop.f32.mrb[45].mxu1  ;;  %v2742_v31 = vor.u32 %v2741_v9, %v2738_v6  ;;  %v6035_v14 = vld [vmem:[%s6291_s18 + $0x30] ss:$0 sps:$4 sm:$0x33]  }
 0x14e   : > { %v6891_v4 = vadd.f32 %v1109_v2, %v969_v50  ;;  %v5427_v47 = vpop.f32.mrb[45].mxu0  ;;  %v959_v61 = vpop.f32.mrb[46].mxu1  ;;  %v2757_v50 = vshll.u32 %v6921_v43, 16  ;;  %v2609_v13 = vrot.slane %v6035_v14, 2 }
 0x14f   : > { %v1112_v5 = vpop.f32.mrb[46].mxu0  ;;  %v972_v22 = vadd.f32 %v959_v61, %v6807_v38  ;;  %v5410_v24 = vpop.f32.mrb[47].mxu1  ;;  %v2605_v38 = vrot.slane %v6901_v21, 2  ;;  %v2743_v33 = vsel %vm1412_vm7, %v2733_v42, %v2742_v31  ;;  %v6938_v42 = vld [vmem:[%s6291_s18 + $0x30] ss:$0 sps:$4 sm:$0x77]  }
 0x150   : > { %v6896_v15 = vadd.f32 %v1112_v5, %v970_v60  ;;  %v5428_v17 = vpop.f32.mrb[47].mxu0  ;;  %v2759_v8 = vrot.slane %v2757_v50, 3  ;;  %v2766_v9 = vshll.u32 %v6938_v42, 16 }
 0x151   : > { %5660 = vmatmul.mubr.msk.bf16.gmra.mrb[152].mxu1 %vm522_vm3, %v2604_v20  ;;  %v2606_v45 = vsel %vm1140_vm6, %v2603_v18, %v2605_v38 }
 0x152   : > { %5678 = vmatmul.mubr.msk.bf16.vlgmr.msra.gmra.mrb[152].mxu0 %vm522_vm3, %v2734_v16  ;;  %5663 = vmatprep.mubr.msk.bf16.mxu1 %vm6107_vm1, %v6106_v1  ;;  %v2760_v6 = vor.u32 %v2759_v8, %v2756_v57  ;;  %v6038_v8 = vld [vmem:[%s6330_s9] sm:$0xff]  }
 0x153   : > { %5720 = vmatpush3.bf16.msra.mxu0 %v3043_v19  ;;  %5681 = vmatprep.mubr.msk.bf16.mxu0 %vm6107_vm1, %v6106_v1  ;;  %v2872_v19 = vld [vmem:[%s6291_s18 + $0x8] sm:$0x8] }
 0x154   : > { %5763 = vmatprep.subr.bf16.mxu0 %v6106_v1  ;;  %v1204_v44 = vpop.f32.mrb[48].mxu1 }
 0x155   : > { %v1117_v28 = vpop.f32.mrb[48].mxu0  ;;  %v1243_v35 = vadd.f32 %v1204_v44, %v6823_v0  ;;  %v5437_v36 = vpop.f32.mrb[49].mxu1  ;;  %v2751_v0 = vor.u32 %v2750_v53, %v2747_v34 }
 0x156   : > { %v6914_v29 = vadd.f32 %v1117_v28, %v971_v12  ;;  %v5431_v32 = vpop.f32.mrb[49].mxu0  ;;  %v1207_v39 = vpop.f32.mrb[50].mxu1  ;;  %v2879_v36 = vrot.slane %v6851_v26, 3 }
 0x157   : > { %v1120_v30 = vpop.f32.mrb[50].mxu0  ;;  %v1244_v46 = vadd.f32 %v1207_v39, %v6827_v3  ;;  %v5438_v48 = vpop.f32.mrb[51].mxu1  ;;  %v2607_v3 = vrot.slane %v6921_v43, 2  ;;  %v2752_v62 = vsel %vm1412_vm7, %v2742_v31, %v2751_v0  ;;  %v2768_v31 = vrot.slane %v2766_v9, 3 }
 0x158   : > { %v6918_v37 = vadd.f32 %v1120_v30, %v972_v22  ;;  %v5432_v41 = vpop.f32.mrb[51].mxu0  ;;  %v2761_v22 = vsel %vm1412_vm7, %v2751_v0, %v2760_v6  ;;  %v5050_v30 = vcombine.low %v2872_v19, %v6840_v11  ;;  %v2883_v9 = vrot.slane %v6901_v21, 3 }
 0x159   : > { %5664 = vmatmul.mubr.msk.bf16.gmra.mrb[156].mxu1 %vm522_vm3, %v2606_v45  ;;  %v2608_v47 = vsel %vm1140_vm6, %v2605_v38, %v2607_v3  ;;  %v2610_v44 = vsel %vm1140_vm6, %v2607_v3, %v2609_v13  ;;  %v6039_v13 = vld [vmem:[%s6330_s9 + $0x8] sm:$0xff]  }
 0x15a   : > { %5682 = vmatmul.mubr.msk.bf16.gmra.mrb[156].mxu0 %vm522_vm3, %v2743_v33  ;;  %5667 = vmatprep.mubr.msk.bf16.mxu1 %vm6107_vm1, %v6106_v1 }
 0x15b   : > { %5685 = vmatprep.mubr.msk.bf16.mxu0 %vm6107_vm1, %v6106_v1 }
 0x15c   : > { %v1212_v60 = vpop.f32.mrb[52].mxu1 }
 0x15d   : > { %v1357_v55 = vpop.f32.mrb[52].mxu0  ;;  %v1245_v63 = vadd.f32 %v1212_v60, %v6842_v23  ;;  %v5441_v58 = vpop.f32.mrb[53].mxu1  ;;  %v2763_v23 = vshrl.u32 %v6938_v42, 16  ;;  %v2881_v60 = vrot.slane %v6875_v59, 3 }
 0x15e   : > { %v6934_v51 = vadd.f32 %v1357_v55, %v1243_v35  ;;  %v5459_v52 = vpop.f32.mrb[53].mxu0  ;;  %v1215_v7 = vpop.f32.mrb[54].mxu1  ;;  %v2878_v35 = vrot.slane %v5050_v30, 3  ;;  %v6040_v30 = vld [vmem:[%s6330_s9 + $0x10] sm:$0xff]  }
 0x15f   : > { %v1360_v56 = vpop.f32.mrb[54].mxu0  ;;  %v1246_v5 = vadd.f32 %v1215_v7, %v6846_v54  ;;  %v5442_v16 = vpop.f32.mrb[55].mxu1  ;;  %v2765_v24 = vrot.slane %v2763_v23, 2 }
 0x160   : > { %v6941_v2 = vadd.f32 %v1360_v56, %v1244_v46  ;;  %v5460_v18 = vpop.f32.mrb[55].mxu0  ;;  %v5067_v46 = vld [vmem:[%s7948_s3 + $0x26] sm:$0x3]  ;;  %v2880_v26 = vsel %vm1573_vm8, %v2878_v35, %v2879_v36  ;;  %v2882_v16 = vsel %vm1573_vm8, %v2879_v36, %v2881_v60 }
 0x161   : > { %5668 = vmatmul.mubr.msk.bf16.gmra.mrb[160].mxu1 %vm522_vm3, %v2608_v47  ;;  %v2769_v53 = vor.u32 %v2768_v31, %v2765_v24  ;;  %v3229_v57 = vsel %vm538_vm0, %v5067_v46, 0 }
 0x162   : > { %5686 = vmatmul.mubr.msk.bf16.gmra.mrb[160].mxu0 %vm522_vm3, %v2752_v62  ;;  %5671 = vmatprep.mubr.msk.bf16.mxu1 %vm6107_vm1, %v6106_v1 }
 0x163   : > { %5689 = vmatprep.mubr.msk.bf16.mxu0 %vm6107_vm1, %v6106_v1  ;;  %v2770_v45 = vsel %vm1412_vm7, %v2760_v6, %v2769_v53 }
 0x164   : > { %v1220_v61 = vpop.f32.mrb[56].mxu1 }
 0x165   : > { %v1365_v12 = vpop.f32.mrb[56].mxu0  ;;  %v1247_v10 = vadd.f32 %v1220_v61, %v6864_v27  ;;  %v5445_v25 = vpop.f32.mrb[57].mxu1 }
 0x166   : > { %v6954_v17 = vadd.f32 %v1365_v12, %v1245_v63  ;;  %v5463_v54 = vpop.f32.mrb[57].mxu0  ;;  %v1223_v32 = vpop.f32.mrb[58].mxu1 }
 0x167   : > { %v1368_v20 = vpop.f32.mrb[58].mxu0  ;;  %v1248_v33 = vadd.f32 %v1223_v32, %v6871_v40  ;;  %v5446_v34 = vpop.f32.mrb[59].mxu1 }
 0x168   : > { %v6959_v28 = vadd.f32 %v1368_v20, %v1246_v5  ;;  %v5464_v38 = vpop.f32.mrb[59].mxu0 }
 0x169   : > { %5672 = vmatmul.mubr.msk.bf16.gmra.mrb[164].mxu1 %vm522_vm3, %v2610_v44  ;;  %v2885_v38 = vrot.slane %v6921_v43, 3 }
 0x16a   : > { %5690 = vmatmul.mubr.msk.bf16.gmra.mrb[164].mxu0 %vm522_vm3, %v2761_v22  ;;  %5699 = vmatprep.mubr.msk.bf16.mxu1 %vm6107_vm1, %v6106_v1 }
 0x16b   : > { %5693 = vmatprep.mubr.msk.bf16.mxu0 %vm6107_vm1, %v6106_v1  ;;  %v2886_v43 = vsel %vm1573_vm8, %v2883_v9, %v2885_v38 }
 0x16c   : > { %v1228_v40 = vpop.f32.mrb[60].mxu1 }
 0x16d   : > { %v1373_v27 = vpop.f32.mrb[60].mxu0  ;;  %v1249_v48 = vadd.f32 %v1228_v40, %v6891_v4  ;;  %v5449_v49 = vpop.f32.mrb[61].mxu1 }
 0x16e   : > { %v6971_v41 = vadd.f32 %v1373_v27, %v1247_v10  ;;  %v5467_v11 = vpop.f32.mrb[61].mxu0  ;;  %v1231_v55 = vpop.f32.mrb[62].mxu1  ;;  %v2884_v10 = vsel %vm1573_vm8, %v2881_v60, %v2883_v9  ;;  %v7047_v49 = vld [vmem:[%s6330_s9 + $0x8] sm:$0xff]  }
 0x16f   : > { %v1376_v39 = vpop.f32.mrb[62].mxu0  ;;  %v1250_v3 = vadd.f32 %v1231_v55, %v6896_v15  ;;  %v5450_v52 = vpop.f32.mrb[63].mxu1  ;;  %v5079_v15 = vld [vmem:[%s7948_s3 + $0x28] sm:$0x3] }
 0x170   : > { %v6978_v0 = vadd.f32 %v1376_v39, %v1248_v33  ;;  %v5468_v50 = vpop.f32.mrb[63].mxu0  ;;  %v3347_v59 = vsel %vm538_vm0, %v5079_v15, 0  ;;  %v3128_v33 = vld [vmem:[%s6330_s9] sm:$0xf] }
 0x171   : > { %5700 = vmatmul.mubr.msk.bf16.vlgmr.msra.gmra.mrb[168].mxu1 %vm522_vm3, %v2880_v26  ;;  %v6041_v26 = vld [vmem:[%s6330_s9 + $0x18] sm:$0xff]  }
 0x172   : > { %5694 = vmatmul.mubr.msk.bf16.gmra.mrb[168].mxu0 %vm522_vm3, %v2770_v45  ;;  %5742 = vmatpush3.bf16.msra.mxu1 %v3229_v57 }
 0x173   : > { %5721 = vmatprep.mubr.msk.bf16.mxu0 %vm6107_vm1, %v6106_v1  ;;  %5703 = vmatprep.mubr.msk.bf16.mxu1 %vm6107_vm1, %v6106_v1 }
 0x174   : > { %5785 = vmatprep.subr.bf16.mxu1 %v6106_v1  ;;  %v1236_v63 = vpop.f32.mrb[64].mxu1 }
 0x175   : > { %v1381_v4 = vpop.f32.mrb[64].mxu0  ;;  %v1251_v18 = vadd.f32 %v1236_v63, %v6914_v29  ;;  %v5453_v7 = vpop.f32.mrb[65].mxu1 }
 0x176   : > { %v6993_v56 = vadd.f32 %v1381_v4, %v1249_v48  ;;  %v5471_v62 = vpop.f32.mrb[65].mxu0  ;;  %v1239_v5 = vpop.f32.mrb[66].mxu1  ;;  %v2887_v48 = vrot.slane %v6938_v42, 3 }
 0x177   : > { %v1384_v58 = vpop.f32.mrb[66].mxu0  ;;  %v1252_v6 = vadd.f32 %v1239_v5, %v6918_v37  ;;  %v5454_v23 = vpop.f32.mrb[67].mxu1 }
 0x178   : > { %v6998_v47 = vadd.f32 %v1384_v58, %v1250_v3  ;;  %v5472_v14 = vpop.f32.mrb[67].mxu0  ;;  %v2888_v42 = vsel %vm1573_vm8, %v2885_v38, %v2887_v48  ;;  %v3177_v58 = vshll.u32 %v7047_v49, 16  ;;  %v6042_v23 = vld [vmem:[%s6330_s9 + $0x20] sm:$0xff]  }
 0x179   : > { %5704 = vmatmul.mubr.msk.bf16.gmra.mrb[172].mxu1 %vm522_vm3, %v2882_v16  ;;  %v7066_v16 = vld [vmem:[%s6330_s9 + $0x10] sm:$0xff]  }
 0x17a   : > { %5722 = vmatmul.mubr.msk.bf16.vlgmr.msra.gmra.mrb[172].mxu0 %vm522_vm3, %v6038_v8  ;;  %5707 = vmatprep.mubr.msk.bf16.mxu1 %vm6107_vm1, %v6106_v1  ;;  %v3179_v5 = vrot.slane %v3177_v58, 1 }
 0x17b   : > { %5764 = vmatpush3.bf16.msra.mxu0 %v3347_v59  ;;  %5725 = vmatprep.mubr.msk.bf16.mxu0 %vm6107_vm1, %v6106_v1 }
 0x17c   : > { %5807 = vmatprep.subr.bf16.mxu0 %v6106_v1  ;;  %v1518_v54 = vpop.f32.mrb[68].mxu1 }
 0x17d   : > { %v1389_v29 = vpop.f32.mrb[68].mxu0  ;;  %v1557_v61 = vadd.f32 %v1518_v54, %v6934_v51  ;;  %v5481_v20 = vpop.f32.mrb[69].mxu1 }
 0x17e   : > { %v7011_v12 = vadd.f32 %v1389_v29, %v1251_v18  ;;  %v5475_v37 = vpop.f32.mrb[69].mxu0  ;;  %v1521_v31 = vpop.f32.mrb[70].mxu1 }
 0x17f   : > { %v1392_v19 = vpop.f32.mrb[70].mxu0  ;;  %v1558_v21 = vadd.f32 %v1521_v31, %v6941_v2  ;;  %v5482_v25 = vpop.f32.mrb[71].mxu1  ;;  %v7031_v2 = vld [vmem:[%s6330_s9 + $0x4] sm:$0xf]  ;;  %v5086_v37 = vld [vmem:[%s7948_s3 + $0x2a] sm:$0x3] }
 0x180   : > { %v7015_v22 = vadd.f32 %v1392_v19, %v1252_v6  ;;  %v5476_v24 = vpop.f32.mrb[71].mxu0  ;;  %v5068_v39 = vcombine.low %v3128_v33, %v7031_v2  ;;  %v3500_v38 = vsel %vm538_vm0, %v5086_v37, 0 }
 0x181   : > { %5708 = vmatmul.mubr.msk.bf16.gmra.mrb[176].mxu1 %vm522_vm3, %v2884_v10  ;;  %v3181_v10 = vshrl.u32 %v7047_v49, 16 }
 0x182   : > { %5726 = vmatmul.mubr.msk.bf16.gmra.mrb[176].mxu0 %vm522_vm3, %v6039_v13  ;;  %5711 = vmatprep.mubr.msk.bf16.mxu1 %vm6107_vm1, %v6106_v1  ;;  %v3172_v50 = vshll.u32 %v5068_v39, 16  ;;  %v3170_v8 = vshrl.u32 %v5068_v39, 16 }
 0x183   : > { %5729 = vmatprep.mubr.msk.bf16.mxu0 %vm6107_vm1, %v6106_v1  ;;  %v3183_v33 = vor.u32 %v3181_v10, %v3179_v5 }
 0x184   : > { %v1526_v34 = vpop.f32.mrb[72].mxu1  ;;  %v3174_v63 = vrot.slane %v3172_v50, 1  ;;  %v3189_v50 = vshrl.u32 %v7066_v16, 16 }
 0x185   : > { %v1637_v51 = vpop.f32.mrb[72].mxu0  ;;  %v1559_v27 = vadd.f32 %v1526_v34, %v6954_v17  ;;  %v5485_v35 = vpop.f32.mrb[73].mxu1  ;;  %v7094_v34 = vld [vmem:[%s6330_s9 + $0x18] sm:$0xff]  }
 0x186   : > { %v7026_v32 = vadd.f32 %v1637_v51, %v1557_v61  ;;  %v5503_v44 = vpop.f32.mrb[73].mxu0  ;;  %v1529_v40 = vpop.f32.mrb[74].mxu1  ;;  %v3175_v59 = vor.u32 %v3174_v63, %v3170_v8 }
 0x187   : > { %v1640_v53 = vpop.f32.mrb[74].mxu0  ;;  %v1560_v45 = vadd.f32 %v1529_v40, %v6959_v28  ;;  %v5486_v46 = vpop.f32.mrb[75].mxu1  ;;  %v3321_v44 = vrot.slane %v7047_v49, 1 }
 0x188   : > { %v7034_v36 = vadd.f32 %v1640_v53, %v1558_v21  ;;  %v5504_v11 = vpop.f32.mrb[75].mxu0  ;;  %v3180_v31 = vsel %vm477_vm2, %v3175_v59, %v3179_v5  ;;  %v3185_v21 = vshll.u32 %v7066_v16, 16  ;;  %v3197_v5 = vshrl.u32 %v7094_v34, 16 }
 0x189   : > { %5712 = vmatmul.mubr.msk.bf16.gmra.mrb[180].mxu1 %vm522_vm3, %v2886_v43 }
 0x18a   : > { %5730 = vmatmul.mubr.msk.bf16.gmra.mrb[180].mxu0 %vm522_vm3, %v6040_v30  ;;  %5715 = vmatprep.mubr.msk.bf16.mxu1 %vm6107_vm1, %v6106_v1 }
 0x18b   : > { %5733 = vmatprep.mubr.msk.bf16.mxu0 %vm6107_vm1, %v6106_v1 }
 0x18c   : > { %v1534_v3 = vpop.f32.mrb[76].mxu1 }
 0x18d   : > { %v1645_v17 = vpop.f32.mrb[76].mxu0  ;;  %v1561_v57 = vadd.f32 %v1534_v3, %v6971_v41  ;;  %v5489_v4 = vpop.f32.mrb[77].mxu1  ;;  %v3314_v41 = vld [vmem:[%s6330_s9] sm:$0xe] }
 0x18e   : > { %v7049_v55 = vadd.f32 %v1645_v17, %v1559_v27  ;;  %v5507_v28 = vpop.f32.mrb[77].mxu0  ;;  %v1537_v62 = vpop.f32.mrb[78].mxu1  ;;  %v5080_v13 = vcombine.low %v3314_v41, %v7031_v2  ;;  %v5098_v2 = vld [vmem:[%s7948_s3 + $0x2c] sm:$0x3] }
 0x18f   : > { %v1648_v52 = vpop.f32.mrb[78].mxu0  ;;  %v1562_v18 = vadd.f32 %v1537_v62, %v6978_v0  ;;  %v5490_v7 = vpop.f32.mrb[79].mxu1  ;;  %v3660_v17 = vsel %vm538_vm0, %v5098_v2, 0  ;;  %v3193_v28 = vshll.u32 %v7094_v34, 16 }
 0x190   : > { %v7053_v60 = vadd.f32 %v1648_v52, %v1560_v45  ;;  %v5508_v15 = vpop.f32.mrb[79].mxu0 }
 0x191   : > { %5716 = vmatmul.mubr.msk.bf16.gmra.mrb[184].mxu1 %vm522_vm3, %v2888_v42  ;;  %v3195_v4 = vrot.slane %v3193_v28, 1 }
 0x192   : > { %5734 = vmatmul.mubr.msk.bf16.gmra.mrb[184].mxu0 %vm522_vm3, %v6041_v26  ;;  %5743 = vmatprep.mubr.msk.bf16.mxu1 %vm6107_vm1, %v6106_v1 }
 0x193   : > { %5737 = vmatprep.mubr.msk.bf16.mxu0 %vm6107_vm1, %v6106_v1 }
 0x194   : > { %v1542_v29 = vpop.f32.mrb[80].mxu1 }
 0x195   : > { %v1653_v14 = vpop.f32.mrb[80].mxu0  ;;  %v1563_v54 = vadd.f32 %v1542_v29, %v6993_v56  ;;  %v5493_v19 = vpop.f32.mrb[81].mxu1  ;;  %v3320_v56 = vrot.slane %v5080_v13, 1  ;;  %v6049_v13 = vld [vmem:[%s6330_s9 + $0x28] ss:$0 sps:$4 sm:$0x11]  }
 0x196   : > { %v7068_v6 = vadd.f32 %v1653_v14, %v1561_v57  ;;  %v5511_v0 = vpop.f32.mrb[81].mxu0  ;;  %v1545_v24 = vpop.f32.mrb[82].mxu1 }
 0x197   : > { %v1656_v9 = vpop.f32.mrb[82].mxu0  ;;  %v1564_v25 = vadd.f32 %v1545_v24, %v6998_v47  ;;  %v5494_v51 = vpop.f32.mrb[83].mxu1  ;;  %v3187_v47 = vrot.slane %v3185_v21, 1  ;;  %v3322_v40 = vsel %vm707_vm4, %v3320_v56, %v3321_v44 }
 0x198   : > { %v7076_v61 = vadd.f32 %v1656_v9, %v1562_v18  ;;  %v5512_v20 = vpop.f32.mrb[83].mxu0  ;;  %v3199_v9 = vor.u32 %v3197_v5, %v3195_v4 }
 0x199   : > { %5744 = vmatmul.mubr.msk.bf16.vlgmr.msra.gmra.mrb[188].mxu1 %vm522_vm3, %v3180_v31  ;;  %v3188_v49 = vsel %vm477_vm2, %v3183_v33, %v3187_v47  ;;  %v3191_v57 = vor.u32 %v3189_v50, %v3187_v47 }
 0x19a   : > { %5738 = vmatmul.mubr.msk.bf16.gmra.mrb[188].mxu0 %vm522_vm3, %v6042_v23  ;;  %5786 = vmatpush3.bf16.msra.mxu1 %v3500_v38 }
 0x19b   : > { %5765 = vmatprep.mubr.msk.bf16.mxu0 %vm6107_vm1, %v6106_v1  ;;  %5747 = vmatprep.mubr.msk.bf16.mxu1 %vm6107_vm1, %v6106_v1  ;;  %v3196_v59 = vsel %vm477_vm2, %v3191_v57, %v3195_v4 }
 0x19c   : > { %5829 = vmatprep.subr.bf16.mxu1 %v6106_v1  ;;  %v1550_v35 = vpop.f32.mrb[84].mxu1 }
 0x19d   : > { %v1661_v30 = vpop.f32.mrb[84].mxu0  ;;  %v1565_v43 = vadd.f32 %v1550_v35, %v7011_v12  ;;  %v5497_v39 = vpop.f32.mrb[85].mxu1  ;;  %v3323_v12 = vrot.slane %v7066_v16, 1  ;;  %v7155_v35 = vld [vmem:[%s6330_s9 + $0x8] sm:$0xf] }
 0x19e   : > { %v7096_v53 = vadd.f32 %v1661_v30, %v1563_v54  ;;  %v5515_v27 = vpop.f32.mrb[85].mxu0  ;;  %v1553_v48 = vpop.f32.mrb[86].mxu1 }
 0x19f   : > { %v1664_v11 = vpop.f32.mrb[86].mxu0  ;;  %v1566_v26 = vadd.f32 %v1553_v48, %v7015_v22  ;;  %v5498_v3 = vpop.f32.mrb[87].mxu1  ;;  %v7117_v22 = vld [vmem:[%s6330_s9 + $0x20] sm:$0xff]   ;;  %v3324_v63 = vsel %vm707_vm4, %v3321_v44, %v3323_v12  ;;  %v3209_v44 = vshll.u32 %v6049_v13, 16 }
 0x1a0   : > { %v7101_v45 = vadd.f32 %v1664_v11, %v1564_v25  ;;  %v5516_v46 = vpop.f32.mrb[87].mxu0  ;;  %v3201_v16 = vshll.u32 %v7117_v22, 16  ;;  %v3205_v56 = vshrl.u32 %v7117_v22, 16  ;;  %v3432_v27 = vld [vmem:[%s6330_s9 + $0x4] sm:$0xe]  ;;  %v7166_v3 = vld [vmem:[%s6330_s9 + $0xc] sm:$0xff]  }
 0x1a1   : > { %5748 = vmatmul.mubr.msk.bf16.gmra.mrb[192].mxu1 %vm522_vm3, %v3188_v49  ;;  %v5087_v50 = vcombine.low %v3432_v27, %v7155_v35 }
 0x1a2   : > { %5766 = vmatmul.mubr.msk.bf16.vlgmr.msra.gmra.mrb[192].mxu0 %vm522_vm3, %v3322_v40  ;;  %5751 = vmatprep.mubr.msk.bf16.mxu1 %vm6107_vm1, %v6106_v1  ;;  %v3203_v37 = vrot.slane %v3201_v16, 1  ;;  %v5105_v16 = vld [vmem:[%s7948_s3 + $0x2e] sm:$0x3] }
 0x1a3   : > { %5808 = vmatpush3.bf16.msra.mxu0 %v3660_v17  ;;  %5769 = vmatprep.mubr.msk.bf16.mxu0 %vm6107_vm1, %v6106_v1  ;;  %v3592_v57 = vshrl.u32 %v5087_v50, 16  ;;  %v3595_v4 = vshll.u32 %v5087_v50, 16 }
 0x1a4   : > { %5851 = vmatprep.subr.bf16.mxu0 %v6106_v1  ;;  %v1775_v42 = vpop.f32.mrb[88].mxu1  ;;  %v3204_v38 = vsel %vm477_vm2, %v3199_v9, %v3203_v37  ;;  %v3207_v2 = vor.u32 %v3205_v56, %v3203_v37  ;;  %v5112_v56 = vld [vmem:[%s7948_s3 + $0x30] sm:$0x3] }
 0x1a5   : > { %v1669_v52 = vpop.f32.mrb[88].mxu0  ;;  %v1814_v58 = vadd.f32 %v1775_v42, %v7026_v32  ;;  %v5525_v18 = vpop.f32.mrb[89].mxu1  ;;  %v3325_v32 = vrot.slane %v7094_v34, 1  ;;  %v3211_v34 = vrot.slane %v3209_v44, 1 }
 0x1a6   : > { %v7119_v15 = vadd.f32 %v1669_v52, %v1565_v43  ;;  %v5519_v62 = vpop.f32.mrb[89].mxu0  ;;  %v1778_v14 = vpop.f32.mrb[90].mxu1  ;;  %v3594_v18 = vrot.slane %v3592_v57, 1 }
 0x1a7   : > { %v1672_v8 = vpop.f32.mrb[90].mxu0  ;;  %v1815_v0 = vadd.f32 %v1778_v14, %v7034_v36  ;;  %v5526_v23 = vpop.f32.mrb[91].mxu1  ;;  %v3326_v24 = vsel %vm707_vm4, %v3323_v12, %v3325_v32  ;;  %v3603_v62 = vshll.u32 %v7166_v3, 16 }
 0x1a8   : > { %v7123_v7 = vadd.f32 %v1672_v8, %v1566_v26  ;;  %v5520_v41 = vpop.f32.mrb[91].mxu0  ;;  %v3212_v26 = vsel %vm477_vm2, %v3207_v2, %v3211_v34  ;;  %v3474_v8 = vrot.slane %v7166_v3, 1 }
 0x1a9   : > { %5752 = vmatmul.mubr.msk.bf16.gmra.mrb[196].mxu1 %vm522_vm3, %v3196_v59  ;;  %v3597_v41 = vrot.slane %v3595_v4, 2  ;;  %v3605_v23 = vrot.slane %v3603_v62, 2 }
 0x1aa   : > { %5770 = vmatmul.mubr.msk.bf16.gmra.mrb[196].mxu0 %vm522_vm3, %v3324_v63  ;;  %5755 = vmatprep.mubr.msk.bf16.mxu1 %vm6107_vm1, %v6106_v1 }
 0x1ab   : > { %5773 = vmatprep.mubr.msk.bf16.mxu0 %vm6107_vm1, %v6106_v1 }
 0x1ac   : > { %v1783_v19 = vpop.f32.mrb[92].mxu1 }
 0x1ad   : > { %v1961_v29 = vpop.f32.mrb[92].mxu0  ;;  %v1816_v31 = vadd.f32 %v1783_v19, %v7049_v55  ;;  %v5529_v10 = vpop.f32.mrb[93].mxu1  ;;  %v3327_v55 = vrot.slane %v7117_v22, 1  ;;  %v3600_v22 = vshrl.u32 %v7166_v3, 16  ;;  %v7189_v19 = vld [vmem:[%s6330_s9 + $0x14] sm:$0xff]  }
 0x1ae   : > { %v7137_v54 = vadd.f32 %v1961_v29, %v1814_v58  ;;  %v5547_v36 = vpop.f32.mrb[93].mxu0  ;;  %v1786_v51 = vpop.f32.mrb[94].mxu1 }
 0x1af   : > { %v1964_v20 = vpop.f32.mrb[94].mxu0  ;;  %v1817_v30 = vadd.f32 %v1786_v51, %v7053_v60  ;;  %v5530_v33 = vpop.f32.mrb[95].mxu1  ;;  %v3328_v39 = vsel %vm707_vm4, %v3325_v32, %v3327_v55  ;;  %v3612_v51 = vshll.u32 %v7189_v19, 16 }
 0x1b0   : > { %v7141_v21 = vadd.f32 %v1964_v20, %v1815_v0  ;;  %v5548_v25 = vpop.f32.mrb[95].mxu0  ;;  %v3602_v0 = vrot.slane %v3600_v22, 1 }
 0x1b1   : > { %5756 = vmatmul.mubr.msk.bf16.gmra.mrb[200].mxu1 %vm522_vm3, %v3204_v38  ;;  %v3609_v25 = vshrl.u32 %v7189_v19, 16  ;;  %v3614_v34 = vrot.slane %v3612_v51, 2 }
 0x1b2   : > { %5774 = vmatmul.mubr.msk.bf16.gmra.mrb[200].mxu0 %vm522_vm3, %v3326_v24  ;;  %5759 = vmatprep.mubr.msk.bf16.mxu1 %vm6107_vm1, %v6106_v1  ;;  %v3606_v10 = vor.u32 %v3605_v23, %v3602_v0 }
 0x1b3   : > { %5777 = vmatprep.mubr.msk.bf16.mxu0 %vm6107_vm1, %v6106_v1  ;;  %v3611_v2 = vrot.slane %v3609_v25, 1 }
 0x1b4   : > { %v1791_v40 = vpop.f32.mrb[96].mxu1 }
 0x1b5   : > { %v1969_v47 = vpop.f32.mrb[96].mxu0  ;;  %v1818_v46 = vadd.f32 %v1791_v40, %v7068_v6  ;;  %v5533_v17 = vpop.f32.mrb[97].mxu1  ;;  %v3329_v6 = vrot.slane %v6049_v13, 1 }
 0x1b6   : > { %v7157_v60 = vadd.f32 %v1969_v47, %v1816_v31  ;;  %v5551_v11 = vpop.f32.mrb[97].mxu0  ;;  %v1794_v28 = vpop.f32.mrb[98].mxu1  ;;  %v3778_v31 = vsel %vm538_vm0, %v5105_v16, 0 }
 0x1b7   : > { %v1972_v43 = vpop.f32.mrb[98].mxu0  ;;  %v1819_v12 = vadd.f32 %v1794_v28, %v7076_v61  ;;  %v5534_v52 = vpop.f32.mrb[99].mxu1  ;;  %v3473_v61 = vrot.slane %v5087_v50, 1  ;;  %v3330_v5 = vsel %vm707_vm4, %v3327_v55, %v3329_v6 }
 0x1b8   : > { %v7161_v48 = vadd.f32 %v1972_v43, %v1817_v30  ;;  %v5552_v49 = vpop.f32.mrb[99].mxu0 }
 0x1b9   : > { %5760 = vmatmul.mubr.msk.bf16.gmra.mrb[204].mxu1 %vm522_vm3, %v3212_v26  ;;  %v3475_v36 = vsel %vm707_vm4, %v3473_v61, %v3474_v8  ;;  %v7215_v49 = vld [vmem:[%s6330_s9 + $0x1c] sm:$0xff]  }
 0x1ba   : > { %5778 = vmatmul.mubr.msk.bf16.gmra.mrb[204].mxu0 %vm522_vm3, %v3328_v39  ;;  %5787 = vmatprep.mubr.msk.bf16.mxu1 %vm6107_vm1, %v6106_v1  ;;  %v3931_v39 = vsel %vm538_vm0, %v5112_v56, 0  ;;  %v3618_v26 = vshrl.u32 %v7215_v49, 16 }
 0x1bb   : > { %5781 = vmatprep.mubr.msk.bf16.mxu0 %vm6107_vm1, %v6106_v1 }
 0x1bc   : > { %v1799_v14 = vpop.f32.mrb[100].mxu1 }
 0x1bd   : > { %v1977_v42 = vpop.f32.mrb[100].mxu0  ;;  %v1820_v32 = vadd.f32 %v1799_v14, %v7096_v53  ;;  %v5537_v29 = vpop.f32.mrb[101].mxu1  ;;  %v3598_v53 = vor.u32 %v3597_v41, %v3594_v18  ;;  %v7235_v14 = vld [vmem:[%s6330_s9 + $0x24] sm:$0xff]  }
 0x1be   : > { %v7178_v63 = vadd.f32 %v1977_v42, %v1818_v46  ;;  %v5555_v58 = vpop.f32.mrb[101].mxu0  ;;  %v1802_v13 = vpop.f32.mrb[102].mxu1  ;;  %v3620_v42 = vrot.slane %v3618_v26, 1  ;;  %v3627_v23 = vshrl.u32 %v7235_v14, 16 }
 0x1bf   : > { %v1980_v59 = vpop.f32.mrb[102].mxu0  ;;  %v1821_v20 = vadd.f32 %v1802_v13, %v7101_v45  ;;  %v5538_v24 = vpop.f32.mrb[103].mxu1  ;;  %v3476_v45 = vrot.slane %v7189_v19, 1  ;;  %v3607_v47 = vsel %vm979_vm5, %v3598_v53, %v3606_v10 }
 0x1c0   : > { %v7185_v9 = vadd.f32 %v1980_v59, %v1819_v12  ;;  %v5556_v37 = vpop.f32.mrb[103].mxu0  ;;  %v3621_v12 = vshll.u32 %v7215_v49, 16 }
 0x1c1   : > { %5788 = vmatmul.mubr.msk.bf16.vlgmr.msra.gmra.mrb[208].mxu1 %vm522_vm3, %v3475_v36  ;;  %v3477_v17 = vsel %vm707_vm4, %v3474_v8, %v3476_v45  ;;  %v3629_v36 = vrot.slane %v3627_v23, 1  ;;  %v5124_v23 = vld [vmem:[%s7948_s3 + $0x32] sm:$0x3] }
 0x1c2   : > { %5782 = vmatmul.mubr.msk.bf16.gmra.mrb[208].mxu0 %vm522_vm3, %v3330_v5  ;;  %5830 = vmatpush3.bf16.msra.mxu1 %v3778_v31  ;;  %v3623_v61 = vrot.slane %v3621_v12, 2 }
 0x1c3   : > { %5809 = vmatprep.mubr.msk.bf16.mxu0 %vm6107_vm1, %v6106_v1  ;;  %5791 = vmatprep.mubr.msk.bf16.mxu1 %vm6107_vm1, %v6106_v1 }
 0x1c4   : > { %5873 = vmatprep.subr.bf16.mxu1 %v6106_v1  ;;  %v1807_v33 = vpop.f32.mrb[104].mxu1 }
 0x1c5   : > { %v1985_v38 = vpop.f32.mrb[104].mxu0  ;;  %v1822_v27 = vadd.f32 %v1807_v33, %v7119_v15  ;;  %v5541_v11 = vpop.f32.mrb[105].mxu1  ;;  %v3615_v15 = vor.u32 %v3614_v34, %v3611_v2  ;;  %v6055_v33 = vld [vmem:[%s6330_s9 + $0x2c] ss:$0 sps:$4 sm:$0x11]  }
 0x1c6   : > { %v7205_v44 = vadd.f32 %v1985_v38, %v1820_v32  ;;  %v5559_v30 = vpop.f32.mrb[105].mxu0  ;;  %v1810_v46 = vpop.f32.mrb[106].mxu1  ;;  %v3630_v32 = vshll.u32 %v7235_v14, 16  ;;  %v3482_v11 = vrot.slane %v6055_v33, 1 }
 0x1c7   : > { %v1988_v55 = vpop.f32.mrb[106].mxu0  ;;  %v1823_v50 = vadd.f32 %v1810_v46, %v7123_v7  ;;  %v5542_v28 = vpop.f32.mrb[107].mxu1  ;;  %v3478_v7 = vrot.slane %v7215_v49, 1  ;;  %v3616_v62 = vsel %vm979_vm5, %v3606_v10, %v3615_v15  ;;  %v7252_v10 = vld [vmem:[%s6330_s9 + $0x2c] ss:$0 sps:$4 sm:$0x33]  }
 0x1c8   : > { %v7210_v40 = vadd.f32 %v1988_v55, %v1821_v20  ;;  %v5560_v43 = vpop.f32.mrb[107].mxu0  ;;  %v3632_v53 = vrot.slane %v3630_v32, 2  ;;  %v3639_v34 = vshll.u32 %v7252_v10, 16  ;;  %v7299_v32 = vld [vmem:[%s6330_s9 + $0x10] sm:$0xff]  }
 0x1c9   : > { %5792 = vmatmul.mubr.msk.bf16.gmra.mrb[212].mxu1 %vm522_vm3, %v3477_v17  ;;  %v3479_v5 = vsel %vm707_vm4, %v3476_v45, %v3478_v7 }
 0x1ca   : > { %5810 = vmatmul.mubr.msk.bf16.vlgmr.msra.gmra.mrb[212].mxu0 %vm522_vm3, %v3607_v47  ;;  %5795 = vmatprep.mubr.msk.bf16.mxu1 %vm6107_vm1, %v6106_v1  ;;  %v3633_v2 = vor.u32 %v3632_v53, %v3629_v36  ;;  %v4091_v53 = vsel %vm538_vm0, %v5124_v23, 0  ;;  %v7362_v23 = vld [vmem:[%s6330_s9 + $0x28] sm:$0xff]  }
 0x1cb   : > { %5852 = vmatpush3.bf16.msra.mxu0 %v3931_v39  ;;  %5813 = vmatprep.mubr.msk.bf16.mxu0 %vm6107_vm1, %v6106_v1  ;;  %v3745_v39 = vld [vmem:[%s6330_s9 + $0x4] sm:$0xc] }
 0x1cc   : > { %5895 = vmatprep.subr.bf16.mxu0 %v6106_v1  ;;  %v2079_v6 = vpop.f32.mrb[108].mxu1 }
 0x1cd   : > { %v1993_v52 = vpop.f32.mrb[108].mxu0  ;;  %v2118_v8 = vadd.f32 %v2079_v6, %v7137_v54  ;;  %v5569_v58 = vpop.f32.mrb[109].mxu1  ;;  %v3624_v54 = vor.u32 %v3623_v61, %v3620_v42 }
 0x1ce   : > { %v7228_v57 = vadd.f32 %v1993_v52, %v1822_v27  ;;  %v5563_v4 = vpop.f32.mrb[109].mxu0  ;;  %v2082_v59 = vpop.f32.mrb[110].mxu1 }
 0x1cf   : > { %v1996_v22 = vpop.f32.mrb[110].mxu0  ;;  %v2119_v16 = vadd.f32 %v2082_v59, %v7141_v21  ;;  %v5570_v0 = vpop.f32.mrb[111].mxu1  ;;  %v3480_v21 = vrot.slane %v7235_v14, 1  ;;  %v3625_v31 = vsel %vm979_vm5, %v3615_v15, %v3624_v54  ;;  %v3641_v15 = vrot.slane %v3639_v34, 2 }
 0x1d0   : > { %v7232_v18 = vadd.f32 %v1996_v22, %v1823_v50  ;;  %v5564_v41 = vpop.f32.mrb[111].mxu0  ;;  %v3634_v50 = vsel %vm979_vm5, %v3624_v54, %v3633_v2  ;;  %v5106_v22 = vcombine.low %v3745_v39, %v7155_v35 }
 0x1d1   : > { %5796 = vmatmul.mubr.msk.bf16.gmra.mrb[216].mxu1 %vm522_vm3, %v3479_v5  ;;  %v3481_v30 = vsel %vm707_vm4, %v3478_v7, %v3480_v21  ;;  %v3483_v6 = vsel %vm707_vm4, %v3480_v21, %v3482_v11 }
 0x1d2   : > { %5814 = vmatmul.mubr.msk.bf16.gmra.mrb[216].mxu0 %vm522_vm3, %v3616_v62  ;;  %5799 = vmatprep.mubr.msk.bf16.mxu1 %vm6107_vm1, %v6106_v1  ;;  %v3751_v35 = vrot.slane %v5106_v22, 2 }
 0x1d3   : > { %5817 = vmatprep.mubr.msk.bf16.mxu0 %vm6107_vm1, %v6106_v1 }
 0x1d4   : > { %v2087_v20 = vpop.f32.mrb[112].mxu1 }
 0x1d5   : > { %v2232_v29 = vpop.f32.mrb[112].mxu0  ;;  %v2120_v25 = vadd.f32 %v2087_v20, %v7157_v60  ;;  %v5573_v51 = vpop.f32.mrb[113].mxu1  ;;  %v3636_v60 = vshrl.u32 %v7252_v10, 16 }
 0x1d6   : > { %v7248_v37 = vadd.f32 %v2232_v29, %v2118_v8  ;;  %v5591_v13 = vpop.f32.mrb[113].mxu0  ;;  %v2090_v56 = vpop.f32.mrb[114].mxu1  ;;  %v7284_v8 = vld [vmem:[%s6330_s9 + $0xc] sm:$0xf] }
 0x1d7   : > { %v2235_v24 = vpop.f32.mrb[114].mxu0  ;;  %v2121_v55 = vadd.f32 %v2090_v56, %v7161_v48  ;;  %v5574_v47 = vpop.f32.mrb[115].mxu1  ;;  %v3638_v28 = vrot.slane %v3636_v60, 1 }
 0x1d8   : > { %v7255_v38 = vadd.f32 %v2235_v24, %v2119_v16  ;;  %v5592_v45 = vpop.f32.mrb[115].mxu0 }
 0x1d9   : > { %5800 = vmatmul.mubr.msk.bf16.gmra.mrb[220].mxu1 %vm522_vm3, %v3481_v30  ;;  %v3642_v61 = vor.u32 %v3641_v15, %v3638_v28  ;;  %v5131_v45 = vld [vmem:[%s7948_s3 + $0x34] sm:$0x3]  ;;  %v3756_v28 = vrot.slane %v7215_v49, 2 }
 0x1da   : > { %5818 = vmatmul.mubr.msk.bf16.gmra.mrb[220].mxu0 %vm522_vm3, %v3625_v31  ;;  %5803 = vmatprep.mubr.msk.bf16.mxu1 %vm6107_vm1, %v6106_v1 }
 0x1db   : > { %5821 = vmatprep.mubr.msk.bf16.mxu0 %vm6107_vm1, %v6106_v1  ;;  %v3643_v0 = vsel %vm979_vm5, %v3633_v2, %v3642_v61  ;;  %v7323_v2 = vld [vmem:[%s6330_s9 + $0x18] sm:$0xff]   ;;  %vm4361_vm5 = vcmask 27648  }
 0x1dc   : > { %v2095_v46 = vpop.f32.mrb[116].mxu1 }
 0x1dd   : > { %v2240_v27 = vpop.f32.mrb[116].mxu0  ;;  %v2122_v26 = vadd.f32 %v2095_v46, %v7178_v63  ;;  %v5577_v12 = vpop.f32.mrb[117].mxu1  ;;  %v3863_v63 = vld [vmem:[%s6330_s9 + $0x8] sm:$0xc] }
 0x1de   : > { %v7268_v43 = vadd.f32 %v2240_v27, %v2120_v25  ;;  %v5595_v48 = vpop.f32.mrb[117].mxu0  ;;  %v2098_v4 = vpop.f32.mrb[118].mxu1  ;;  %v7296_v54 = vcombine.low %v3863_v63, %v7284_v8  ;;  %v3905_v25 = vrot.slane %v7299_v32, 2 }
 0x1df   : > { %v2243_v17 = vpop.f32.mrb[118].mxu0  ;;  %v2123_v62 = vadd.f32 %v2098_v4, %v7185_v9  ;;  %v5578_v42 = vpop.f32.mrb[119].mxu1  ;;  %v3752_v9 = vrot.slane %v7166_v3, 2  ;;  %v7343_v4 = vld [vmem:[%s6330_s9 + $0x20] sm:$0xff]  }
 0x1e0   : > { %v7273_v52 = vadd.f32 %v2243_v17, %v2121_v55  ;;  %v5596_v7 = vpop.f32.mrb[119].mxu0 }
 0x1e1   : > { %5804 = vmatmul.mubr.msk.bf16.gmra.mrb[224].mxu1 %vm522_vm3, %v3483_v6  ;;  %v3753_v20 = vsel %vm1140_vm6, %v3751_v35, %v3752_v9  ;;  %v3909_v35 = vrot.slane %v7343_v4, 2 }
 0x1e2   : > { %5822 = vmatmul.mubr.msk.bf16.gmra.mrb[224].mxu0 %vm522_vm3, %v3634_v50  ;;  %5831 = vmatprep.mubr.msk.bf16.mxu1 %vm6107_vm1, %v6106_v1 }
 0x1e3   : > { %5825 = vmatprep.mubr.msk.bf16.mxu0 %vm6107_vm1, %v6106_v1 }
 0x1e4   : > { %v2103_v5 = vpop.f32.mrb[120].mxu1 }
 0x1e5   : > { %v2248_v58 = vpop.f32.mrb[120].mxu0  ;;  %v2124_v29 = vadd.f32 %v2103_v5, %v7205_v44  ;;  %v5581_v21 = vpop.f32.mrb[121].mxu1  ;;  %v3904_v44 = vrot.slane %v7296_v54, 2 }
 0x1e6   : > { %v7289_v41 = vadd.f32 %v2248_v58, %v2122_v26  ;;  %v5599_v59 = vpop.f32.mrb[121].mxu0  ;;  %v2106_v36 = vpop.f32.mrb[122].mxu1 }
 0x1e7   : > { %v2251_v16 = vpop.f32.mrb[122].mxu0  ;;  %v2125_v24 = vadd.f32 %v2106_v36, %v7210_v40  ;;  %v5582_v31 = vpop.f32.mrb[123].mxu1  ;;  %v3754_v40 = vrot.slane %v7189_v19, 2  ;;  %v3906_v47 = vsel %vm1140_vm6, %v3904_v44, %v3905_v25  ;;  %v4209_v19 = vsel %vm538_vm0, %v5131_v45, 0 }
 0x1e8   : > { %v7302_v3 = vadd.f32 %v2251_v16, %v2123_v62  ;;  %v5600_v13 = vpop.f32.mrb[123].mxu0 }
 0x1e9   : > { %5832 = vmatmul.mubr.msk.bf16.vlgmr.msra.gmra.mrb[228].mxu1 %vm522_vm3, %v3753_v20  ;;  %v3755_v39 = vsel %vm1140_vm6, %v3752_v9, %v3754_v40  ;;  %v3757_v63 = vsel %vm1140_vm6, %v3754_v40, %v3756_v28  ;;  %v3758_v9 = vrot.slane %v7235_v14, 2  ;;  %v4034_v40 = vshll.u32 %v7299_v32, 16 }
 0x1ea   : > { %5826 = vmatmul.mubr.msk.bf16.gmra.mrb[228].mxu0 %vm522_vm3, %v3643_v0  ;;  %5874 = vmatpush3.bf16.msra.mxu1 %v4091_v53  ;;  %v3911_v53 = vrot.slane %v7362_v23, 2 }
 0x1eb   : > { %5853 = vmatprep.mubr.msk.bf16.mxu0 %vm6107_vm1, %v6106_v1  ;;  %5835 = vmatprep.mubr.msk.bf16.mxu1 %vm6107_vm1, %v6106_v1 }
 0x1ec   : > { %v2111_v33 = vpop.f32.mrb[124].mxu1 }
 0x1ed   : > { %v2256_v51 = vpop.f32.mrb[124].mxu0  ;;  %v2126_v60 = vadd.f32 %v2111_v33, %v7228_v57  ;;  %v5585_v34 = vpop.f32.mrb[125].mxu1  ;;  %v3907_v57 = vrot.slane %v7323_v2, 2 }
 0x1ee   : > { %v7319_v56 = vadd.f32 %v2256_v51, %v2124_v29  ;;  %v5603_v30 = vpop.f32.mrb[125].mxu0  ;;  %v2114_v48 = vpop.f32.mrb[126].mxu1  ;;  %v4031_v51 = vshrl.u32 %v7299_v32, 16 }
 0x1ef   : > { %v2259_v55 = vpop.f32.mrb[126].mxu0  ;;  %v2127_v46 = vadd.f32 %v2114_v48, %v7232_v18  ;;  %v5586_v17 = vpop.f32.mrb[127].mxu1  ;;  %v3908_v7 = vsel %vm1140_vm6, %v3905_v25, %v3907_v57  ;;  %v3910_v0 = vsel %vm1140_vm6, %v3907_v57, %v3909_v35  ;;  %v4023_v25 = vshrl.u32 %v7296_v54, 16 }
 0x1f0   : > { %v7326_v27 = vadd.f32 %v2259_v55, %v2125_v24  ;;  %v5604_v11 = vpop.f32.mrb[127].mxu0  ;;  %v3759_v24 = vsel %vm1140_vm6, %v3756_v28, %v3758_v9  ;;  %v4033_v17 = vrot.slane %v4031_v51, 2  ;;  %v4036_v57 = vrot.slane %v4034_v40, 3 }
 0x1f1   : > { %5836 = vmatmul.mubr.msk.bf16.gmra.mrb[232].mxu1 %vm522_vm3, %v3755_v39  ;;  %v4025_v39 = vrot.slane %v4023_v25, 2 }
 0x1f2   : > { %5854 = vmatmul.mubr.msk.bf16.vlgmr.msra.gmra.mrb[232].mxu0 %vm522_vm3, %v3906_v47  ;;  %5839 = vmatprep.mubr.msk.bf16.mxu1 %vm6107_vm1, %v6106_v1  ;;  %v3912_v47 = vsel %vm1140_vm6, %v3909_v35, %v3911_v53 }
 0x1f3   : > { %5896 = vmatpush3.bf16.msra.mxu0 %v4209_v19  ;;  %5857 = vmatprep.mubr.msk.bf16.mxu0 %vm6107_vm1, %v6106_v1 }
 0x1f4   : > { %v2392_v26 = vpop.f32.mrb[128].mxu1 }
 0x1f5   : > { %v2264_v50 = vpop.f32.mrb[128].mxu0  ;;  %v2431_v6 = vadd.f32 %v2392_v26, %v7248_v37  ;;  %v5613_v22 = vpop.f32.mrb[129].mxu1 }
 0x1f6   : > { %v7339_v15 = vadd.f32 %v2264_v50, %v2126_v60  ;;  %v5607_v18 = vpop.f32.mrb[129].mxu0  ;;  %v2395_v61 = vpop.f32.mrb[130].mxu1 }
 0x1f7   : > { %v2267_v12 = vpop.f32.mrb[130].mxu0  ;;  %v2432_v49 = vadd.f32 %v2395_v61, %v7255_v38  ;;  %v5614_v58 = vpop.f32.mrb[131].mxu1  ;;  %v4176_v18 = vld [vmem:[%s6330_s9 + $0x8] sm:$0x8] }
 0x1f8   : > { %v7346_v62 = vadd.f32 %v2267_v12, %v2127_v46  ;;  %v5608_v42 = vpop.f32.mrb[131].mxu0  ;;  %v5132_v58 = vcombine.low %v4176_v18, %v7284_v8 }
 0x1f9   : > { %5840 = vmatmul.mubr.msk.bf16.gmra.mrb[236].mxu1 %vm522_vm3, %v3757_v63 }
 0x1fa   : > { %5858 = vmatmul.mubr.msk.bf16.gmra.mrb[236].mxu0 %vm522_vm3, %v3908_v7  ;;  %5843 = vmatprep.mubr.msk.bf16.mxu1 %vm6107_vm1, %v6106_v1  ;;  %v4037_v7 = vor.u32 %v4036_v57, %v4033_v17  ;;  %v4182_v8 = vrot.slane %v5132_v58, 3 }
 0x1fb   : > { %5861 = vmatprep.mubr.msk.bf16.mxu0 %vm6107_vm1, %v6106_v1 }
 0x1fc   : > { %v2400_v38 = vpop.f32.mrb[132].mxu1 }
 0x1fd   : > { %v2510_v37 = vpop.f32.mrb[132].mxu0  ;;  %v2433_v29 = vadd.f32 %v2400_v38, %v7268_v43  ;;  %v5617_v21 = vpop.f32.mrb[133].mxu1  ;;  %v3760_v43 = vrot.slane %v7252_v10, 2  ;;  %v6063_v10 = vld [vmem:[%s6330_s9 + $0x30] ss:$0 sps:$4 sm:$0x33]  }
 0x1fe   : > { %v7358_v59 = vadd.f32 %v2510_v37, %v2431_v6  ;;  %v5635_v5 = vpop.f32.mrb[133].mxu0  ;;  %v2403_v20 = vpop.f32.mrb[134].mxu1  ;;  %v4040_v6 = vshrl.u32 %v7323_v2, 16 }
 0x1ff   : > { %v2513_v16 = vpop.f32.mrb[134].mxu0  ;;  %v2434_v14 = vadd.f32 %v2403_v20, %v7273_v52  ;;  %v5618_v31 = vpop.f32.mrb[135].mxu1  ;;  %v4026_v52 = vshll.u32 %v7296_v54, 16  ;;  %v3761_v54 = vsel %vm1140_vm6, %v3758_v9, %v3760_v43 }
 0x200   : > { %v7365_v13 = vadd.f32 %v2513_v16, %v2432_v49  ;;  %v5636_v36 = vpop.f32.mrb[135].mxu0 }
 0x201   : > { %5844 = vmatmul.mubr.msk.bf16.gmra.mrb[240].mxu1 %vm522_vm3, %v3759_v24  ;;  %v4028_v46 = vrot.slane %v4026_v52, 3 }
 0x202   : > { %5862 = vmatmul.mubr.msk.bf16.gmra.mrb[240].mxu0 %vm522_vm3, %v3910_v0  ;;  %5847 = vmatprep.mubr.msk.bf16.mxu1 %vm6107_vm1, %v6106_v1  ;;  %v4042_v0 = vrot.slane %v4040_v6, 2  ;;  %v6065_v6 = vld [vmem:[%s6330_s9 + $0x30] ss:$0 sps:$4 sm:$0x77]   ;;  %s5924_s9 = smul.u32 80, %s8005_s25 }
 0x203   : > { %5865 = vmatprep.mubr.msk.bf16.mxu0 %vm6107_vm1, %v6106_v1  ;;  %v4029_v12 = vor.u32 %v4028_v46, %v4025_v39  ;;  %v4070_v58 = vshll.u32 %v6065_v6, 16 }
 0x204   : > { %v2408_v33 = vpop.f32.mrb[136].mxu1  ;;  %s7601_s12 = sadd.s32 %s5924_s9, %s5923_s10 }
 0x205   : > { %v2518_v44 = vpop.f32.mrb[136].mxu0  ;;  %v2435_v60 = vadd.f32 %v2408_v33, %v7289_v41  ;;  %v5621_v34 = vpop.f32.mrb[137].mxu1  ;;  %v3913_v41 = vrot.slane %v6063_v10, 2  ;;  %v4038_v16 = vsel %vm1412_vm7, %v4029_v12, %v4037_v7  ;;  %s4895_s15 = sshll.u32 %s7601_s12, 2 }
 0x206   : > { %v7381_v45 = vadd.f32 %v2518_v44, %v2433_v29  ;;  %v5639_v30 = vpop.f32.mrb[137].mxu0  ;;  %v2411_v48 = vpop.f32.mrb[138].mxu1  ;;  %v4185_v34 = vrot.slane %v7323_v2, 3  ;;  %s7665_s20 = scalar_lea.vmem %s7950_s5, %s4895_s15 }
 0x207   : > { %v2521_v55 = vpop.f32.mrb[138].mxu0  ;;  %v2436_v50 = vadd.f32 %v2411_v48, %v7302_v3  ;;  %v5622_v28 = vpop.f32.mrb[139].mxu1  ;;  %v4043_v3 = vshll.u32 %v7323_v2, 16  ;;  %v3914_v49 = vsel %vm1140_vm6, %v3911_v53, %v3913_v41 }
 0x208   : > { %v7386_v11 = vadd.f32 %v2521_v55, %v2434_v14  ;;  %v5640_v19 = vpop.f32.mrb[139].mxu0  ;;  %v4049_v14 = vshrl.u32 %v7343_v4, 16 }
 0x209   : > { %5848 = vmatmul.mubr.msk.bf16.gmra.mrb[244].mxu1 %vm522_vm3, %v3761_v54  ;;  %v4045_v29 = vrot.slane %v4043_v3, 3  ;;  %v4058_v54 = vshrl.u32 %v7362_v23, 16 }
 0x20a   : > { %5866 = vmatmul.mubr.msk.bf16.gmra.mrb[244].mxu0 %vm522_vm3, %v3912_v47  ;;  %5875 = vmatprep.mubr.msk.bf16.mxu1 %vm6107_vm1, %v6106_v1  ;;  %v4051_v55 = vrot.slane %v4049_v14, 2  ;;  %v4189_v14 = vrot.slane %v7362_v23, 3 }
 0x20b   : > { %5869 = vmatprep.mubr.msk.bf16.mxu0 %vm6107_vm1, %v6106_v1  ;;  %v4046_v24 = vor.u32 %v4045_v29, %v4042_v0  ;;  %v4060_v12 = vrot.slane %v4058_v54, 2 }
 0x20c   : > { %v2416_v61 = vpop.f32.mrb[140].mxu1 }
 0x20d   : > { %v2526_v26 = vpop.f32.mrb[140].mxu0  ;;  %v2437_v35 = vadd.f32 %v2416_v61, %v7319_v56  ;;  %v5625_v37 = vpop.f32.mrb[141].mxu1  ;;  %v4183_v56 = vrot.slane %v7299_v32, 3  ;;  %v4047_v33 = vsel %vm1412_vm7, %v4037_v7, %v4046_v24 }
 0x20e   : > { %v7399_v22 = vadd.f32 %v2526_v26, %v2435_v60  ;;  %v5643_v42 = vpop.f32.mrb[141].mxu0  ;;  %v2419_v38 = vpop.f32.mrb[142].mxu1 }
 0x20f   : > { %v2529_v63 = vpop.f32.mrb[142].mxu0  ;;  %v2438_v21 = vadd.f32 %v2419_v38, %v7326_v27  ;;  %v5626_v36 = vpop.f32.mrb[143].mxu1  ;;  %v4052_v27 = vshll.u32 %v7343_v4, 16  ;;  %v4184_v25 = vsel %vm1573_vm8, %v4182_v8, %v4183_v56  ;;  %v4186_v57 = vsel %vm1573_vm8, %v4183_v56, %v4185_v34 }
 0x210   : > { %v7404_v9 = vadd.f32 %v2529_v63, %v2436_v50  ;;  %v5644_v5 = vpop.f32.mrb[143].mxu0  ;;  %v4072_v56 = vrot.slane %v4070_v58, 3 }
 0x211   : > { %5876 = vmatmul.mubr.msk.bf16.vlgmr.msra.gmra.mrb[248].mxu1 %vm522_vm3, %v4038_v16  ;;  %v4054_v47 = vrot.slane %v4052_v27, 3 }
 0x212   : > { %5870 = vmatmul.mubr.msk.bf16.gmra.mrb[248].mxu0 %vm522_vm3, %v3914_v49  ;;  %5879 = vmatprep.mubr.msk.bf16.mxu1 %vm6107_vm1, %v6106_v1  ;;  %v4067_v49 = vshrl.u32 %v6065_v6, 16 }
 0x213   : > { %5897 = vmatprep.mubr.msk.bf16.mxu0 %vm6107_vm1, %v6106_v1 }
 0x214   : > { %v2424_v43 = vpop.f32.mrb[144].mxu1  ;;  %v4069_v8 = vrot.slane %v4067_v49, 2 }
 0x215   : > { %v2534_v20 = vpop.f32.mrb[144].mxu0  ;;  %v2439_v32 = vadd.f32 %v2424_v43, %v7339_v15  ;;  %v5629_v52 = vpop.f32.mrb[145].mxu1  ;;  %v4055_v15 = vor.u32 %v4054_v47, %v4051_v55 }
 0x216   : > { %v7417_v31 = vadd.f32 %v2534_v20, %v2437_v35  ;;  %v5647_v53 = vpop.f32.mrb[145].mxu0  ;;  %v2427_v30 = vpop.f32.mrb[146].mxu1  ;;  %v4073_v27 = vor.u32 %v4072_v56, %v4069_v8 }
 0x217   : > { %v2537_v44 = vpop.f32.mrb[146].mxu0  ;;  %v2440_v10 = vadd.f32 %v2427_v30, %v7346_v62  ;;  %v5630_v60 = vpop.f32.mrb[147].mxu1  ;;  %v4061_v62 = vshll.u32 %v7362_v23, 16  ;;  %v4056_v18 = vsel %vm1412_vm7, %v4046_v24, %v4055_v15 }
 0x218   : > { %v7421_v51 = vadd.f32 %v2537_v44, %v2438_v21  ;;  %v5648_v40 = vpop.f32.mrb[147].mxu0 }
 0x219   : > { %5880 = vmatmul.mubr.msk.bf16.gmra.mrb[252].mxu1 %vm522_vm3, %v4047_v33  ;;  %v4063_v7 = vrot.slane %v4061_v62, 3 }
 0x21a   : > { %5898 = vmatmul.mubr.msk.bf16.vlgmr.msra.gmra.mrb[252].mxu0 %vm522_vm3, %v4184_v25  ;;  %5883 = vmatprep.mubr.msk.bf16.mxu1 %vm6107_vm1, %v6106_v1 }
 0x21b   : > { %5901 = vmatprep.mubr.msk.bf16.mxu0 %vm6107_vm1, %v6106_v1  ;;  %v4064_v63 = vor.u32 %v4063_v7, %v4060_v12 }
 0x21c   : > { %v2663_v46 = vpop.f32.mrb[148].mxu1 }
 0x21d   : > { %v2542_v19 = vpop.f32.mrb[148].mxu0  ;;  %v2702_v2 = vadd.f32 %v2663_v46, %v7358_v59  ;;  %v5657_v50 = vpop.f32.mrb[149].mxu1  ;;  %v4187_v59 = vrot.slane %v7343_v4, 3  ;;  %v4065_v36 = vsel %vm1412_vm7, %v4055_v15, %v4064_v63  ;;  %v4074_v23 = vsel %vm1412_vm7, %v4064_v63, %v4073_v27 }
 0x21e   : > { %v7434_v48 = vadd.f32 %v2542_v19, %v2439_v32  ;;  %v5651_v39 = vpop.f32.mrb[149].mxu0  ;;  %v2666_v26 = vpop.f32.mrb[150].mxu1 }
 0x21f   : > { %v2545_v17 = vpop.f32.mrb[150].mxu0  ;;  %v2703_v3 = vadd.f32 %v2666_v26, %v7365_v13  ;;  %v5658_v42 = vpop.f32.mrb[151].mxu1  ;;  %v4188_v38 = vsel %vm1573_vm8, %v4185_v34, %v4187_v59 }
 0x220   : > { %v7438_v28 = vadd.f32 %v2545_v17, %v2440_v10  ;;  %v5652_v41 = vpop.f32.mrb[151].mxu0  ;;  %v4191_v10 = vrot.slane %v6065_v6, 3 }
 0x221   : > { %5884 = vmatmul.mubr.msk.bf16.gmra.mrb[0].mxu1 %vm522_vm3, %v4056_v18 }
 0x222   : > { %5902 = vmatmul.mubr.msk.bf16.gmra.mrb[0].mxu0 %vm522_vm3, %v4186_v57  ;;  %5887 = vmatprep.mubr.msk.bf16.mxu1 %vm6107_vm1, %v6106_v1  ;;  %v4192_v54 = vsel %vm1573_vm8, %v4189_v14, %v4191_v10 }
 0x223   : > { %5905 = vmatprep.mubr.msk.bf16.mxu0 %vm6107_vm1, %v6106_v1 }
 0x224   : > { %v2671_v37 = vpop.f32.mrb[152].mxu1 }
 0x225   : > { %v2823_v61 = vpop.f32.mrb[152].mxu0  ;;  %v2704_v16 = vadd.f32 %v2671_v37, %v7381_v45  ;;  %v5661_v0 = vpop.f32.mrb[153].mxu1 }
 0x226   : > { %v7450_v35 = vadd.f32 %v2823_v61, %v2702_v2  ;;  %v5679_v13 = vpop.f32.mrb[153].mxu0  ;;  %v2674_v21 = vpop.f32.mrb[154].mxu1 }
 0x227   : > { %v2826_v5 = vpop.f32.mrb[154].mxu0  ;;  %v2705_v20 = vadd.f32 %v2674_v21, %v7386_v11  ;;  %v5662_v24 = vpop.f32.mrb[155].mxu1  ;;  %v4190_v11 = vsel %vm1573_vm8, %v4187_v59, %v4189_v14 }
 0x228   : > { %v7454_v4 = vadd.f32 %v2826_v5, %v2703_v3  ;;  %v5680_v29 = vpop.f32.mrb[155].mxu0 }
 0x229   : > { %5888 = vmatmul.mubr.msk.bf16.gmra.mrb[4].mxu1 %vm522_vm3, %v4065_v36 }
 0x22a   : > { %5906 = vmatmul.mubr.msk.bf16.gmra.mrb[4].mxu0 %vm522_vm3, %v4188_v38  ;;  %5891 = vmatprep.mubr.msk.bf16.mxu1 %vm6107_vm1, %v6106_v1 }
 0x22b   : > { %5909 = vmatprep.mubr.msk.bf16.mxu0 %vm6107_vm1, %v6106_v1 }
 0x22c   : > { %v2679_v44 = vpop.f32.mrb[156].mxu1 }
 0x22d   : > { %v2831_v45 = vpop.f32.mrb[156].mxu0  ;;  %v2706_v32 = vadd.f32 %v2679_v44, %v7399_v22  ;;  %v5665_v52 = vpop.f32.mrb[157].mxu1 }
 0x22e   : > { %v2864_v53 = vadd.f32 %v2831_v45, %v2704_v16  ;;  %v5683_v43 = vpop.f32.mrb[157].mxu0  ;;  %v2682_v33 = vpop.f32.mrb[158].mxu1 }
 0x22f   : > { %v2834_v25 = vpop.f32.mrb[158].mxu0  ;;  %v2707_v55 = vadd.f32 %v2682_v33, %v7404_v9  ;;  %v5666_v47 = vpop.f32.mrb[159].mxu1 }
 0x230   : > { %v2865_v40 = vadd.f32 %v2834_v25, %v2705_v20  ;;  %v5684_v30 = vpop.f32.mrb[159].mxu0 }
 0x231   : > { %5892 = vmatmul.mubr.msk.bf16.gmra.mrb[8].mxu1 %vm522_vm3, %v4074_v23 }
 0x232   : > { %5910 = vmatmul.mubr.msk.bf16.gmra.mrb[8].mxu0 %vm522_vm3, %v4190_v11 }
 0x233   : > { %5913 = vmatprep.mubr.msk.bf16.mxu0 %vm6107_vm1, %v6106_v1 }
 0x234   : > { %v2687_v15 = vpop.f32.mrb[160].mxu1 }
 0x235   : > { %v2839_v60 = vpop.f32.mrb[160].mxu0  ;;  %v2708_v62 = vadd.f32 %v2687_v15, %v7417_v31  ;;  %v5669_v39 = vpop.f32.mrb[161].mxu1 }
 0x236   : > { %v2866_v34 = vadd.f32 %v2839_v60, %v2706_v32  ;;  %v5687_v22 = vpop.f32.mrb[161].mxu0  ;;  %v2690_v17 = vpop.f32.mrb[162].mxu1 }
 0x237   : > { %v2842_v19 = vpop.f32.mrb[162].mxu0  ;;  %v2709_v57 = vadd.f32 %v2690_v17, %v7421_v51  ;;  %v5670_v1 = vpop.f32.mrb[163].mxu1 }
 0x238   : > { %v2867_v9 = vadd.f32 %v2842_v19, %v2707_v55  ;;  %v5688_v46 = vpop.f32.mrb[163].mxu0 }
 0x23a   : > { %5914 = vmatmul.mubr.msk.bf16.gmra.mrb[12].mxu0 %vm522_vm3, %v4192_v54 }
 0x23c   : > { %v2695_v18 = vpop.f32.mrb[164].mxu1 }
 0x23d   : > { %v2847_v2 = vpop.f32.mrb[164].mxu0  ;;  %v2710_v12 = vadd.f32 %v2695_v18, %v7434_v48  ;;  %v5673_v7 = vpop.f32.mrb[165].mxu1 }
 0x23e   : > { %v2868_v50 = vadd.f32 %v2847_v2, %v2708_v62  ;;  %v5691_v41 = vpop.f32.mrb[165].mxu0  ;;  %v2698_v31 = vpop.f32.mrb[166].mxu1 }
 0x23f   : > { %v2850_v26 = vpop.f32.mrb[166].mxu0  ;;  %v2711_v42 = vadd.f32 %v2698_v31, %v7438_v28  ;;  %v5674_v59 = vpop.f32.mrb[167].mxu1 }
 0x240   : > { %v2869_v6 = vadd.f32 %v2850_v26, %v2709_v57  ;;  %v5692_v3 = vpop.f32.mrb[167].mxu0 }
 0x244   : > { %v2941_v49 = vpop.f32.mrb[168].mxu1 }
 0x245   : > { %v2855_v61 = vpop.f32.mrb[168].mxu0  ;;  %v2980_v13 = vadd.f32 %v2941_v49, %v7450_v35  ;;  %v5701_v37 = vpop.f32.mrb[169].mxu1 }
 0x246   : > { %v2870_v63 = vadd.f32 %v2855_v61, %v2710_v12  ;;  %v5695_v51 = vpop.f32.mrb[169].mxu0  ;;  %v2944_v16 = vpop.f32.mrb[170].mxu1 }
 0x247   : > { %v2858_v58 = vpop.f32.mrb[170].mxu0  ;;  %v2981_v48 = vadd.f32 %v2944_v16, %v7454_v4  ;;  %v5702_v0 = vpop.f32.mrb[171].mxu1 }
 0x248   : > { %v2871_v5 = vadd.f32 %v2858_v58, %v2711_v42  ;;  %v5696_v38 = vpop.f32.mrb[171].mxu0 }
 0x24c   : > { %v2949_v8 = vpop.f32.mrb[172].mxu1 }
 0x24d   : > { %v3079_v29 = vpop.f32.mrb[172].mxu0  ;;  %v2982_v56 = vadd.f32 %v2949_v8, %v2864_v53  ;;  %v5705_v20 = vpop.f32.mrb[173].mxu1 }
 0x24e   : > { %v3118_v21 = vadd.f32 %v3079_v29, %v2980_v13  ;;  %v5723_v36 = vpop.f32.mrb[173].mxu0  ;;  %v2952_v45 = vpop.f32.mrb[174].mxu1 }
 0x24f   : > { %v3082_v28 = vpop.f32.mrb[174].mxu0  ;;  %v2983_v27 = vadd.f32 %v2952_v45, %v2865_v40  ;;  %v5706_v43 = vpop.f32.mrb[175].mxu1 }
 0x250   : > { %v3119_v24 = vadd.f32 %v3082_v28, %v2981_v48  ;;  %v5724_v14 = vpop.f32.mrb[175].mxu0 }
 0x254   : > { %v2957_v11 = vpop.f32.mrb[176].mxu1 }
 0x255   : > { %v3087_v35 = vpop.f32.mrb[176].mxu0  ;;  %v2984_v52 = vadd.f32 %v2957_v11, %v2866_v34  ;;  %v5709_v4 = vpop.f32.mrb[177].mxu1 }
 0x256   : > { %v3120_v44 = vadd.f32 %v3087_v35, %v2982_v56  ;;  %v5727_v25 = vpop.f32.mrb[177].mxu0  ;;  %v2960_v23 = vpop.f32.mrb[178].mxu1 }
 0x257   : > { %v3090_v32 = vpop.f32.mrb[178].mxu0  ;;  %v2985_v55 = vadd.f32 %v2960_v23, %v2867_v9  ;;  %v5710_v47 = vpop.f32.mrb[179].mxu1 }
 0x258   : > { %v3121_v30 = vadd.f32 %v3090_v32, %v2983_v27  ;;  %v5728_v33 = vpop.f32.mrb[179].mxu0 }
 0x25c   : > { %v2965_v22 = vpop.f32.mrb[180].mxu1 }
 0x25d   : > { %v3095_v10 = vpop.f32.mrb[180].mxu0  ;;  %v2986_v19 = vadd.f32 %v2965_v22, %v2868_v50  ;;  %v5713_v40 = vpop.f32.mrb[181].mxu1 }
 0x25e   : > { %v3122_v53 = vadd.f32 %v3095_v10, %v2984_v52  ;;  %v5731_v60 = vpop.f32.mrb[181].mxu0  ;;  %v2968_v39 = vpop.f32.mrb[182].mxu1 }
 0x25f   : > { %v3098_v15 = vpop.f32.mrb[182].mxu0  ;;  %v2987_v46 = vadd.f32 %v2968_v39, %v2869_v6  ;;  %v5714_v17 = vpop.f32.mrb[183].mxu1 }
 0x260   : > { %v3123_v54 = vadd.f32 %v3098_v15, %v2985_v55  ;;  %v5732_v62 = vpop.f32.mrb[183].mxu0 }
 0x264   : > { %v2973_v2 = vpop.f32.mrb[184].mxu1 }
 0x265   : > { %v3103_v57 = vpop.f32.mrb[184].mxu0  ;;  %v2988_v18 = vadd.f32 %v2973_v2, %v2870_v63  ;;  %v5717_v9 = vpop.f32.mrb[185].mxu1 }
 0x266   : > { %v3124_v34 = vadd.f32 %v3103_v57, %v2986_v19  ;;  %v5735_v1 = vpop.f32.mrb[185].mxu0  ;;  %v2976_v7 = vpop.f32.mrb[186].mxu1 }
 0x267   : > { %v3106_v41 = vpop.f32.mrb[186].mxu0  ;;  %v2989_v3 = vadd.f32 %v2976_v7, %v2871_v5  ;;  %v5718_v31 = vpop.f32.mrb[187].mxu1 }
 0x268   : > { %v3125_v26 = vadd.f32 %v3106_v41, %v2987_v46  ;;  %v5736_v12 = vpop.f32.mrb[187].mxu0 }
 0x26c   : > { %v3265_v61 = vpop.f32.mrb[188].mxu1 }
 0x26d   : > { %v3111_v42 = vpop.f32.mrb[188].mxu0  ;;  %v3304_v49 = vadd.f32 %v3265_v61, %v3118_v21  ;;  %v5745_v6 = vpop.f32.mrb[189].mxu1 }
 0x26e   : > { %v3126_v50 = vadd.f32 %v3111_v42, %v2988_v18  ;;  %v5739_v59 = vpop.f32.mrb[189].mxu0  ;;  %v3268_v37 = vpop.f32.mrb[190].mxu1 }
 0x26f   : > { %v3114_v51 = vpop.f32.mrb[190].mxu0  ;;  %v3305_v38 = vadd.f32 %v3268_v37, %v3119_v24  ;;  %v5746_v16 = vpop.f32.mrb[191].mxu1 }
 0x270   : > { %v3127_v58 = vadd.f32 %v3114_v51, %v2989_v3  ;;  %v5740_v13 = vpop.f32.mrb[191].mxu0 }
 0x274   : > { %v3273_v29 = vpop.f32.mrb[192].mxu1 }
 0x275   : > { %v3383_v48 = vpop.f32.mrb[192].mxu0  ;;  %v3306_v8 = vadd.f32 %v3273_v29, %v3120_v44  ;;  %v5749_v5 = vpop.f32.mrb[193].mxu1 }
 0x276   : > { %v3422_v63 = vadd.f32 %v3383_v48, %v3304_v49  ;;  %v5767_v0 = vpop.f32.mrb[193].mxu0  ;;  %v3276_v20 = vpop.f32.mrb[194].mxu1 }
 0x277   : > { %v3386_v36 = vpop.f32.mrb[194].mxu0  ;;  %v3307_v14 = vadd.f32 %v3276_v20, %v3121_v30  ;;  %v5750_v45 = vpop.f32.mrb[195].mxu1 }
 0x278   : > { %v3423_v28 = vadd.f32 %v3386_v36, %v3305_v38  ;;  %v5768_v56 = vpop.f32.mrb[195].mxu0 }
 0x27c   : > { %v3281_v35 = vpop.f32.mrb[196].mxu1 }
 0x27d   : > { %v3391_v27 = vpop.f32.mrb[196].mxu0  ;;  %v3308_v11 = vadd.f32 %v3281_v35, %v3122_v53  ;;  %v5753_v24 = vpop.f32.mrb[197].mxu1 }
 0x27e   : > { %v3424_v21 = vadd.f32 %v3391_v27, %v3306_v8  ;;  %v5771_v43 = vpop.f32.mrb[197].mxu0  ;;  %v3284_v4 = vpop.f32.mrb[198].mxu1 }
 0x27f   : > { %v3394_v25 = vpop.f32.mrb[198].mxu0  ;;  %v3309_v33 = vadd.f32 %v3284_v4, %v3123_v54  ;;  %v5754_v23 = vpop.f32.mrb[199].mxu1 }
 0x280   : > { %v3425_v32 = vadd.f32 %v3394_v25, %v3307_v14  ;;  %v5772_v52 = vpop.f32.mrb[199].mxu0 }
 0x284   : > { %v3289_v10 = vpop.f32.mrb[200].mxu1 }
 0x285   : > { %v3399_v55 = vpop.f32.mrb[200].mxu0  ;;  %v3310_v22 = vadd.f32 %v3289_v10, %v3124_v34  ;;  %v5757_v30 = vpop.f32.mrb[201].mxu1 }
 0x286   : > { %v3426_v44 = vadd.f32 %v3399_v55, %v3308_v11  ;;  %v5775_v47 = vpop.f32.mrb[201].mxu0  ;;  %v3292_v40 = vpop.f32.mrb[202].mxu1 }
 0x287   : > { %v3402_v60 = vpop.f32.mrb[202].mxu0  ;;  %v3311_v62 = vadd.f32 %v3292_v40, %v3125_v26  ;;  %v5758_v39 = vpop.f32.mrb[203].mxu1 }
 0x288   : > { %v3427_v15 = vadd.f32 %v3402_v60, %v3309_v33  ;;  %v5776_v19 = vpop.f32.mrb[203].mxu0 }
 0x28c   : > { %v3297_v57 = vpop.f32.mrb[204].mxu1 }
 0x28d   : > { %v3407_v46 = vpop.f32.mrb[204].mxu0  ;;  %v3312_v2 = vadd.f32 %v3297_v57, %v3126_v50  ;;  %v5761_v54 = vpop.f32.mrb[205].mxu1 }
 0x28e   : > { %v3428_v53 = vadd.f32 %v3407_v46, %v3310_v22  ;;  %v5779_v17 = vpop.f32.mrb[205].mxu0  ;;  %v3300_v9 = vpop.f32.mrb[206].mxu1 }
 0x28f   : > { %v3410_v1 = vpop.f32.mrb[206].mxu0  ;;  %v3313_v12 = vadd.f32 %v3300_v9, %v3127_v58  ;;  %v5762_v7 = vpop.f32.mrb[207].mxu1 }
 0x290   : > { %v3429_v41 = vadd.f32 %v3410_v1, %v3311_v62  ;;  %v5780_v18 = vpop.f32.mrb[207].mxu0 }
 0x294   : > { %v3536_v42 = vpop.f32.mrb[208].mxu1 }
 0x295   : > { %v3415_v3 = vpop.f32.mrb[208].mxu0  ;;  %v3575_v61 = vadd.f32 %v3536_v42, %v3422_v63  ;;  %v5789_v26 = vpop.f32.mrb[209].mxu1 }
 0x296   : > { %v3430_v34 = vadd.f32 %v3415_v3, %v3312_v2  ;;  %v5783_v31 = vpop.f32.mrb[209].mxu0  ;;  %v3539_v6 = vpop.f32.mrb[210].mxu1 }
 0x297   : > { %v3418_v59 = vpop.f32.mrb[210].mxu0  ;;  %v3576_v13 = vadd.f32 %v3539_v6, %v3423_v28  ;;  %v5790_v37 = vpop.f32.mrb[211].mxu1 }
 0x298   : > { %v3431_v51 = vadd.f32 %v3418_v59, %v3313_v12  ;;  %v5784_v49 = vpop.f32.mrb[211].mxu0 }
 0x29c   : > { %v3544_v48 = vpop.f32.mrb[212].mxu1 }
 0x29d   : > { %v3696_v38 = vpop.f32.mrb[212].mxu0  ;;  %v3577_v29 = vadd.f32 %v3544_v48, %v3424_v21  ;;  %v5793_v58 = vpop.f32.mrb[213].mxu1 }
 0x29e   : > { %v3735_v50 = vadd.f32 %v3696_v38, %v3575_v61  ;;  %v5811_v16 = vpop.f32.mrb[213].mxu0  ;;  %v3547_v5 = vpop.f32.mrb[214].mxu1 }
 0x29f   : > { %v3699_v0 = vpop.f32.mrb[214].mxu0  ;;  %v3578_v56 = vadd.f32 %v3547_v5, %v3425_v32  ;;  %v5794_v20 = vpop.f32.mrb[215].mxu1 }
 0x2a0   : > { %v3736_v36 = vadd.f32 %v3699_v0, %v3576_v13  ;;  %v5812_v8 = vpop.f32.mrb[215].mxu0  ;;  %v4372_v13 = vlaneseq }
 0x2a2   : > { %v7491_v8 = vshrl.u32 %v4372_v13, 7 }
 0x2a4   : > { %v3552_v27 = vpop.f32.mrb[216].mxu1 }
 0x2a5   : > { %v3704_v14 = vpop.f32.mrb[216].mxu0  ;;  %v3579_v35 = vadd.f32 %v3552_v27, %v3426_v44  ;;  %v5797_v28 = vpop.f32.mrb[217].mxu1 }
 0x2a6   : > { %v3737_v63 = vadd.f32 %v3704_v14, %v3577_v29  ;;  %v5815_v45 = vpop.f32.mrb[217].mxu0  ;;  %v3555_v24 = vpop.f32.mrb[218].mxu1 }
 0x2a7   : > { %v3707_v43 = vpop.f32.mrb[218].mxu0  ;;  %v3580_v52 = vadd.f32 %v3555_v24, %v3427_v15  ;;  %v5798_v4 = vpop.f32.mrb[219].mxu1 }
 0x2a8   : > { %v3738_v25 = vadd.f32 %v3707_v43, %v3578_v56  ;;  %v5816_v11 = vpop.f32.mrb[219].mxu0 }
 0x2ac   : > { %v3560_v55 = vpop.f32.mrb[220].mxu1 }
 0x2ad   : > { %v3712_v33 = vpop.f32.mrb[220].mxu0  ;;  %v3581_v10 = vadd.f32 %v3560_v55, %v3428_v53  ;;  %v5801_v32 = vpop.f32.mrb[221].mxu1 }
 0x2ae   : > { %v3739_v21 = vadd.f32 %v3712_v33, %v3579_v35  ;;  %v5819_v23 = vpop.f32.mrb[221].mxu0  ;;  %v3563_v30 = vpop.f32.mrb[222].mxu1 }
 0x2af   : > { %v3715_v47 = vpop.f32.mrb[222].mxu0  ;;  %v3582_v19 = vadd.f32 %v3563_v30, %v3429_v41  ;;  %v5802_v40 = vpop.f32.mrb[223].mxu1 }
 0x2b0   : > { %v3740_v60 = vadd.f32 %v3715_v47, %v3580_v52  ;;  %v5820_v22 = vpop.f32.mrb[223].mxu0  ;;  %v7499_v24 = vmul.u32.u64.low 3435973837, %v7491_v8  ;;  %v7500_v52 = vmul.u32.u64.high 3435973837, %v7491_v8, %v7499_v24  ;;  %v4375_v47 = vadd.s32 16, %v7491_v8 }
 0x2b1   : > { %v7509_v22 = vadd.s32 24, %v7491_v8 }
 0x2b4   : > { %v3568_v46 = vpop.f32.mrb[224].mxu1 }
 0x2b5   : > { %v3720_v62 = vpop.f32.mrb[224].mxu0  ;;  %v3583_v57 = vadd.f32 %v3568_v46, %v3430_v34  ;;  %v5805_v15 = vpop.f32.mrb[225].mxu1 }
 0x2b6   : > { %v3741_v44 = vadd.f32 %v3720_v62, %v3581_v10  ;;  %v5823_v39 = vpop.f32.mrb[225].mxu0  ;;  %v3571_v54 = vpop.f32.mrb[226].mxu1  ;;  %v7511_v40 = vmul.u32.u64.low 3435973837, %v4375_v47  ;;  %v7512_v62 = vmul.u32.u64.high 3435973837, %v4375_v47, %v7511_v40 }
 0x2b7   : > { %v3723_v17 = vpop.f32.mrb[226].mxu0  ;;  %v3584_v18 = vadd.f32 %v3571_v54, %v3431_v51  ;;  %v5806_v9 = vpop.f32.mrb[227].mxu1  ;;  %v7519_v54 = vadd.s32 32, %v7491_v8 }
 0x2b8   : > { %v7481_v1 = vadd.f32 %v3723_v17, %v3582_v19  ;;  %v5824_v2 = vpop.f32.mrb[227].mxu0 }
 0x2bc   : > { %v3814_v3 = vpop.f32.mrb[228].mxu1 }
 0x2bd   : > { %v3728_v53 = vpop.f32.mrb[228].mxu0  ;;  %v3853_v31 = vadd.f32 %v3814_v3, %v3735_v50  ;;  %v5833_v42 = vpop.f32.mrb[229].mxu1 }
 0x2be   : > { %v7483_v12 = vadd.f32 %v3728_v53, %v3583_v57  ;;  %v5827_v7 = vpop.f32.mrb[229].mxu0  ;;  %v3817_v26 = vpop.f32.mrb[230].mxu1  ;;  %v4389_v57 = vshrl.u32 %v7500_v52, 3  ;;  %v7560_v52 = vadd.s32 48, %v7491_v8 }
 0x2bf   : > { %v3731_v41 = vpop.f32.mrb[230].mxu0  ;;  %v3854_v34 = vadd.f32 %v3817_v26, %v3736_v36  ;;  %v5834_v49 = vpop.f32.mrb[231].mxu1  ;;  %v4374_v36 = vadd.s32 8, %v7491_v8  ;;  %v7523_v53 = vmul.u32.u64.low 3435973837, %v7509_v22  ;;  %v7524_v7 = vmul.u32.u64.high 3435973837, %v7509_v22, %v7523_v53 }
 0x2c0   : > { %v7485_v59 = vadd.f32 %v3731_v41, %v3584_v18  ;;  %v5828_v61 = vpop.f32.mrb[231].mxu0 }
 0x2c4   : > { %v3822_v38 = vpop.f32.mrb[232].mxu1 }
 0x2c5   : > { %v3967_v6 = vpop.f32.mrb[232].mxu0  ;;  %v3855_v48 = vadd.f32 %v3822_v38, %v3737_v63  ;;  %v5837_v0 = vpop.f32.mrb[233].mxu1 }
 0x2c6   : > { %v7487_v37 = vadd.f32 %v3967_v6, %v3853_v31  ;;  %v5855_v51 = vpop.f32.mrb[233].mxu0  ;;  %v3825_v50 = vpop.f32.mrb[234].mxu1  ;;  %v7527_v31 = vmul.u32.u64.low 3435973837, %v7519_v54  ;;  %v7528_v42 = vmul.u32.u64.high 3435973837, %v7519_v54, %v7527_v31  ;;  %v4411_v6 = vshrl.u32 %v7512_v62, 3 }
 0x2c7   : > { %v3970_v16 = vpop.f32.mrb[234].mxu0  ;;  %v3856_v5 = vadd.f32 %v3825_v50, %v3738_v25  ;;  %v5838_v56 = vpop.f32.mrb[235].mxu1  ;;  %v7502_v25 = vmul.u32.u64.low 3435973837, %v4374_v36  ;;  %v7503_v33 = vmul.u32.u64.high 3435973837, %v4374_v36, %v7502_v25 }
 0x2c8   : > { %v7489_v29 = vadd.f32 %v3970_v16, %v3854_v34  ;;  %v5856_v58 = vpop.f32.mrb[235].mxu0  ;;  %v7533_v34 = vadd.s32 40, %v7491_v8  ;;  %v4422_v56 = vshrl.u32 %v7524_v7, 3 }
 0x2c9   : > { %v4400_v2 = vshrl.u32 %v7503_v33, 3 }
 0x2cb   : > { %v4401_v41 = vmul.u32 10, %v4400_v2  ;;  %v7606_v2 = vld [vmem:[%s7949_s4] ss:$0 sm:$0xff] }
 0x2cc   : > { %v3830_v27 = vpop.f32.mrb[236].mxu1 }
 0x2cd   : > { %v3975_v20 = vpop.f32.mrb[236].mxu0  ;;  %v3857_v35 = vadd.f32 %v3830_v27, %v3739_v21  ;;  %v5841_v28 = vpop.f32.mrb[237].mxu1  ;;  %v7541_v58 = vsub.s32 %v4374_v36, %v4401_v41 }
 0x2ce   : > { %v7494_v14 = vadd.f32 %v3975_v20, %v3855_v48  ;;  %v5859_v45 = vpop.f32.mrb[237].mxu0  ;;  %v3833_v4 = vpop.f32.mrb[238].mxu1 }
 0x2cf   : > { %v3978_v43 = vpop.f32.mrb[238].mxu0  ;;  %v3858_v23 = vadd.f32 %v3833_v4, %v3740_v60  ;;  %v5842_v55 = vpop.f32.mrb[239].mxu1  ;;  %v7546_v20 = vmul.u32.u64.low 3435973837, %v7533_v34  ;;  %v7547_v45 = vmul.u32.u64.high 3435973837, %v7533_v34, %v7546_v20  ;;  %vm4494_vm11 = vcmp.ne.s32.totalorder %v7541_v58, 0 }
 0x2d0   : > { %v7496_v63 = vadd.f32 %v3978_v43, %v3856_v5  ;;  %v5860_v11 = vpop.f32.mrb[239].mxu0  ;;  %v4433_v43 = vshrl.u32 %v7528_v42, 3  ;;  %vm4504_vm12 = vcmp.lt.s32.totalorder %v7541_v58, 0 }
 0x2d1   : > { %vm7578_vm14 = vmand %vm4504_vm12, %vm4494_vm11 }
 0x2d4   : > { %v3838_v30 = vpop.f32.mrb[240].mxu1 }
 0x2d5   : > { %v3983_v10 = vpop.f32.mrb[240].mxu0  ;;  %v3859_v39 = vadd.f32 %v3838_v30, %v3741_v44  ;;  %v5845_v46 = vpop.f32.mrb[241].mxu1  ;;  %v4390_v44 = vmul.u32 10, %v4389_v57  ;;  %v4434_v30 = vmul.u32 10, %v4433_v43 }
 0x2d6   : > { %v7506_v32 = vadd.f32 %v3983_v10, %v3857_v35  ;;  %v5863_v21 = vpop.f32.mrb[241].mxu0  ;;  %v3841_v15 = vpop.f32.mrb[242].mxu1  ;;  %v4444_v46 = vshrl.u32 %v7547_v45, 3 }
 0x2d7   : > { %v3986_v19 = vpop.f32.mrb[242].mxu0  ;;  %v3860_v18 = vadd.f32 %v3841_v15, %v7481_v1  ;;  %v5846_v9 = vpop.f32.mrb[243].mxu1  ;;  %v4391_v0 = vsub.s32 %v7491_v8, %v4390_v44 }
 0x2d8   : > { %v7514_v17 = vadd.f32 %v3986_v19, %v3858_v23  ;;  %v5864_v60 = vpop.f32.mrb[243].mxu0  ;;  %v7583_v19 = vadd.s32 56, %v7491_v8  ;;  %v7612_v9 = vsub.s32 %v7519_v54, %v4434_v30  ;;  %v4445_v31 = vmul.u32 10, %v4444_v46 }
 0x2d9   : > { %vm4493_vm9 = vcmp.ne.s32.totalorder %v4391_v0, 0  ;;  %vm4503_vm10 = vcmp.lt.s32.totalorder %v4391_v0, 0  ;;  %v4523_v10 = vadd.s32 10, %v4391_v0 }
 0x2da   : > { %vm7568_vm13 = vmand %vm4503_vm10, %vm4493_vm9  ;;  %v7593_v60 = vmul.u32.u64.low 3435973837, %v7560_v52  ;;  %v7594_v57 = vmul.u32.u64.high 3435973837, %v7560_v52, %v7593_v60  ;;  %v7615_v53 = vmul.u32.u64.low 3435973837, %v7583_v19  ;;  %v7616_v7 = vmul.u32.u64.high 3435973837, %v7583_v19, %v7615_v53 }
 0x2db   : > { %v4533_v15 = vsel %vm7568_vm13, %v4523_v10, %v4391_v0  ;;  %vm4497_vm9 = vcmp.ne.s32.totalorder %v7612_v9, 0  ;;  %vm4507_vm10 = vcmp.lt.s32.totalorder %v7612_v9, 0 }
 0x2dc   : > { %v3846_v1 = vpop.f32.mrb[244].mxu1  ;;  %vm7624_vm6 = vcmp.lt.s32.totalorder %v4533_v15, 8  ;;  %vm7700_vm11 = vmand %vm4507_vm10, %vm4497_vm9 }
 0x2dd   : > { %v3991_v3 = vpop.f32.mrb[244].mxu0  ;;  %v3861_v13 = vadd.f32 %v3846_v1, %v7483_v12  ;;  %v5849_v51 = vpop.f32.mrb[245].mxu1  ;;  %v4412_v12 = vmul.u32 10, %v4411_v6  ;;  %v7629_v1 = vadd.s32 64, %v7491_v8 }
 0x2de   : > { %v7530_v61 = vadd.f32 %v3991_v3, %v3859_v39  ;;  %v5867_v26 = vpop.f32.mrb[245].mxu0  ;;  %v3849_v48 = vpop.f32.mrb[246].mxu1 }
 0x2df   : > { %v3994_v49 = vpop.f32.mrb[246].mxu0  ;;  %v3862_v50 = vadd.f32 %v3849_v48, %v7485_v59  ;;  %v5850_v5 = vpop.f32.mrb[247].mxu1  ;;  %v4423_v59 = vmul.u32 10, %v4422_v56  ;;  %v7557_v24 = vsub.s32 %v4375_v47, %v4412_v12  ;;  %v4524_v47 = vadd.s32 10, %v7541_v58 }
 0x2e0   : > { %v7537_v38 = vadd.f32 %v3994_v49, %v3860_v18  ;;  %v5868_v16 = vpop.f32.mrb[247].mxu0  ;;  %v7653_v5 = vadd.s32 72, %v7491_v8  ;;  %v4455_v8 = vshrl.u32 %v7594_v57, 3 }
 0x2e1   : > { %v7587_v39 = vsub.s32 %v7509_v22, %v4423_v59  ;;  %vm4495_vm15 = vcmp.ne.s32.totalorder %v7557_v24, 0  ;;  %vm4505_vm0 = vcmp.lt.s32.totalorder %v7557_v24, 0  ;;  %v7609_v18 = vadd.s32 10, %v7557_v24 }
 0x2e2   : > { %vm7618_vm1 = vmand %vm4505_vm0, %vm4495_vm15  ;;  %v4456_v46 = vmul.u32 10, %v4455_v8 }
 0x2e3   : > { %vm4496_vm2 = vcmp.ne.s32.totalorder %v7587_v39, 0  ;;  %vm4506_vm4 = vcmp.lt.s32.totalorder %v7587_v39, 0  ;;  %v4526_v48 = vadd.s32 10, %v7587_v39 }
 0x2e4   : > { %v4127_v28 = vpop.f32.mrb[248].mxu1  ;;  %vm7647_vm8 = vmand %vm4506_vm4, %vm4496_vm2 }
 0x2e5   : > { %v3999_v27 = vpop.f32.mrb[248].mxu0  ;;  %v4166_v4 = vadd.f32 %v4127_v28, %v7487_v37  ;;  %v5877_v25 = vpop.f32.mrb[249].mxu1  ;;  %v4536_v28 = vsel %vm7647_vm8, %v4526_v48, %v7587_v39 }
 0x2e6   : > { %v7553_v36 = vadd.f32 %v3999_v27, %v3861_v13  ;;  %v5871_v35 = vpop.f32.mrb[249].mxu0  ;;  %v4130_v21 = vpop.f32.mrb[250].mxu1  ;;  %v7660_v27 = vsub.s32 %v7533_v34, %v4445_v31  ;;  %vm7732_vm0 = vcmp.lt.s32.totalorder %v4536_v28, 8 }
 0x2e7   : > { %v4002_v11 = vpop.f32.mrb[250].mxu0  ;;  %v4167_v40 = vadd.f32 %v4130_v21, %v7489_v29  ;;  %v5878_v62 = vpop.f32.mrb[251].mxu1  ;;  %v4534_v29 = vsel %vm7578_vm14, %v4524_v47, %v7541_v58  ;;  %v7670_v43 = vmul.u32.u64.low 3435973837, %v7629_v1  ;;  %v7671_v35 = vmul.u32.u64.high 3435973837, %v7629_v1, %v7670_v43 }
 0x2e8   : > { %v7563_v33 = vadd.f32 %v4002_v11, %v3862_v50  ;;  %v5872_v23 = vpop.f32.mrb[251].mxu0  ;;  %vm7635_vm7 = vcmp.lt.s32.totalorder %v4534_v29, 8  ;;  %v4535_v50 = vsel %vm7618_vm1, %v7609_v18, %v7557_v24  ;;  %v4527_v24 = vadd.s32 10, %v7612_v9 }
 0x2e9   : > { %v7686_v25 = vmul.u32.u64.low 3435973837, %v7653_v5  ;;  %v7687_v23 = vmul.u32.u64.high 3435973837, %v7653_v5, %v7686_v25  ;;  %vm4498_vm12 = vcmp.ne.s32.totalorder %v7660_v27, 0  ;;  %vm4508_vm13 = vcmp.lt.s32.totalorder %v7660_v27, 0 }
 0x2ea   : > { %vm7712_vm14 = vcmp.lt.s32.totalorder %v4535_v50, 8  ;;  %vm7728_vm15 = vmand %vm4508_vm13, %vm4498_vm12 }
 0x2ec   : > { %v4135_v42 = vpop.f32.mrb[252].mxu1 }
 0x2ed   : > { %v4245_v22 = vpop.f32.mrb[252].mxu0  ;;  %v4168_v49 = vadd.f32 %v4135_v42, %v7494_v14  ;;  %v5881_v13 = vpop.f32.mrb[253].mxu1 }
 0x2ee   : > { %v4284_v44 = vadd.f32 %v4245_v22, %v4166_v4  ;;  %v5899_v3 = vpop.f32.mrb[253].mxu0  ;;  %v4138_v0 = vpop.f32.mrb[254].mxu1  ;;  %v4466_v4 = vshrl.u32 %v7616_v7, 3 }
 0x2ef   : > { %v4248_v26 = vpop.f32.mrb[254].mxu0  ;;  %v4169_v20 = vadd.f32 %v4138_v0, %v7496_v63  ;;  %v5882_v12 = vpop.f32.mrb[255].mxu1  ;;  %v4528_v3 = vadd.s32 10, %v7660_v27 }
 0x2f0   : > { %v4301_v6 = vadd.f32 %v7606_v2, %v4284_v44  ;;  %v4285_v51 = vadd.f32 %v4248_v26, %v4167_v40  ;;  %v5900_v16 = vpop.f32.mrb[255].mxu0  ;;  %v4537_v44 = vsel %vm7700_vm11, %v4527_v24, %v7612_v9  ;;  %v4467_v41 = vmul.u32 10, %v4466_v4 }
 0x2f1   : > { %vm7747_vm1 = vcmp.lt.s32.totalorder %v4537_v44, 8 }
 0x2f2   : > { %v7655_v56 = vmax.f32 %v4301_v6, 0.0  ;;  %v4302_v45 = vadd.f32 %v7606_v2, %v4285_v51  ;;  %v7737_v6 = vsub.s32 %v7560_v52, %v4456_v46  ;;  %v4538_v52 = vsel %vm7728_vm15, %v4528_v3, %v7660_v27 }
 0x2f3   : > { %v7756_v14 = vsub.s32 %v7583_v19, %v4467_v41  ;;  %vm7788_vm11 = vcmp.lt.s32.totalorder %v4538_v52, 8 }
 0x2f4   : > { %v5151_v63 = vpack.c.bf16 %v7655_v56, %v7655_v56  ;;  %v4573_v34 = vsel %vm7624_vm6, %v7655_v56, 0.0  ;;  %v7678_v59 = vmax.f32 %v4302_v45, 0.0  ;;  %v4143_v62 = vpop.f32.mrb[0].mxu1  ;;  %vm4499_vm2 = vcmp.ne.s32.totalorder %v7737_v6, 0 }
 0x2f5   : > { %v4253_v11 = vpop.f32.mrb[0].mxu0  ;;  %v4583_v30 = vsel %vm522_vm3, %v4573_v34, 0.0  ;;  %v4170_v57 = vadd.f32 %v4143_v62, %v7506_v32  ;;  %v5885_v29 = vpop.f32.mrb[1].mxu1  ;;  %vm4509_vm4 = vcmp.lt.s32.totalorder %v7737_v6, 0  ;;  %vm4500_vm8 = vcmp.ne.s32.totalorder %v7756_v14, 0 }
 0x2f6   : > { %4362 = vst.msk [vmem:[%s7665_s20] sm:$0xf] %vm4361_vm5, %v5151_v63  ;;  %v5152_v55 = vpack.c.bf16 %v7678_v59, %v7678_v59  ;;  %v4574_v10 = vsel %vm7635_vm7, %v7678_v59, 0.0  ;;  %v4286_v47 = vadd.f32 %v4253_v11, %v4168_v49  ;;  %v5903_v21 = vpop.f32.mrb[1].mxu0  ;;  %v4146_v7 = vpop.f32.mrb[2].mxu1  ;;  %vm4510_vm9 = vcmp.lt.s32.totalorder %v7756_v14, 0  ;;  %vm7784_vm10 = vmand %vm4509_vm4, %vm4499_vm2 }
 0x2f7   : > { %v4584_v40 = vsel %vm522_vm3, %v4574_v10, 0.0  ;;  %v4256_v39 = vpop.f32.mrb[2].mxu0  ;;  %v4171_v32 = vadd.f32 %v4146_v7, %v7514_v17  ;;  %v5886_v26 = vpop.f32.mrb[3].mxu1  ;;  %v4477_v17 = vshrl.u32 %v7671_v35, 3  ;;  %v4529_v10 = vadd.s32 10, %v7737_v6  ;;  %vm7801_vm12 = vmand %vm4510_vm9, %vm4500_vm8 }
 0x2f8   : > { %4363 = vst.msk [vmem:[%s7665_s20 + $0x4] sm:$0xf] %vm4361_vm5, %v5152_v55  ;;  %v4585_v60 = vadd.f32 %v4584_v40, %v4583_v30  ;;  %v4303_v15 = vadd.f32 %v7606_v2, %v4286_v47  ;;  %v4287_v22 = vadd.f32 %v4256_v39, %v4169_v20  ;;  %v5904_v18 = vpop.f32.mrb[3].mxu0  ;;  %v4488_v20 = vshrl.u32 %v7687_v23, 3 }
 0x2f9   : > { %v4478_v19 = vmul.u32 10, %v4477_v17  ;;  %v4530_v39 = vadd.s32 10, %v7756_v14 }
 0x2fa   : > { %v7720_v31 = vmax.f32 %v4303_v15, 0.0  ;;  %v4304_v42 = vadd.f32 %v7606_v2, %v4287_v22  ;;  %v4489_v47 = vmul.u32 10, %v4488_v20 }
 0x2fb   : > { %v4479_v46 = vsub.s32 %v7629_v1, %v4478_v19  ;;  %v4539_v1 = vsel %vm7784_vm10, %v4529_v10, %v7737_v6 }
 0x2fc   : > { %v5153_v13 = vpack.c.bf16 %v7720_v31, %v7720_v31  ;;  %v4575_v51 = vsel %vm7712_vm14, %v7720_v31, 0.0  ;;  %v7745_v16 = vmax.f32 %v4304_v42, 0.0  ;;  %v4151_v27 = vpop.f32.mrb[4].mxu1  ;;  %v4490_v18 = vsub.s32 %v7653_v5, %v4489_v47 }
 0x2fd   : > { %v4586_v0 = vsel %vm522_vm3, %v4575_v51, 0.0  ;;  %v4261_v50 = vpop.f32.mrb[4].mxu0  ;;  %v4172_v11 = vadd.f32 %v4151_v27, %v7530_v61  ;;  %v5889_v4 = vpop.f32.mrb[5].mxu1  ;;  %v4540_v5 = vsel %vm7801_vm12, %v4530_v39, %v7756_v14  ;;  %vm4501_vm13 = vcmp.ne.s32.totalorder %v4479_v46, 0 }
 0x2fe   : > { %4364 = vst.msk [vmem:[%s7665_s20 + $0x8] sm:$0xf] %vm4361_vm5, %v5153_v13  ;;  %v4587_v45 = vadd.f32 %v4586_v0, %v4585_v60  ;;  %v5154_v12 = vpack.c.bf16 %v7745_v16, %v7745_v16  ;;  %v4576_v8 = vsel %vm7732_vm0, %v7745_v16, 0.0  ;;  %v4288_v43 = vadd.f32 %v4261_v50, %v4170_v57  ;;  %v5907_v35 = vpop.f32.mrb[5].mxu0  ;;  %v4154_v55 = vpop.f32.mrb[6].mxu1 }
 0x2ff   : > { %v4588_v63 = vsel %vm522_vm3, %v4576_v8, 0.0  ;;  %v4264_v34 = vpop.f32.mrb[6].mxu0  ;;  %v4173_v37 = vadd.f32 %v4154_v55, %v7537_v38  ;;  %v5890_v30 = vpop.f32.mrb[7].mxu1  ;;  %vm4511_vm15 = vcmp.lt.s32.totalorder %v4479_v46, 0  ;;  %vm7825_vm2 = vcmp.lt.s32.totalorder %v4539_v1, 8 }
 0x300   : > { %4365 = vst.msk [vmem:[%s7665_s20 + $0xc] sm:$0xf] %vm4361_vm5, %v5154_v12  ;;  %v4589_v28 = vadd.f32 %v4588_v63, %v4587_v45  ;;  %v4305_v24 = vadd.f32 %v7606_v2, %v4288_v43  ;;  %v4289_v25 = vadd.f32 %v4264_v34, %v4171_v32  ;;  %v5908_v23 = vpop.f32.mrb[7].mxu0  ;;  %v4531_v45 = vadd.s32 10, %v4479_v46  ;;  %vm7833_vm8 = vmand %vm4511_vm15, %vm4501_vm13 }
 0x301   : > { %vm4502_vm4 = vcmp.ne.s32.totalorder %v4490_v18, 0  ;;  %vm4512_vm9 = vcmp.lt.s32.totalorder %v4490_v18, 0  ;;  %vm7837_vm10 = vcmp.lt.s32.totalorder %v4540_v5, 8  ;;  %v4532_v34 = vadd.s32 10, %v4490_v18 }
 0x302   : > { %v7776_v21 = vmax.f32 %v4305_v24, 0.0  ;;  %v4306_v61 = vadd.f32 %v7606_v2, %v4289_v25  ;;  %vm7847_vm12 = vmand %vm4512_vm9, %vm4502_vm4  ;;  %vm4665_vm4 = vcmask 24576  }
 0x303   : > { %v4542_v39 = vsel %vm7847_vm12, %v4532_v34, %v4490_v18 }
 0x304   : > { %v5155_v38 = vpack.c.bf16 %v7776_v21, %v7776_v21  ;;  %v4577_v60 = vsel %vm7747_vm1, %v7776_v21, 0.0  ;;  %v7799_v57 = vmax.f32 %v4306_v61, 0.0  ;;  %v4159_v26 = vpop.f32.mrb[8].mxu1  ;;  %vm7866_vm15 = vcmp.lt.s32.totalorder %v4542_v39, 8 }
 0x305   : > { %v4590_v29 = vsel %vm522_vm3, %v4577_v60, 0.0  ;;  %v4269_v22 = vpop.f32.mrb[8].mxu0  ;;  %v4174_v17 = vadd.f32 %v4159_v26, %v7553_v36  ;;  %v5893_v51 = vpop.f32.mrb[9].mxu1 }
 0x306   : > { %4366 = vst.msk [vmem:[%s7665_s20 + $0x10] sm:$0xf] %vm4361_vm5, %v5155_v38  ;;  %v4591_v7 = vadd.f32 %v4590_v29, %v4589_v28  ;;  %v5156_v44 = vpack.c.bf16 %v7799_v57, %v7799_v57  ;;  %v4578_v3 = vsel %vm7788_vm11, %v7799_v57, 0.0  ;;  %v4290_v41 = vadd.f32 %v4269_v22, %v4172_v11  ;;  %v5911_v32 = vpop.f32.mrb[9].mxu0  ;;  %v4162_v20 = vpop.f32.mrb[10].mxu1 }
 0x307   : > { %v4592_v42 = vsel %vm522_vm3, %v4578_v3, 0.0  ;;  %v4272_v49 = vpop.f32.mrb[10].mxu0  ;;  %v4175_v12 = vadd.f32 %v4162_v20, %v7563_v33  ;;  %v5894_v43 = vpop.f32.mrb[11].mxu1  ;;  %v4541_v11 = vsel %vm7833_vm8, %v4531_v45, %v4479_v46 }
 0x308   : > { %4367 = vst.msk [vmem:[%s7665_s20 + $0x14] sm:$0xf] %vm4361_vm5, %v5156_v44  ;;  %v4593_v6 = vadd.f32 %v4592_v42, %v4591_v7  ;;  %v4307_v13 = vadd.f32 %v7606_v2, %v4290_v41  ;;  %v4291_v0 = vadd.f32 %v4272_v49, %v4173_v37  ;;  %v5912_v50 = vpop.f32.mrb[11].mxu0  ;;  %vm7861_vm13 = vcmp.lt.s32.totalorder %v4541_v11, 8 }
 0x30a   : > { %v4317_v14 = vmax.f32 %v4307_v13, 0.0  ;;  %v4308_v8 = vadd.f32 %v7606_v2, %v4291_v0 }
 0x30c   : > { %v5157_v63 = vpack.c.bf16 %v4317_v14, %v4317_v14  ;;  %v4579_v27 = vsel %vm7825_vm2, %v4317_v14, 0.0  ;;  %v4318_v33 = vmax.f32 %v4308_v8, 0.0 }
 0x30d   : > { %v4594_v19 = vsel %vm522_vm3, %v4579_v27, 0.0  ;;  %v4277_v28 = vpop.f32.mrb[12].mxu0 }
 0x30e   : > { %4368 = vst.msk [vmem:[%s7665_s20 + $0x18] sm:$0xf] %vm4361_vm5, %v5157_v63  ;;  %v4595_v4 = vadd.f32 %v4594_v19, %v4593_v6  ;;  %v5158_v25 = vpack.c.bf16 %v4318_v33, %v4318_v33  ;;  %v4580_v23 = vsel %vm7837_vm10, %v4318_v33, 0.0  ;;  %v4292_v55 = vadd.f32 %v4277_v28, %v4174_v17  ;;  %v5915_v10 = vpop.f32.mrb[13].mxu0 }
 0x30f   : > { %v4596_v47 = vsel %vm522_vm3, %v4580_v23, 0.0  ;;  %v4280_v37 = vpop.f32.mrb[14].mxu0 }
 0x310   : > { %4369 = vst.msk [vmem:[%s7665_s20 + $0x1c] sm:$0xf] %vm4361_vm5, %v5158_v25  ;;  %v4597_v61 = vadd.f32 %v4596_v47, %v4595_v4  ;;  %v4309_v30 = vadd.f32 %v7606_v2, %v4292_v55  ;;  %v4293_v40 = vadd.f32 %v4280_v37, %v4175_v12  ;;  %v5916_v46 = vpop.f32.mrb[15].mxu0 }
 0x312   : > { %v4319_v60 = vmax.f32 %v4309_v30, 0.0  ;;  %v4310_v15 = vadd.f32 %v7606_v2, %v4293_v40 }
 0x314   : > { %v5159_v22 = vpack.c.bf16 %v4319_v60, %v4319_v60  ;;  %v4581_v1 = vsel %vm7861_vm13, %v4319_v60, 0.0  ;;  %v4320_v7 = vmax.f32 %v4310_v15, 0.0 }
 0x315   : > { %v4598_v18 = vsel %vm522_vm3, %v4581_v1, 0.0 }
 0x316   : > { %4370 = vst.msk [vmem:[%s7665_s20 + $0x20] sm:$0xf] %vm4361_vm5, %v5159_v22  ;;  %v4599_v44 = vadd.f32 %v4598_v18, %v4597_v61  ;;  %v5160_v3 = vpack.c.bf16 %v4320_v7, %v4320_v7  ;;  %v4582_v41 = vsel %vm7866_vm15, %v4320_v7, 0.0 }
 0x317   : > { %v4600_v2 = vsel %vm522_vm3, %v4582_v41, 0.0 }
 0x318   : > { %4371 = vst.msk [vmem:[%s7665_s20 + $0x24] sm:$0xf] %vm4361_vm5, %v5160_v3  ;;  %v4601_v32 = vadd.f32 %v4600_v2, %v4599_v44 }
 0x31a   : > { %v4602_v42 = vrot.slane %v4601_v32, 4 }
 0x31c   : > { %v4603_v26 = vadd.f32 %v4602_v42, %v4601_v32 }
 0x31e   : > { %v4604_v49 = vrot.slane %v4603_v26, 2 }
 0x320   : > { %v4605_v5 = vadd.f32 %v4604_v49, %v4603_v26 }
 0x322   : > { %v4606_v6 = vrot.slane %v4605_v5, 1 }
 0x324   : > { %v4607_v17 = vadd.f32 %v4606_v6, %v4605_v5 }
 0x326   : > { %v4609_v13 = vmul.f32 0.015625, %v4607_v17  ;;  %4666 = vst.msk [vmem:[%s426_s17] sm:$0x1] %vm4665_vm4, %v4607_v17 }
 0x328   : > { %v4610_v51 = vsub.f32 %v7655_v56, %v4609_v13  ;;  %v4611_v0 = vsub.f32 %v7678_v59, %v4609_v13  ;;  %v4612_v50 = vsub.f32 %v7720_v31, %v4609_v13  ;;  %v4613_v20 = vsub.f32 %v7745_v16, %v4609_v13 }
 0x329   : > { %v4614_v45 = vsub.f32 %v7776_v21, %v4609_v13  ;;  %v4615_v12 = vsub.f32 %v7799_v57, %v4609_v13  ;;  %v4616_v8 = vsub.f32 %v4317_v14, %v4609_v13  ;;  %v4617_v43 = vsub.f32 %v4318_v33, %v4609_v13 }
 0x32a   : > { %v4618_v36 = vsub.f32 %v4319_v60, %v4609_v13  ;;  %v4619_v63 = vsub.f32 %v4320_v7, %v4609_v13  ;;  %v4620_v27 = vmul.f32 %v4610_v51, %v4610_v51  ;;  %v4621_v34 = vmul.f32 %v4611_v0, %v4611_v0 }
 0x32b   : > { %v4622_v19 = vmul.f32 %v4612_v50, %v4612_v50  ;;  %v4623_v28 = vmul.f32 %v4613_v20, %v4613_v20  ;;  %v4624_v31 = vmul.f32 %v4614_v45, %v4614_v45  ;;  %v4625_v14 = vmul.f32 %v4615_v12, %v4615_v12 }
 0x32c   : > { %v4630_v56 = vsel %vm7624_vm6, %v4620_v27, 0.0  ;;  %v4631_v59 = vsel %vm7635_vm7, %v4621_v34, 0.0  ;;  %v4626_v54 = vmul.f32 %v4616_v8, %v4616_v8  ;;  %v4627_v53 = vmul.f32 %v4617_v43, %v4617_v43 }
 0x32d   : > { %v4632_v16 = vsel %vm7712_vm14, %v4622_v19, 0.0  ;;  %v4640_v21 = vsel %vm522_vm3, %v4630_v56, 0.0  ;;  %v4641_v57 = vsel %vm522_vm3, %v4631_v59, 0.0  ;;  %v4633_v33 = vsel %vm7732_vm0, %v4623_v28, 0.0 }
 0x32e   : > { %v4642_v11 = vadd.f32 %v4641_v57, %v4640_v21  ;;  %v4643_v24 = vsel %vm522_vm3, %v4632_v16, 0.0  ;;  %v4634_v58 = vsel %vm7747_vm1, %v4624_v31, 0.0  ;;  %v4645_v25 = vsel %vm522_vm3, %v4633_v33, 0.0 }
 0x32f   : > { %v4635_v23 = vsel %vm7788_vm11, %v4625_v14, 0.0  ;;  %v4647_v10 = vsel %vm522_vm3, %v4634_v58, 0.0  ;;  %v4628_v47 = vmul.f32 %v4618_v36, %v4618_v36  ;;  %v4636_v9 = vsel %vm7825_vm2, %v4626_v54, 0.0 }
 0x330   : > { %v4644_v4 = vadd.f32 %v4643_v24, %v4642_v11  ;;  %v4649_v61 = vsel %vm522_vm3, %v4635_v23, 0.0  ;;  %v4629_v30 = vmul.f32 %v4619_v63, %v4619_v63  ;;  %v4637_v48 = vsel %vm7837_vm10, %v4627_v53, 0.0 }
 0x331   : > { %v4651_v39 = vsel %vm522_vm3, %v4636_v9, 0.0  ;;  %v4638_v62 = vsel %vm7861_vm13, %v4628_v47, 0.0  ;;  %v4653_v60 = vsel %vm522_vm3, %v4637_v48, 0.0 }
 0x332   : > { %v4646_v55 = vadd.f32 %v4645_v25, %v4644_v4  ;;  %v4639_v52 = vsel %vm7866_vm15, %v4629_v30, 0.0  ;;  %v4655_v22 = vsel %vm522_vm3, %v4638_v62, 0.0 }
 0x333   : > { %v4657_v35 = vsel %vm522_vm3, %v4639_v52, 0.0 }
 0x334   : > { %v4648_v37 = vadd.f32 %v4647_v10, %v4646_v55 }
 0x336   : > { %v4650_v40 = vadd.f32 %v4649_v61, %v4648_v37 }
 0x338   : > { %v4652_v46 = vadd.f32 %v4651_v39, %v4650_v40 }
 0x33a   : > { %v4654_v15 = vadd.f32 %v4653_v60, %v4652_v46 }
 0x33c   : > { %v4656_v1 = vadd.f32 %v4655_v22, %v4654_v15 }
 0x33e   : > { %v4658_v7 = vadd.f32 %v4657_v35, %v4656_v1 }
 0x340   : > { %v4659_v18 = vrot.slane %v4658_v7, 4 }
 0x342   : > { %v4660_v44 = vadd.f32 %v4659_v18, %v4658_v7 }
 0x344   : > { %v4661_v3 = vrot.slane %v4660_v44, 2 }
 0x346   : > { %v4662_v41 = vadd.f32 %v4661_v3, %v4660_v44 }
 0x348   : > { %v4663_v2 = vrot.slane %v4662_v41, 1 }
 0x34a   : > { %v4664_v38 = vadd.f32 %v4663_v2, %v4662_v41 }
 0x34c   : > { %4667 = vst.msk [vmem:[%s433_s8] sm:$0x1] %vm4665_vm4, %v4664_v38 }
 0x34d PF: > { %s18_s28 = sadd.s32 1, %s6104_s28   ;;  %s7994_s24 = smov %s6096_s26 }
 0x34e   : > { %p15_p10 = scmp.ge.s32.totalorder %s18_s28, 18   ;;  %s7995_s25 = smov %s6100_s27 }
 0x34f   : > { %s7996_s26 = smov %s7999_s29  ;;  %s7997_s27 = smov %s8003_s30 }
 0x350   :  { %17 = sbr.rel (!%p15_p10) target bundleno = 3 (0x3), region = 126 }

// kernel: residual_layer.6
= control target key start
LH: loop header
LB: loop body
LE: loop exit
PB: predicated region body
PF: predicated region fallthrough
CT: control target
= control target key end

     0   :  { %s6087_s24 = smov 0   ;;  %s6089_s25 = smov 0   ;;  %s7885_s0 = inlined_call_operand.vmem [shape: bf16[2,10,110,4], index: 0, kind: input, shape index: {}, may-alias: {0,1,2}]   ;;  %s7886_s1 = inlined_call_operand.vmem [shape: bf16[2,10,110,4], index: 1, kind: input, shape index: {}, may-alias: {0,1,2}]   ;;  %s7887_s2 = inlined_call_operand.vmem [shape: bf16[2,10,110,4], index: 2, kind: input, shape index: {}, may-alias: {0,1,2}]   ;;  %s7888_s3 = inlined_call_operand.vmem [shape: bf16[27,4,4], index: 3, kind: input, shape index: {}]   ;;  %s7889_s4 = inlined_call_operand.vmem [shape: f32[1,4], index: 4, kind: input, shape index: {}]   ;;  %s7890_s5 = inlined_call_operand.vmem [shape: f32[2,8,80,4], index: 5, kind: output, shape index: {0}]   ;;  %s7891_s6 = inlined_call_operand.vmem [shape: f32[2,8,1,4], index: 6, kind: output, shape index: {1}]   ;;  %s7892_s7 = inlined_call_operand.vmem [shape: f32[2,8,1,4], index: 7, kind: output, shape index: {2}]  }
   0x1   :  { %s6091_s26 = smov 0   ;;  %s6093_s27 = smov 0  }
   0x2   :  { %s6095_s28 = smov 0  }
   0x3 LB: > { %s27_s29 = sadd.s32 1, %s6035_s26  ;;  %s30_s30 = sadd.s32 1, %s6039_s27  ;;  %s6043_s28 = sphi %s6095_s28, %s18_s28   ;;  %s6039_s27 = sphi %s6093_s27, %s7937_s27   ;;  %s6035_s26 = sphi %s6091_s26, %s7936_s26   ;;  %s6031_s25 = sphi %s6089_s25, %s7935_s25   ;;  %s6027_s24 = sphi %s6087_s24, %s7934_s24  }
   0x4   : > { %p28_p0 = scmp.ge.s32.totalorder %s27_s29, 8  ;;  %p4850_p1 = scmp.ge.s32.totalorder %s6043_s28, 1 }
   0x5   : > { %p306_p2 = scmp.lt.s32.totalorder %s6043_s28, 17 }
   0x6   : > { %s7939_s29 = smov (%p28_p0, %s27_s29), 0  ;;  %s7941_s30 = smov (!%p28_p0, %s30_s30), %s6039_s27 }
   0x7   : > { %p307_p3 = pnand %p4850_p1, %p306_p2  ;;  %p32_p4 = scmp.ge.s32.totalorder %s7941_s30, 2 }
   0x8   : > { %v4857_v0 = vld [vmem:[%s7888_s3 + $0x2] sm:$0x3] (!%p307_p3)  ;;  %vm538_vm0 = vcmask (!%p307_p3), 1041408   ;;  %p380_p5 = scmp.lt.s32.totalorder (!%p307_p3), %s6031_s25, 1  ;;  %v6045_v1 = vmov (!%p307_p3), 0.0   ;;  %p382_p6 = scmp.lt.s32.totalorder (!%p307_p3), %s6027_s24, 9 }
   0x9   : > { %s7943_s30 = smov (%p32_p4, %s7941_s30), 0  ;;  %310 = sbr.rel (%p307_p3) target bundleno = 845 (0x34d), region = 40 }
   0xa   : > { %5262 = vmatprep.subr.bf16.mxu0 (!%p307_p3), %v6045_v1  ;;  %5856 = vmatprep.subr.bf16.mxu1 (!%p307_p3), %v6045_v1  ;;  %v540_v2 = vsel (!%p307_p3), %vm538_vm0, %v4857_v0, 0  ;;  %vm6046_vm1 = vmmov (!%p307_p3), 0   ;;  %vm477_vm2 = vsmask.f32 (!%p307_p3), 7424  ;;  %s389_s18 = sadd.s32 (!%p307_p3), 1, %s6027_s24  ;;  %vm522_vm3 = vcmask (!%p307_p3), 31744  }
   0xb   : > { %5263 = vmatpush3.bf16.msra.mxu0 (!%p307_p3), %v540_v2  ;;  %5857 = vmatpush3.bf16.msra.mxu1 (!%p307_p3), %v540_v2  ;;  %v4874_v17 = vld [vmem:[%s7888_s3 + $0x4] sm:$0x3] (!%p307_p3)  ;;  %v445_v19 = vld [vmem:[%s7888_s3] sm:$0x3] (!%p307_p3)  ;;  %p6187_p7 = scmp.lt.s32.totalorder (!%p307_p3), %s389_s18, 9  ;;  %vm707_vm4 = vcmask (!%p307_p3), 1046528  }
   0xc   : > { %5264 = vmatprep.mubr.msk.bf16.mxu0 (!%p307_p3), %vm6046_vm1, %v6045_v1  ;;  %5276 = vmatprep.mubr.msk.bf16.mxu1 (!%p307_p3), %vm6046_vm1, %v6045_v1  ;;  %v735_v26 = vsel (!%p307_p3), %vm538_vm0, %v4874_v17, 0  ;;  %v626_v31 = vsel (!%p307_p3), %vm538_vm0, %v445_v19, 0  ;;  %v4881_v43 = vld [vmem:[%s7888_s3 + $0x6] sm:$0x3] (!%p307_p3)  ;;  %v4893_v48 = vld [vmem:[%s7888_s3 + $0x8] sm:$0x3] (!%p307_p3) }
   0xd   : > { %5306 = vmatprep.subr.bf16.mxu0 (!%p307_p3), %v6045_v1  ;;  %5284 = vmatprep.subr.bf16.mxu1 (!%p307_p3), %v6045_v1  ;;  %v888_v45 = vsel (!%p307_p3), %vm538_vm0, %v4881_v43, 0  ;;  %v1049_v50 = vsel (!%p307_p3), %vm538_vm0, %v4893_v48, 0  ;;  %vm979_vm5 = vsmask.f32 (!%p307_p3), 6400  ;;  %v4907_v19 = vld [vmem:[%s7888_s3 + $0xc] sm:$0x3] (!%p307_p3) }
   0xe   : > { %vm1140_vm6 = vcmask (!%p307_p3), 1045504   ;;  %vm1412_vm7 = vsmask.f32 (!%p307_p3), 5376  ;;  %vm1573_vm8 = vcmask (!%p307_p3), 1044480   ;;  %p413_p9 = scmp.lt.s32.totalorder (!%p307_p3), %s6027_s24, 7 }
  0x10   : > { %s7945_s25 = smov (!%p380_p5, %s6031_s25), 1  ;;  %s7947_s18 = smov (!%p6187_p7, %s389_s18), 9 }
  0x11   : > { %s383_s10 = scalar_select %p382_p6, %s6027_s24, 9 }
  0x12   : > { %s6135_s11 = smul.u32 140, %s7945_s25 }
  0x13   : > { %s5858_s12 = smul.u32 14, %s383_s10 }
  0x14   : > { %s5860_s8 = smul.u32 14, %s7947_s18 }
  0x15   : > { %s386_s13 = sadd.s32 %s6135_s11, %s5858_s12 }
  0x16   : > { %s4851_s14 = sshll.u32 %s386_s13, 2  ;;  %s396_s9 = sadd.s32 %s5860_s8, %s6135_s11 }
  0x17   : > { %s6142_s17 = scalar_lea.vmem %s7885_s0, %s4851_s14  ;;  %s4852_s13 = sshll.u32 %s396_s9, 2 }
  0x18   : > { %v435_v3 = vld [vmem:[%s6142_s17] sm:$0xf]  ;;  %v6146_v4 = vld [vmem:[%s6142_s17 + $0x4] sm:$0xf]  ;;  %v6152_v6 = vld [vmem:[%s6142_s17 + $0x8] sm:$0xff]   ;;  %s400_s14 = sadd.s32 2, %s6027_s24  ;;  %s6230_s18 = scalar_lea.vmem %s7886_s1, %s4852_s13 }
  0x19   : > { %v6149_v5 = vcombine.low %v435_v3, %v6146_v4  ;;  %v486_v9 = vshll.u32 %v6152_v6, 16  ;;  %v6158_v10 = vld [vmem:[%s6142_s17 + $0x18] sm:$0xff]   ;;  %v6161_v11 = vld [vmem:[%s6142_s17 + $0x20] sm:$0xff]   ;;  %v6165_v12 = vld [vmem:[%s6142_s17 + $0x10] sm:$0xff]   ;;  %v490_v22 = vshrl.u32 %v6152_v6, 16  ;;  %v709_v47 = vrot.slane %v6152_v6, 1 }
  0x1a   : > { %v502_v15 = vshll.u32 %v6158_v10, 16  ;;  %v506_v16 = vshrl.u32 %v6158_v10, 16  ;;  %v510_v18 = vshll.u32 %v6161_v11, 16  ;;  %v494_v23 = vshll.u32 %v6165_v12, 16  ;;  %v701_v41 = vld [vmem:[%s6142_s17] sm:$0xe] }
  0x1b   : > { %v479_v7 = vshrl.u32 %v6149_v5, 16  ;;  %v481_v8 = vshll.u32 %v6149_v5, 16  ;;  %v488_v14 = vrot.slane %v486_v9, 1  ;;  %v6179_v24 = vld [vmem:[%s6142_s17 + $0x28] ss:$0 sps:$4 sm:$0x11]   ;;  %v4875_v44 = vcombine.low %v701_v41, %v6146_v4 }
  0x1c   : > { %v504_v21 = vrot.slane %v502_v15, 1  ;;  %v512_v25 = vrot.slane %v510_v18, 1  ;;  %v514_v29 = vshrl.u32 %v6161_v11, 16  ;;  %v518_v30 = vshll.u32 %v6179_v24, 16  ;;  %p403_p8 = scmp.lt.s32.totalorder %s400_s14, 9  ;;  %v6274_v58 = vld [vmem:[%s6142_s17 + $0xc] sm:$0xff]  }
  0x1d   : > { %v483_v13 = vrot.slane %v481_v8, 1  ;;  %v492_v33 = vor.u32 %v490_v22, %v488_v14  ;;  %v496_v34 = vrot.slane %v494_v23, 1  ;;  %v498_v38 = vshrl.u32 %v6165_v12, 16  ;;  %v820_v54 = vld [vmem:[%s6142_s17 + $0x4] sm:$0xe]  ;;  %s7951_s24 = smov (!%p413_p9, %s6027_s24), 7 }
  0x1e   : > { %v508_v28 = vor.u32 %v506_v16, %v504_v21  ;;  %v516_v35 = vor.u32 %v514_v29, %v512_v25  ;;  %v520_v36 = vrot.slane %v518_v30, 1  ;;  %v708_v46 = vrot.slane %v4875_v44, 1  ;;  %s7949_s14 = smov (!%p403_p8, %s400_s14), 9  ;;  %v6264_v56 = vld [vmem:[%s6142_s17 + $0x8] sm:$0xf]  ;;  %s5862_s10 = smul.u32 10, %s7951_s24 }
  0x1f   : > { %v484_v20 = vor.u32 %v483_v13, %v479_v7  ;;  %v497_v37 = vsel %vm477_vm2, %v492_v33, %v496_v34  ;;  %v500_v40 = vor.u32 %v498_v38, %v496_v34  ;;  %v711_v51 = vrot.slane %v6165_v12, 1  ;;  %s5861_s21 = smul.u32 14, %s7949_s14  ;;  %v6336_v34 = vld [vmem:[%s6142_s17 + $0x24] sm:$0xff]   ;;  %v5938_v44 = vld [vmem:[%s6142_s17 + $0x2c] ss:$0 sps:$4 sm:$0x11]  }
  0x20   : > { %v513_v32 = vsel %vm477_vm2, %v508_v28, %v512_v25  ;;  %v521_v39 = vsel %vm477_vm2, %v516_v35, %v520_v36  ;;  %v710_v49 = vsel %vm707_vm4, %v708_v46, %v709_v47  ;;  %v713_v53 = vrot.slane %v6158_v10, 1  ;;  %v6321_v25 = vld [vmem:[%s6142_s17 + $0x1c] sm:$0xff]  }
  0x21   : > { %v489_v27 = vsel %vm477_vm2, %v484_v20, %v488_v14  ;;  %5277 = vmatmul.mubr.msk.bf16.vlgmr.msra.gmra.mrb[0].mxu1 %vm522_vm3, %v513_v32  ;;  %v505_v42 = vsel %vm477_vm2, %v500_v40, %v504_v21  ;;  %v712_v52 = vsel %vm707_vm4, %v709_v47, %v711_v51  ;;  %s407_s22 = sadd.s32 %s5861_s21, %s6135_s11  ;;  %v715_v57 = vrot.slane %v6161_v11, 1  ;;  %s4855_s21 = sshll.u32 %s7945_s25, 3 }
  0x22   : > { %5265 = vmatmul.mubr.msk.bf16.vlgmr.msra.gmra.mrb[0].mxu0 %vm522_vm3, %v489_v27  ;;  %5285 = vmatpush3.bf16.msra.mxu1 %v626_v31  ;;  %s4853_s23 = sshll.u32 %s407_s22, 2  ;;  %v714_v55 = vsel %vm707_vm4, %v711_v51, %v713_v53  ;;  %v4882_v59 = vcombine.low %v820_v54, %v6264_v56  ;;  %v989_v61 = vshrl.u32 %v6274_v58, 16  ;;  %v992_v0 = vshll.u32 %v6274_v58, 16  ;;  %s7822_s22 = sadd.s32 %s4855_s21, %s7951_s24 }
  0x23   : > { %5307 = vmatpush3.bf16.msra.mxu0 %v735_v26  ;;  %5268 = vmatprep.mubr.msk.bf16.mxu0 %vm6046_vm1, %v6045_v1  ;;  %s6269_s9 = scalar_lea.vmem %s7887_s2, %s4853_s23  ;;  %v716_v62 = vsel %vm707_vm4, %v713_v53, %v715_v57  ;;  %v717_v2 = vrot.slane %v6179_v24, 1  ;;  %v862_v4 = vrot.slane %v6274_v58, 1  ;;  %v1321_v23 = vsel %vm538_vm0, %v4907_v19, 0  ;;  %v6428_v19 = vld [vmem:[%s6142_s17 + $0x28] sm:$0xff]   ;;  %s433_s8 = scalar_lea.vmem %s7892_s7, %s7822_s22 }
  0x24   : > { %5350 = vmatprep.subr.bf16.mxu0 %v6045_v1  ;;  %5280 = vmatprep.mubr.msk.bf16.mxu1 %vm6046_vm1, %v6045_v1  ;;  %v981_v60 = vshrl.u32 %v4882_v59, 16  ;;  %v984_v63 = vshll.u32 %v4882_v59, 16  ;;  %v861_v3 = vrot.slane %v4882_v59, 1  ;;  %v991_v7 = vrot.slane %v989_v61, 1  ;;  %v6371_v59 = vld [vmem:[%s6142_s17 + $0xc] sm:$0xf] }
  0x25   : > { %5328 = vmatprep.subr.bf16.mxu1 %v6045_v1  ;;  %v994_v9 = vrot.slane %v992_v0, 2  ;;  %v1007_v27 = vshrl.u32 %v6321_v25, 16  ;;  %v1010_v28 = vshll.u32 %v6321_v25, 16  ;;  %v866_v29 = vrot.slane %v6321_v25, 1  ;;  %v6382_v0 = vld [vmem:[%s6142_s17 + $0x10] sm:$0xff]  }
  0x26   : > { %v986_v8 = vrot.slane %v984_v63, 2  ;;  %v1016_v36 = vshrl.u32 %v6336_v34, 16  ;;  %v868_v38 = vrot.slane %v6336_v34, 1  ;;  %v870_v48 = vrot.slane %v5938_v44, 1 }
  0x27   : > { %v995_v15 = vor.u32 %v994_v9, %v991_v7  ;;  %v1009_v31 = vrot.slane %v1007_v27, 1  ;;  %v1012_v32 = vrot.slane %v1010_v28, 2  ;;  %v1142_v61 = vrot.slane %v6274_v58, 2  ;;  %v5946_v28 = vld [vmem:[%s6142_s17 + $0x30] ss:$0 sps:$4 sm:$0x33]  }
  0x28   : > { %v1018_v40 = vrot.slane %v1016_v36, 1  ;;  %v869_v43 = vsel %vm707_vm4, %v866_v29, %v868_v38  ;;  %v871_v53 = vsel %vm707_vm4, %v868_v38, %v870_v48  ;;  %v1575_v48 = vrot.slane %v6382_v0, 3 }
  0x29   : > { %5281 = vmatmul.mubr.msk.bf16.gmra.mrb[4].mxu1 %vm522_vm3, %v521_v39  ;;  %v1013_v35 = vor.u32 %v1012_v32, %v1009_v31 }
  0x2a   : > { %5269 = vmatmul.mubr.msk.bf16.gmra.mrb[4].mxu0 %vm522_vm3, %v497_v37  ;;  %5286 = vmatprep.mubr.msk.bf16.mxu1 %vm6046_vm1, %v6045_v1  ;;  %v1019_v37 = vshll.u32 %v6336_v34, 16 }
  0x2b   : > { %5272 = vmatprep.mubr.msk.bf16.mxu0 %vm6046_vm1, %v6045_v1 }
  0x2c   : > { %v1021_v41 = vrot.slane %v1019_v37, 2 }
  0x31   : > { %5287 = vmatmul.mubr.msk.bf16.vlgmr.msra.gmra.mrb[8].mxu1 %vm522_vm3, %v6149_v5  ;;  %v4900_v5 = vld [vmem:[%s7888_s3 + $0xa] sm:$0x3] }
  0x32   : > { %5273 = vmatmul.mubr.msk.bf16.gmra.mrb[8].mxu0 %vm522_vm3, %v505_v42  ;;  %5329 = vmatpush3.bf16.msra.mxu1 %v888_v45  ;;  %v1168_v13 = vsel %vm538_vm0, %v4900_v5, 0  ;;  %v6349_v42 = vld [vmem:[%s6142_s17 + $0x2c] ss:$0 sps:$4 sm:$0x33]   ;;  %v1022_v45 = vor.u32 %v1021_v41, %v1018_v40  ;;  %v4933_v41 = vld [vmem:[%s7888_s3 + $0x12] sm:$0x3] }
  0x33   : > { %5308 = vmatprep.mubr.msk.bf16.mxu0 %vm6046_vm1, %v6045_v1  ;;  %5290 = vmatprep.mubr.msk.bf16.mxu1 %vm6046_vm1, %v6045_v1  ;;  %v1025_v46 = vshrl.u32 %v6349_v42, 16  ;;  %v1028_v47 = vshll.u32 %v6349_v42, 16 }
  0x34   : > { %5372 = vmatprep.subr.bf16.mxu1 %v6045_v1 }
  0x35   : > { %v1027_v51 = vrot.slane %v1025_v46, 1  ;;  %v1739_v46 = vsel %vm538_vm0, %v4933_v41, 0 }
  0x39   : > { %5291 = vmatmul.mubr.msk.bf16.gmra.mrb[12].mxu1 %vm522_vm3, %v6152_v6  ;;  %v983_v6 = vrot.slane %v981_v60, 1 }
  0x3a   : > { %5309 = vmatmul.mubr.msk.bf16.vlgmr.msra.gmra.mrb[12].mxu0 %vm522_vm3, %v710_v49  ;;  %5294 = vmatprep.mubr.msk.bf16.mxu1 %vm6046_vm1, %v6045_v1  ;;  %v1134_v49 = vld [vmem:[%s6142_s17 + $0x4] sm:$0xc] }
  0x3b   : > { %5351 = vmatpush3.bf16.msra.mxu0 %v1049_v50  ;;  %5312 = vmatprep.mubr.msk.bf16.mxu0 %vm6046_vm1, %v6045_v1  ;;  %v987_v14 = vor.u32 %v986_v8, %v983_v6  ;;  %v1023_v50 = vsel %vm979_vm5, %v1013_v35, %v1022_v45  ;;  %v4901_v54 = vcombine.low %v1134_v49, %v6264_v56  ;;  %v4926_v6 = vld [vmem:[%s7888_s3 + $0x10] sm:$0x3]  ;;  %v6400_v8 = vld [vmem:[%s6142_s17 + $0x18] sm:$0xff]  }
  0x3c   : > { %5394 = vmatprep.subr.bf16.mxu0 %v6045_v1  ;;  %v1601_v9 = vsel %vm538_vm0, %v4926_v6, 0  ;;  %v1431_v38 = vshrl.u32 %v6400_v8, 16 }
  0x3d   : > { %v996_v20 = vsel %vm979_vm5, %v987_v14, %v995_v15  ;;  %v1141_v60 = vrot.slane %v4901_v54, 2  ;;  %v6415_v14 = vld [vmem:[%s6142_s17 + $0x20] sm:$0xff]  }
  0x3e   : > { %v1433_v44 = vrot.slane %v1431_v38, 2 }
  0x41   : > { %5295 = vmatmul.mubr.msk.bf16.gmra.mrb[16].mxu1 %vm522_vm3, %v6165_v12  ;;  %v6300_v12 = vld [vmem:[%s6142_s17 + $0x14] sm:$0xff]  }
  0x42   : > { %5313 = vmatmul.mubr.msk.bf16.gmra.mrb[16].mxu0 %vm522_vm3, %v712_v52  ;;  %5298 = vmatprep.mubr.msk.bf16.mxu1 %vm6046_vm1, %v6045_v1  ;;  %v998_v16 = vshrl.u32 %v6300_v12, 16  ;;  %v1001_v17 = vshll.u32 %v6300_v12, 16  ;;  %v864_v18 = vrot.slane %v6300_v12, 1  ;;  %v1030_v52 = vrot.slane %v1028_v47, 2 }
  0x43   : > { %5316 = vmatprep.mubr.msk.bf16.mxu0 %vm6046_vm1, %v6045_v1  ;;  %v1144_v5 = vrot.slane %v6300_v12, 2  ;;  %v1297_v12 = vrot.slane %v6400_v8, 2 }
  0x44   : > { %v1000_v21 = vrot.slane %v998_v16, 1  ;;  %v1003_v22 = vrot.slane %v1001_v17, 2  ;;  %v865_v24 = vsel %vm707_vm4, %v862_v4, %v864_v18  ;;  %v867_v33 = vsel %vm707_vm4, %v864_v18, %v866_v29 }
  0x45   : > { %v1299_v16 = vrot.slane %v6415_v14, 2  ;;  %v1148_v17 = vrot.slane %v6336_v34, 2  ;;  %v1303_v34 = vrot.slane %v5946_v28, 2 }
  0x46   : > { %v1004_v26 = vor.u32 %v1003_v22, %v1000_v21  ;;  %v1301_v21 = vrot.slane %v6428_v19, 2  ;;  %v1150_v22 = vrot.slane %v6349_v42, 2 }
  0x47   : > { %v1300_v18 = vsel %vm1140_vm6, %v1297_v12, %v1299_v16 }
  0x48   : > { %v1005_v30 = vsel %vm979_vm5, %v995_v15, %v1004_v26  ;;  %v1014_v39 = vsel %vm979_vm5, %v1004_v26, %v1013_v35  ;;  %v1425_v26 = vshll.u32 %v6382_v0, 16  ;;  %v1302_v27 = vsel %vm1140_vm6, %v1299_v16, %v1301_v21  ;;  %v1567_v35 = vld [vmem:[%s6142_s17 + $0x8] sm:$0x8] }
  0x49   : > { %5299 = vmatmul.mubr.msk.bf16.gmra.mrb[20].mxu1 %vm522_vm3, %v6158_v10  ;;  %v718_v10 = vsel %vm707_vm4, %v715_v57, %v717_v2  ;;  %v1253_v57 = vld [vmem:[%s6142_s17 + $0x8] sm:$0xc]  ;;  %v1143_v2 = vsel %vm1140_vm6, %v1141_v60, %v1142_v61  ;;  %v1151_v29 = vsel %vm1140_vm6, %v1148_v17, %v1150_v22  ;;  %v1304_v40 = vsel %vm1140_vm6, %v1301_v21, %v1303_v34 }
  0x4a   : > { %5317 = vmatmul.mubr.msk.bf16.gmra.mrb[20].mxu0 %vm522_vm3, %v714_v55  ;;  %5302 = vmatprep.mubr.msk.bf16.mxu1 %vm6046_vm1, %v6045_v1  ;;  %v1031_v55 = vor.u32 %v1030_v52, %v1027_v51  ;;  %v4908_v63 = vcombine.low %v1253_v57, %v6371_v59  ;;  %v4927_v42 = vcombine.low %v1567_v35, %v6371_v59  ;;  %v1440_v51 = vshrl.u32 %v6415_v14, 16 }
  0x4b   : > { %5320 = vmatprep.mubr.msk.bf16.mxu0 %vm6046_vm1, %v6045_v1  ;;  %v1443_v52 = vshll.u32 %v6415_v14, 16  ;;  %v1577_v60 = vrot.slane %v6400_v8, 3 }
  0x4c   : > { %v1032_v56 = vsel %vm979_vm5, %v1022_v45, %v1031_v55  ;;  %v1294_v58 = vrot.slane %v4908_v63, 2  ;;  %v1574_v47 = vrot.slane %v4927_v42, 3  ;;  %v1442_v57 = vrot.slane %v1440_v51, 2  ;;  %v5955_v51 = vld [vmem:[%s6230_s18 + $0x18] sm:$0xff]  }
  0x4d   : > { %v1445_v59 = vrot.slane %v1443_v52, 3 }
  0x51   : > { %5303 = vmatmul.mubr.msk.bf16.gmra.mrb[24].mxu1 %vm522_vm3, %v6161_v11  ;;  %v863_v11 = vsel %vm707_vm4, %v861_v3, %v862_v4  ;;  %v1295_v4 = vrot.slane %v6382_v0, 2 }
  0x52   : > { %5321 = vmatmul.mubr.msk.bf16.gmra.mrb[24].mxu0 %vm522_vm3, %v716_v62  ;;  %5330 = vmatprep.mubr.msk.bf16.mxu1 %vm6046_vm1, %v6045_v1  ;;  %v4919_v62 = vld [vmem:[%s7888_s3 + $0xe] sm:$0x3] }
  0x53   : > { %5324 = vmatprep.mubr.msk.bf16.mxu0 %vm6046_vm1, %v6045_v1  ;;  %v1482_v3 = vsel %vm538_vm0, %v4919_v62, 0  ;;  %v1296_v7 = vsel %vm1140_vm6, %v1294_v58, %v1295_v4  ;;  %v1452_v62 = vshll.u32 %v6428_v19, 16  ;;  %v5948_v58 = vld [vmem:[%s6142_s17 + $0x30] ss:$0 sps:$4 sm:$0x77]   ;;  %s426_s17 = scalar_lea.vmem %s7891_s6, %s7822_s22 }
  0x54   : > { %v1458_v6 = vshrl.u32 %v5948_v58, 16 }
  0x59   : > { %5331 = vmatmul.mubr.msk.bf16.vlgmr.msra.gmra.mrb[28].mxu1 %vm522_vm3, %v863_v11  ;;  %v1146_v11 = vrot.slane %v6321_v25, 2  ;;  %v1422_v25 = vshrl.u32 %v6382_v0, 16 }
  0x5a   : > { %5325 = vmatmul.mubr.msk.bf16.gmra.mrb[28].mxu0 %vm522_vm3, %v718_v10  ;;  %5373 = vmatpush3.bf16.msra.mxu1 %v1168_v13  ;;  %v1145_v10 = vsel %vm1140_vm6, %v1142_v61, %v1144_v5  ;;  %v1298_v13 = vsel %vm1140_vm6, %v1295_v4, %v1297_v12  ;;  %v1446_v61 = vor.u32 %v1445_v59, %v1442_v57  ;;  %v1579_v4 = vrot.slane %v6415_v14, 3  ;;  %v6505_v14 = vld [vmem:[%s6230_s18 + $0x4] sm:$0xf] }
  0x5b   : > { %5352 = vmatprep.mubr.msk.bf16.mxu0 %vm6046_vm1, %v6045_v1  ;;  %5334 = vmatprep.mubr.msk.bf16.mxu1 %vm6046_vm1, %v6045_v1  ;;  %v1147_v15 = vsel %vm1140_vm6, %v1144_v5, %v1146_v11  ;;  %v1424_v32 = vrot.slane %v1422_v25, 2 }
  0x5c   : > { %5416 = vmatprep.subr.bf16.mxu1 %v6045_v1 }
  0x61   : > { %5335 = vmatmul.mubr.msk.bf16.gmra.mrb[32].mxu1 %vm522_vm3, %v865_v24  ;;  %v1417_v24 = vshll.u32 %v4908_v63, 16 }
  0x62   : > { %5353 = vmatmul.mubr.msk.bf16.vlgmr.msra.gmra.mrb[32].mxu0 %vm522_vm3, %v996_v20  ;;  %5338 = vmatprep.mubr.msk.bf16.mxu1 %vm6046_vm1, %v6045_v1  ;;  %v1149_v20 = vsel %vm1140_vm6, %v1146_v11, %v1148_v17  ;;  %v1581_v11 = vrot.slane %v6428_v19, 3 }
  0x63   : > { %5395 = vmatpush3.bf16.msra.mxu0 %v1321_v23  ;;  %5356 = vmatprep.mubr.msk.bf16.mxu0 %vm6046_vm1, %v6045_v1  ;;  %v1414_v23 = vshrl.u32 %v4908_v63, 16  ;;  %v1419_v31 = vrot.slane %v1417_v24, 3  ;;  %v1578_v63 = vsel %vm1573_vm8, %v1575_v48, %v1577_v60 }
  0x64   : > { %5438 = vmatprep.subr.bf16.mxu0 %v6045_v1  ;;  %v1582_v16 = vsel %vm1573_vm8, %v1579_v4, %v1581_v11 }
  0x69   : > { %5339 = vmatmul.mubr.msk.bf16.gmra.mrb[36].mxu1 %vm522_vm3, %v867_v33  ;;  %v1427_v33 = vrot.slane %v1425_v26, 3 }
  0x6a   : > { %5357 = vmatmul.mubr.msk.bf16.gmra.mrb[36].mxu0 %vm522_vm3, %v1005_v30  ;;  %5342 = vmatprep.mubr.msk.bf16.mxu1 %vm6046_vm1, %v6045_v1  ;;  %v1416_v30 = vrot.slane %v1414_v23, 2  ;;  %v4956_v23 = vld [vmem:[%s7888_s3 + $0x16] sm:$0x3] }
  0x6b   : > { %5360 = vmatprep.mubr.msk.bf16.mxu0 %vm6046_vm1, %v6045_v1  ;;  %v1428_v37 = vor.u32 %v1427_v33, %v1424_v32  ;;  %v2043_v28 = vsel %vm538_vm0, %v4956_v23, 0  ;;  %v4963_v32 = vld [vmem:[%s7888_s3 + $0x18] sm:$0x3] }
  0x6c   : > { %v1420_v36 = vor.u32 %v1419_v31, %v1416_v30  ;;  %v6532_v31 = vld [vmem:[%s6230_s18 + $0x10] sm:$0xff]  }
  0x6d   : > { %v1881_v35 = vshll.u32 %v6532_v31, 16  ;;  %v1885_v42 = vshrl.u32 %v6532_v31, 16 }
  0x71   : > { %5343 = vmatmul.mubr.msk.bf16.gmra.mrb[40].mxu1 %vm522_vm3, %v869_v43  ;;  %v1429_v43 = vsel %vm1412_vm7, %v1420_v36, %v1428_v37  ;;  %v5950_v36 = vld [vmem:[%s6230_s18 + $0x8] sm:$0xff]  }
  0x72   : > { %5361 = vmatmul.mubr.msk.bf16.gmra.mrb[40].mxu0 %vm522_vm3, %v1014_v39  ;;  %5346 = vmatprep.mubr.msk.bf16.mxu1 %vm6046_vm1, %v6045_v1  ;;  %v1434_v39 = vshll.u32 %v6400_v8, 16  ;;  %v1580_v8 = vsel %vm1573_vm8, %v1577_v60, %v1579_v4 }
  0x73   : > { %5364 = vmatprep.mubr.msk.bf16.mxu0 %vm6046_vm1, %v6045_v1 }
  0x74   : > { %v1436_v45 = vrot.slane %v1434_v39, 3  ;;  %v1883_v39 = vrot.slane %v1881_v35, 1 }
  0x76   : > { %v1437_v49 = vor.u32 %v1436_v45, %v1433_v44  ;;  %v5953_v44 = vld [vmem:[%s6230_s18 + $0x10] sm:$0xff]   ;;  %v1887_v45 = vor.u32 %v1885_v42, %v1883_v39  ;;  %v6649_v42 = vld [vmem:[%s6230_s18 + $0x1c] sm:$0xff]  }
  0x78   : > { %v1438_v55 = vsel %vm1412_vm7, %v1428_v37, %v1437_v49  ;;  %v1447_v0 = vsel %vm1412_vm7, %v1437_v49, %v1446_v61  ;;  %v2196_v37 = vsel %vm538_vm0, %v4963_v32, 0 }
  0x79   : > { %5347 = vmatmul.mubr.msk.bf16.gmra.mrb[44].mxu1 %vm522_vm3, %v871_v53  ;;  %v1576_v53 = vsel %vm1573_vm8, %v1574_v47, %v1575_v48  ;;  %v6564_v47 = vld [vmem:[%s6230_s18 + $0x20] sm:$0xff]  }
  0x7a   : > { %5365 = vmatmul.mubr.msk.bf16.gmra.mrb[44].mxu0 %vm522_vm3, %v1023_v50  ;;  %5374 = vmatprep.mubr.msk.bf16.mxu1 %vm6046_vm1, %v6045_v1  ;;  %v4944_v50 = vld [vmem:[%s7888_s3 + $0x14] sm:$0x3]  ;;  %v1901_v59 = vshrl.u32 %v6564_v47, 16 }
  0x7b   : > { %5368 = vmatprep.mubr.msk.bf16.mxu0 %vm6046_vm1, %v6045_v1  ;;  %v1925_v54 = vsel %vm538_vm0, %v4944_v50, 0  ;;  %v1897_v50 = vshll.u32 %v6564_v47, 16 }
  0x81   : > { %5375 = vmatmul.mubr.msk.bf16.vlgmr.msra.gmra.mrb[48].mxu1 %vm522_vm3, %v1143_v2 }
  0x82   : > { %5369 = vmatmul.mubr.msk.bf16.gmra.mrb[48].mxu0 %vm522_vm3, %v1032_v56  ;;  %5417 = vmatpush3.bf16.msra.mxu1 %v1482_v3  ;;  %v1449_v56 = vshrl.u32 %v6428_v19, 16  ;;  %v1454_v3 = vrot.slane %v1452_v62, 3  ;;  %v1583_v19 = vrot.slane %v5948_v58, 3 }
  0x83   : > { %5396 = vmatprep.mubr.msk.bf16.mxu0 %vm6046_vm1, %v6045_v1  ;;  %5378 = vmatprep.mubr.msk.bf16.mxu1 %vm6046_vm1, %v6045_v1 }
  0x84   : > { %5460 = vmatprep.subr.bf16.mxu1 %v6045_v1  ;;  %v1451_v2 = vrot.slane %v1449_v56, 2  ;;  %v1584_v22 = vsel %vm1573_vm8, %v1581_v11, %v1583_v19 }
  0x86   : > { %v1455_v5 = vor.u32 %v1454_v3, %v1451_v2  ;;  %v6594_v2 = vld [vmem:[%s6230_s18 + $0x8] sm:$0xf] }
  0x89   : > { %5379 = vmatmul.mubr.msk.bf16.gmra.mrb[52].mxu1 %vm522_vm3, %v1145_v10  ;;  %v1460_v10 = vrot.slane %v1458_v6, 2 }
  0x8a   : > { %5397 = vmatmul.mubr.msk.bf16.vlgmr.msra.gmra.mrb[52].mxu0 %vm522_vm3, %v1296_v7  ;;  %5382 = vmatprep.mubr.msk.bf16.mxu1 %vm6046_vm1, %v6045_v1  ;;  %v1461_v7 = vshll.u32 %v5948_v58, 16 }
  0x8b   : > { %5439 = vmatpush3.bf16.msra.mxu0 %v1601_v9  ;;  %5400 = vmatprep.mubr.msk.bf16.mxu0 %vm6046_vm1, %v6045_v1  ;;  %v1456_v9 = vsel %vm1412_vm7, %v1446_v61, %v1455_v5  ;;  %v5957_v61 = vld [vmem:[%s6230_s18 + $0x20] sm:$0xff]  }
  0x8c   : > { %5482 = vmatprep.subr.bf16.mxu0 %v6045_v1  ;;  %v1463_v12 = vrot.slane %v1461_v7, 3 }
  0x91   : > { %5383 = vmatmul.mubr.msk.bf16.gmra.mrb[56].mxu1 %vm522_vm3, %v1147_v15  ;;  %v1464_v15 = vor.u32 %v1463_v12, %v1460_v10  ;;  %v6609_v12 = vld [vmem:[%s6230_s18 + $0xc] sm:$0xff]  }
  0x92   : > { %5401 = vmatmul.mubr.msk.bf16.gmra.mrb[56].mxu0 %vm522_vm3, %v1298_v13  ;;  %5386 = vmatprep.mubr.msk.bf16.mxu1 %vm6046_vm1, %v6045_v1  ;;  %v1824_v13 = vld [vmem:[%s6230_s18] sm:$0xf]  ;;  %v2170_v19 = vrot.slane %v6609_v12, 1 }
  0x93   : > { %5404 = vmatprep.mubr.msk.bf16.mxu0 %vm6046_vm1, %v6045_v1  ;;  %v4945_v17 = vcombine.low %v1824_v13, %v6505_v14 }
  0x95   : > { %v1868_v21 = vshll.u32 %v4945_v17, 16  ;;  %v1866_v24 = vshrl.u32 %v4945_v17, 16 }
  0x97   : > { %v1870_v25 = vrot.slane %v1868_v21, 1  ;;  %v2019_v21 = vrot.slane %v6532_v31, 1 }
  0x99   : > { %5387 = vmatmul.mubr.msk.bf16.gmra.mrb[60].mxu1 %vm522_vm3, %v1149_v20  ;;  %v6516_v20 = vld [vmem:[%s6230_s18 + $0x8] sm:$0xff]  }
  0x9a   : > { %5405 = vmatmul.mubr.msk.bf16.gmra.mrb[60].mxu0 %vm522_vm3, %v1300_v18  ;;  %5390 = vmatprep.mubr.msk.bf16.mxu1 %vm6046_vm1, %v6045_v1  ;;  %v1465_v18 = vsel %vm1412_vm7, %v1455_v5, %v1464_v15  ;;  %v1873_v26 = vshll.u32 %v6516_v20, 16  ;;  %v1877_v34 = vshrl.u32 %v6516_v20, 16  ;;  %v2017_v4 = vrot.slane %v6516_v20, 1 }
  0x9b   : > { %5408 = vmatprep.mubr.msk.bf16.mxu0 %vm6046_vm1, %v6045_v1 }
  0x9c   : > { %v1875_v30 = vrot.slane %v1873_v26, 1  ;;  %v2020_v31 = vsel %vm707_vm4, %v2017_v4, %v2019_v21 }
  0x9e   : > { %v1879_v38 = vor.u32 %v1877_v34, %v1875_v30 }
  0xa0   : > { %v1884_v41 = vsel %vm477_vm2, %v1879_v38, %v1883_v39 }
  0xa1   : > { %5391 = vmatmul.mubr.msk.bf16.gmra.mrb[64].mxu1 %vm522_vm3, %v1151_v29  ;;  %v1871_v29 = vor.u32 %v1870_v25, %v1866_v24 }
  0xa2   : > { %5409 = vmatmul.mubr.msk.bf16.gmra.mrb[64].mxu0 %vm522_vm3, %v1302_v27  ;;  %5418 = vmatprep.mubr.msk.bf16.mxu1 %vm6046_vm1, %v6045_v1  ;;  %v5949_v27 = vld [vmem:[%s6230_s18] sm:$0xff]  }
  0xa3   : > { %5412 = vmatprep.mubr.msk.bf16.mxu0 %vm6046_vm1, %v6045_v1  ;;  %v1876_v33 = vsel %vm477_vm2, %v1871_v29, %v1875_v30 }
  0xa9   : > { %5419 = vmatmul.mubr.msk.bf16.vlgmr.msra.gmra.mrb[68].mxu1 %vm522_vm3, %v1429_v43 }
  0xaa   : > { %5413 = vmatmul.mubr.msk.bf16.gmra.mrb[68].mxu0 %vm522_vm3, %v1304_v40  ;;  %5461 = vmatpush3.bf16.msra.mxu1 %v1739_v46  ;;  %v6550_v40 = vld [vmem:[%s6230_s18 + $0x18] sm:$0xff]  }
  0xab   : > { %5440 = vmatprep.mubr.msk.bf16.mxu0 %vm6046_vm1, %v6045_v1  ;;  %5422 = vmatprep.mubr.msk.bf16.mxu1 %vm6046_vm1, %v6045_v1  ;;  %v1889_v43 = vshll.u32 %v6550_v40, 16  ;;  %v1893_v49 = vshrl.u32 %v6550_v40, 16 }
  0xac   : > { %5504 = vmatprep.subr.bf16.mxu1 %v6045_v1 }
  0xad   : > { %v1891_v46 = vrot.slane %v1889_v43, 1 }
  0xaf   : > { %v1892_v48 = vsel %vm477_vm2, %v1887_v45, %v1891_v46  ;;  %v1895_v52 = vor.u32 %v1893_v49, %v1891_v46 }
  0xb1   : > { %5423 = vmatmul.mubr.msk.bf16.gmra.mrb[72].mxu1 %vm522_vm3, %v1438_v55  ;;  %v2010_v55 = vld [vmem:[%s6230_s18] sm:$0xe] }
  0xb2   : > { %5441 = vmatmul.mubr.msk.bf16.vlgmr.msra.gmra.mrb[72].mxu0 %vm522_vm3, %v1576_v53  ;;  %5426 = vmatprep.mubr.msk.bf16.mxu1 %vm6046_vm1, %v6045_v1  ;;  %v1899_v53 = vrot.slane %v1897_v50, 1  ;;  %v4957_v56 = vcombine.low %v2010_v55, %v6505_v14 }
  0xb3   : > { %5483 = vmatpush3.bf16.msra.mxu0 %v1925_v54  ;;  %5444 = vmatprep.mubr.msk.bf16.mxu0 %vm6046_vm1, %v6045_v1  ;;  %v6577_v54 = vld [vmem:[%s6230_s18 + $0x28] ss:$0 sps:$4 sm:$0x11]  }
  0xb4   : > { %5526 = vmatprep.subr.bf16.mxu0 %v6045_v1  ;;  %v1900_v57 = vsel %vm477_vm2, %v1895_v52, %v1899_v53  ;;  %v1905_v60 = vshll.u32 %v6577_v54, 16  ;;  %v1903_v62 = vor.u32 %v1901_v59, %v1899_v53  ;;  %v2016_v58 = vrot.slane %v4957_v56, 1 }
  0xb5   : > { %v2023_v52 = vrot.slane %v6564_v47, 1 }
  0xb6   : > { %v2018_v15 = vsel %vm707_vm4, %v2016_v58, %v2017_v4 }
  0xb9   : > { %5427 = vmatmul.mubr.msk.bf16.gmra.mrb[76].mxu1 %vm522_vm3, %v1447_v0  ;;  %v2128_v0 = vld [vmem:[%s6230_s18 + $0x4] sm:$0xe] }
  0xba   : > { %5445 = vmatmul.mubr.msk.bf16.gmra.mrb[76].mxu0 %vm522_vm3, %v1578_v63  ;;  %5430 = vmatprep.mubr.msk.bf16.mxu1 %vm6046_vm1, %v6045_v1  ;;  %v1907_v63 = vrot.slane %v1905_v60, 1  ;;  %v6606_v10 = vcombine.low %v2128_v0, %v6594_v2 }
  0xbb   : > { %5448 = vmatprep.mubr.msk.bf16.mxu0 %vm6046_vm1, %v6045_v1 }
  0xc1   : > { %5431 = vmatmul.mubr.msk.bf16.gmra.mrb[80].mxu1 %vm522_vm3, %v1456_v9  ;;  %v4975_v9 = vld [vmem:[%s7888_s3 + $0x1a] sm:$0x3] }
  0xc2   : > { %5449 = vmatmul.mubr.msk.bf16.gmra.mrb[80].mxu0 %vm522_vm3, %v1580_v8  ;;  %5434 = vmatprep.mubr.msk.bf16.mxu1 %vm6046_vm1, %v6045_v1  ;;  %v1908_v8 = vsel %vm477_vm2, %v1903_v62, %v1907_v63  ;;  %v2356_v17 = vsel %vm538_vm0, %v4975_v9, 0  ;;  %v2288_v9 = vshrl.u32 %v6606_v10, 16 }
  0xc3   : > { %5452 = vmatprep.mubr.msk.bf16.mxu0 %vm6046_vm1, %v6045_v1 }
  0xc9   : > { %5435 = vmatmul.mubr.msk.bf16.gmra.mrb[84].mxu1 %vm522_vm3, %v1465_v18  ;;  %v2169_v18 = vrot.slane %v6606_v10, 1 }
  0xca   : > { %5453 = vmatmul.mubr.msk.bf16.gmra.mrb[84].mxu0 %vm522_vm3, %v1582_v16  ;;  %5462 = vmatprep.mubr.msk.bf16.mxu1 %vm6046_vm1, %v6045_v1 }
  0xcb   : > { %5456 = vmatprep.mubr.msk.bf16.mxu0 %vm6046_vm1, %v6045_v1  ;;  %v2171_v26 = vsel %vm707_vm4, %v2169_v18, %v2170_v19 }
  0xd1   : > { %5463 = vmatmul.mubr.msk.bf16.vlgmr.msra.gmra.mrb[88].mxu1 %vm522_vm3, %v5949_v27  ;;  %v6632_v27 = vld [vmem:[%s6230_s18 + $0x14] sm:$0xff]  }
  0xd2   : > { %5457 = vmatmul.mubr.msk.bf16.gmra.mrb[88].mxu0 %vm522_vm3, %v1584_v22  ;;  %5505 = vmatpush3.bf16.msra.mxu1 %v2043_v28  ;;  %v4982_v22 = vld [vmem:[%s7888_s3 + $0x1c] sm:$0x3]  ;;  %v2172_v34 = vrot.slane %v6632_v27, 1 }
  0xd3   : > { %5484 = vmatprep.mubr.msk.bf16.mxu0 %vm6046_vm1, %v6045_v1  ;;  %5466 = vmatprep.mubr.msk.bf16.mxu1 %vm6046_vm1, %v6045_v1  ;;  %v2474_v30 = vsel %vm538_vm0, %v4982_v22, 0 }
  0xd4   : > { %5548 = vmatprep.subr.bf16.mxu1 %v6045_v1 }
  0xd9   : > { %5467 = vmatmul.mubr.msk.bf16.gmra.mrb[92].mxu1 %vm522_vm3, %v5950_v36  ;;  %v2021_v36 = vrot.slane %v6550_v40, 1  ;;  %v2174_v40 = vrot.slane %v6649_v42, 1 }
  0xda   : > { %5485 = vmatmul.mubr.msk.bf16.vlgmr.msra.gmra.mrb[92].mxu0 %vm522_vm3, %v1876_v33  ;;  %5470 = vmatprep.mubr.msk.bf16.mxu1 %vm6046_vm1, %v6045_v1 }
  0xdb   : > { %5527 = vmatpush3.bf16.msra.mxu0 %v2196_v37  ;;  %5488 = vmatprep.mubr.msk.bf16.mxu0 %vm6046_vm1, %v6045_v1  ;;  %v2175_v60 = vsel %vm707_vm4, %v2172_v34, %v2174_v40  ;;  %v2024_v58 = vsel %vm707_vm4, %v2021_v36, %v2023_v52 }
  0xdc   : > { %5570 = vmatprep.subr.bf16.mxu0 %v6045_v1 }
  0xe1   : > { %5471 = vmatmul.mubr.msk.bf16.gmra.mrb[96].mxu1 %vm522_vm3, %v5953_v44 }
  0xe2   : > { %5489 = vmatmul.mubr.msk.bf16.gmra.mrb[96].mxu0 %vm522_vm3, %v1884_v41  ;;  %5474 = vmatprep.mubr.msk.bf16.mxu1 %vm6046_vm1, %v6045_v1  ;;  %v2173_v41 = vsel %vm707_vm4, %v2170_v19, %v2172_v34 }
  0xe3   : > { %5492 = vmatprep.mubr.msk.bf16.mxu0 %vm6046_vm1, %v6045_v1 }
  0xe9   : > { %5475 = vmatmul.mubr.msk.bf16.gmra.mrb[100].mxu1 %vm522_vm3, %v5955_v51 }
  0xea   : > { %5493 = vmatmul.mubr.msk.bf16.gmra.mrb[100].mxu0 %vm522_vm3, %v1892_v48  ;;  %5478 = vmatprep.mubr.msk.bf16.mxu1 %vm6046_vm1, %v6045_v1  ;;  %v2022_v48 = vsel %vm707_vm4, %v2019_v21, %v2021_v36  ;;  %v2441_v36 = vld [vmem:[%s6230_s18 + $0x4] sm:$0xc] }
  0xeb   : > { %5496 = vmatprep.mubr.msk.bf16.mxu0 %vm6046_vm1, %v6045_v1 }
  0xf1   : > { %5479 = vmatmul.mubr.msk.bf16.gmra.mrb[104].mxu1 %vm522_vm3, %v5957_v61  ;;  %v6664_v61 = vld [vmem:[%s6230_s18 + $0x24] sm:$0xff]  }
  0xf2   : > { %5497 = vmatmul.mubr.msk.bf16.gmra.mrb[104].mxu0 %vm522_vm3, %v1900_v57  ;;  %5506 = vmatprep.mubr.msk.bf16.mxu1 %vm6046_vm1, %v6045_v1 }
  0xf3   : > { %5500 = vmatprep.mubr.msk.bf16.mxu0 %vm6046_vm1, %v6045_v1 }
  0xf4   : > { %v6599_v7 = vpop.f32.mrb[0].mxu1 }
  0xf5   : > { %v576_v3 = vpop.f32.mrb[0].mxu0  ;;  %v5278_v13 = vpop.f32.mrb[1].mxu1 }
  0xf6   : > { %v5266_v5 = vpop.f32.mrb[1].mxu0  ;;  %v6611_v14 = vpop.f32.mrb[2].mxu1  ;;  %v2296_v13 = vshrl.u32 %v6609_v12, 16 }
  0xf7   : > { %v579_v6 = vpop.f32.mrb[2].mxu0  ;;  %v5279_v16 = vpop.f32.mrb[3].mxu1  ;;  %v2176_v5 = vrot.slane %v6664_v61, 1 }
  0xf8   : > { %v5267_v11 = vpop.f32.mrb[3].mxu0 }
  0xf9   : > { %5507 = vmatmul.mubr.msk.bf16.vlgmr.msra.gmra.mrb[108].mxu1 %vm522_vm3, %v2018_v15  ;;  %v2291_v11 = vshll.u32 %v6606_v10, 16  ;;  %v2299_v15 = vshll.u32 %v6609_v12, 16 }
  0xfa   : > { %5501 = vmatmul.mubr.msk.bf16.gmra.mrb[108].mxu0 %vm522_vm3, %v1908_v8  ;;  %5549 = vmatpush3.bf16.msra.mxu1 %v2356_v17 }
  0xfb   : > { %5528 = vmatprep.mubr.msk.bf16.mxu0 %vm6046_vm1, %v6045_v1  ;;  %5510 = vmatprep.mubr.msk.bf16.mxu1 %vm6046_vm1, %v6045_v1 }
  0xfc   : > { %5592 = vmatprep.subr.bf16.mxu1 %v6045_v1  ;;  %v6628_v25 = vpop.f32.mrb[4].mxu1 }
  0xfd   : > { %v584_v20 = vpop.f32.mrb[4].mxu0  ;;  %v5282_v29 = vpop.f32.mrb[5].mxu1 }
  0xfe   : > { %v5270_v23 = vpop.f32.mrb[5].mxu0  ;;  %v6635_v32 = vpop.f32.mrb[6].mxu1  ;;  %v2293_v29 = vrot.slane %v2291_v11, 2 }
  0xff   : > { %v587_v24 = vpop.f32.mrb[6].mxu0  ;;  %v5283_v33 = vpop.f32.mrb[7].mxu1 }
 0x100   : > { %v5271_v28 = vpop.f32.mrb[7].mxu0 }
 0x101   : > { %5511 = vmatmul.mubr.msk.bf16.gmra.mrb[112].mxu1 %vm522_vm3, %v2020_v31  ;;  %v2290_v28 = vrot.slane %v2288_v9, 1  ;;  %v2301_v31 = vrot.slane %v2299_v15, 2 }
 0x102   : > { %5529 = vmatmul.mubr.msk.bf16.vlgmr.msra.gmra.mrb[112].mxu0 %vm522_vm3, %v2171_v26  ;;  %5514 = vmatprep.mubr.msk.bf16.mxu1 %vm6046_vm1, %v6045_v1 }
 0x103   : > { %5571 = vmatpush3.bf16.msra.mxu0 %v2474_v30  ;;  %5532 = vmatprep.mubr.msk.bf16.mxu0 %vm6046_vm1, %v6045_v1  ;;  %v2298_v30 = vrot.slane %v2296_v13, 1 }
 0x104   : > { %5614 = vmatprep.subr.bf16.mxu0 %v6045_v1  ;;  %v662_v38 = vpop.f32.mrb[8].mxu1 }
 0x105   : > { %v592_v35 = vpop.f32.mrb[8].mxu0  ;;  %v663_v43 = vadd.f32 %v662_v38, %v576_v3  ;;  %v5288_v44 = vpop.f32.mrb[9].mxu1  ;;  %v2294_v38 = vor.u32 %v2293_v29, %v2290_v28 }
 0x106   : > { %v5274_v37 = vpop.f32.mrb[9].mxu0  ;;  %v665_v46 = vpop.f32.mrb[10].mxu1 }
 0x107   : > { %v595_v39 = vpop.f32.mrb[10].mxu0  ;;  %v666_v49 = vadd.f32 %v665_v46, %v579_v6  ;;  %v5289_v50 = vpop.f32.mrb[11].mxu1  ;;  %v2025_v6 = vrot.slane %v6577_v54, 1  ;;  %v5966_v54 = vld [vmem:[%s6230_s18 + $0x2c] ss:$0 sps:$4 sm:$0x11]  }
 0x108   : > { %v5275_v45 = vpop.f32.mrb[11].mxu0  ;;  %v4989_v50 = vld [vmem:[%s7888_s3 + $0x1e] sm:$0x3] }
 0x109   : > { %5515 = vmatmul.mubr.msk.bf16.gmra.mrb[116].mxu1 %vm522_vm3, %v2022_v48  ;;  %v2026_v10 = vsel %vm707_vm4, %v2023_v52, %v2025_v6  ;;  %v2317_v6 = vshll.u32 %v6649_v42, 16 }
 0x10a   : > { %5533 = vmatmul.mubr.msk.bf16.gmra.mrb[116].mxu0 %vm522_vm3, %v2173_v41  ;;  %5518 = vmatprep.mubr.msk.bf16.mxu1 %vm6046_vm1, %v6045_v1  ;;  %v2302_v41 = vor.u32 %v2301_v31, %v2298_v30  ;;  %v2326_v30 = vshll.u32 %v6664_v61, 16 }
 0x10b   : > { %5536 = vmatprep.mubr.msk.bf16.mxu0 %vm6046_vm1, %v6045_v1 }
 0x10c   : > { %v670_v57 = vpop.f32.mrb[12].mxu1 }
 0x10d   : > { %v771_v51 = vpop.f32.mrb[12].mxu0  ;;  %v671_v56 = vadd.f32 %v670_v57, %v584_v20  ;;  %v5292_v62 = vpop.f32.mrb[13].mxu1  ;;  %v2177_v20 = vsel %vm707_vm4, %v2174_v40, %v2176_v5  ;;  %v4983_v40 = vcombine.low %v2441_v36, %v6594_v2 }
 0x10e   : > { %v5310_v53 = vpop.f32.mrb[13].mxu0  ;;  %v6660_v55 = vadd.f32 %v771_v51, %v663_v43  ;;  %v673_v3 = vpop.f32.mrb[14].mxu1  ;;  %v2305_v43 = vshrl.u32 %v6632_v27, 16 }
 0x10f   : > { %v774_v59 = vpop.f32.mrb[14].mxu0  ;;  %v674_v4 = vadd.f32 %v673_v3, %v587_v24  ;;  %v5293_v47 = vpop.f32.mrb[15].mxu1  ;;  %v2447_v2 = vrot.slane %v4983_v40, 2 }
 0x110   : > { %v5311_v63 = vpop.f32.mrb[15].mxu0  ;;  %v6666_v0 = vadd.f32 %v774_v59, %v666_v49 }
 0x111   : > { %5519 = vmatmul.mubr.msk.bf16.gmra.mrb[120].mxu1 %vm522_vm3, %v2024_v58  ;;  %v2627_v58 = vsel %vm538_vm0, %v4989_v50, 0 }
 0x112   : > { %5537 = vmatmul.mubr.msk.bf16.gmra.mrb[120].mxu0 %vm522_vm3, %v2175_v60  ;;  %5522 = vmatprep.mubr.msk.bf16.mxu1 %vm6046_vm1, %v6045_v1  ;;  %v2303_v60 = vsel %vm979_vm5, %v2294_v38, %v2302_v41 }
 0x113   : > { %5540 = vmatprep.mubr.msk.bf16.mxu0 %vm6046_vm1, %v6045_v1 }
 0x114   : > { %v678_v18 = vpop.f32.mrb[16].mxu1 }
 0x115   : > { %v779_v8 = vpop.f32.mrb[16].mxu0  ;;  %v679_v21 = vadd.f32 %v678_v18, %v592_v35  ;;  %v5296_v22 = vpop.f32.mrb[17].mxu1  ;;  %v2178_v35 = vrot.slane %v5966_v54, 1 }
 0x116   : > { %v6681_v16 = vadd.f32 %v779_v8, %v671_v56  ;;  %v5314_v17 = vpop.f32.mrb[17].mxu0  ;;  %v681_v26 = vpop.f32.mrb[18].mxu1  ;;  %v2307_v56 = vrot.slane %v2305_v43, 1 }
 0x117   : > { %v782_v19 = vpop.f32.mrb[18].mxu0  ;;  %v682_v33 = vadd.f32 %v681_v26, %v595_v39  ;;  %v5297_v34 = vpop.f32.mrb[19].mxu1  ;;  %v2308_v39 = vshll.u32 %v6632_v27, 16  ;;  %v2179_v49 = vsel %vm707_vm4, %v2176_v5, %v2178_v35  ;;  %v2314_v5 = vshrl.u32 %v6649_v42, 16 }
 0x118   : > { %v6685_v23 = vadd.f32 %v782_v19, %v674_v4  ;;  %v5315_v24 = vpop.f32.mrb[19].mxu0 }
 0x119   : > { %5523 = vmatmul.mubr.msk.bf16.gmra.mrb[124].mxu1 %vm522_vm3, %v2026_v10  ;;  %v2310_v62 = vrot.slane %v2308_v39, 2  ;;  %v2316_v22 = vrot.slane %v2314_v5, 1  ;;  %v2319_v24 = vrot.slane %v2317_v6, 2 }
 0x11a   : > { %5541 = vmatmul.mubr.msk.bf16.gmra.mrb[124].mxu0 %vm522_vm3, %v2177_v20  ;;  %5550 = vmatprep.mubr.msk.bf16.mxu1 %vm6046_vm1, %v6045_v1 }
 0x11b   : > { %5544 = vmatprep.mubr.msk.bf16.mxu0 %vm6046_vm1, %v6045_v1  ;;  %v2311_v47 = vor.u32 %v2310_v62, %v2307_v56  ;;  %v2320_v29 = vor.u32 %v2319_v24, %v2316_v22 }
 0x11c   : > { %v686_v46 = vpop.f32.mrb[20].mxu1 }
 0x11d   : > { %v787_v37 = vpop.f32.mrb[20].mxu0  ;;  %v687_v51 = vadd.f32 %v686_v46, %v6599_v7  ;;  %v5300_v52 = vpop.f32.mrb[21].mxu1  ;;  %v2448_v7 = vrot.slane %v6609_v12, 2  ;;  %v2321_v39 = vsel %vm979_vm5, %v2311_v47, %v2320_v29  ;;  %v2328_v46 = vrot.slane %v2326_v30, 2 }
 0x11e   : > { %v6697_v44 = vadd.f32 %v787_v37, %v679_v21  ;;  %v5318_v45 = vpop.f32.mrb[21].mxu0  ;;  %v689_v59 = vpop.f32.mrb[22].mxu1  ;;  %v2312_v21 = vsel %vm979_vm5, %v2302_v41, %v2311_v47 }
 0x11f   : > { %v790_v48 = vpop.f32.mrb[22].mxu0  ;;  %v690_v63 = vadd.f32 %v689_v59, %v6611_v14  ;;  %v5301_v3 = vpop.f32.mrb[23].mxu1  ;;  %v5001_v14 = vld [vmem:[%s7888_s3 + $0x20] sm:$0x3]  ;;  %v2449_v13 = vsel %vm1140_vm6, %v2447_v2, %v2448_v7 }
 0x120   : > { %v6705_v53 = vadd.f32 %v790_v48, %v682_v33  ;;  %v5319_v57 = vpop.f32.mrb[23].mxu0  ;;  %v2787_v20 = vsel %vm538_vm0, %v5001_v14, 0  ;;  %v6750_v48 = vld [vmem:[%s6230_s18 + $0x2c] ss:$0 sps:$4 sm:$0x33]  }
 0x121   : > { %5551 = vmatmul.mubr.msk.bf16.vlgmr.msra.gmra.mrb[128].mxu1 %vm522_vm3, %v2303_v60  ;;  %v2332_v52 = vshrl.u32 %v6750_v48, 16  ;;  %v2335_v57 = vshll.u32 %v6750_v48, 16 }
 0x122   : > { %5545 = vmatmul.mubr.msk.bf16.gmra.mrb[128].mxu0 %vm522_vm3, %v2179_v49  ;;  %5593 = vmatpush3.bf16.msra.mxu1 %v2627_v58 }
 0x123   : > { %5572 = vmatprep.mubr.msk.bf16.mxu0 %vm6046_vm1, %v6045_v1  ;;  %5554 = vmatprep.mubr.msk.bf16.mxu1 %vm6046_vm1, %v6045_v1  ;;  %v2337_v47 = vrot.slane %v2335_v57, 2 }
 0x124   : > { %5636 = vmatprep.subr.bf16.mxu1 %v6045_v1  ;;  %v694_v12 = vpop.f32.mrb[24].mxu1 }
 0x125   : > { %v795_v4 = vpop.f32.mrb[24].mxu0  ;;  %v695_v15 = vadd.f32 %v694_v12, %v6628_v25  ;;  %v5304_v17 = vpop.f32.mrb[25].mxu1  ;;  %v2450_v25 = vrot.slane %v6632_v27, 2  ;;  %v2559_v12 = vld [vmem:[%s6230_s18 + $0x8] sm:$0xc] }
 0x126   : > { %v6722_v8 = vadd.f32 %v795_v4, %v687_v51  ;;  %v5322_v9 = vpop.f32.mrb[25].mxu0  ;;  %v697_v54 = vpop.f32.mrb[26].mxu1  ;;  %v2334_v4 = vrot.slane %v2332_v52, 1 }
 0x127   : > { %v798_v11 = vpop.f32.mrb[26].mxu0  ;;  %v698_v10 = vadd.f32 %v697_v54, %v6635_v32  ;;  %v5305_v26 = vpop.f32.mrb[27].mxu1  ;;  %v2323_v32 = vshrl.u32 %v6664_v61, 16  ;;  %v2451_v27 = vsel %vm1140_vm6, %v2448_v7, %v2450_v25 }
 0x128   : > { %v6727_v18 = vadd.f32 %v798_v11, %v690_v63  ;;  %v5323_v19 = vpop.f32.mrb[27].mxu0  ;;  %v2338_v9 = vor.u32 %v2337_v47, %v2334_v4  ;;  %v6779_v11 = vld [vmem:[%s6230_s18 + $0xc] sm:$0xf]  ;;  %v6790_v26 = vld [vmem:[%s6230_s18 + $0x10] sm:$0xff]  }
 0x129   : > { %5555 = vmatmul.mubr.msk.bf16.gmra.mrb[132].mxu1 %vm522_vm3, %v2312_v21  ;;  %v2325_v45 = vrot.slane %v2323_v32, 1  ;;  %v4990_v22 = vcombine.low %v2559_v12, %v6779_v11  ;;  %v2727_v30 = vshrl.u32 %v6790_v26, 16 }
 0x12a   : > { %5573 = vmatmul.mubr.msk.bf16.vlgmr.msra.gmra.mrb[132].mxu0 %vm522_vm3, %v2449_v13  ;;  %5558 = vmatprep.mubr.msk.bf16.mxu1 %vm6046_vm1, %v6045_v1 }
 0x12b   : > { %5615 = vmatpush3.bf16.msra.mxu0 %v2787_v20  ;;  %5576 = vmatprep.mubr.msk.bf16.mxu0 %vm6046_vm1, %v6045_v1  ;;  %v2329_v51 = vor.u32 %v2328_v46, %v2325_v45  ;;  %v2722_v32 = vshll.u32 %v4990_v22, 16  ;;  %v5008_v46 = vld [vmem:[%s7888_s3 + $0x22] sm:$0x3] }
 0x12c   : > { %5658 = vmatprep.subr.bf16.mxu0 %v6045_v1  ;;  %v924_v34 = vpop.f32.mrb[28].mxu1 }
 0x12d   : > { %v803_v28 = vpop.f32.mrb[28].mxu0  ;;  %v963_v36 = vadd.f32 %v924_v34, %v6660_v55  ;;  %v5332_v37 = vpop.f32.mrb[29].mxu1  ;;  %v2452_v55 = vrot.slane %v6649_v42, 2  ;;  %v2330_v7 = vsel %vm979_vm5, %v2320_v29, %v2329_v51  ;;  %v2719_v29 = vshrl.u32 %v4990_v22, 16 }
 0x12e   : > { %v6742_v31 = vadd.f32 %v803_v28, %v695_v15  ;;  %v5326_v33 = vpop.f32.mrb[29].mxu0  ;;  %v927_v43 = vpop.f32.mrb[30].mxu1 }
 0x12f   : > { %v806_v35 = vpop.f32.mrb[30].mxu0  ;;  %v964_v49 = vadd.f32 %v927_v43, %v6666_v0  ;;  %v5333_v50 = vpop.f32.mrb[31].mxu1  ;;  %v2453_v62 = vsel %vm1140_vm6, %v2450_v25, %v2452_v55  ;;  %v2730_v33 = vshll.u32 %v6790_v26, 16  ;;  %v2721_v37 = vrot.slane %v2719_v29, 2 }
 0x130   : > { %v6746_v38 = vadd.f32 %v806_v35, %v698_v10  ;;  %v5327_v41 = vpop.f32.mrb[31].mxu0  ;;  %v2339_v10 = vsel %vm979_vm5, %v2329_v51, %v2338_v9  ;;  %v2601_v35 = vrot.slane %v6790_v26, 2 }
 0x131   : > { %5559 = vmatmul.mubr.msk.bf16.gmra.mrb[136].mxu1 %vm522_vm3, %v2321_v39  ;;  %v2724_v41 = vrot.slane %v2722_v32, 3 }
 0x132   : > { %5577 = vmatmul.mubr.msk.bf16.gmra.mrb[136].mxu0 %vm522_vm3, %v2451_v27  ;;  %5562 = vmatprep.mubr.msk.bf16.mxu1 %vm6046_vm1, %v6045_v1 }
 0x133   : > { %5580 = vmatprep.mubr.msk.bf16.mxu0 %vm6046_vm1, %v6045_v1 }
 0x134   : > { %v932_v60 = vpop.f32.mrb[32].mxu1 }
 0x135   : > { %v1085_v40 = vpop.f32.mrb[32].mxu0  ;;  %v965_v42 = vadd.f32 %v932_v60, %v6681_v16  ;;  %v5336_v63 = vpop.f32.mrb[33].mxu1  ;;  %v2454_v16 = vrot.slane %v6664_v61, 2 }
 0x136   : > { %v6762_v0 = vadd.f32 %v1085_v40, %v963_v36  ;;  %v5354_v59 = vpop.f32.mrb[33].mxu0  ;;  %v935_v2 = vpop.f32.mrb[34].mxu1 }
 0x137   : > { %v1088_v56 = vpop.f32.mrb[34].mxu0  ;;  %v966_v14 = vadd.f32 %v935_v2, %v6685_v23  ;;  %v5337_v5 = vpop.f32.mrb[35].mxu1  ;;  %v2455_v19 = vsel %vm1140_vm6, %v2452_v55, %v2454_v16  ;;  %v6814_v59 = vld [vmem:[%s6230_s18 + $0x18] sm:$0xff]  }
 0x138   : > { %v6766_v3 = vadd.f32 %v1088_v56, %v964_v49  ;;  %v5355_v58 = vpop.f32.mrb[35].mxu0  ;;  %v2732_v49 = vrot.slane %v2730_v33, 3  ;;  %v2736_v63 = vshrl.u32 %v6814_v59, 16 }
 0x139   : > { %5563 = vmatmul.mubr.msk.bf16.gmra.mrb[140].mxu1 %vm522_vm3, %v2330_v7  ;;  %v2739_v58 = vshll.u32 %v6814_v59, 16  ;;  %v5015_v7 = vld [vmem:[%s7888_s3 + $0x24] sm:$0x3] }
 0x13a   : > { %5581 = vmatmul.mubr.msk.bf16.gmra.mrb[140].mxu0 %vm522_vm3, %v2453_v62  ;;  %5566 = vmatprep.mubr.msk.bf16.mxu1 %vm6046_vm1, %v6045_v1  ;;  %v2905_v62 = vsel %vm538_vm0, %v5008_v46, 0 }
 0x13b   : > { %5584 = vmatprep.mubr.msk.bf16.mxu0 %vm6046_vm1, %v6045_v1  ;;  %v2741_v9 = vrot.slane %v2739_v58, 3 }
 0x13c   : > { %v940_v15 = vpop.f32.mrb[36].mxu1 }
 0x13d   : > { %v1093_v6 = vpop.f32.mrb[36].mxu0  ;;  %v967_v61 = vadd.f32 %v940_v15, %v6697_v44  ;;  %v5340_v20 = vpop.f32.mrb[37].mxu1  ;;  %v2456_v44 = vrot.slane %v6750_v48, 2  ;;  %v2729_v48 = vrot.slane %v2727_v30, 2 }
 0x13e   : > { %v6781_v23 = vadd.f32 %v1093_v6, %v965_v42  ;;  %v5358_v13 = vpop.f32.mrb[37].mxu0  ;;  %v943_v24 = vpop.f32.mrb[38].mxu1  ;;  %v2738_v6 = vrot.slane %v2736_v63, 2 }
 0x13f   : > { %v1096_v17 = vpop.f32.mrb[38].mxu0  ;;  %v968_v25 = vadd.f32 %v943_v24, %v6705_v53  ;;  %v5341_v28 = vpop.f32.mrb[39].mxu1  ;;  %v2600_v53 = vrot.slane %v4990_v22, 2  ;;  %v2457_v45 = vsel %vm1140_vm6, %v2454_v16, %v2456_v44  ;;  %v2733_v42 = vor.u32 %v2732_v49, %v2729_v48 }
 0x140   : > { %v6785_v54 = vadd.f32 %v1096_v17, %v966_v14  ;;  %v5359_v21 = vpop.f32.mrb[39].mxu0 }
 0x141   : > { %5567 = vmatmul.mubr.msk.bf16.gmra.mrb[144].mxu1 %vm522_vm3, %v2339_v10  ;;  %v2602_v57 = vsel %vm1140_vm6, %v2600_v53, %v2601_v35  ;;  %v6840_v21 = vld [vmem:[%s6230_s18 + $0x20] sm:$0xff]  }
 0x142   : > { %5585 = vmatmul.mubr.msk.bf16.gmra.mrb[144].mxu0 %vm522_vm3, %v2455_v19  ;;  %5594 = vmatprep.mubr.msk.bf16.mxu1 %vm6046_vm1, %v6045_v1  ;;  %v3043_v19 = vsel %vm538_vm0, %v5015_v7, 0  ;;  %v2745_v10 = vshrl.u32 %v6840_v21, 16 }
 0x143   : > { %5588 = vmatprep.mubr.msk.bf16.mxu0 %vm6046_vm1, %v6045_v1 }
 0x144   : > { %v948_v43 = vpop.f32.mrb[40].mxu1 }
 0x145   : > { %v1101_v34 = vpop.f32.mrb[40].mxu0  ;;  %v969_v50 = vadd.f32 %v948_v43, %v6722_v8  ;;  %v5344_v55 = vpop.f32.mrb[41].mxu1  ;;  %v2725_v8 = vor.u32 %v2724_v41, %v2721_v37  ;;  %v6860_v43 = vld [vmem:[%s6230_s18 + $0x28] sm:$0xff]  }
 0x146   : > { %v6803_v27 = vadd.f32 %v1101_v34, %v967_v61  ;;  %v5362_v36 = vpop.f32.mrb[41].mxu0  ;;  %v951_v52 = vpop.f32.mrb[42].mxu1  ;;  %v2747_v34 = vrot.slane %v2745_v10, 2  ;;  %v2754_v49 = vshrl.u32 %v6860_v43, 16 }
 0x147   : > { %v1104_v39 = vpop.f32.mrb[42].mxu0  ;;  %v970_v60 = vadd.f32 %v951_v52, %v6727_v18  ;;  %v5345_v56 = vpop.f32.mrb[43].mxu1  ;;  %v2603_v18 = vrot.slane %v6814_v59, 2  ;;  %v2734_v16 = vsel %vm1412_vm7, %v2725_v8, %v2733_v42 }
 0x148   : > { %v6810_v40 = vadd.f32 %v1104_v39, %v968_v25  ;;  %v5363_v51 = vpop.f32.mrb[43].mxu0  ;;  %v2748_v25 = vshll.u32 %v6840_v21, 16 }
 0x149   : > { %5595 = vmatmul.mubr.msk.bf16.vlgmr.msra.gmra.mrb[148].mxu1 %vm522_vm3, %v2602_v57  ;;  %v2604_v20 = vsel %vm1140_vm6, %v2601_v35, %v2603_v18  ;;  %v2756_v57 = vrot.slane %v2754_v49, 2 }
 0x14a   : > { %5589 = vmatmul.mubr.msk.bf16.gmra.mrb[148].mxu0 %vm522_vm3, %v2457_v45  ;;  %5637 = vmatpush3.bf16.msra.mxu1 %v2905_v62  ;;  %v2750_v53 = vrot.slane %v2748_v25, 3 }
 0x14b   : > { %5616 = vmatprep.mubr.msk.bf16.mxu0 %vm6046_vm1, %v6045_v1  ;;  %5598 = vmatprep.mubr.msk.bf16.mxu1 %vm6046_vm1, %v6045_v1 }
 0x14c   : > { %5680 = vmatprep.subr.bf16.mxu1 %v6045_v1  ;;  %v956_v14 = vpop.f32.mrb[44].mxu1 }
 0x14d   : > { %v1109_v2 = vpop.f32.mrb[44].mxu0  ;;  %v971_v12 = vadd.f32 %v956_v14, %v6742_v31  ;;  %v5348_v13 = vpop.f32.mrb[45].mxu1  ;;  %v2742_v31 = vor.u32 %v2741_v9, %v2738_v6  ;;  %v5974_v14 = vld [vmem:[%s6230_s18 + $0x30] ss:$0 sps:$4 sm:$0x33]  }
 0x14e   : > { %v6830_v4 = vadd.f32 %v1109_v2, %v969_v50  ;;  %v5366_v47 = vpop.f32.mrb[45].mxu0  ;;  %v959_v61 = vpop.f32.mrb[46].mxu1  ;;  %v2757_v50 = vshll.u32 %v6860_v43, 16  ;;  %v2609_v13 = vrot.slane %v5974_v14, 2 }
 0x14f   : > { %v1112_v5 = vpop.f32.mrb[46].mxu0  ;;  %v972_v22 = vadd.f32 %v959_v61, %v6746_v38  ;;  %v5349_v24 = vpop.f32.mrb[47].mxu1  ;;  %v2605_v38 = vrot.slane %v6840_v21, 2  ;;  %v2743_v33 = vsel %vm1412_vm7, %v2733_v42, %v2742_v31  ;;  %v6877_v42 = vld [vmem:[%s6230_s18 + $0x30] ss:$0 sps:$4 sm:$0x77]  }
 0x150   : > { %v6835_v15 = vadd.f32 %v1112_v5, %v970_v60  ;;  %v5367_v17 = vpop.f32.mrb[47].mxu0  ;;  %v2759_v8 = vrot.slane %v2757_v50, 3  ;;  %v2766_v9 = vshll.u32 %v6877_v42, 16 }
 0x151   : > { %5599 = vmatmul.mubr.msk.bf16.gmra.mrb[152].mxu1 %vm522_vm3, %v2604_v20  ;;  %v2606_v45 = vsel %vm1140_vm6, %v2603_v18, %v2605_v38 }
 0x152   : > { %5617 = vmatmul.mubr.msk.bf16.vlgmr.msra.gmra.mrb[152].mxu0 %vm522_vm3, %v2734_v16  ;;  %5602 = vmatprep.mubr.msk.bf16.mxu1 %vm6046_vm1, %v6045_v1  ;;  %v2760_v6 = vor.u32 %v2759_v8, %v2756_v57  ;;  %v5977_v8 = vld [vmem:[%s6269_s9] sm:$0xff]  }
 0x153   : > { %5659 = vmatpush3.bf16.msra.mxu0 %v3043_v19  ;;  %5620 = vmatprep.mubr.msk.bf16.mxu0 %vm6046_vm1, %v6045_v1  ;;  %v2872_v19 = vld [vmem:[%s6230_s18 + $0x8] sm:$0x8] }
 0x154   : > { %5702 = vmatprep.subr.bf16.mxu0 %v6045_v1  ;;  %v1204_v44 = vpop.f32.mrb[48].mxu1 }
 0x155   : > { %v1117_v28 = vpop.f32.mrb[48].mxu0  ;;  %v1243_v35 = vadd.f32 %v1204_v44, %v6762_v0  ;;  %v5376_v36 = vpop.f32.mrb[49].mxu1  ;;  %v2751_v0 = vor.u32 %v2750_v53, %v2747_v34 }
 0x156   : > { %v6853_v29 = vadd.f32 %v1117_v28, %v971_v12  ;;  %v5370_v32 = vpop.f32.mrb[49].mxu0  ;;  %v1207_v39 = vpop.f32.mrb[50].mxu1  ;;  %v2879_v36 = vrot.slane %v6790_v26, 3 }
 0x157   : > { %v1120_v30 = vpop.f32.mrb[50].mxu0  ;;  %v1244_v46 = vadd.f32 %v1207_v39, %v6766_v3  ;;  %v5377_v48 = vpop.f32.mrb[51].mxu1  ;;  %v2607_v3 = vrot.slane %v6860_v43, 2  ;;  %v2752_v62 = vsel %vm1412_vm7, %v2742_v31, %v2751_v0  ;;  %v2768_v31 = vrot.slane %v2766_v9, 3 }
 0x158   : > { %v6857_v37 = vadd.f32 %v1120_v30, %v972_v22  ;;  %v5371_v41 = vpop.f32.mrb[51].mxu0  ;;  %v2761_v22 = vsel %vm1412_vm7, %v2751_v0, %v2760_v6  ;;  %v5009_v30 = vcombine.low %v2872_v19, %v6779_v11  ;;  %v2883_v9 = vrot.slane %v6840_v21, 3 }
 0x159   : > { %5603 = vmatmul.mubr.msk.bf16.gmra.mrb[156].mxu1 %vm522_vm3, %v2606_v45  ;;  %v2608_v47 = vsel %vm1140_vm6, %v2605_v38, %v2607_v3  ;;  %v2610_v44 = vsel %vm1140_vm6, %v2607_v3, %v2609_v13  ;;  %v5978_v13 = vld [vmem:[%s6269_s9 + $0x8] sm:$0xff]  }
 0x15a   : > { %5621 = vmatmul.mubr.msk.bf16.gmra.mrb[156].mxu0 %vm522_vm3, %v2743_v33  ;;  %5606 = vmatprep.mubr.msk.bf16.mxu1 %vm6046_vm1, %v6045_v1 }
 0x15b   : > { %5624 = vmatprep.mubr.msk.bf16.mxu0 %vm6046_vm1, %v6045_v1 }
 0x15c   : > { %v1212_v60 = vpop.f32.mrb[52].mxu1 }
 0x15d   : > { %v1357_v55 = vpop.f32.mrb[52].mxu0  ;;  %v1245_v63 = vadd.f32 %v1212_v60, %v6781_v23  ;;  %v5380_v58 = vpop.f32.mrb[53].mxu1  ;;  %v2763_v23 = vshrl.u32 %v6877_v42, 16  ;;  %v2881_v60 = vrot.slane %v6814_v59, 3 }
 0x15e   : > { %v6873_v51 = vadd.f32 %v1357_v55, %v1243_v35  ;;  %v5398_v52 = vpop.f32.mrb[53].mxu0  ;;  %v1215_v7 = vpop.f32.mrb[54].mxu1  ;;  %v2878_v35 = vrot.slane %v5009_v30, 3  ;;  %v5979_v30 = vld [vmem:[%s6269_s9 + $0x10] sm:$0xff]  }
 0x15f   : > { %v1360_v56 = vpop.f32.mrb[54].mxu0  ;;  %v1246_v5 = vadd.f32 %v1215_v7, %v6785_v54  ;;  %v5381_v16 = vpop.f32.mrb[55].mxu1  ;;  %v2765_v24 = vrot.slane %v2763_v23, 2 }
 0x160   : > { %v6880_v2 = vadd.f32 %v1360_v56, %v1244_v46  ;;  %v5399_v18 = vpop.f32.mrb[55].mxu0  ;;  %v5026_v46 = vld [vmem:[%s7888_s3 + $0x26] sm:$0x3]  ;;  %v2880_v26 = vsel %vm1573_vm8, %v2878_v35, %v2879_v36  ;;  %v2882_v16 = vsel %vm1573_vm8, %v2879_v36, %v2881_v60 }
 0x161   : > { %5607 = vmatmul.mubr.msk.bf16.gmra.mrb[160].mxu1 %vm522_vm3, %v2608_v47  ;;  %v2769_v53 = vor.u32 %v2768_v31, %v2765_v24  ;;  %v3229_v57 = vsel %vm538_vm0, %v5026_v46, 0 }
 0x162   : > { %5625 = vmatmul.mubr.msk.bf16.gmra.mrb[160].mxu0 %vm522_vm3, %v2752_v62  ;;  %5610 = vmatprep.mubr.msk.bf16.mxu1 %vm6046_vm1, %v6045_v1 }
 0x163   : > { %5628 = vmatprep.mubr.msk.bf16.mxu0 %vm6046_vm1, %v6045_v1  ;;  %v2770_v45 = vsel %vm1412_vm7, %v2760_v6, %v2769_v53 }
 0x164   : > { %v1220_v61 = vpop.f32.mrb[56].mxu1 }
 0x165   : > { %v1365_v12 = vpop.f32.mrb[56].mxu0  ;;  %v1247_v10 = vadd.f32 %v1220_v61, %v6803_v27  ;;  %v5384_v25 = vpop.f32.mrb[57].mxu1 }
 0x166   : > { %v6893_v17 = vadd.f32 %v1365_v12, %v1245_v63  ;;  %v5402_v54 = vpop.f32.mrb[57].mxu0  ;;  %v1223_v32 = vpop.f32.mrb[58].mxu1 }
 0x167   : > { %v1368_v20 = vpop.f32.mrb[58].mxu0  ;;  %v1248_v33 = vadd.f32 %v1223_v32, %v6810_v40  ;;  %v5385_v34 = vpop.f32.mrb[59].mxu1 }
 0x168   : > { %v6898_v28 = vadd.f32 %v1368_v20, %v1246_v5  ;;  %v5403_v38 = vpop.f32.mrb[59].mxu0 }
 0x169   : > { %5611 = vmatmul.mubr.msk.bf16.gmra.mrb[164].mxu1 %vm522_vm3, %v2610_v44  ;;  %v2885_v38 = vrot.slane %v6860_v43, 3 }
 0x16a   : > { %5629 = vmatmul.mubr.msk.bf16.gmra.mrb[164].mxu0 %vm522_vm3, %v2761_v22  ;;  %5638 = vmatprep.mubr.msk.bf16.mxu1 %vm6046_vm1, %v6045_v1 }
 0x16b   : > { %5632 = vmatprep.mubr.msk.bf16.mxu0 %vm6046_vm1, %v6045_v1  ;;  %v2886_v43 = vsel %vm1573_vm8, %v2883_v9, %v2885_v38 }
 0x16c   : > { %v1228_v40 = vpop.f32.mrb[60].mxu1 }
 0x16d   : > { %v1373_v27 = vpop.f32.mrb[60].mxu0  ;;  %v1249_v48 = vadd.f32 %v1228_v40, %v6830_v4  ;;  %v5388_v49 = vpop.f32.mrb[61].mxu1 }
 0x16e   : > { %v6910_v41 = vadd.f32 %v1373_v27, %v1247_v10  ;;  %v5406_v11 = vpop.f32.mrb[61].mxu0  ;;  %v1231_v55 = vpop.f32.mrb[62].mxu1  ;;  %v2884_v10 = vsel %vm1573_vm8, %v2881_v60, %v2883_v9  ;;  %v6986_v49 = vld [vmem:[%s6269_s9 + $0x8] sm:$0xff]  }
 0x16f   : > { %v1376_v39 = vpop.f32.mrb[62].mxu0  ;;  %v1250_v3 = vadd.f32 %v1231_v55, %v6835_v15  ;;  %v5389_v52 = vpop.f32.mrb[63].mxu1  ;;  %v5038_v15 = vld [vmem:[%s7888_s3 + $0x28] sm:$0x3] }
 0x170   : > { %v6917_v0 = vadd.f32 %v1376_v39, %v1248_v33  ;;  %v5407_v50 = vpop.f32.mrb[63].mxu0  ;;  %v3347_v59 = vsel %vm538_vm0, %v5038_v15, 0  ;;  %v3128_v33 = vld [vmem:[%s6269_s9] sm:$0xf] }
 0x171   : > { %5639 = vmatmul.mubr.msk.bf16.vlgmr.msra.gmra.mrb[168].mxu1 %vm522_vm3, %v2880_v26  ;;  %v5980_v26 = vld [vmem:[%s6269_s9 + $0x18] sm:$0xff]  }
 0x172   : > { %5633 = vmatmul.mubr.msk.bf16.gmra.mrb[168].mxu0 %vm522_vm3, %v2770_v45  ;;  %5681 = vmatpush3.bf16.msra.mxu1 %v3229_v57 }
 0x173   : > { %5660 = vmatprep.mubr.msk.bf16.mxu0 %vm6046_vm1, %v6045_v1  ;;  %5642 = vmatprep.mubr.msk.bf16.mxu1 %vm6046_vm1, %v6045_v1 }
 0x174   : > { %5724 = vmatprep.subr.bf16.mxu1 %v6045_v1  ;;  %v1236_v63 = vpop.f32.mrb[64].mxu1 }
 0x175   : > { %v1381_v4 = vpop.f32.mrb[64].mxu0  ;;  %v1251_v18 = vadd.f32 %v1236_v63, %v6853_v29  ;;  %v5392_v7 = vpop.f32.mrb[65].mxu1 }
 0x176   : > { %v6932_v56 = vadd.f32 %v1381_v4, %v1249_v48  ;;  %v5410_v62 = vpop.f32.mrb[65].mxu0  ;;  %v1239_v5 = vpop.f32.mrb[66].mxu1  ;;  %v2887_v48 = vrot.slane %v6877_v42, 3 }
 0x177   : > { %v1384_v58 = vpop.f32.mrb[66].mxu0  ;;  %v1252_v6 = vadd.f32 %v1239_v5, %v6857_v37  ;;  %v5393_v23 = vpop.f32.mrb[67].mxu1 }
 0x178   : > { %v6937_v47 = vadd.f32 %v1384_v58, %v1250_v3  ;;  %v5411_v14 = vpop.f32.mrb[67].mxu0  ;;  %v2888_v42 = vsel %vm1573_vm8, %v2885_v38, %v2887_v48  ;;  %v3177_v58 = vshll.u32 %v6986_v49, 16  ;;  %v5981_v23 = vld [vmem:[%s6269_s9 + $0x20] sm:$0xff]  }
 0x179   : > { %5643 = vmatmul.mubr.msk.bf16.gmra.mrb[172].mxu1 %vm522_vm3, %v2882_v16  ;;  %v7005_v16 = vld [vmem:[%s6269_s9 + $0x10] sm:$0xff]  }
 0x17a   : > { %5661 = vmatmul.mubr.msk.bf16.vlgmr.msra.gmra.mrb[172].mxu0 %vm522_vm3, %v5977_v8  ;;  %5646 = vmatprep.mubr.msk.bf16.mxu1 %vm6046_vm1, %v6045_v1  ;;  %v3179_v5 = vrot.slane %v3177_v58, 1 }
 0x17b   : > { %5703 = vmatpush3.bf16.msra.mxu0 %v3347_v59  ;;  %5664 = vmatprep.mubr.msk.bf16.mxu0 %vm6046_vm1, %v6045_v1 }
 0x17c   : > { %5746 = vmatprep.subr.bf16.mxu0 %v6045_v1  ;;  %v1518_v54 = vpop.f32.mrb[68].mxu1 }
 0x17d   : > { %v1389_v29 = vpop.f32.mrb[68].mxu0  ;;  %v1557_v61 = vadd.f32 %v1518_v54, %v6873_v51  ;;  %v5420_v20 = vpop.f32.mrb[69].mxu1 }
 0x17e   : > { %v6950_v12 = vadd.f32 %v1389_v29, %v1251_v18  ;;  %v5414_v37 = vpop.f32.mrb[69].mxu0  ;;  %v1521_v31 = vpop.f32.mrb[70].mxu1 }
 0x17f   : > { %v1392_v19 = vpop.f32.mrb[70].mxu0  ;;  %v1558_v21 = vadd.f32 %v1521_v31, %v6880_v2  ;;  %v5421_v25 = vpop.f32.mrb[71].mxu1  ;;  %v6970_v2 = vld [vmem:[%s6269_s9 + $0x4] sm:$0xf]  ;;  %v5045_v37 = vld [vmem:[%s7888_s3 + $0x2a] sm:$0x3] }
 0x180   : > { %v6954_v22 = vadd.f32 %v1392_v19, %v1252_v6  ;;  %v5415_v24 = vpop.f32.mrb[71].mxu0  ;;  %v5027_v39 = vcombine.low %v3128_v33, %v6970_v2  ;;  %v3500_v38 = vsel %vm538_vm0, %v5045_v37, 0 }
 0x181   : > { %5647 = vmatmul.mubr.msk.bf16.gmra.mrb[176].mxu1 %vm522_vm3, %v2884_v10  ;;  %v3181_v10 = vshrl.u32 %v6986_v49, 16 }
 0x182   : > { %5665 = vmatmul.mubr.msk.bf16.gmra.mrb[176].mxu0 %vm522_vm3, %v5978_v13  ;;  %5650 = vmatprep.mubr.msk.bf16.mxu1 %vm6046_vm1, %v6045_v1  ;;  %v3172_v50 = vshll.u32 %v5027_v39, 16  ;;  %v3170_v8 = vshrl.u32 %v5027_v39, 16 }
 0x183   : > { %5668 = vmatprep.mubr.msk.bf16.mxu0 %vm6046_vm1, %v6045_v1  ;;  %v3183_v33 = vor.u32 %v3181_v10, %v3179_v5 }
 0x184   : > { %v1526_v34 = vpop.f32.mrb[72].mxu1  ;;  %v3174_v63 = vrot.slane %v3172_v50, 1  ;;  %v3189_v50 = vshrl.u32 %v7005_v16, 16 }
 0x185   : > { %v1637_v51 = vpop.f32.mrb[72].mxu0  ;;  %v1559_v27 = vadd.f32 %v1526_v34, %v6893_v17  ;;  %v5424_v35 = vpop.f32.mrb[73].mxu1  ;;  %v7033_v34 = vld [vmem:[%s6269_s9 + $0x18] sm:$0xff]  }
 0x186   : > { %v6965_v32 = vadd.f32 %v1637_v51, %v1557_v61  ;;  %v5442_v44 = vpop.f32.mrb[73].mxu0  ;;  %v1529_v40 = vpop.f32.mrb[74].mxu1  ;;  %v3175_v59 = vor.u32 %v3174_v63, %v3170_v8 }
 0x187   : > { %v1640_v53 = vpop.f32.mrb[74].mxu0  ;;  %v1560_v45 = vadd.f32 %v1529_v40, %v6898_v28  ;;  %v5425_v46 = vpop.f32.mrb[75].mxu1  ;;  %v3321_v44 = vrot.slane %v6986_v49, 1 }
 0x188   : > { %v6973_v36 = vadd.f32 %v1640_v53, %v1558_v21  ;;  %v5443_v11 = vpop.f32.mrb[75].mxu0  ;;  %v3180_v31 = vsel %vm477_vm2, %v3175_v59, %v3179_v5  ;;  %v3185_v21 = vshll.u32 %v7005_v16, 16  ;;  %v3197_v5 = vshrl.u32 %v7033_v34, 16 }
 0x189   : > { %5651 = vmatmul.mubr.msk.bf16.gmra.mrb[180].mxu1 %vm522_vm3, %v2886_v43 }
 0x18a   : > { %5669 = vmatmul.mubr.msk.bf16.gmra.mrb[180].mxu0 %vm522_vm3, %v5979_v30  ;;  %5654 = vmatprep.mubr.msk.bf16.mxu1 %vm6046_vm1, %v6045_v1 }
 0x18b   : > { %5672 = vmatprep.mubr.msk.bf16.mxu0 %vm6046_vm1, %v6045_v1 }
 0x18c   : > { %v1534_v3 = vpop.f32.mrb[76].mxu1 }
 0x18d   : > { %v1645_v17 = vpop.f32.mrb[76].mxu0  ;;  %v1561_v57 = vadd.f32 %v1534_v3, %v6910_v41  ;;  %v5428_v4 = vpop.f32.mrb[77].mxu1  ;;  %v3314_v41 = vld [vmem:[%s6269_s9] sm:$0xe] }
 0x18e   : > { %v6988_v55 = vadd.f32 %v1645_v17, %v1559_v27  ;;  %v5446_v28 = vpop.f32.mrb[77].mxu0  ;;  %v1537_v62 = vpop.f32.mrb[78].mxu1  ;;  %v5039_v13 = vcombine.low %v3314_v41, %v6970_v2  ;;  %v5057_v2 = vld [vmem:[%s7888_s3 + $0x2c] sm:$0x3] }
 0x18f   : > { %v1648_v52 = vpop.f32.mrb[78].mxu0  ;;  %v1562_v18 = vadd.f32 %v1537_v62, %v6917_v0  ;;  %v5429_v7 = vpop.f32.mrb[79].mxu1  ;;  %v3660_v17 = vsel %vm538_vm0, %v5057_v2, 0  ;;  %v3193_v28 = vshll.u32 %v7033_v34, 16 }
 0x190   : > { %v6992_v60 = vadd.f32 %v1648_v52, %v1560_v45  ;;  %v5447_v15 = vpop.f32.mrb[79].mxu0 }
 0x191   : > { %5655 = vmatmul.mubr.msk.bf16.gmra.mrb[184].mxu1 %vm522_vm3, %v2888_v42  ;;  %v3195_v4 = vrot.slane %v3193_v28, 1 }
 0x192   : > { %5673 = vmatmul.mubr.msk.bf16.gmra.mrb[184].mxu0 %vm522_vm3, %v5980_v26  ;;  %5682 = vmatprep.mubr.msk.bf16.mxu1 %vm6046_vm1, %v6045_v1 }
 0x193   : > { %5676 = vmatprep.mubr.msk.bf16.mxu0 %vm6046_vm1, %v6045_v1 }
 0x194   : > { %v1542_v29 = vpop.f32.mrb[80].mxu1 }
 0x195   : > { %v1653_v14 = vpop.f32.mrb[80].mxu0  ;;  %v1563_v54 = vadd.f32 %v1542_v29, %v6932_v56  ;;  %v5432_v19 = vpop.f32.mrb[81].mxu1  ;;  %v3320_v56 = vrot.slane %v5039_v13, 1  ;;  %v5988_v13 = vld [vmem:[%s6269_s9 + $0x28] ss:$0 sps:$4 sm:$0x11]  }
 0x196   : > { %v7007_v6 = vadd.f32 %v1653_v14, %v1561_v57  ;;  %v5450_v0 = vpop.f32.mrb[81].mxu0  ;;  %v1545_v24 = vpop.f32.mrb[82].mxu1 }
 0x197   : > { %v1656_v9 = vpop.f32.mrb[82].mxu0  ;;  %v1564_v25 = vadd.f32 %v1545_v24, %v6937_v47  ;;  %v5433_v51 = vpop.f32.mrb[83].mxu1  ;;  %v3187_v47 = vrot.slane %v3185_v21, 1  ;;  %v3322_v40 = vsel %vm707_vm4, %v3320_v56, %v3321_v44 }
 0x198   : > { %v7015_v61 = vadd.f32 %v1656_v9, %v1562_v18  ;;  %v5451_v20 = vpop.f32.mrb[83].mxu0  ;;  %v3199_v9 = vor.u32 %v3197_v5, %v3195_v4 }
 0x199   : > { %5683 = vmatmul.mubr.msk.bf16.vlgmr.msra.gmra.mrb[188].mxu1 %vm522_vm3, %v3180_v31  ;;  %v3188_v49 = vsel %vm477_vm2, %v3183_v33, %v3187_v47  ;;  %v3191_v57 = vor.u32 %v3189_v50, %v3187_v47 }
 0x19a   : > { %5677 = vmatmul.mubr.msk.bf16.gmra.mrb[188].mxu0 %vm522_vm3, %v5981_v23  ;;  %5725 = vmatpush3.bf16.msra.mxu1 %v3500_v38 }
 0x19b   : > { %5704 = vmatprep.mubr.msk.bf16.mxu0 %vm6046_vm1, %v6045_v1  ;;  %5686 = vmatprep.mubr.msk.bf16.mxu1 %vm6046_vm1, %v6045_v1  ;;  %v3196_v59 = vsel %vm477_vm2, %v3191_v57, %v3195_v4 }
 0x19c   : > { %5768 = vmatprep.subr.bf16.mxu1 %v6045_v1  ;;  %v1550_v35 = vpop.f32.mrb[84].mxu1 }
 0x19d   : > { %v1661_v30 = vpop.f32.mrb[84].mxu0  ;;  %v1565_v43 = vadd.f32 %v1550_v35, %v6950_v12  ;;  %v5436_v39 = vpop.f32.mrb[85].mxu1  ;;  %v3323_v12 = vrot.slane %v7005_v16, 1  ;;  %v7094_v35 = vld [vmem:[%s6269_s9 + $0x8] sm:$0xf] }
 0x19e   : > { %v7035_v53 = vadd.f32 %v1661_v30, %v1563_v54  ;;  %v5454_v27 = vpop.f32.mrb[85].mxu0  ;;  %v1553_v48 = vpop.f32.mrb[86].mxu1 }
 0x19f   : > { %v1664_v11 = vpop.f32.mrb[86].mxu0  ;;  %v1566_v26 = vadd.f32 %v1553_v48, %v6954_v22  ;;  %v5437_v3 = vpop.f32.mrb[87].mxu1  ;;  %v7056_v22 = vld [vmem:[%s6269_s9 + $0x20] sm:$0xff]   ;;  %v3324_v63 = vsel %vm707_vm4, %v3321_v44, %v3323_v12  ;;  %v3209_v44 = vshll.u32 %v5988_v13, 16 }
 0x1a0   : > { %v7040_v45 = vadd.f32 %v1664_v11, %v1564_v25  ;;  %v5455_v46 = vpop.f32.mrb[87].mxu0  ;;  %v3201_v16 = vshll.u32 %v7056_v22, 16  ;;  %v3205_v56 = vshrl.u32 %v7056_v22, 16  ;;  %v3432_v27 = vld [vmem:[%s6269_s9 + $0x4] sm:$0xe]  ;;  %v7105_v3 = vld [vmem:[%s6269_s9 + $0xc] sm:$0xff]  }
 0x1a1   : > { %5687 = vmatmul.mubr.msk.bf16.gmra.mrb[192].mxu1 %vm522_vm3, %v3188_v49  ;;  %v5046_v50 = vcombine.low %v3432_v27, %v7094_v35 }
 0x1a2   : > { %5705 = vmatmul.mubr.msk.bf16.vlgmr.msra.gmra.mrb[192].mxu0 %vm522_vm3, %v3322_v40  ;;  %5690 = vmatprep.mubr.msk.bf16.mxu1 %vm6046_vm1, %v6045_v1  ;;  %v3203_v37 = vrot.slane %v3201_v16, 1  ;;  %v5064_v16 = vld [vmem:[%s7888_s3 + $0x2e] sm:$0x3] }
 0x1a3   : > { %5747 = vmatpush3.bf16.msra.mxu0 %v3660_v17  ;;  %5708 = vmatprep.mubr.msk.bf16.mxu0 %vm6046_vm1, %v6045_v1  ;;  %v3592_v57 = vshrl.u32 %v5046_v50, 16  ;;  %v3595_v4 = vshll.u32 %v5046_v50, 16 }
 0x1a4   : > { %5790 = vmatprep.subr.bf16.mxu0 %v6045_v1  ;;  %v1775_v42 = vpop.f32.mrb[88].mxu1  ;;  %v3204_v38 = vsel %vm477_vm2, %v3199_v9, %v3203_v37  ;;  %v3207_v2 = vor.u32 %v3205_v56, %v3203_v37  ;;  %v5071_v56 = vld [vmem:[%s7888_s3 + $0x30] sm:$0x3] }
 0x1a5   : > { %v1669_v52 = vpop.f32.mrb[88].mxu0  ;;  %v1814_v58 = vadd.f32 %v1775_v42, %v6965_v32  ;;  %v5464_v18 = vpop.f32.mrb[89].mxu1  ;;  %v3325_v32 = vrot.slane %v7033_v34, 1  ;;  %v3211_v34 = vrot.slane %v3209_v44, 1 }
 0x1a6   : > { %v7058_v15 = vadd.f32 %v1669_v52, %v1565_v43  ;;  %v5458_v62 = vpop.f32.mrb[89].mxu0  ;;  %v1778_v14 = vpop.f32.mrb[90].mxu1  ;;  %v3594_v18 = vrot.slane %v3592_v57, 1 }
 0x1a7   : > { %v1672_v8 = vpop.f32.mrb[90].mxu0  ;;  %v1815_v0 = vadd.f32 %v1778_v14, %v6973_v36  ;;  %v5465_v23 = vpop.f32.mrb[91].mxu1  ;;  %v3326_v24 = vsel %vm707_vm4, %v3323_v12, %v3325_v32  ;;  %v3603_v62 = vshll.u32 %v7105_v3, 16 }
 0x1a8   : > { %v7062_v7 = vadd.f32 %v1672_v8, %v1566_v26  ;;  %v5459_v41 = vpop.f32.mrb[91].mxu0  ;;  %v3212_v26 = vsel %vm477_vm2, %v3207_v2, %v3211_v34  ;;  %v3474_v8 = vrot.slane %v7105_v3, 1 }
 0x1a9   : > { %5691 = vmatmul.mubr.msk.bf16.gmra.mrb[196].mxu1 %vm522_vm3, %v3196_v59  ;;  %v3597_v41 = vrot.slane %v3595_v4, 2  ;;  %v3605_v23 = vrot.slane %v3603_v62, 2 }
 0x1aa   : > { %5709 = vmatmul.mubr.msk.bf16.gmra.mrb[196].mxu0 %vm522_vm3, %v3324_v63  ;;  %5694 = vmatprep.mubr.msk.bf16.mxu1 %vm6046_vm1, %v6045_v1 }
 0x1ab   : > { %5712 = vmatprep.mubr.msk.bf16.mxu0 %vm6046_vm1, %v6045_v1 }
 0x1ac   : > { %v1783_v19 = vpop.f32.mrb[92].mxu1 }
 0x1ad   : > { %v1961_v29 = vpop.f32.mrb[92].mxu0  ;;  %v1816_v31 = vadd.f32 %v1783_v19, %v6988_v55  ;;  %v5468_v10 = vpop.f32.mrb[93].mxu1  ;;  %v3327_v55 = vrot.slane %v7056_v22, 1  ;;  %v3600_v22 = vshrl.u32 %v7105_v3, 16  ;;  %v7128_v19 = vld [vmem:[%s6269_s9 + $0x14] sm:$0xff]  }
 0x1ae   : > { %v7076_v54 = vadd.f32 %v1961_v29, %v1814_v58  ;;  %v5486_v36 = vpop.f32.mrb[93].mxu0  ;;  %v1786_v51 = vpop.f32.mrb[94].mxu1 }
 0x1af   : > { %v1964_v20 = vpop.f32.mrb[94].mxu0  ;;  %v1817_v30 = vadd.f32 %v1786_v51, %v6992_v60  ;;  %v5469_v33 = vpop.f32.mrb[95].mxu1  ;;  %v3328_v39 = vsel %vm707_vm4, %v3325_v32, %v3327_v55  ;;  %v3612_v51 = vshll.u32 %v7128_v19, 16 }
 0x1b0   : > { %v7080_v21 = vadd.f32 %v1964_v20, %v1815_v0  ;;  %v5487_v25 = vpop.f32.mrb[95].mxu0  ;;  %v3602_v0 = vrot.slane %v3600_v22, 1 }
 0x1b1   : > { %5695 = vmatmul.mubr.msk.bf16.gmra.mrb[200].mxu1 %vm522_vm3, %v3204_v38  ;;  %v3609_v25 = vshrl.u32 %v7128_v19, 16  ;;  %v3614_v34 = vrot.slane %v3612_v51, 2 }
 0x1b2   : > { %5713 = vmatmul.mubr.msk.bf16.gmra.mrb[200].mxu0 %vm522_vm3, %v3326_v24  ;;  %5698 = vmatprep.mubr.msk.bf16.mxu1 %vm6046_vm1, %v6045_v1  ;;  %v3606_v10 = vor.u32 %v3605_v23, %v3602_v0 }
 0x1b3   : > { %5716 = vmatprep.mubr.msk.bf16.mxu0 %vm6046_vm1, %v6045_v1  ;;  %v3611_v2 = vrot.slane %v3609_v25, 1 }
 0x1b4   : > { %v1791_v40 = vpop.f32.mrb[96].mxu1 }
 0x1b5   : > { %v1969_v47 = vpop.f32.mrb[96].mxu0  ;;  %v1818_v46 = vadd.f32 %v1791_v40, %v7007_v6  ;;  %v5472_v17 = vpop.f32.mrb[97].mxu1  ;;  %v3329_v6 = vrot.slane %v5988_v13, 1 }
 0x1b6   : > { %v7096_v60 = vadd.f32 %v1969_v47, %v1816_v31  ;;  %v5490_v11 = vpop.f32.mrb[97].mxu0  ;;  %v1794_v28 = vpop.f32.mrb[98].mxu1  ;;  %v3778_v31 = vsel %vm538_vm0, %v5064_v16, 0 }
 0x1b7   : > { %v1972_v43 = vpop.f32.mrb[98].mxu0  ;;  %v1819_v12 = vadd.f32 %v1794_v28, %v7015_v61  ;;  %v5473_v52 = vpop.f32.mrb[99].mxu1  ;;  %v3473_v61 = vrot.slane %v5046_v50, 1  ;;  %v3330_v5 = vsel %vm707_vm4, %v3327_v55, %v3329_v6 }
 0x1b8   : > { %v7100_v48 = vadd.f32 %v1972_v43, %v1817_v30  ;;  %v5491_v49 = vpop.f32.mrb[99].mxu0 }
 0x1b9   : > { %5699 = vmatmul.mubr.msk.bf16.gmra.mrb[204].mxu1 %vm522_vm3, %v3212_v26  ;;  %v3475_v36 = vsel %vm707_vm4, %v3473_v61, %v3474_v8  ;;  %v7154_v49 = vld [vmem:[%s6269_s9 + $0x1c] sm:$0xff]  }
 0x1ba   : > { %5717 = vmatmul.mubr.msk.bf16.gmra.mrb[204].mxu0 %vm522_vm3, %v3328_v39  ;;  %5726 = vmatprep.mubr.msk.bf16.mxu1 %vm6046_vm1, %v6045_v1  ;;  %v3931_v39 = vsel %vm538_vm0, %v5071_v56, 0  ;;  %v3618_v26 = vshrl.u32 %v7154_v49, 16 }
 0x1bb   : > { %5720 = vmatprep.mubr.msk.bf16.mxu0 %vm6046_vm1, %v6045_v1 }
 0x1bc   : > { %v1799_v14 = vpop.f32.mrb[100].mxu1 }
 0x1bd   : > { %v1977_v42 = vpop.f32.mrb[100].mxu0  ;;  %v1820_v32 = vadd.f32 %v1799_v14, %v7035_v53  ;;  %v5476_v29 = vpop.f32.mrb[101].mxu1  ;;  %v3598_v53 = vor.u32 %v3597_v41, %v3594_v18  ;;  %v7174_v14 = vld [vmem:[%s6269_s9 + $0x24] sm:$0xff]  }
 0x1be   : > { %v7117_v63 = vadd.f32 %v1977_v42, %v1818_v46  ;;  %v5494_v58 = vpop.f32.mrb[101].mxu0  ;;  %v1802_v13 = vpop.f32.mrb[102].mxu1  ;;  %v3620_v42 = vrot.slane %v3618_v26, 1  ;;  %v3627_v23 = vshrl.u32 %v7174_v14, 16 }
 0x1bf   : > { %v1980_v59 = vpop.f32.mrb[102].mxu0  ;;  %v1821_v20 = vadd.f32 %v1802_v13, %v7040_v45  ;;  %v5477_v24 = vpop.f32.mrb[103].mxu1  ;;  %v3476_v45 = vrot.slane %v7128_v19, 1  ;;  %v3607_v47 = vsel %vm979_vm5, %v3598_v53, %v3606_v10 }
 0x1c0   : > { %v7124_v9 = vadd.f32 %v1980_v59, %v1819_v12  ;;  %v5495_v37 = vpop.f32.mrb[103].mxu0  ;;  %v3621_v12 = vshll.u32 %v7154_v49, 16 }
 0x1c1   : > { %5727 = vmatmul.mubr.msk.bf16.vlgmr.msra.gmra.mrb[208].mxu1 %vm522_vm3, %v3475_v36  ;;  %v3477_v17 = vsel %vm707_vm4, %v3474_v8, %v3476_v45  ;;  %v3629_v36 = vrot.slane %v3627_v23, 1  ;;  %v5083_v23 = vld [vmem:[%s7888_s3 + $0x32] sm:$0x3] }
 0x1c2   : > { %5721 = vmatmul.mubr.msk.bf16.gmra.mrb[208].mxu0 %vm522_vm3, %v3330_v5  ;;  %5769 = vmatpush3.bf16.msra.mxu1 %v3778_v31  ;;  %v3623_v61 = vrot.slane %v3621_v12, 2 }
 0x1c3   : > { %5748 = vmatprep.mubr.msk.bf16.mxu0 %vm6046_vm1, %v6045_v1  ;;  %5730 = vmatprep.mubr.msk.bf16.mxu1 %vm6046_vm1, %v6045_v1 }
 0x1c4   : > { %5812 = vmatprep.subr.bf16.mxu1 %v6045_v1  ;;  %v1807_v33 = vpop.f32.mrb[104].mxu1 }
 0x1c5   : > { %v1985_v38 = vpop.f32.mrb[104].mxu0  ;;  %v1822_v27 = vadd.f32 %v1807_v33, %v7058_v15  ;;  %v5480_v11 = vpop.f32.mrb[105].mxu1  ;;  %v3615_v15 = vor.u32 %v3614_v34, %v3611_v2  ;;  %v5994_v33 = vld [vmem:[%s6269_s9 + $0x2c] ss:$0 sps:$4 sm:$0x11]  }
 0x1c6   : > { %v7144_v44 = vadd.f32 %v1985_v38, %v1820_v32  ;;  %v5498_v30 = vpop.f32.mrb[105].mxu0  ;;  %v1810_v46 = vpop.f32.mrb[106].mxu1  ;;  %v3630_v32 = vshll.u32 %v7174_v14, 16  ;;  %v3482_v11 = vrot.slane %v5994_v33, 1 }
 0x1c7   : > { %v1988_v55 = vpop.f32.mrb[106].mxu0  ;;  %v1823_v50 = vadd.f32 %v1810_v46, %v7062_v7  ;;  %v5481_v28 = vpop.f32.mrb[107].mxu1  ;;  %v3478_v7 = vrot.slane %v7154_v49, 1  ;;  %v3616_v62 = vsel %vm979_vm5, %v3606_v10, %v3615_v15  ;;  %v7191_v10 = vld [vmem:[%s6269_s9 + $0x2c] ss:$0 sps:$4 sm:$0x33]  }
 0x1c8   : > { %v7149_v40 = vadd.f32 %v1988_v55, %v1821_v20  ;;  %v5499_v43 = vpop.f32.mrb[107].mxu0  ;;  %v3632_v53 = vrot.slane %v3630_v32, 2  ;;  %v3639_v34 = vshll.u32 %v7191_v10, 16  ;;  %v7238_v32 = vld [vmem:[%s6269_s9 + $0x10] sm:$0xff]  }
 0x1c9   : > { %5731 = vmatmul.mubr.msk.bf16.gmra.mrb[212].mxu1 %vm522_vm3, %v3477_v17  ;;  %v3479_v5 = vsel %vm707_vm4, %v3476_v45, %v3478_v7 }
 0x1ca   : > { %5749 = vmatmul.mubr.msk.bf16.vlgmr.msra.gmra.mrb[212].mxu0 %vm522_vm3, %v3607_v47  ;;  %5734 = vmatprep.mubr.msk.bf16.mxu1 %vm6046_vm1, %v6045_v1  ;;  %v3633_v2 = vor.u32 %v3632_v53, %v3629_v36  ;;  %v4091_v53 = vsel %vm538_vm0, %v5083_v23, 0  ;;  %v7301_v23 = vld [vmem:[%s6269_s9 + $0x28] sm:$0xff]  }
 0x1cb   : > { %5791 = vmatpush3.bf16.msra.mxu0 %v3931_v39  ;;  %5752 = vmatprep.mubr.msk.bf16.mxu0 %vm6046_vm1, %v6045_v1  ;;  %v3745_v39 = vld [vmem:[%s6269_s9 + $0x4] sm:$0xc] }
 0x1cc   : > { %5834 = vmatprep.subr.bf16.mxu0 %v6045_v1  ;;  %v2079_v6 = vpop.f32.mrb[108].mxu1 }
 0x1cd   : > { %v1993_v52 = vpop.f32.mrb[108].mxu0  ;;  %v2118_v8 = vadd.f32 %v2079_v6, %v7076_v54  ;;  %v5508_v58 = vpop.f32.mrb[109].mxu1  ;;  %v3624_v54 = vor.u32 %v3623_v61, %v3620_v42 }
 0x1ce   : > { %v7167_v57 = vadd.f32 %v1993_v52, %v1822_v27  ;;  %v5502_v4 = vpop.f32.mrb[109].mxu0  ;;  %v2082_v59 = vpop.f32.mrb[110].mxu1 }
 0x1cf   : > { %v1996_v22 = vpop.f32.mrb[110].mxu0  ;;  %v2119_v16 = vadd.f32 %v2082_v59, %v7080_v21  ;;  %v5509_v0 = vpop.f32.mrb[111].mxu1  ;;  %v3480_v21 = vrot.slane %v7174_v14, 1  ;;  %v3625_v31 = vsel %vm979_vm5, %v3615_v15, %v3624_v54  ;;  %v3641_v15 = vrot.slane %v3639_v34, 2 }
 0x1d0   : > { %v7171_v18 = vadd.f32 %v1996_v22, %v1823_v50  ;;  %v5503_v41 = vpop.f32.mrb[111].mxu0  ;;  %v3634_v50 = vsel %vm979_vm5, %v3624_v54, %v3633_v2  ;;  %v5065_v22 = vcombine.low %v3745_v39, %v7094_v35 }
 0x1d1   : > { %5735 = vmatmul.mubr.msk.bf16.gmra.mrb[216].mxu1 %vm522_vm3, %v3479_v5  ;;  %v3481_v30 = vsel %vm707_vm4, %v3478_v7, %v3480_v21  ;;  %v3483_v6 = vsel %vm707_vm4, %v3480_v21, %v3482_v11 }
 0x1d2   : > { %5753 = vmatmul.mubr.msk.bf16.gmra.mrb[216].mxu0 %vm522_vm3, %v3616_v62  ;;  %5738 = vmatprep.mubr.msk.bf16.mxu1 %vm6046_vm1, %v6045_v1  ;;  %v3751_v35 = vrot.slane %v5065_v22, 2 }
 0x1d3   : > { %5756 = vmatprep.mubr.msk.bf16.mxu0 %vm6046_vm1, %v6045_v1 }
 0x1d4   : > { %v2087_v20 = vpop.f32.mrb[112].mxu1 }
 0x1d5   : > { %v2232_v29 = vpop.f32.mrb[112].mxu0  ;;  %v2120_v25 = vadd.f32 %v2087_v20, %v7096_v60  ;;  %v5512_v51 = vpop.f32.mrb[113].mxu1  ;;  %v3636_v60 = vshrl.u32 %v7191_v10, 16 }
 0x1d6   : > { %v7187_v37 = vadd.f32 %v2232_v29, %v2118_v8  ;;  %v5530_v13 = vpop.f32.mrb[113].mxu0  ;;  %v2090_v56 = vpop.f32.mrb[114].mxu1  ;;  %v7223_v8 = vld [vmem:[%s6269_s9 + $0xc] sm:$0xf] }
 0x1d7   : > { %v2235_v24 = vpop.f32.mrb[114].mxu0  ;;  %v2121_v55 = vadd.f32 %v2090_v56, %v7100_v48  ;;  %v5513_v47 = vpop.f32.mrb[115].mxu1  ;;  %v3638_v28 = vrot.slane %v3636_v60, 1 }
 0x1d8   : > { %v7194_v38 = vadd.f32 %v2235_v24, %v2119_v16  ;;  %v5531_v45 = vpop.f32.mrb[115].mxu0 }
 0x1d9   : > { %5739 = vmatmul.mubr.msk.bf16.gmra.mrb[220].mxu1 %vm522_vm3, %v3481_v30  ;;  %v3642_v61 = vor.u32 %v3641_v15, %v3638_v28  ;;  %v5090_v45 = vld [vmem:[%s7888_s3 + $0x34] sm:$0x3]  ;;  %v3756_v28 = vrot.slane %v7154_v49, 2 }
 0x1da   : > { %5757 = vmatmul.mubr.msk.bf16.gmra.mrb[220].mxu0 %vm522_vm3, %v3625_v31  ;;  %5742 = vmatprep.mubr.msk.bf16.mxu1 %vm6046_vm1, %v6045_v1 }
 0x1db   : > { %5760 = vmatprep.mubr.msk.bf16.mxu0 %vm6046_vm1, %v6045_v1  ;;  %v3643_v0 = vsel %vm979_vm5, %v3633_v2, %v3642_v61  ;;  %v7262_v2 = vld [vmem:[%s6269_s9 + $0x18] sm:$0xff]  }
 0x1dc   : > { %v2095_v46 = vpop.f32.mrb[116].mxu1 }
 0x1dd   : > { %v2240_v27 = vpop.f32.mrb[116].mxu0  ;;  %v2122_v26 = vadd.f32 %v2095_v46, %v7117_v63  ;;  %v5516_v12 = vpop.f32.mrb[117].mxu1  ;;  %v3863_v63 = vld [vmem:[%s6269_s9 + $0x8] sm:$0xc] }
 0x1de   : > { %v7207_v43 = vadd.f32 %v2240_v27, %v2120_v25  ;;  %v5534_v48 = vpop.f32.mrb[117].mxu0  ;;  %v2098_v4 = vpop.f32.mrb[118].mxu1  ;;  %v7235_v54 = vcombine.low %v3863_v63, %v7223_v8  ;;  %v3905_v25 = vrot.slane %v7238_v32, 2 }
 0x1df   : > { %v2243_v17 = vpop.f32.mrb[118].mxu0  ;;  %v2123_v62 = vadd.f32 %v2098_v4, %v7124_v9  ;;  %v5517_v42 = vpop.f32.mrb[119].mxu1  ;;  %v3752_v9 = vrot.slane %v7105_v3, 2  ;;  %v7282_v4 = vld [vmem:[%s6269_s9 + $0x20] sm:$0xff]  }
 0x1e0   : > { %v7212_v52 = vadd.f32 %v2243_v17, %v2121_v55  ;;  %v5535_v7 = vpop.f32.mrb[119].mxu0 }
 0x1e1   : > { %5743 = vmatmul.mubr.msk.bf16.gmra.mrb[224].mxu1 %vm522_vm3, %v3483_v6  ;;  %v3753_v20 = vsel %vm1140_vm6, %v3751_v35, %v3752_v9  ;;  %v3909_v35 = vrot.slane %v7282_v4, 2 }
 0x1e2   : > { %5761 = vmatmul.mubr.msk.bf16.gmra.mrb[224].mxu0 %vm522_vm3, %v3634_v50  ;;  %5770 = vmatprep.mubr.msk.bf16.mxu1 %vm6046_vm1, %v6045_v1 }
 0x1e3   : > { %5764 = vmatprep.mubr.msk.bf16.mxu0 %vm6046_vm1, %v6045_v1 }
 0x1e4   : > { %v2103_v5 = vpop.f32.mrb[120].mxu1 }
 0x1e5   : > { %v2248_v58 = vpop.f32.mrb[120].mxu0  ;;  %v2124_v29 = vadd.f32 %v2103_v5, %v7144_v44  ;;  %v5520_v21 = vpop.f32.mrb[121].mxu1  ;;  %v3904_v44 = vrot.slane %v7235_v54, 2 }
 0x1e6   : > { %v7228_v41 = vadd.f32 %v2248_v58, %v2122_v26  ;;  %v5538_v59 = vpop.f32.mrb[121].mxu0  ;;  %v2106_v36 = vpop.f32.mrb[122].mxu1 }
 0x1e7   : > { %v2251_v16 = vpop.f32.mrb[122].mxu0  ;;  %v2125_v24 = vadd.f32 %v2106_v36, %v7149_v40  ;;  %v5521_v31 = vpop.f32.mrb[123].mxu1  ;;  %v3754_v40 = vrot.slane %v7128_v19, 2  ;;  %v3906_v47 = vsel %vm1140_vm6, %v3904_v44, %v3905_v25  ;;  %v4209_v19 = vsel %vm538_vm0, %v5090_v45, 0 }
 0x1e8   : > { %v7241_v3 = vadd.f32 %v2251_v16, %v2123_v62  ;;  %v5539_v13 = vpop.f32.mrb[123].mxu0 }
 0x1e9   : > { %5771 = vmatmul.mubr.msk.bf16.vlgmr.msra.gmra.mrb[228].mxu1 %vm522_vm3, %v3753_v20  ;;  %v3755_v39 = vsel %vm1140_vm6, %v3752_v9, %v3754_v40  ;;  %v3757_v63 = vsel %vm1140_vm6, %v3754_v40, %v3756_v28  ;;  %v3758_v9 = vrot.slane %v7174_v14, 2  ;;  %v4034_v40 = vshll.u32 %v7238_v32, 16 }
 0x1ea   : > { %5765 = vmatmul.mubr.msk.bf16.gmra.mrb[228].mxu0 %vm522_vm3, %v3643_v0  ;;  %5813 = vmatpush3.bf16.msra.mxu1 %v4091_v53  ;;  %v3911_v53 = vrot.slane %v7301_v23, 2 }
 0x1eb   : > { %5792 = vmatprep.mubr.msk.bf16.mxu0 %vm6046_vm1, %v6045_v1  ;;  %5774 = vmatprep.mubr.msk.bf16.mxu1 %vm6046_vm1, %v6045_v1 }
 0x1ec   : > { %v2111_v33 = vpop.f32.mrb[124].mxu1 }
 0x1ed   : > { %v2256_v51 = vpop.f32.mrb[124].mxu0  ;;  %v2126_v60 = vadd.f32 %v2111_v33, %v7167_v57  ;;  %v5524_v34 = vpop.f32.mrb[125].mxu1  ;;  %v3907_v57 = vrot.slane %v7262_v2, 2 }
 0x1ee   : > { %v7258_v56 = vadd.f32 %v2256_v51, %v2124_v29  ;;  %v5542_v30 = vpop.f32.mrb[125].mxu0  ;;  %v2114_v48 = vpop.f32.mrb[126].mxu1  ;;  %v4031_v51 = vshrl.u32 %v7238_v32, 16 }
 0x1ef   : > { %v2259_v55 = vpop.f32.mrb[126].mxu0  ;;  %v2127_v46 = vadd.f32 %v2114_v48, %v7171_v18  ;;  %v5525_v17 = vpop.f32.mrb[127].mxu1  ;;  %v3908_v7 = vsel %vm1140_vm6, %v3905_v25, %v3907_v57  ;;  %v3910_v0 = vsel %vm1140_vm6, %v3907_v57, %v3909_v35  ;;  %v4023_v25 = vshrl.u32 %v7235_v54, 16 }
 0x1f0   : > { %v7265_v27 = vadd.f32 %v2259_v55, %v2125_v24  ;;  %v5543_v11 = vpop.f32.mrb[127].mxu0  ;;  %v3759_v24 = vsel %vm1140_vm6, %v3756_v28, %v3758_v9  ;;  %v4033_v17 = vrot.slane %v4031_v51, 2  ;;  %v4036_v57 = vrot.slane %v4034_v40, 3 }
 0x1f1   : > { %5775 = vmatmul.mubr.msk.bf16.gmra.mrb[232].mxu1 %vm522_vm3, %v3755_v39  ;;  %v4025_v39 = vrot.slane %v4023_v25, 2 }
 0x1f2   : > { %5793 = vmatmul.mubr.msk.bf16.vlgmr.msra.gmra.mrb[232].mxu0 %vm522_vm3, %v3906_v47  ;;  %5778 = vmatprep.mubr.msk.bf16.mxu1 %vm6046_vm1, %v6045_v1  ;;  %v3912_v47 = vsel %vm1140_vm6, %v3909_v35, %v3911_v53 }
 0x1f3   : > { %5835 = vmatpush3.bf16.msra.mxu0 %v4209_v19  ;;  %5796 = vmatprep.mubr.msk.bf16.mxu0 %vm6046_vm1, %v6045_v1 }
 0x1f4   : > { %v2392_v26 = vpop.f32.mrb[128].mxu1 }
 0x1f5   : > { %v2264_v50 = vpop.f32.mrb[128].mxu0  ;;  %v2431_v6 = vadd.f32 %v2392_v26, %v7187_v37  ;;  %v5552_v22 = vpop.f32.mrb[129].mxu1 }
 0x1f6   : > { %v7278_v15 = vadd.f32 %v2264_v50, %v2126_v60  ;;  %v5546_v18 = vpop.f32.mrb[129].mxu0  ;;  %v2395_v61 = vpop.f32.mrb[130].mxu1 }
 0x1f7   : > { %v2267_v12 = vpop.f32.mrb[130].mxu0  ;;  %v2432_v49 = vadd.f32 %v2395_v61, %v7194_v38  ;;  %v5553_v58 = vpop.f32.mrb[131].mxu1  ;;  %v4176_v18 = vld [vmem:[%s6269_s9 + $0x8] sm:$0x8] }
 0x1f8   : > { %v7285_v62 = vadd.f32 %v2267_v12, %v2127_v46  ;;  %v5547_v42 = vpop.f32.mrb[131].mxu0  ;;  %v5091_v58 = vcombine.low %v4176_v18, %v7223_v8 }
 0x1f9   : > { %5779 = vmatmul.mubr.msk.bf16.gmra.mrb[236].mxu1 %vm522_vm3, %v3757_v63 }
 0x1fa   : > { %5797 = vmatmul.mubr.msk.bf16.gmra.mrb[236].mxu0 %vm522_vm3, %v3908_v7  ;;  %5782 = vmatprep.mubr.msk.bf16.mxu1 %vm6046_vm1, %v6045_v1  ;;  %v4037_v7 = vor.u32 %v4036_v57, %v4033_v17  ;;  %v4182_v8 = vrot.slane %v5091_v58, 3 }
 0x1fb   : > { %5800 = vmatprep.mubr.msk.bf16.mxu0 %vm6046_vm1, %v6045_v1 }
 0x1fc   : > { %v2400_v38 = vpop.f32.mrb[132].mxu1 }
 0x1fd   : > { %v2510_v37 = vpop.f32.mrb[132].mxu0  ;;  %v2433_v29 = vadd.f32 %v2400_v38, %v7207_v43  ;;  %v5556_v21 = vpop.f32.mrb[133].mxu1  ;;  %v3760_v43 = vrot.slane %v7191_v10, 2  ;;  %v6002_v10 = vld [vmem:[%s6269_s9 + $0x30] ss:$0 sps:$4 sm:$0x33]  }
 0x1fe   : > { %v7297_v59 = vadd.f32 %v2510_v37, %v2431_v6  ;;  %v5574_v5 = vpop.f32.mrb[133].mxu0  ;;  %v2403_v20 = vpop.f32.mrb[134].mxu1  ;;  %v4040_v6 = vshrl.u32 %v7262_v2, 16 }
 0x1ff   : > { %v2513_v16 = vpop.f32.mrb[134].mxu0  ;;  %v2434_v14 = vadd.f32 %v2403_v20, %v7212_v52  ;;  %v5557_v31 = vpop.f32.mrb[135].mxu1  ;;  %v4026_v52 = vshll.u32 %v7235_v54, 16  ;;  %v3761_v54 = vsel %vm1140_vm6, %v3758_v9, %v3760_v43 }
 0x200   : > { %v7304_v13 = vadd.f32 %v2513_v16, %v2432_v49  ;;  %v5575_v36 = vpop.f32.mrb[135].mxu0 }
 0x201   : > { %5783 = vmatmul.mubr.msk.bf16.gmra.mrb[240].mxu1 %vm522_vm3, %v3759_v24  ;;  %v4028_v46 = vrot.slane %v4026_v52, 3 }
 0x202   : > { %5801 = vmatmul.mubr.msk.bf16.gmra.mrb[240].mxu0 %vm522_vm3, %v3910_v0  ;;  %5786 = vmatprep.mubr.msk.bf16.mxu1 %vm6046_vm1, %v6045_v1  ;;  %v4042_v0 = vrot.slane %v4040_v6, 2  ;;  %v6004_v6 = vld [vmem:[%s6269_s9 + $0x30] ss:$0 sps:$4 sm:$0x77]   ;;  %s5863_s9 = smul.u32 80, %s7945_s25 }
 0x203   : > { %5804 = vmatprep.mubr.msk.bf16.mxu0 %vm6046_vm1, %v6045_v1  ;;  %v4029_v12 = vor.u32 %v4028_v46, %v4025_v39  ;;  %v4070_v58 = vshll.u32 %v6004_v6, 16 }
 0x204   : > { %v2408_v33 = vpop.f32.mrb[136].mxu1  ;;  %s7528_s12 = sadd.s32 %s5863_s9, %s5862_s10 }
 0x205   : > { %v2518_v44 = vpop.f32.mrb[136].mxu0  ;;  %v2435_v60 = vadd.f32 %v2408_v33, %v7228_v41  ;;  %v5560_v34 = vpop.f32.mrb[137].mxu1  ;;  %v3913_v41 = vrot.slane %v6002_v10, 2  ;;  %v4038_v16 = vsel %vm1412_vm7, %v4029_v12, %v4037_v7  ;;  %s4854_s15 = sshll.u32 %s7528_s12, 3 }
 0x206   : > { %v7320_v45 = vadd.f32 %v2518_v44, %v2433_v29  ;;  %v5578_v30 = vpop.f32.mrb[137].mxu0  ;;  %v2411_v48 = vpop.f32.mrb[138].mxu1  ;;  %v4185_v34 = vrot.slane %v7262_v2, 3  ;;  %s7577_s20 = scalar_lea.vmem %s7890_s5, %s4854_s15 }
 0x207   : > { %v2521_v55 = vpop.f32.mrb[138].mxu0  ;;  %v2436_v50 = vadd.f32 %v2411_v48, %v7241_v3  ;;  %v5561_v28 = vpop.f32.mrb[139].mxu1  ;;  %v4043_v3 = vshll.u32 %v7262_v2, 16  ;;  %v3914_v49 = vsel %vm1140_vm6, %v3911_v53, %v3913_v41 }
 0x208   : > { %v7325_v11 = vadd.f32 %v2521_v55, %v2434_v14  ;;  %v5579_v19 = vpop.f32.mrb[139].mxu0  ;;  %v4049_v14 = vshrl.u32 %v7282_v4, 16 }
 0x209   : > { %5787 = vmatmul.mubr.msk.bf16.gmra.mrb[244].mxu1 %vm522_vm3, %v3761_v54  ;;  %v4045_v29 = vrot.slane %v4043_v3, 3  ;;  %v4058_v54 = vshrl.u32 %v7301_v23, 16 }
 0x20a   : > { %5805 = vmatmul.mubr.msk.bf16.gmra.mrb[244].mxu0 %vm522_vm3, %v3912_v47  ;;  %5814 = vmatprep.mubr.msk.bf16.mxu1 %vm6046_vm1, %v6045_v1  ;;  %v4051_v55 = vrot.slane %v4049_v14, 2  ;;  %v4189_v14 = vrot.slane %v7301_v23, 3 }
 0x20b   : > { %5808 = vmatprep.mubr.msk.bf16.mxu0 %vm6046_vm1, %v6045_v1  ;;  %v4046_v24 = vor.u32 %v4045_v29, %v4042_v0  ;;  %v4060_v12 = vrot.slane %v4058_v54, 2 }
 0x20c   : > { %v2416_v61 = vpop.f32.mrb[140].mxu1 }
 0x20d   : > { %v2526_v26 = vpop.f32.mrb[140].mxu0  ;;  %v2437_v35 = vadd.f32 %v2416_v61, %v7258_v56  ;;  %v5564_v37 = vpop.f32.mrb[141].mxu1  ;;  %v4183_v56 = vrot.slane %v7238_v32, 3  ;;  %v4047_v33 = vsel %vm1412_vm7, %v4037_v7, %v4046_v24 }
 0x20e   : > { %v7338_v22 = vadd.f32 %v2526_v26, %v2435_v60  ;;  %v5582_v42 = vpop.f32.mrb[141].mxu0  ;;  %v2419_v38 = vpop.f32.mrb[142].mxu1 }
 0x20f   : > { %v2529_v63 = vpop.f32.mrb[142].mxu0  ;;  %v2438_v21 = vadd.f32 %v2419_v38, %v7265_v27  ;;  %v5565_v36 = vpop.f32.mrb[143].mxu1  ;;  %v4052_v27 = vshll.u32 %v7282_v4, 16  ;;  %v4184_v25 = vsel %vm1573_vm8, %v4182_v8, %v4183_v56  ;;  %v4186_v57 = vsel %vm1573_vm8, %v4183_v56, %v4185_v34 }
 0x210   : > { %v7343_v9 = vadd.f32 %v2529_v63, %v2436_v50  ;;  %v5583_v5 = vpop.f32.mrb[143].mxu0  ;;  %v4072_v56 = vrot.slane %v4070_v58, 3 }
 0x211   : > { %5815 = vmatmul.mubr.msk.bf16.vlgmr.msra.gmra.mrb[248].mxu1 %vm522_vm3, %v4038_v16  ;;  %v4054_v47 = vrot.slane %v4052_v27, 3 }
 0x212   : > { %5809 = vmatmul.mubr.msk.bf16.gmra.mrb[248].mxu0 %vm522_vm3, %v3914_v49  ;;  %5818 = vmatprep.mubr.msk.bf16.mxu1 %vm6046_vm1, %v6045_v1  ;;  %v4067_v49 = vshrl.u32 %v6004_v6, 16 }
 0x213   : > { %5836 = vmatprep.mubr.msk.bf16.mxu0 %vm6046_vm1, %v6045_v1 }
 0x214   : > { %v2424_v43 = vpop.f32.mrb[144].mxu1  ;;  %v4069_v8 = vrot.slane %v4067_v49, 2 }
 0x215   : > { %v2534_v20 = vpop.f32.mrb[144].mxu0  ;;  %v2439_v32 = vadd.f32 %v2424_v43, %v7278_v15  ;;  %v5568_v52 = vpop.f32.mrb[145].mxu1  ;;  %v4055_v15 = vor.u32 %v4054_v47, %v4051_v55 }
 0x216   : > { %v7356_v31 = vadd.f32 %v2534_v20, %v2437_v35  ;;  %v5586_v53 = vpop.f32.mrb[145].mxu0  ;;  %v2427_v30 = vpop.f32.mrb[146].mxu1  ;;  %v4073_v27 = vor.u32 %v4072_v56, %v4069_v8 }
 0x217   : > { %v2537_v44 = vpop.f32.mrb[146].mxu0  ;;  %v2440_v10 = vadd.f32 %v2427_v30, %v7285_v62  ;;  %v5569_v60 = vpop.f32.mrb[147].mxu1  ;;  %v4061_v62 = vshll.u32 %v7301_v23, 16  ;;  %v4056_v18 = vsel %vm1412_vm7, %v4046_v24, %v4055_v15 }
 0x218   : > { %v7360_v51 = vadd.f32 %v2537_v44, %v2438_v21  ;;  %v5587_v40 = vpop.f32.mrb[147].mxu0 }
 0x219   : > { %5819 = vmatmul.mubr.msk.bf16.gmra.mrb[252].mxu1 %vm522_vm3, %v4047_v33  ;;  %v4063_v7 = vrot.slane %v4061_v62, 3 }
 0x21a   : > { %5837 = vmatmul.mubr.msk.bf16.vlgmr.msra.gmra.mrb[252].mxu0 %vm522_vm3, %v4184_v25  ;;  %5822 = vmatprep.mubr.msk.bf16.mxu1 %vm6046_vm1, %v6045_v1 }
 0x21b   : > { %5840 = vmatprep.mubr.msk.bf16.mxu0 %vm6046_vm1, %v6045_v1  ;;  %v4064_v63 = vor.u32 %v4063_v7, %v4060_v12 }
 0x21c   : > { %v2663_v46 = vpop.f32.mrb[148].mxu1 }
 0x21d   : > { %v2542_v19 = vpop.f32.mrb[148].mxu0  ;;  %v2702_v2 = vadd.f32 %v2663_v46, %v7297_v59  ;;  %v5596_v50 = vpop.f32.mrb[149].mxu1  ;;  %v4187_v59 = vrot.slane %v7282_v4, 3  ;;  %v4065_v36 = vsel %vm1412_vm7, %v4055_v15, %v4064_v63  ;;  %v4074_v23 = vsel %vm1412_vm7, %v4064_v63, %v4073_v27 }
 0x21e   : > { %v7373_v48 = vadd.f32 %v2542_v19, %v2439_v32  ;;  %v5590_v39 = vpop.f32.mrb[149].mxu0  ;;  %v2666_v26 = vpop.f32.mrb[150].mxu1 }
 0x21f   : > { %v2545_v17 = vpop.f32.mrb[150].mxu0  ;;  %v2703_v3 = vadd.f32 %v2666_v26, %v7304_v13  ;;  %v5597_v42 = vpop.f32.mrb[151].mxu1  ;;  %v4188_v38 = vsel %vm1573_vm8, %v4185_v34, %v4187_v59 }
 0x220   : > { %v7377_v28 = vadd.f32 %v2545_v17, %v2440_v10  ;;  %v5591_v41 = vpop.f32.mrb[151].mxu0  ;;  %v4191_v10 = vrot.slane %v6004_v6, 3 }
 0x221   : > { %5823 = vmatmul.mubr.msk.bf16.gmra.mrb[0].mxu1 %vm522_vm3, %v4056_v18 }
 0x222   : > { %5841 = vmatmul.mubr.msk.bf16.gmra.mrb[0].mxu0 %vm522_vm3, %v4186_v57  ;;  %5826 = vmatprep.mubr.msk.bf16.mxu1 %vm6046_vm1, %v6045_v1  ;;  %v4192_v54 = vsel %vm1573_vm8, %v4189_v14, %v4191_v10 }
 0x223   : > { %5844 = vmatprep.mubr.msk.bf16.mxu0 %vm6046_vm1, %v6045_v1 }
 0x224   : > { %v2671_v37 = vpop.f32.mrb[152].mxu1 }
 0x225   : > { %v2823_v61 = vpop.f32.mrb[152].mxu0  ;;  %v2704_v16 = vadd.f32 %v2671_v37, %v7320_v45  ;;  %v5600_v0 = vpop.f32.mrb[153].mxu1 }
 0x226   : > { %v7389_v35 = vadd.f32 %v2823_v61, %v2702_v2  ;;  %v5618_v13 = vpop.f32.mrb[153].mxu0  ;;  %v2674_v21 = vpop.f32.mrb[154].mxu1 }
 0x227   : > { %v2826_v5 = vpop.f32.mrb[154].mxu0  ;;  %v2705_v20 = vadd.f32 %v2674_v21, %v7325_v11  ;;  %v5601_v24 = vpop.f32.mrb[155].mxu1  ;;  %v4190_v11 = vsel %vm1573_vm8, %v4187_v59, %v4189_v14 }
 0x228   : > { %v7393_v4 = vadd.f32 %v2826_v5, %v2703_v3  ;;  %v5619_v29 = vpop.f32.mrb[155].mxu0 }
 0x229   : > { %5827 = vmatmul.mubr.msk.bf16.gmra.mrb[4].mxu1 %vm522_vm3, %v4065_v36 }
 0x22a   : > { %5845 = vmatmul.mubr.msk.bf16.gmra.mrb[4].mxu0 %vm522_vm3, %v4188_v38  ;;  %5830 = vmatprep.mubr.msk.bf16.mxu1 %vm6046_vm1, %v6045_v1 }
 0x22b   : > { %5848 = vmatprep.mubr.msk.bf16.mxu0 %vm6046_vm1, %v6045_v1 }
 0x22c   : > { %v2679_v44 = vpop.f32.mrb[156].mxu1 }
 0x22d   : > { %v2831_v45 = vpop.f32.mrb[156].mxu0  ;;  %v2706_v32 = vadd.f32 %v2679_v44, %v7338_v22  ;;  %v5604_v52 = vpop.f32.mrb[157].mxu1 }
 0x22e   : > { %v2864_v53 = vadd.f32 %v2831_v45, %v2704_v16  ;;  %v5622_v43 = vpop.f32.mrb[157].mxu0  ;;  %v2682_v33 = vpop.f32.mrb[158].mxu1 }
 0x22f   : > { %v2834_v25 = vpop.f32.mrb[158].mxu0  ;;  %v2707_v55 = vadd.f32 %v2682_v33, %v7343_v9  ;;  %v5605_v47 = vpop.f32.mrb[159].mxu1 }
 0x230   : > { %v2865_v40 = vadd.f32 %v2834_v25, %v2705_v20  ;;  %v5623_v30 = vpop.f32.mrb[159].mxu0 }
 0x231   : > { %5831 = vmatmul.mubr.msk.bf16.gmra.mrb[8].mxu1 %vm522_vm3, %v4074_v23 }
 0x232   : > { %5849 = vmatmul.mubr.msk.bf16.gmra.mrb[8].mxu0 %vm522_vm3, %v4190_v11 }
 0x233   : > { %5852 = vmatprep.mubr.msk.bf16.mxu0 %vm6046_vm1, %v6045_v1 }
 0x234   : > { %v2687_v15 = vpop.f32.mrb[160].mxu1 }
 0x235   : > { %v2839_v60 = vpop.f32.mrb[160].mxu0  ;;  %v2708_v62 = vadd.f32 %v2687_v15, %v7356_v31  ;;  %v5608_v39 = vpop.f32.mrb[161].mxu1 }
 0x236   : > { %v2866_v34 = vadd.f32 %v2839_v60, %v2706_v32  ;;  %v5626_v22 = vpop.f32.mrb[161].mxu0  ;;  %v2690_v17 = vpop.f32.mrb[162].mxu1 }
 0x237   : > { %v2842_v19 = vpop.f32.mrb[162].mxu0  ;;  %v2709_v57 = vadd.f32 %v2690_v17, %v7360_v51  ;;  %v5609_v1 = vpop.f32.mrb[163].mxu1 }
 0x238   : > { %v2867_v9 = vadd.f32 %v2842_v19, %v2707_v55  ;;  %v5627_v46 = vpop.f32.mrb[163].mxu0 }
 0x23a   : > { %5853 = vmatmul.mubr.msk.bf16.gmra.mrb[12].mxu0 %vm522_vm3, %v4192_v54 }
 0x23c   : > { %v2695_v18 = vpop.f32.mrb[164].mxu1 }
 0x23d   : > { %v2847_v2 = vpop.f32.mrb[164].mxu0  ;;  %v2710_v12 = vadd.f32 %v2695_v18, %v7373_v48  ;;  %v5612_v7 = vpop.f32.mrb[165].mxu1 }
 0x23e   : > { %v2868_v50 = vadd.f32 %v2847_v2, %v2708_v62  ;;  %v5630_v41 = vpop.f32.mrb[165].mxu0  ;;  %v2698_v31 = vpop.f32.mrb[166].mxu1 }
 0x23f   : > { %v2850_v26 = vpop.f32.mrb[166].mxu0  ;;  %v2711_v42 = vadd.f32 %v2698_v31, %v7377_v28  ;;  %v5613_v59 = vpop.f32.mrb[167].mxu1 }
 0x240   : > { %v2869_v6 = vadd.f32 %v2850_v26, %v2709_v57  ;;  %v5631_v3 = vpop.f32.mrb[167].mxu0 }
 0x244   : > { %v2941_v49 = vpop.f32.mrb[168].mxu1 }
 0x245   : > { %v2855_v61 = vpop.f32.mrb[168].mxu0  ;;  %v2980_v13 = vadd.f32 %v2941_v49, %v7389_v35  ;;  %v5640_v37 = vpop.f32.mrb[169].mxu1 }
 0x246   : > { %v2870_v63 = vadd.f32 %v2855_v61, %v2710_v12  ;;  %v5634_v51 = vpop.f32.mrb[169].mxu0  ;;  %v2944_v16 = vpop.f32.mrb[170].mxu1 }
 0x247   : > { %v2858_v58 = vpop.f32.mrb[170].mxu0  ;;  %v2981_v48 = vadd.f32 %v2944_v16, %v7393_v4  ;;  %v5641_v0 = vpop.f32.mrb[171].mxu1 }
 0x248   : > { %v2871_v5 = vadd.f32 %v2858_v58, %v2711_v42  ;;  %v5635_v38 = vpop.f32.mrb[171].mxu0 }
 0x24c   : > { %v2949_v8 = vpop.f32.mrb[172].mxu1 }
 0x24d   : > { %v3079_v29 = vpop.f32.mrb[172].mxu0  ;;  %v2982_v56 = vadd.f32 %v2949_v8, %v2864_v53  ;;  %v5644_v20 = vpop.f32.mrb[173].mxu1 }
 0x24e   : > { %v3118_v21 = vadd.f32 %v3079_v29, %v2980_v13  ;;  %v5662_v36 = vpop.f32.mrb[173].mxu0  ;;  %v2952_v45 = vpop.f32.mrb[174].mxu1 }
 0x24f   : > { %v3082_v28 = vpop.f32.mrb[174].mxu0  ;;  %v2983_v27 = vadd.f32 %v2952_v45, %v2865_v40  ;;  %v5645_v43 = vpop.f32.mrb[175].mxu1 }
 0x250   : > { %v3119_v24 = vadd.f32 %v3082_v28, %v2981_v48  ;;  %v5663_v14 = vpop.f32.mrb[175].mxu0 }
 0x254   : > { %v2957_v11 = vpop.f32.mrb[176].mxu1 }
 0x255   : > { %v3087_v35 = vpop.f32.mrb[176].mxu0  ;;  %v2984_v52 = vadd.f32 %v2957_v11, %v2866_v34  ;;  %v5648_v4 = vpop.f32.mrb[177].mxu1 }
 0x256   : > { %v3120_v44 = vadd.f32 %v3087_v35, %v2982_v56  ;;  %v5666_v25 = vpop.f32.mrb[177].mxu0  ;;  %v2960_v23 = vpop.f32.mrb[178].mxu1 }
 0x257   : > { %v3090_v32 = vpop.f32.mrb[178].mxu0  ;;  %v2985_v55 = vadd.f32 %v2960_v23, %v2867_v9  ;;  %v5649_v47 = vpop.f32.mrb[179].mxu1 }
 0x258   : > { %v3121_v30 = vadd.f32 %v3090_v32, %v2983_v27  ;;  %v5667_v33 = vpop.f32.mrb[179].mxu0 }
 0x25c   : > { %v2965_v22 = vpop.f32.mrb[180].mxu1 }
 0x25d   : > { %v3095_v10 = vpop.f32.mrb[180].mxu0  ;;  %v2986_v19 = vadd.f32 %v2965_v22, %v2868_v50  ;;  %v5652_v40 = vpop.f32.mrb[181].mxu1 }
 0x25e   : > { %v3122_v53 = vadd.f32 %v3095_v10, %v2984_v52  ;;  %v5670_v60 = vpop.f32.mrb[181].mxu0  ;;  %v2968_v39 = vpop.f32.mrb[182].mxu1 }
 0x25f   : > { %v3098_v15 = vpop.f32.mrb[182].mxu0  ;;  %v2987_v46 = vadd.f32 %v2968_v39, %v2869_v6  ;;  %v5653_v17 = vpop.f32.mrb[183].mxu1 }
 0x260   : > { %v3123_v54 = vadd.f32 %v3098_v15, %v2985_v55  ;;  %v5671_v62 = vpop.f32.mrb[183].mxu0 }
 0x264   : > { %v2973_v2 = vpop.f32.mrb[184].mxu1 }
 0x265   : > { %v3103_v57 = vpop.f32.mrb[184].mxu0  ;;  %v2988_v18 = vadd.f32 %v2973_v2, %v2870_v63  ;;  %v5656_v9 = vpop.f32.mrb[185].mxu1 }
 0x266   : > { %v3124_v34 = vadd.f32 %v3103_v57, %v2986_v19  ;;  %v5674_v1 = vpop.f32.mrb[185].mxu0  ;;  %v2976_v7 = vpop.f32.mrb[186].mxu1 }
 0x267   : > { %v3106_v41 = vpop.f32.mrb[186].mxu0  ;;  %v2989_v3 = vadd.f32 %v2976_v7, %v2871_v5  ;;  %v5657_v31 = vpop.f32.mrb[187].mxu1 }
 0x268   : > { %v3125_v26 = vadd.f32 %v3106_v41, %v2987_v46  ;;  %v5675_v12 = vpop.f32.mrb[187].mxu0 }
 0x26c   : > { %v3265_v61 = vpop.f32.mrb[188].mxu1 }
 0x26d   : > { %v3111_v42 = vpop.f32.mrb[188].mxu0  ;;  %v3304_v49 = vadd.f32 %v3265_v61, %v3118_v21  ;;  %v5684_v6 = vpop.f32.mrb[189].mxu1 }
 0x26e   : > { %v3126_v50 = vadd.f32 %v3111_v42, %v2988_v18  ;;  %v5678_v59 = vpop.f32.mrb[189].mxu0  ;;  %v3268_v37 = vpop.f32.mrb[190].mxu1 }
 0x26f   : > { %v3114_v51 = vpop.f32.mrb[190].mxu0  ;;  %v3305_v38 = vadd.f32 %v3268_v37, %v3119_v24  ;;  %v5685_v16 = vpop.f32.mrb[191].mxu1 }
 0x270   : > { %v3127_v58 = vadd.f32 %v3114_v51, %v2989_v3  ;;  %v5679_v13 = vpop.f32.mrb[191].mxu0 }
 0x274   : > { %v3273_v29 = vpop.f32.mrb[192].mxu1 }
 0x275   : > { %v3383_v48 = vpop.f32.mrb[192].mxu0  ;;  %v3306_v8 = vadd.f32 %v3273_v29, %v3120_v44  ;;  %v5688_v5 = vpop.f32.mrb[193].mxu1 }
 0x276   : > { %v3422_v63 = vadd.f32 %v3383_v48, %v3304_v49  ;;  %v5706_v0 = vpop.f32.mrb[193].mxu0  ;;  %v3276_v20 = vpop.f32.mrb[194].mxu1 }
 0x277   : > { %v3386_v36 = vpop.f32.mrb[194].mxu0  ;;  %v3307_v14 = vadd.f32 %v3276_v20, %v3121_v30  ;;  %v5689_v45 = vpop.f32.mrb[195].mxu1 }
 0x278   : > { %v3423_v28 = vadd.f32 %v3386_v36, %v3305_v38  ;;  %v5707_v56 = vpop.f32.mrb[195].mxu0 }
 0x27c   : > { %v3281_v35 = vpop.f32.mrb[196].mxu1 }
 0x27d   : > { %v3391_v27 = vpop.f32.mrb[196].mxu0  ;;  %v3308_v11 = vadd.f32 %v3281_v35, %v3122_v53  ;;  %v5692_v24 = vpop.f32.mrb[197].mxu1 }
 0x27e   : > { %v3424_v21 = vadd.f32 %v3391_v27, %v3306_v8  ;;  %v5710_v43 = vpop.f32.mrb[197].mxu0  ;;  %v3284_v4 = vpop.f32.mrb[198].mxu1 }
 0x27f   : > { %v3394_v25 = vpop.f32.mrb[198].mxu0  ;;  %v3309_v33 = vadd.f32 %v3284_v4, %v3123_v54  ;;  %v5693_v23 = vpop.f32.mrb[199].mxu1 }
 0x280   : > { %v3425_v32 = vadd.f32 %v3394_v25, %v3307_v14  ;;  %v5711_v52 = vpop.f32.mrb[199].mxu0 }
 0x284   : > { %v3289_v10 = vpop.f32.mrb[200].mxu1 }
 0x285   : > { %v3399_v55 = vpop.f32.mrb[200].mxu0  ;;  %v3310_v22 = vadd.f32 %v3289_v10, %v3124_v34  ;;  %v5696_v30 = vpop.f32.mrb[201].mxu1 }
 0x286   : > { %v3426_v44 = vadd.f32 %v3399_v55, %v3308_v11  ;;  %v5714_v47 = vpop.f32.mrb[201].mxu0  ;;  %v3292_v40 = vpop.f32.mrb[202].mxu1 }
 0x287   : > { %v3402_v60 = vpop.f32.mrb[202].mxu0  ;;  %v3311_v62 = vadd.f32 %v3292_v40, %v3125_v26  ;;  %v5697_v39 = vpop.f32.mrb[203].mxu1 }
 0x288   : > { %v3427_v15 = vadd.f32 %v3402_v60, %v3309_v33  ;;  %v5715_v19 = vpop.f32.mrb[203].mxu0 }
 0x28c   : > { %v3297_v57 = vpop.f32.mrb[204].mxu1 }
 0x28d   : > { %v3407_v46 = vpop.f32.mrb[204].mxu0  ;;  %v3312_v2 = vadd.f32 %v3297_v57, %v3126_v50  ;;  %v5700_v54 = vpop.f32.mrb[205].mxu1 }
 0x28e   : > { %v3428_v53 = vadd.f32 %v3407_v46, %v3310_v22  ;;  %v5718_v17 = vpop.f32.mrb[205].mxu0  ;;  %v3300_v9 = vpop.f32.mrb[206].mxu1 }
 0x28f   : > { %v3410_v1 = vpop.f32.mrb[206].mxu0  ;;  %v3313_v12 = vadd.f32 %v3300_v9, %v3127_v58  ;;  %v5701_v7 = vpop.f32.mrb[207].mxu1 }
 0x290   : > { %v3429_v41 = vadd.f32 %v3410_v1, %v3311_v62  ;;  %v5719_v18 = vpop.f32.mrb[207].mxu0 }
 0x294   : > { %v3536_v42 = vpop.f32.mrb[208].mxu1 }
 0x295   : > { %v3415_v3 = vpop.f32.mrb[208].mxu0  ;;  %v3575_v61 = vadd.f32 %v3536_v42, %v3422_v63  ;;  %v5728_v26 = vpop.f32.mrb[209].mxu1 }
 0x296   : > { %v3430_v34 = vadd.f32 %v3415_v3, %v3312_v2  ;;  %v5722_v31 = vpop.f32.mrb[209].mxu0  ;;  %v3539_v6 = vpop.f32.mrb[210].mxu1 }
 0x297   : > { %v3418_v59 = vpop.f32.mrb[210].mxu0  ;;  %v3576_v13 = vadd.f32 %v3539_v6, %v3423_v28  ;;  %v5729_v37 = vpop.f32.mrb[211].mxu1 }
 0x298   : > { %v3431_v51 = vadd.f32 %v3418_v59, %v3313_v12  ;;  %v5723_v49 = vpop.f32.mrb[211].mxu0 }
 0x29c   : > { %v3544_v48 = vpop.f32.mrb[212].mxu1 }
 0x29d   : > { %v3696_v38 = vpop.f32.mrb[212].mxu0  ;;  %v3577_v29 = vadd.f32 %v3544_v48, %v3424_v21  ;;  %v5732_v58 = vpop.f32.mrb[213].mxu1 }
 0x29e   : > { %v3735_v50 = vadd.f32 %v3696_v38, %v3575_v61  ;;  %v5750_v16 = vpop.f32.mrb[213].mxu0  ;;  %v3547_v5 = vpop.f32.mrb[214].mxu1 }
 0x29f   : > { %v3699_v0 = vpop.f32.mrb[214].mxu0  ;;  %v3578_v56 = vadd.f32 %v3547_v5, %v3425_v32  ;;  %v5733_v20 = vpop.f32.mrb[215].mxu1 }
 0x2a0   : > { %v3736_v36 = vadd.f32 %v3699_v0, %v3576_v13  ;;  %v5751_v8 = vpop.f32.mrb[215].mxu0 }
 0x2a4   : > { %v3552_v27 = vpop.f32.mrb[216].mxu1 }
 0x2a5   : > { %v3704_v14 = vpop.f32.mrb[216].mxu0  ;;  %v3579_v35 = vadd.f32 %v3552_v27, %v3426_v44  ;;  %v5736_v28 = vpop.f32.mrb[217].mxu1 }
 0x2a6   : > { %v3737_v63 = vadd.f32 %v3704_v14, %v3577_v29  ;;  %v5754_v45 = vpop.f32.mrb[217].mxu0  ;;  %v3555_v24 = vpop.f32.mrb[218].mxu1 }
 0x2a7   : > { %v3707_v43 = vpop.f32.mrb[218].mxu0  ;;  %v3580_v52 = vadd.f32 %v3555_v24, %v3427_v15  ;;  %v5737_v4 = vpop.f32.mrb[219].mxu1 }
 0x2a8   : > { %v3738_v25 = vadd.f32 %v3707_v43, %v3578_v56  ;;  %v5755_v11 = vpop.f32.mrb[219].mxu0 }
 0x2ac   : > { %v3560_v55 = vpop.f32.mrb[220].mxu1 }
 0x2ad   : > { %v3712_v33 = vpop.f32.mrb[220].mxu0  ;;  %v3581_v10 = vadd.f32 %v3560_v55, %v3428_v53  ;;  %v5740_v32 = vpop.f32.mrb[221].mxu1 }
 0x2ae   : > { %v3739_v21 = vadd.f32 %v3712_v33, %v3579_v35  ;;  %v5758_v23 = vpop.f32.mrb[221].mxu0  ;;  %v3563_v30 = vpop.f32.mrb[222].mxu1 }
 0x2af   : > { %v3715_v47 = vpop.f32.mrb[222].mxu0  ;;  %v3582_v19 = vadd.f32 %v3563_v30, %v3429_v41  ;;  %v5741_v40 = vpop.f32.mrb[223].mxu1 }
 0x2b0   : > { %v3740_v60 = vadd.f32 %v3715_v47, %v3580_v52  ;;  %v5759_v22 = vpop.f32.mrb[223].mxu0 }
 0x2b4   : > { %v3568_v46 = vpop.f32.mrb[224].mxu1 }
 0x2b5   : > { %v3720_v62 = vpop.f32.mrb[224].mxu0  ;;  %v3583_v57 = vadd.f32 %v3568_v46, %v3430_v34  ;;  %v5744_v15 = vpop.f32.mrb[225].mxu1 }
 0x2b6   : > { %v3741_v44 = vadd.f32 %v3720_v62, %v3581_v10  ;;  %v5762_v39 = vpop.f32.mrb[225].mxu0  ;;  %v3571_v54 = vpop.f32.mrb[226].mxu1 }
 0x2b7   : > { %v3723_v17 = vpop.f32.mrb[226].mxu0  ;;  %v3584_v18 = vadd.f32 %v3571_v54, %v3431_v51  ;;  %v5745_v9 = vpop.f32.mrb[227].mxu1 }
 0x2b8   : > { %v3742_v1 = vadd.f32 %v3723_v17, %v3582_v19  ;;  %v5763_v2 = vpop.f32.mrb[227].mxu0 }
 0x2bc   : > { %v3814_v3 = vpop.f32.mrb[228].mxu1 }
 0x2bd   : > { %v3728_v12 = vpop.f32.mrb[228].mxu0  ;;  %v3853_v41 = vadd.f32 %v3814_v3, %v3735_v50  ;;  %v5772_v42 = vpop.f32.mrb[229].mxu1  ;;  %v4331_v50 = vlaneseq }
 0x2be   : > { %v7420_v53 = vadd.f32 %v3728_v12, %v3583_v57  ;;  %v5766_v7 = vpop.f32.mrb[229].mxu0  ;;  %v3817_v26 = vpop.f32.mrb[230].mxu1 }
 0x2bf   : > { %v3731_v31 = vpop.f32.mrb[230].mxu0  ;;  %v3854_v49 = vadd.f32 %v3817_v26, %v3736_v36  ;;  %v5773_v34 = vpop.f32.mrb[231].mxu1  ;;  %v7428_v20 = vshrl.u32 %v4331_v50, 7 }
 0x2c0   : > { %v7422_v59 = vadd.f32 %v3731_v31, %v3584_v18  ;;  %v5767_v61 = vpop.f32.mrb[231].mxu0 }
 0x2c1   : > { %v7435_v24 = vmul.u32.u64.low 3435973837, %v7428_v20  ;;  %v7436_v52 = vmul.u32.u64.high 3435973837, %v7428_v20, %v7435_v24  ;;  %v7440_v23 = vadd.s32 16, %v7428_v20  ;;  %v7448_v22 = vadd.s32 24, %v7428_v20 }
 0x2c2   : > { %v7463_v3 = vadd.s32 32, %v7428_v20  ;;  %v7468_v42 = vadd.s32 40, %v7428_v20 }
 0x2c3   : > { %v7453_v46 = vmul.u32.u64.low 3435973837, %v7440_v23  ;;  %v7454_v17 = vmul.u32.u64.high 3435973837, %v7440_v23, %v7453_v46  ;;  %v4348_v15 = vshrl.u32 %v7436_v52, 3 }
 0x2c4   : > { %v3822_v51 = vpop.f32.mrb[232].mxu1  ;;  %v7458_v18 = vmul.u32.u64.low 3435973837, %v7448_v22  ;;  %v7459_v9 = vmul.u32.u64.high 3435973837, %v7448_v22, %v7458_v18 }
 0x2c5   : > { %v3967_v6 = vpop.f32.mrb[232].mxu0  ;;  %v3855_v16 = vadd.f32 %v3822_v51, %v3737_v63  ;;  %v5776_v48 = vpop.f32.mrb[233].mxu1 }
 0x2c6   : > { %v7424_v13 = vadd.f32 %v3967_v6, %v3853_v41  ;;  %v5794_v37 = vpop.f32.mrb[233].mxu0  ;;  %v3825_v58 = vpop.f32.mrb[234].mxu1 }
 0x2c7   : > { %v3970_v38 = vpop.f32.mrb[234].mxu0  ;;  %v3856_v8 = vadd.f32 %v3825_v58, %v3738_v25  ;;  %v5777_v5 = vpop.f32.mrb[235].mxu1  ;;  %v4333_v25 = vadd.s32 8, %v7428_v20  ;;  %v4370_v37 = vshrl.u32 %v7454_v17, 3  ;;  %v7538_v17 = vld [vmem:[%s7889_s4] ss:$0 sm:$0xff] }
 0x2c8   : > { %v7426_v0 = vadd.f32 %v3970_v38, %v3854_v49  ;;  %v5795_v29 = vpop.f32.mrb[235].mxu0 }
 0x2c9   : > { %v7442_v47 = vmul.u32.u64.low 3435973837, %v4333_v25  ;;  %v7443_v10 = vmul.u32.u64.high 3435973837, %v4333_v25, %v7442_v47  ;;  %v7479_v48 = vmul.u32.u64.low 3435973837, %v7463_v3  ;;  %v7480_v29 = vmul.u32.u64.high 3435973837, %v7463_v3, %v7479_v48 }
 0x2cb   : > { %v4359_v7 = vshrl.u32 %v7443_v10, 3 }
 0x2cc   : > { %v3830_v45 = vpop.f32.mrb[236].mxu1 }
 0x2cd   : > { %v3975_v56 = vpop.f32.mrb[236].mxu0  ;;  %v3857_v43 = vadd.f32 %v3830_v45, %v3739_v21  ;;  %v5780_v35 = vpop.f32.mrb[237].mxu1 }
 0x2ce   : > { %v7430_v36 = vadd.f32 %v3975_v56, %v3855_v16  ;;  %v5798_v14 = vpop.f32.mrb[237].mxu0  ;;  %v3833_v11 = vpop.f32.mrb[238].mxu1  ;;  %v4360_v16 = vmul.u32 10, %v4359_v7  ;;  %v4371_v56 = vmul.u32 10, %v4370_v37 }
 0x2cf   : > { %v3978_v27 = vpop.f32.mrb[238].mxu0  ;;  %v3858_v4 = vadd.f32 %v3833_v11, %v3740_v60  ;;  %v5781_v33 = vpop.f32.mrb[239].mxu1  ;;  %v7502_v11 = vadd.s32 48, %v7428_v20 }
 0x2d0   : > { %v7432_v28 = vadd.f32 %v3978_v27, %v3856_v8  ;;  %v5799_v63 = vpop.f32.mrb[239].mxu0  ;;  %v7485_v8 = vmul.u32.u64.low 3435973837, %v7468_v42  ;;  %v7486_v5 = vmul.u32.u64.high 3435973837, %v7468_v42, %v7485_v8  ;;  %v7493_v45 = vsub.s32 %v4333_v25, %v4360_v16 }
 0x2d2   : > { %vm4453_vm12 = vcmp.ne.s32.totalorder %v7493_v45, 0  ;;  %vm4463_vm13 = vcmp.lt.s32.totalorder %v7493_v45, 0 }
 0x2d3   : > { %vm7543_vm14 = vmand %vm4463_vm13, %vm4453_vm12 }
 0x2d4   : > { %v3838_v30 = vpop.f32.mrb[240].mxu1 }
 0x2d5   : > { %v3983_v55 = vpop.f32.mrb[240].mxu0  ;;  %v3859_v40 = vadd.f32 %v3838_v30, %v3741_v44  ;;  %v5784_v62 = vpop.f32.mrb[241].mxu1  ;;  %v4349_v44 = vmul.u32 10, %v4348_v15 }
 0x2d6   : > { %v7445_v21 = vadd.f32 %v3983_v55, %v3857_v43  ;;  %v5802_v32 = vpop.f32.mrb[241].mxu0  ;;  %v3841_v57 = vpop.f32.mrb[242].mxu1  ;;  %v7509_v55 = vsub.s32 %v7440_v23, %v4371_v56  ;;  %v4483_v62 = vadd.s32 10, %v7493_v45 }
 0x2d7   : > { %v3986_v19 = vpop.f32.mrb[242].mxu0  ;;  %v3860_v2 = vadd.f32 %v3841_v57, %v3742_v1  ;;  %v5785_v54 = vpop.f32.mrb[243].mxu1  ;;  %v7476_v38 = vsub.s32 %v7428_v20, %v4349_v44  ;;  %v7521_v32 = vadd.s32 56, %v7428_v20 }
 0x2d8   : > { %v7450_v39 = vadd.f32 %v3986_v19, %v3858_v4  ;;  %v5803_v60 = vpop.f32.mrb[243].mxu0  ;;  %vm4454_vm15 = vcmp.ne.s32.totalorder %v7509_v55, 0  ;;  %vm4464_vm0 = vcmp.lt.s32.totalorder %v7509_v55, 0 }
 0x2d9   : > { %vm4452_vm9 = vcmp.ne.s32.totalorder %v7476_v38, 0  ;;  %vm4462_vm10 = vcmp.lt.s32.totalorder %v7476_v38, 0  ;;  %v4482_v33 = vadd.s32 10, %v7476_v38  ;;  %vm7569_vm4 = vmand %vm4464_vm0, %vm4454_vm15 }
 0x2da   : > { %vm7513_vm11 = vmand %vm4462_vm10, %vm4452_vm9  ;;  %v7532_v60 = vmul.u32.u64.low 3435973837, %v7502_v11  ;;  %v7533_v46 = vmul.u32.u64.high 3435973837, %v7502_v11, %v7532_v60 }
 0x2dc   : > { %v3846_v61 = vpop.f32.mrb[244].mxu1 }
 0x2dd   : > { %v3991_v12 = vpop.f32.mrb[244].mxu0  ;;  %v3861_v26 = vadd.f32 %v3846_v61, %v7420_v53  ;;  %v5788_v49 = vpop.f32.mrb[245].mxu1  ;;  %v4381_v53 = vshrl.u32 %v7459_v9, 3  ;;  %v4484_v61 = vadd.s32 10, %v7509_v55 }
 0x2de   : > { %v7465_v31 = vadd.f32 %v3991_v12, %v3859_v40  ;;  %v5806_v41 = vpop.f32.mrb[245].mxu0  ;;  %v3849_v51 = vpop.f32.mrb[246].mxu1  ;;  %v4403_v40 = vshrl.u32 %v7486_v5, 3 }
 0x2df   : > { %v3994_v1 = vpop.f32.mrb[246].mxu0  ;;  %v3862_v58 = vadd.f32 %v3849_v51, %v7422_v59  ;;  %v5789_v50 = vpop.f32.mrb[247].mxu1  ;;  %v4382_v59 = vmul.u32 10, %v4381_v53  ;;  %v4493_v41 = vsel %vm7543_vm14, %v4483_v62, %v7493_v45 }
 0x2e0   : > { %v7472_v34 = vadd.f32 %v3994_v1, %v3860_v2  ;;  %v5807_v6 = vpop.f32.mrb[247].mxu0  ;;  %v7550_v2 = vmul.u32.u64.low 3435973837, %v7521_v32  ;;  %v7551_v54 = vmul.u32.u64.high 3435973837, %v7521_v32, %v7550_v2  ;;  %v4404_v12 = vmul.u32 10, %v4403_v40 }
 0x2e1   : > { %v7525_v19 = vsub.s32 %v7448_v22, %v4382_v59  ;;  %v7561_v1 = vadd.s32 64, %v7428_v20  ;;  %v7595_v50 = vadd.s32 72, %v7428_v20  ;;  %vm7604_vm7 = vcmp.lt.s32.totalorder %v4493_v41, 8 }
 0x2e3   : > { %vm4455_vm1 = vcmp.ne.s32.totalorder %v7525_v19, 0  ;;  %vm4465_vm2 = vcmp.lt.s32.totalorder %v7525_v19, 0  ;;  %v4485_v16 = vadd.s32 10, %v7525_v19 }
 0x2e4   : > { %v4127_v35 = vpop.f32.mrb[248].mxu1  ;;  %vm7587_vm6 = vmand %vm4465_vm2, %vm4455_vm1 }
 0x2e5   : > { %v3999_v14 = vpop.f32.mrb[248].mxu0  ;;  %v4166_v24 = vadd.f32 %v4127_v35, %v7424_v13  ;;  %v5816_v52 = vpop.f32.mrb[249].mxu1  ;;  %v4392_v13 = vshrl.u32 %v7480_v29, 3  ;;  %v4495_v35 = vsel %vm7587_vm6, %v4485_v16, %v7525_v19 }
 0x2e6   : > { %v7495_v27 = vadd.f32 %v3999_v14, %v3861_v26  ;;  %v5810_v43 = vpop.f32.mrb[249].mxu0  ;;  %v4130_v47 = vpop.f32.mrb[250].mxu1  ;;  %v7602_v14 = vsub.s32 %v7468_v42, %v4404_v12  ;;  %v4494_v42 = vsel %vm7569_vm4, %v4484_v61, %v7509_v55  ;;  %vm7664_vm14 = vcmp.lt.s32.totalorder %v4495_v35, 8 }
 0x2e7   : > { %v4002_v63 = vpop.f32.mrb[250].mxu0  ;;  %v4167_v30 = vadd.f32 %v4130_v47, %v7426_v0  ;;  %v5817_v23 = vpop.f32.mrb[251].mxu1  ;;  %v4492_v0 = vsel %vm7513_vm11, %v4482_v33, %v7476_v38  ;;  %v4393_v15 = vmul.u32 10, %v4392_v13  ;;  %vm7646_vm12 = vcmp.lt.s32.totalorder %v4494_v42, 8 }
 0x2e8   : > { %v7505_v25 = vadd.f32 %v4002_v63, %v3862_v58  ;;  %v5811_v4 = vpop.f32.mrb[251].mxu0  ;;  %vm7579_vm5 = vcmp.lt.s32.totalorder %v4492_v0, 8  ;;  %v7610_v20 = vmul.u32.u64.low 3435973837, %v7561_v1  ;;  %v7611_v43 = vmul.u32.u64.high 3435973837, %v7561_v1, %v7610_v20 }
 0x2e9   : > { %v7592_v58 = vsub.s32 %v7463_v3, %v4393_v15  ;;  %v4414_v3 = vshrl.u32 %v7533_v46, 3  ;;  %v7630_v52 = vmul.u32.u64.low 3435973837, %v7595_v50  ;;  %v7631_v4 = vmul.u32.u64.high 3435973837, %v7595_v50, %v7630_v52 }
 0x2ea   : > { %vm4457_vm10 = vcmp.ne.s32.totalorder %v7602_v14, 0  ;;  %vm4467_vm11 = vcmp.lt.s32.totalorder %v7602_v14, 0 }
 0x2eb   : > { %vm4456_vm8 = vcmp.ne.s32.totalorder %v7592_v58, 0  ;;  %vm4466_vm9 = vcmp.lt.s32.totalorder %v7592_v58, 0  ;;  %v4415_v19 = vmul.u32 10, %v4414_v3  ;;  %v4486_v2 = vadd.s32 10, %v7592_v58  ;;  %vm7672_vm15 = vmand %vm4467_vm11, %vm4457_vm10 }
 0x2ec   : > { %v4135_v44 = vpop.f32.mrb[252].mxu1  ;;  %vm7659_vm13 = vmand %vm4466_vm9, %vm4456_vm8  ;;  %v4447_v16 = vshrl.u32 %v7631_v4, 3 }
 0x2ed   : > { %v4245_v57 = vpop.f32.mrb[252].mxu0  ;;  %v4168_v26 = vadd.f32 %v4135_v44, %v7430_v36  ;;  %v5820_v6 = vpop.f32.mrb[253].mxu1  ;;  %v7677_v61 = vsub.s32 %v7502_v11, %v4415_v19  ;;  %v4496_v38 = vsel %vm7659_vm13, %v4486_v2, %v7592_v58 }
 0x2ee   : > { %v4284_v18 = vadd.f32 %v4245_v57, %v4166_v24  ;;  %v5838_v9 = vpop.f32.mrb[253].mxu0  ;;  %v4138_v48 = vpop.f32.mrb[254].mxu1  ;;  %v4425_v24 = vshrl.u32 %v7551_v54, 3  ;;  %vm7710_vm2 = vcmp.lt.s32.totalorder %v4496_v38, 8  ;;  %v4448_v4 = vmul.u32 10, %v4447_v16 }
 0x2ef   : > { %v4248_v7 = vpop.f32.mrb[254].mxu0  ;;  %v4169_v8 = vadd.f32 %v4138_v48, %v7432_v28  ;;  %v5821_v56 = vpop.f32.mrb[255].mxu1  ;;  %vm4458_vm0 = vcmp.ne.s32.totalorder %v7677_v61, 0  ;;  %vm4468_vm1 = vcmp.lt.s32.totalorder %v7677_v61, 0 }
 0x2f0   : > { %v4301_v49 = vadd.f32 %v7538_v17, %v4284_v18  ;;  %v4285_v37 = vadd.f32 %v4248_v7, %v4167_v30  ;;  %v5839_v51 = vpop.f32.mrb[255].mxu0  ;;  %v4426_v54 = vmul.u32 10, %v4425_v24  ;;  %v4487_v7 = vadd.s32 10, %v7602_v14  ;;  %vm7729_vm9 = vmand %vm4468_vm1, %vm4458_vm0 }
 0x2f2   : > { %v7597_v53 = vmax.f32 %v4301_v49, 0.0  ;;  %v4302_v5 = vadd.f32 %v7538_v17, %v4285_v37  ;;  %v7693_v11 = vsub.s32 %v7521_v32, %v4426_v54  ;;  %v4497_v56 = vsel %vm7672_vm15, %v4487_v7, %v7602_v14 }
 0x2f3   : > { %vm7721_vm8 = vcmp.lt.s32.totalorder %v4497_v56, 8 }
 0x2f4   : > { %4321 = vst.msk [vmem:[%s7577_s20] sm:$0xff] %vm522_vm3, %v7597_v53  ;;  %v4532_v28 = vsel %vm7579_vm5, %v7597_v53, 0.0  ;;  %v7619_v59 = vmax.f32 %v4302_v5, 0.0  ;;  %v4143_v30 = vpop.f32.mrb[0].mxu1  ;;  %vm4459_vm4 = vcmp.ne.s32.totalorder %v7693_v11, 0  ;;  %vm4469_vm6 = vcmp.lt.s32.totalorder %v7693_v11, 0 }
 0x2f5   : > { %v4253_v63 = vpop.f32.mrb[0].mxu0  ;;  %v4542_v10 = vsel %vm522_vm3, %v4532_v28, 0.0  ;;  %v4170_v62 = vadd.f32 %v4143_v30, %v7445_v21  ;;  %v5824_v46 = vpop.f32.mrb[1].mxu1  ;;  %vm7745_vm10 = vmand %vm4469_vm6, %vm4459_vm4 }
 0x2f6   : > { %4322 = vst.msk [vmem:[%s7577_s20 + $0x8] sm:$0xff] %vm522_vm3, %v7619_v59  ;;  %v4533_v33 = vsel %vm7604_vm7, %v7619_v59, 0.0  ;;  %v4286_v55 = vadd.f32 %v4253_v63, %v4168_v26  ;;  %v5842_v47 = vpop.f32.mrb[1].mxu0  ;;  %v4146_v15 = vpop.f32.mrb[2].mxu1  ;;  %v4436_v26 = vshrl.u32 %v7611_v43, 3 }
 0x2f7   : > { %v4543_v13 = vsel %vm522_vm3, %v4533_v33, 0.0  ;;  %v4256_v23 = vpop.f32.mrb[2].mxu0  ;;  %v4171_v9 = vadd.f32 %v4146_v15, %v7450_v39  ;;  %v5825_v12 = vpop.f32.mrb[3].mxu1 }
 0x2f8   : > { %v4544_v40 = vadd.f32 %v4543_v13, %v4542_v10  ;;  %v4303_v60 = vadd.f32 %v7538_v17, %v4286_v55  ;;  %v4287_v0 = vadd.f32 %v4256_v23, %v4169_v8  ;;  %v5843_v22 = vpop.f32.mrb[3].mxu0  ;;  %v4437_v20 = vmul.u32 10, %v4436_v26 }
 0x2f9   : > { %v4488_v10 = vadd.s32 10, %v7677_v61 }
 0x2fa   : > { %v7651_v18 = vmax.f32 %v4303_v60, 0.0  ;;  %v4304_v21 = vadd.f32 %v7538_v17, %v4287_v0  ;;  %v4438_v23 = vsub.s32 %v7561_v1, %v4437_v20  ;;  %v4449_v1 = vsub.s32 %v7595_v50, %v4448_v4 }
 0x2fb   : > { %v4498_v2 = vsel %vm7729_vm9, %v4488_v10, %v7677_v61 }
 0x2fc   : > { %4323 = vst.msk [vmem:[%s7577_s20 + $0x10] sm:$0xff] %vm522_vm3, %v7651_v18  ;;  %v4534_v49 = vsel %vm7646_vm12, %v7651_v18, 0.0  ;;  %v7686_v6 = vmax.f32 %v4304_v21, 0.0  ;;  %v4151_v32 = vpop.f32.mrb[4].mxu1  ;;  %vm4460_vm11 = vcmp.ne.s32.totalorder %v4438_v23, 0  ;;  %vm4470_vm13 = vcmp.lt.s32.totalorder %v4438_v23, 0 }
 0x2fd   : > { %v4545_v37 = vsel %vm522_vm3, %v4534_v49, 0.0  ;;  %v4261_v51 = vpop.f32.mrb[4].mxu0  ;;  %v4172_v28 = vadd.f32 %v4151_v32, %v7465_v31  ;;  %v5828_v35 = vpop.f32.mrb[5].mxu1  ;;  %vm7766_vm15 = vcmp.lt.s32.totalorder %v4498_v2, 8  ;;  %v4490_v38 = vadd.s32 10, %v4438_v23  ;;  %vm7778_vm6 = vmand %vm4470_vm13, %vm4460_vm11 }
 0x2fe   : > { %v4546_v48 = vadd.f32 %v4545_v37, %v4544_v40  ;;  %4324 = vst.msk [vmem:[%s7577_s20 + $0x18] sm:$0xff] %vm522_vm3, %v7686_v6  ;;  %v4535_v29 = vsel %vm7664_vm14, %v7686_v6, 0.0  ;;  %v4288_v8 = vadd.f32 %v4261_v51, %v4170_v62  ;;  %v5846_v5 = vpop.f32.mrb[5].mxu0  ;;  %v4154_v52 = vpop.f32.mrb[6].mxu1  ;;  %vm4461_vm0 = vcmp.ne.s32.totalorder %v4449_v1, 0 }
 0x2ff   : > { %v4547_v58 = vsel %vm522_vm3, %v4535_v29, 0.0  ;;  %v4264_v3 = vpop.f32.mrb[6].mxu0  ;;  %v4173_v31 = vadd.f32 %v4154_v52, %v7472_v34  ;;  %v5829_v47 = vpop.f32.mrb[7].mxu1  ;;  %v4489_v34 = vadd.s32 10, %v7693_v11  ;;  %vm4471_vm1 = vcmp.lt.s32.totalorder %v4449_v1, 0 }
 0x300   : > { %v4548_v43 = vadd.f32 %v4547_v58, %v4546_v48  ;;  %v4305_v42 = vadd.f32 %v7538_v17, %v4288_v8  ;;  %v4289_v63 = vadd.f32 %v4264_v3, %v4171_v9  ;;  %v5847_v24 = vpop.f32.mrb[7].mxu0  ;;  %v4491_v56 = vadd.s32 10, %v4449_v1  ;;  %vm7787_vm9 = vmand %vm4471_vm1, %vm4461_vm0 }
 0x301   : > { %v4499_v50 = vsel %vm7745_vm10, %v4489_v34, %v7693_v11  ;;  %vm4624_vm13 = vcmask 24576  }
 0x302   : > { %v7716_v33 = vmax.f32 %v4305_v42, 0.0  ;;  %v4306_v55 = vadd.f32 %v7538_v17, %v4289_v63  ;;  %vm7772_vm4 = vcmp.lt.s32.totalorder %v4499_v50, 8  ;;  %v4500_v42 = vsel %vm7778_vm6, %v4490_v38, %v4438_v23 }
 0x303   : > { %vm7801_vm10 = vcmp.lt.s32.totalorder %v4500_v42, 8 }
 0x304   : > { %4325 = vst.msk [vmem:[%s7577_s20 + $0x20] sm:$0xff] %vm522_vm3, %v7716_v33  ;;  %v4536_v19 = vsel %vm7710_vm2, %v7716_v33, 0.0  ;;  %v7741_v40 = vmax.f32 %v4306_v55, 0.0  ;;  %v4159_v21 = vpop.f32.mrb[8].mxu1  ;;  %v4501_v55 = vsel %vm7787_vm9, %v4491_v56, %v4449_v1 }
 0x305   : > { %v4549_v60 = vsel %vm522_vm3, %v4536_v19, 0.0  ;;  %v4269_v46 = vpop.f32.mrb[8].mxu0  ;;  %v4174_v7 = vadd.f32 %v4159_v21, %v7495_v27  ;;  %v5832_v26 = vpop.f32.mrb[9].mxu1  ;;  %vm7806_vm11 = vcmp.lt.s32.totalorder %v4501_v55, 8 }
 0x306   : > { %v4550_v0 = vadd.f32 %v4549_v60, %v4548_v43  ;;  %4326 = vst.msk [vmem:[%s7577_s20 + $0x28] sm:$0xff] %vm522_vm3, %v7741_v40  ;;  %v4537_v22 = vsel %vm7721_vm8, %v7741_v40, 0.0  ;;  %v4290_v15 = vadd.f32 %v4269_v46, %v4172_v28  ;;  %v5850_v54 = vpop.f32.mrb[9].mxu0  ;;  %v4162_v51 = vpop.f32.mrb[10].mxu1 }
 0x307   : > { %v4551_v9 = vsel %vm522_vm3, %v4537_v22, 0.0  ;;  %v4272_v12 = vpop.f32.mrb[10].mxu0  ;;  %v4175_v16 = vadd.f32 %v4162_v51, %v7505_v25  ;;  %v5833_v27 = vpop.f32.mrb[11].mxu1 }
 0x308   : > { %v4552_v44 = vadd.f32 %v4551_v9, %v4550_v0  ;;  %v4307_v39 = vadd.f32 %v7538_v17, %v4290_v15  ;;  %v4291_v49 = vadd.f32 %v4272_v12, %v4173_v31  ;;  %v5851_v61 = vpop.f32.mrb[11].mxu0 }
 0x30a   : > { %v4317_v11 = vmax.f32 %v4307_v39, 0.0  ;;  %v4308_v48 = vadd.f32 %v7538_v17, %v4291_v49 }
 0x30c   : > { %4327 = vst.msk [vmem:[%s7577_s20 + $0x30] sm:$0xff] %vm522_vm3, %v4317_v11  ;;  %v4538_v5 = vsel %vm7766_vm15, %v4317_v11, 0.0  ;;  %v4318_v25 = vmax.f32 %v4308_v48, 0.0 }
 0x30d   : > { %v4553_v58 = vsel %vm522_vm3, %v4538_v5, 0.0  ;;  %v4277_v32 = vpop.f32.mrb[12].mxu0 }
 0x30e   : > { %v4554_v20 = vadd.f32 %v4553_v58, %v4552_v44  ;;  %4328 = vst.msk [vmem:[%s7577_s20 + $0x38] sm:$0xff] %vm522_vm3, %v4318_v25  ;;  %v4539_v43 = vsel %vm7772_vm4, %v4318_v25, 0.0  ;;  %v4292_v28 = vadd.f32 %v4277_v32, %v4174_v7  ;;  %v5854_v35 = vpop.f32.mrb[13].mxu0 }
 0x30f   : > { %v4555_v63 = vsel %vm522_vm3, %v4539_v43, 0.0  ;;  %v4280_v24 = vpop.f32.mrb[14].mxu0 }
 0x310   : > { %v4556_v52 = vadd.f32 %v4555_v63, %v4554_v20  ;;  %v4309_v4 = vadd.f32 %v7538_v17, %v4292_v28  ;;  %v4293_v31 = vadd.f32 %v4280_v24, %v4175_v16  ;;  %v5855_v47 = vpop.f32.mrb[15].mxu0 }
 0x312   : > { %v4319_v30 = vmax.f32 %v4309_v4, 0.0  ;;  %v4310_v34 = vadd.f32 %v7538_v17, %v4293_v31 }
 0x314   : > { %4329 = vst.msk [vmem:[%s7577_s20 + $0x40] sm:$0xff] %vm522_vm3, %v4319_v30  ;;  %v4540_v19 = vsel %vm7801_vm10, %v4319_v30, 0.0  ;;  %v4320_v62 = vmax.f32 %v4310_v34, 0.0 }
 0x315   : > { %v4557_v60 = vsel %vm522_vm3, %v4540_v19, 0.0 }
 0x316   : > { %v4558_v46 = vadd.f32 %v4557_v60, %v4556_v52  ;;  %4330 = vst.msk [vmem:[%s7577_s20 + $0x48] sm:$0xff] %vm522_vm3, %v4320_v62  ;;  %v4541_v1 = vsel %vm7806_vm11, %v4320_v62, 0.0 }
 0x317   : > { %v4559_v17 = vsel %vm522_vm3, %v4541_v1, 0.0 }
 0x318   : > { %v4560_v0 = vadd.f32 %v4559_v17, %v4558_v46 }
 0x31a   : > { %v4561_v22 = vrot.slane %v4560_v0, 4 }
 0x31c   : > { %v4562_v15 = vadd.f32 %v4561_v22, %v4560_v0 }
 0x31e   : > { %v4563_v2 = vrot.slane %v4562_v15, 2 }
 0x320   : > { %v4564_v54 = vadd.f32 %v4563_v2, %v4562_v15 }
 0x322   : > { %v4565_v9 = vrot.slane %v4564_v54, 1 }
 0x324   : > { %v4566_v21 = vadd.f32 %v4565_v9, %v4564_v54 }
 0x326   : > { %v4568_v12 = vmul.f32 0.015625, %v4566_v21  ;;  %4625 = vst.msk [vmem:[%s426_s17] sm:$0x1] %vm4624_vm13, %v4566_v21 }
 0x328   : > { %v4569_v50 = vsub.f32 %v7597_v53, %v4568_v12  ;;  %v4570_v44 = vsub.f32 %v7619_v59, %v4568_v12  ;;  %v4571_v7 = vsub.f32 %v7651_v18, %v4568_v12  ;;  %v4572_v39 = vsub.f32 %v7686_v6, %v4568_v12 }
 0x329   : > { %v4573_v26 = vsub.f32 %v7716_v33, %v4568_v12  ;;  %v4574_v49 = vsub.f32 %v7741_v40, %v4568_v12  ;;  %v4575_v61 = vsub.f32 %v4317_v11, %v4568_v12  ;;  %v4576_v51 = vsub.f32 %v4318_v25, %v4568_v12 }
 0x32a   : > { %v4577_v38 = vsub.f32 %v4319_v30, %v4568_v12  ;;  %v4578_v16 = vsub.f32 %v4320_v62, %v4568_v12  ;;  %v4579_v48 = vmul.f32 %v4569_v50, %v4569_v50  ;;  %v4580_v27 = vmul.f32 %v4570_v44, %v4570_v44 }
 0x32b   : > { %v4581_v8 = vmul.f32 %v4571_v7, %v4571_v7  ;;  %v4582_v5 = vmul.f32 %v4572_v39, %v4572_v39  ;;  %v4583_v18 = vmul.f32 %v4573_v26, %v4573_v26  ;;  %v4584_v11 = vmul.f32 %v4574_v49, %v4574_v49 }
 0x32c   : > { %v4589_v53 = vsel %vm7579_vm5, %v4579_v48, 0.0  ;;  %v4590_v59 = vsel %vm7604_vm7, %v4580_v27, 0.0  ;;  %v4585_v36 = vmul.f32 %v4575_v61, %v4575_v61  ;;  %v4586_v57 = vmul.f32 %v4576_v51, %v4576_v51 }
 0x32d   : > { %v4591_v6 = vsel %vm7646_vm12, %v4581_v8, 0.0  ;;  %v4599_v33 = vsel %vm522_vm3, %v4589_v53, 0.0  ;;  %v4600_v40 = vsel %vm522_vm3, %v4590_v59, 0.0  ;;  %v4592_v25 = vsel %vm7664_vm14, %v4582_v5, 0.0 }
 0x32e   : > { %v4601_v56 = vadd.f32 %v4600_v40, %v4599_v33  ;;  %v4602_v58 = vsel %vm522_vm3, %v4591_v6, 0.0  ;;  %v4593_v45 = vsel %vm7710_vm2, %v4583_v18, 0.0  ;;  %v4604_v3 = vsel %vm522_vm3, %v4592_v25, 0.0 }
 0x32f   : > { %v4594_v20 = vsel %vm7721_vm8, %v4584_v11, 0.0  ;;  %v4606_v28 = vsel %vm522_vm3, %v4593_v45, 0.0  ;;  %v4587_v42 = vmul.f32 %v4577_v38, %v4577_v38  ;;  %v4595_v41 = vsel %vm7766_vm15, %v4585_v36, 0.0 }
 0x330   : > { %v4603_v32 = vadd.f32 %v4602_v58, %v4601_v56  ;;  %v4608_v63 = vsel %vm522_vm3, %v4594_v20, 0.0  ;;  %v4588_v24 = vmul.f32 %v4578_v16, %v4578_v16  ;;  %v4596_v14 = vsel %vm7772_vm4, %v4586_v57, 0.0 }
 0x331   : > { %v4610_v4 = vsel %vm522_vm3, %v4595_v41, 0.0  ;;  %v4597_v13 = vsel %vm7801_vm10, %v4587_v42, 0.0  ;;  %v4612_v55 = vsel %vm522_vm3, %v4596_v14, 0.0 }
 0x332   : > { %v4605_v43 = vadd.f32 %v4604_v3, %v4603_v32  ;;  %v4598_v37 = vsel %vm7806_vm11, %v4588_v24, 0.0  ;;  %v4614_v30 = vsel %vm522_vm3, %v4597_v13, 0.0 }
 0x333   : > { %v4616_v29 = vsel %vm522_vm3, %v4598_v37, 0.0 }
 0x334   : > { %v4607_v35 = vadd.f32 %v4606_v28, %v4605_v43 }
 0x336   : > { %v4609_v52 = vadd.f32 %v4608_v63, %v4607_v35 }
 0x338   : > { %v4611_v31 = vadd.f32 %v4610_v4, %v4609_v52 }
 0x33a   : > { %v4613_v47 = vadd.f32 %v4612_v55, %v4611_v31 }
 0x33c   : > { %v4615_v34 = vadd.f32 %v4614_v30, %v4613_v47 }
 0x33e   : > { %v4617_v19 = vadd.f32 %v4616_v29, %v4615_v34 }
 0x340   : > { %v4618_v62 = vrot.slane %v4617_v19, 4 }
 0x342   : > { %v4619_v60 = vadd.f32 %v4618_v62, %v4617_v19 }
 0x344   : > { %v4620_v46 = vrot.slane %v4619_v60, 2 }
 0x346   : > { %v4621_v1 = vadd.f32 %v4620_v46, %v4619_v60 }
 0x348   : > { %v4622_v17 = vrot.slane %v4621_v1, 1 }
 0x34a   : > { %v4623_v10 = vadd.f32 %v4622_v17, %v4621_v1 }
 0x34c   : > { %4626 = vst.msk [vmem:[%s433_s8] sm:$0x1] %vm4624_vm13, %v4623_v10 }
 0x34d PF: > { %s18_s28 = sadd.s32 1, %s6043_s28   ;;  %s7934_s24 = smov %s6035_s26 }
 0x34e   : > { %p15_p10 = scmp.ge.s32.totalorder %s18_s28, 18   ;;  %s7935_s25 = smov %s6039_s27 }
 0x34f   : > { %s7936_s26 = smov %s7939_s29  ;;  %s7937_s27 = smov %s7943_s30 }
 0x350   :  { %17 = sbr.rel (!%p15_p10) target bundleno = 3 (0x3), region = 126 }

// kernel: residual_layer.7
= control target key start
LH: loop header
LB: loop body
LE: loop exit
PB: predicated region body
PF: predicated region fallthrough
CT: control target
= control target key end

     0   :  { %s128_s0 = inlined_call_operand.vmem [shape: f32[32,128], index: 0, kind: input, shape index: {}]   ;;  %s129_s1 = inlined_call_operand.vmem [shape: f32[32,128], index: 1, kind: input, shape index: {}]   ;;  %s130_s2 = inlined_call_operand.vmem [shape: f32[1,128], index: 2, kind: input, shape index: {}]   ;;  %s131_s3 = inlined_call_operand.vmem [shape: f32[1,128], index: 3, kind: input, shape index: {}]   ;;  %s132_s4 = inlined_call_operand.vmem [shape: f32[32,128], index: 4, kind: output, shape index: {}]  }
   0x1   :  { %v17_v0 = vld [vmem:[%s128_s0] sm:$0xff]  ;;  %v18_v4 = vld [vmem:[%s128_s0 + $0x8] sm:$0xff]  ;;  %v19_v7 = vld [vmem:[%s128_s0 + $0x10] sm:$0xff] }
   0x2   :  { %v59_v1 = vld [vmem:[%s130_s2] ss:$0 sm:$0xff]  ;;  %v20_v8 = vld [vmem:[%s128_s0 + $0x18] sm:$0xff]  ;;  %v44_v10 = vld [vmem:[%s129_s1 + $0x8] sm:$0xff] }
   0x3   :  { %v60_v2 = vld [vmem:[%s131_s3] ss:$0 sm:$0xff]  ;;  %v28_v3 = vmul.f32 %v59_v1, %v17_v0  ;;  %v29_v6 = vmul.f32 %v59_v1, %v18_v4  ;;  %v30_v11 = vmul.f32 %v59_v1, %v19_v7  ;;  %v31_v12 = vmul.f32 %v59_v1, %v20_v8  ;;  %v45_v14 = vld [vmem:[%s129_s1 + $0x10] sm:$0xff]  ;;  %v46_v15 = vld [vmem:[%s129_s1 + $0x18] sm:$0xff] }
   0x4   :  { %v43_v5 = vld [vmem:[%s129_s1] sm:$0xff] }
   0x5   :  { %v39_v9 = vadd.f32 %v60_v2, %v28_v3  ;;  %v40_v13 = vadd.f32 %v60_v2, %v29_v6  ;;  %v41_v17 = vadd.f32 %v60_v2, %v30_v11  ;;  %v42_v18 = vadd.f32 %v60_v2, %v31_v12 }
   0x7   :  { %v47_v16 = vadd.f32 %v43_v5, %v39_v9  ;;  %v48_v19 = vadd.f32 %v44_v10, %v40_v13  ;;  %v49_v20 = vadd.f32 %v45_v14, %v41_v17  ;;  %v50_v21 = vadd.f32 %v46_v15, %v42_v18 }
   0x9   :  { %51 = vst [vmem:[%s132_s4] sm:$0xff] %v47_v16  ;;  %52 = vst [vmem:[%s132_s4 + $0x8] sm:$0xff] %v48_v19 }
   0xa   :  { %53 = vst [vmem:[%s132_s4 + $0x10] sm:$0xff] %v49_v20  ;;  %54 = vst [vmem:[%s132_s4 + $0x18] sm:$0xff] %v50_v21 }

</bundles_post_ra>
